<compile_context>
chip_gen: v7x
topology: tpu7x:2x2x1
jax: 0.10.0
libtpu: 0.0.40
codegen_flags: <defaults>
</compile_context>

<pallas_src>
import functools

import jax
import jax.numpy as jnp
from jax.experimental import pallas as pl
from jax.experimental.pallas import tpu as pltpu


def _round_up(x, m):
    return (x + m - 1) // m * m


# ----------------------------------------------------------------------------
# Pallas kernel: one bidirectional LSTM layer (both directions, full sequence)
# ----------------------------------------------------------------------------
def _bilstm_layer_kernel(*refs, T, Bp, Hp, dins, last):
    """Fused bidirectional LSTM layer.

    inputs:
      x_0..x_{n-1} : (T*Bp, dins[i])  input stream(s); layer 0 has one stream
                     (embeddings), deeper layers have two (prev fwd, prev bwd)
      wih          : (sum(dins), 8*Hp) input weights, cols = [fwd 4Hp | bwd 4Hp]
      whh_f, whh_b : (Hp, 4*Hp)        hidden weights per direction
      b            : (1, 8*Hp)         b_ih + b_hh for both directions
    outputs (intermediate layer):
      out_f, out_b : (T*Bp, Hp)        per-time hidden states, fwd / bwd
      h_n, c_n     : (Bp, 2*Hp)        final states, [fwd | bwd]
    outputs (last layer):
      out_sum      : (T*Bp, Hp)        out_f + out_b  (the Encoder output)
      h_n, c_n     : (Bp, 2*Hp)
    scratch:
      gx_scr       : (T*Bp, 8*Hp)      precomputed input projections
      (last layer only) out_f / out_b scratch buffers (never written to HBM)
    """
    num_x = len(dins)
    x_refs = refs[:num_x]
    wih_ref, whhf_ref, whhb_ref, b_ref = refs[num_x:num_x + 4]
    i0 = num_x + 4
    if last:
        outsum_ref, hN_ref, cN_ref = refs[i0:i0 + 3]
        gx_scr, outf_ref, outb_ref = refs[i0 + 3:i0 + 6]
    else:
        outf_ref, outb_ref, hN_ref, cN_ref = refs[i0:i0 + 4]
        gx_scr = refs[i0 + 4]
        outsum_ref = None

    G = 4 * Hp  # per-direction gate-block width

    # 1) Input projections for every time step of both directions in one MXU
    #    pass per stream (independent of the recurrence); bias folded in once.
    acc = (jnp.dot(x_refs[0][...], wih_ref[0:dins[0], :],
                   preferred_element_type=jnp.float32)
           + b_ref[...])
    row = dins[0]
    for i in range(1, num_x):
        acc = acc + jnp.dot(x_refs[i][...], wih_ref[row:row + dins[i], :],
                            preferred_element_type=jnp.float32)
        row += dins[i]
    gx_scr[...] = acc

    # 2) Recurrence. h / c are carried as values (vregs), not VMEM scratch.
    def cell(gates, c_prev):              # PyTorch gate order: i, f, g, o
        i = jax.nn.sigmoid(gates[:, 0 * Hp:1 * Hp])
        f = jax.nn.sigmoid(gates[:, 1 * Hp:2 * Hp])
        g = jnp.tanh(gates[:, 2 * Hp:3 * Hp])
        o = jax.nn.sigmoid(gates[:, 3 * Hp:4 * Hp])
        c = f * c_prev + i * g
        h = o * jnp.tanh(c)
        return h, c

    def step(s, carry):
        h_f, h_b, c_f, c_b = carry
        tf = s * Bp                       # fwd consumes time s
        tb = (T - 1 - s) * Bp             # bwd consumes time T-1-s
        if not isinstance(s, int):
            tf = pl.multiple_of(tf, Bp)
            tb = pl.multiple_of(tb, Bp)

        ga = gx_scr[pl.ds(tf, Bp), :]     # (Bp, 8Hp): fwd gates live in [:G]
        gb = gx_scr[pl.ds(tb, Bp), :]     # (Bp, 8Hp): bwd gates live in [G:]

        gates_f = ga[:, :G] + jnp.dot(h_f, whhf_ref[...],
                                      preferred_element_type=jnp.float32)
        gates_b = gb[:, G:] + jnp.dot(h_b, whhb_ref[...],
                                      preferred_element_type=jnp.float32)

        h_f, c_f = cell(gates_f, c_f)
        h_b, c_b = cell(gates_b, c_b)

        outf_ref[pl.ds(tf, Bp), :] = h_f
        outb_ref[pl.ds(tb, Bp), :] = h_b
        return h_f, h_b, c_f, c_b

    zeros = jnp.zeros((Bp, Hp), jnp.float32)
    carry = (zeros, zeros, zeros, zeros)  # h_0 = c_0 = 0, both directions
    if T <= 64:                 # short sequences: full unroll (LLO visibility)
        for s in range(T):
            carry = step(s, carry)
    else:                       # long sequences: keep the loop rolled
        carry = jax.lax.fori_loop(0, T, step, carry)
    h_f, h_b, c_f, c_b = carry

    # 3) Epilogue: final states (written exactly once) + fused fwd+bwd sum.
    hN_ref[:, 0:Hp] = h_f
    hN_ref[:, Hp:2 * Hp] = h_b
    cN_ref[:, 0:Hp] = c_f
    cN_ref[:, Hp:2 * Hp] = c_b
    if last:
        outsum_ref[...] = outf_ref[...] + outb_ref[...]


def _bilstm_layer(xs, wih, whh_f, whh_b, b, *, T, Bp, Hp, last):
    """xs: tuple of (T*Bp, Din_i) float32 streams.
    Returns (out_f, out_b, h_n, c_n) for intermediate layers, or
    (out_sum, h_n, c_n) for the last layer, in the padded layout."""
    dins = tuple(int(x.shape[-1]) for x in xs)
    TB = T * Bp
    kernel = functools.partial(_bilstm_layer_kernel, T=T, Bp=Bp, Hp=Hp,
                               dins=dins, last=last)
    if last:
        out_shape = (
            jax.ShapeDtypeStruct((TB, Hp), jnp.float32),       # out fwd + bwd
            jax.ShapeDtypeStruct((Bp, 2 * Hp), jnp.float32),   # h_n [fwd | bwd]
            jax.ShapeDtypeStruct((Bp, 2 * Hp), jnp.float32),   # c_n [fwd | bwd]
        )
        scratch = [
            pltpu.VMEM((TB, 8 * Hp), jnp.float32),   # precomputed input gates
            pltpu.VMEM((TB, Hp), jnp.float32),       # fwd stream (stays on-chip)
            pltpu.VMEM((TB, Hp), jnp.float32),       # bwd stream (stays on-chip)
        ]
    else:
        out_shape = (
            jax.ShapeDtypeStruct((TB, Hp), jnp.float32),       # out fwd
            jax.ShapeDtypeStruct((TB, Hp), jnp.float32),       # out bwd
            jax.ShapeDtypeStruct((Bp, 2 * Hp), jnp.float32),   # h_n [fwd | bwd]
            jax.ShapeDtypeStruct((Bp, 2 * Hp), jnp.float32),   # c_n [fwd | bwd]
        )
        scratch = [pltpu.VMEM((TB, 8 * Hp), jnp.float32)]

    return pl.pallas_call(
        kernel,
        out_shape=out_shape,
        # No grid: a single invocation; all operands/outputs are whole-array
        # VMEM-resident blocks and the recurrence is an in-kernel loop.
        scratch_shapes=scratch,
    )(*xs, wih, whh_f, whh_b, b)


# ----------------------------------------------------------------------------
# Parameter init (PyTorch nn.Embedding / nn.LSTM layout, packed for the kernel)
# ----------------------------------------------------------------------------
def _pad_gate_cols(w, H, Hp):
    """(rows, 4H) -> (rows, 4Hp): zero-pad each of the 4 gate blocks H -> Hp."""
    rows = w.shape[0]
    w = w.reshape(rows, 4, H)
    w = jnp.pad(w, ((0, 0), (0, 0), (0, Hp - H)))
    return w.reshape(rows, 4 * Hp)


def init_encoder_params(key, input_dim, emb_dim, hid_dim, n_layers):
    H, Hp = hid_dim, _round_up(hid_dim, 128)
    Ep = _round_up(emb_dim, 128)
    bound = 1.0 / (hid_dim ** 0.5)

    key, k_emb = jax.random.split(key)
    emb = jax.random.normal(k_emb, (input_dim, emb_dim), dtype=jnp.float32)
    emb = jnp.pad(emb, ((0, 0), (0, Ep - emb_dim)))          # lane-pad the table

    layers = []
    for layer in range(n_layers):
        in_dim = emb_dim if layer == 0 else 2 * H
        wih_dirs, whh_dirs, b_dirs = [], [], []
        for _direction in range(2):                          # 0 = fwd, 1 = bwd
            key, k1, k2, k3, k4 = jax.random.split(key, 5)
            w_ih = jax.random.uniform(k1, (4 * H, in_dim), minval=-bound,
                                      maxval=bound, dtype=jnp.float32)
            w_hh = jax.random.uniform(k2, (4 * H, H), minval=-bound,
                                      maxval=bound, dtype=jnp.float32)
            b_ih = jax.random.uniform(k3, (4 * H,), minval=-bound,
                                      maxval=bound, dtype=jnp.float32)
            b_hh = jax.random.uniform(k4, (4 * H,), minval=-bound,
                                      maxval=bound, dtype=jnp.float32)
            wih_dirs.append(_pad_gate_cols(w_ih.T, H, Hp))            # (in, 4Hp)
            whh_t = _pad_gate_cols(w_hh.T, H, Hp)                     # (H, 4Hp)
            whh_dirs.append(jnp.pad(whh_t, ((0, Hp - H), (0, 0))))    # (Hp, 4Hp)
            b_dirs.append(_pad_gate_cols((b_ih + b_hh).reshape(1, 4 * H), H, Hp))

        if layer == 0:
            # one input stream (embeddings): row-pad emb_dim -> Ep
            wih = jnp.concatenate(
                [jnp.pad(w, ((0, Ep - in_dim), (0, 0))) for w in wih_dirs], axis=1)
        else:
            # two input streams (prev fwd / prev bwd): split rows, pad each to Hp
            tops = [jnp.pad(w[:H], ((0, Hp - H), (0, 0))) for w in wih_dirs]
            bots = [jnp.pad(w[H:], ((0, Hp - H), (0, 0))) for w in wih_dirs]
            wih = jnp.concatenate([jnp.concatenate(tops, axis=1),
                                   jnp.concatenate(bots, axis=1)], axis=0)

        b = jnp.concatenate(b_dirs, axis=1)                   # (1, 8Hp)
        layers.append({"wih": wih, "whh_f": whh_dirs[0],
                       "whh_b": whh_dirs[1], "b": b})

    return {"embedding": emb, "layers": layers,
            "meta": {"hid_dim": H, "Hp": Hp, "emb_dim": emb_dim, "Ep": Ep,
                     "n_layers": n_layers}}


# ----------------------------------------------------------------------------
# Encoder forward
# ----------------------------------------------------------------------------
@functools.partial(jax.jit, static_argnames=("H", "Hp", "n_layers"))
def _encoder_forward_impl(src, embedding, layers, *, H, Hp, n_layers):
    T, B = src.shape
    Bp = _round_up(B, 8)
    Ep = embedding.shape[-1]

    # Embedding lookup (gather) -- plain-JAX glue; table is already lane-padded.
    embedded = jnp.take(embedding, src, axis=0)               # (T, B, Ep)
    # TODO(synk): training-mode dropout (embedding + inter-layer, pltpu.prng_*)
    # not implemented; eval-mode dropout == identity.

    # Pad batch to 8 sublanes and flatten (T, Bp) into the row dimension.
    x0 = jnp.pad(embedded, ((0, 0), (0, Bp - B), (0, 0)))
    xs = (x0.reshape(T * Bp, Ep),)

    h_list, c_list, out_sum = [], [], None
    for layer in range(n_layers):
        lw = layers[layer]
        last = layer == n_layers - 1
        outs = _bilstm_layer(xs, lw["wih"], lw["whh_f"], lw["whh_b"], lw["b"],
                             T=T, Bp=Bp, Hp=Hp, last=last)
        if last:
            out_sum, h_n, c_n = outs
        else:
            out_f, out_b, h_n, c_n = outs
            xs = (out_f, out_b)   # next layer consumes fwd/bwd streams directly
        h_list.append(jnp.stack([h_n[:B, :H], h_n[:B, Hp:Hp + H]], axis=0))
        c_list.append(jnp.stack([c_n[:B, :H], c_n[:B, Hp:Hp + H]], axis=0))

    output = out_sum.reshape(T, Bp, Hp)[:, :B, :H]            # fwd + bwd sum
    h_n = jnp.concatenate(h_list, axis=0)                     # (n_layers*2, B, H)
    c_n = jnp.concatenate(c_list, axis=0)
    return output, (h_n, c_n)


def encoder_forward(src, params):
    """src: (T, B) int32 token ids.  Returns (output, (h_n, c_n))."""
    meta = params["meta"]
    return _encoder_forward_impl(src, params["embedding"], params["layers"],
                                 H=meta["hid_dim"], Hp=meta["Hp"],
                                 n_layers=meta["n_layers"])


# ----------------------------------------------------------------------------
# Demo
# ----------------------------------------------------------------------------
if __name__ == "__main__":
    INPUT_DIM = 16      # vocab size
    EMB_DIM = 32
    HID_DIM = 32
    N_LAYERS = 2
    DROPOUT = 0.25      # eval-mode -> identity
    SEQ_LEN = 8
    BATCH = 2

    key = jax.random.PRNGKey(0)
    key, k_src = jax.random.split(key)
    src = jax.random.randint(k_src, (SEQ_LEN, BATCH), 0, INPUT_DIM, dtype=jnp.int32)

    params = init_encoder_params(key, INPUT_DIM, EMB_DIM, HID_DIM, N_LAYERS)

    output, (h_n, c_n) = encoder_forward(src, params)
    jax.block_until_ready((output, h_n, c_n))

    assert output.shape == (SEQ_LEN, BATCH, HID_DIM)
    assert h_n.shape == (N_LAYERS * 2, BATCH, HID_DIM)
    assert c_n.shape == (N_LAYERS * 2, BATCH, HID_DIM)
    assert bool(jnp.isfinite(output).all())
    assert bool(jnp.isfinite(h_n).all()) and bool(jnp.isfinite(c_n).all())
    print("KERNEL_OK")
</pallas_src>

<mosaic_0001>
module attributes {stable_mosaic.version = 11 : i64} {
  func.func @_bilstm_layer_kernel(%arg0: memref<64x128xf32, #tpu.memory_space<vmem>>, %arg1: memref<64x128xf32, #tpu.memory_space<vmem>>, %arg2: memref<256x1024xf32, #tpu.memory_space<vmem>>, %arg3: memref<128x512xf32, #tpu.memory_space<vmem>>, %arg4: memref<128x512xf32, #tpu.memory_space<vmem>>, %arg5: memref<1x1024xf32, #tpu.memory_space<vmem>>, %arg6: memref<64x128xf32, #tpu.memory_space<vmem>>, %arg7: memref<8x256xf32, #tpu.memory_space<vmem>>, %arg8: memref<8x256xf32, #tpu.memory_space<vmem>>, %arg9: memref<64x1024xf32, #tpu.memory_space<vmem>>, %arg10: memref<64x128xf32, #tpu.memory_space<vmem>>, %arg11: memref<64x128xf32, #tpu.memory_space<vmem>>) attributes {dimension_semantics = [], scalar_prefetch = 0 : i64, scratch_operands = 3 : i64, tpu.core_type = #tpu.core_type<tc>} {
    %c0 = arith.constant 0 : index
    %c0_0 = arith.constant 0 : index
    %0 = vector.load %arg0[%c0, %c0_0] : memref<64x128xf32, #tpu.memory_space<vmem>>, vector<64x128xf32>
    %c0_1 = arith.constant 0 : index
    %c0_2 = arith.constant 0 : index
    %1 = vector.load %arg2[%c0_1, %c0_2] : memref<256x1024xf32, #tpu.memory_space<vmem>>, vector<128x1024xf32>
    %cst = arith.constant dense<0.000000e+00> : vector<64x1024xf32>
    %2 = tpu.matmul %0, %1, %cst {dimension_numbers = #tpu.dot_dimension_numbers<[1], [0], [0], [1], [0, 0, 1, 1], [], []>} : vector<64x128xf32>, vector<128x1024xf32>, vector<64x1024xf32> -> vector<64x1024xf32>
    %c0_3 = arith.constant 0 : index
    %c0_4 = arith.constant 0 : index
    %3 = vector.load %arg5[%c0_3, %c0_4] : memref<1x1024xf32, #tpu.memory_space<vmem>>, vector<1x1024xf32>
    %4 = vector.broadcast %3 : vector<1x1024xf32> to vector<64x1024xf32>
    %5 = arith.addf %2, %4 : vector<64x1024xf32>
    %c0_5 = arith.constant 0 : index
    %c0_6 = arith.constant 0 : index
    %6 = vector.load %arg1[%c0_5, %c0_6] : memref<64x128xf32, #tpu.memory_space<vmem>>, vector<64x128xf32>
    %c128 = arith.constant 128 : index
    %c0_7 = arith.constant 0 : index
    %7 = vector.load %arg2[%c128, %c0_7] : memref<256x1024xf32, #tpu.memory_space<vmem>>, vector<128x1024xf32>
    %cst_8 = arith.constant dense<0.000000e+00> : vector<64x1024xf32>
    %8 = tpu.matmul %6, %7, %cst_8 {dimension_numbers = #tpu.dot_dimension_numbers<[1], [0], [0], [1], [0, 0, 1, 1], [], []>} : vector<64x128xf32>, vector<128x1024xf32>, vector<64x1024xf32> -> vector<64x1024xf32>
    %9 = arith.addf %5, %8 : vector<64x1024xf32>
    %c0_9 = arith.constant 0 : index
    %c0_10 = arith.constant 0 : index
    %10 = vector.load %arg9[%c0_9, %c0_10] : memref<64x1024xf32, #tpu.memory_space<vmem>>, vector<64x1024xf32>
    tpu.vector_store %arg9[%c0_9, %c0_10], %9 {strides = array<i32>} : memref<64x1024xf32, #tpu.memory_space<vmem>>, vector<64x1024xf32>,
    %cst_11 = arith.constant 0.000000e+00 : f32
    %11 = vector.broadcast %cst_11 : f32 to vector<8x128xf32>
    %c0_12 = arith.constant 0 : index
    %c0_13 = arith.constant 0 : index
    %12 = vector.load %arg9[%c0_12, %c0_13] : memref<64x1024xf32, #tpu.memory_space<vmem>>, vector<8x1024xf32>
    %c56 = arith.constant 56 : index
    %c0_14 = arith.constant 0 : index
    %13 = vector.load %arg9[%c56, %c0_14] : memref<64x1024xf32, #tpu.memory_space<vmem>>, vector<8x1024xf32>
    %14 = vector.extract_strided_slice %12 {offsets = [0, 0], sizes = [8, 512], strides = [1, 1]} : vector<8x1024xf32> to vector<8x512xf32>
    %c0_15 = arith.constant 0 : index
    %c0_16 = arith.constant 0 : index
    %15 = vector.load %arg3[%c0_15, %c0_16] : memref<128x512xf32, #tpu.memory_space<vmem>>, vector<128x512xf32>
    %cst_17 = arith.constant dense<0.000000e+00> : vector<8x512xf32>
    %16 = tpu.matmul %11, %15, %cst_17 {dimension_numbers = #tpu.dot_dimension_numbers<[1], [0], [0], [1], [0, 0, 1, 1], [], []>} : vector<8x128xf32>, vector<128x512xf32>, vector<8x512xf32> -> vector<8x512xf32>
    %17 = arith.addf %14, %16 : vector<8x512xf32>
    %18 = vector.extract_strided_slice %13 {offsets = [0, 512], sizes = [8, 512], strides = [1, 1]} : vector<8x1024xf32> to vector<8x512xf32>
    %c0_18 = arith.constant 0 : index
    %c0_19 = arith.constant 0 : index
    %19 = vector.load %arg4[%c0_18, %c0_19] : memref<128x512xf32, #tpu.memory_space<vmem>>, vector<128x512xf32>
    %cst_20 = arith.constant dense<0.000000e+00> : vector<8x512xf32>
    %20 = tpu.matmul %11, %19, %cst_20 {dimension_numbers = #tpu.dot_dimension_numbers<[1], [0], [0], [1], [0, 0, 1, 1], [], []>} : vector<8x128xf32>, vector<128x512xf32>, vector<8x512xf32> -> vector<8x512xf32>
    %21 = arith.addf %18, %20 : vector<8x512xf32>
    %22 = vector.extract_strided_slice %17 {offsets = [0, 0], sizes = [8, 128], strides = [1, 1]} : vector<8x512xf32> to vector<8x128xf32>
    %23 = arith.negf %22 : vector<8x128xf32>
    %24 = math.exp %23 : vector<8x128xf32>
    %cst_21 = arith.constant 1.000000e+00 : f32
    %25 = vector.broadcast %cst_21 : f32 to vector<8x128xf32>
    %26 = arith.addf %25, %24 : vector<8x128xf32>
    %27 = arith.divf %25, %26 : vector<8x128xf32>
    %28 = vector.extract_strided_slice %17 {offsets = [0, 128], sizes = [8, 128], strides = [1, 1]} : vector<8x512xf32> to vector<8x128xf32>
    %29 = arith.negf %28 : vector<8x128xf32>
    %30 = math.exp %29 : vector<8x128xf32>
    %cst_22 = arith.constant 1.000000e+00 : f32
    %31 = vector.broadcast %cst_22 : f32 to vector<8x128xf32>
    %32 = arith.addf %31, %30 : vector<8x128xf32>
    %33 = arith.divf %31, %32 : vector<8x128xf32>
    %34 = vector.extract_strided_slice %17 {offsets = [0, 256], sizes = [8, 128], strides = [1, 1]} : vector<8x512xf32> to vector<8x128xf32>
    %35 = math.tanh %34 : vector<8x128xf32>
    %36 = vector.extract_strided_slice %17 {offsets = [0, 384], sizes = [8, 128], strides = [1, 1]} : vector<8x512xf32> to vector<8x128xf32>
    %37 = arith.negf %36 : vector<8x128xf32>
    %38 = math.exp %37 : vector<8x128xf32>
    %cst_23 = arith.constant 1.000000e+00 : f32
    %39 = vector.broadcast %cst_23 : f32 to vector<8x128xf32>
    %40 = arith.addf %39, %38 : vector<8x128xf32>
    %41 = arith.divf %39, %40 : vector<8x128xf32>
    %42 = arith.mulf %33, %11 : vector<8x128xf32>
    %43 = arith.mulf %27, %35 : vector<8x128xf32>
    %44 = arith.addf %42, %43 : vector<8x128xf32>
    %45 = math.tanh %44 : vector<8x128xf32>
    %46 = arith.mulf %41, %45 : vector<8x128xf32>
    %47 = vector.extract_strided_slice %21 {offsets = [0, 0], sizes = [8, 128], strides = [1, 1]} : vector<8x512xf32> to vector<8x128xf32>
    %48 = arith.negf %47 : vector<8x128xf32>
    %49 = math.exp %48 : vector<8x128xf32>
    %cst_24 = arith.constant 1.000000e+00 : f32
    %50 = vector.broadcast %cst_24 : f32 to vector<8x128xf32>
    %51 = arith.addf %50, %49 : vector<8x128xf32>
    %52 = arith.divf %50, %51 : vector<8x128xf32>
    %53 = vector.extract_strided_slice %21 {offsets = [0, 128], sizes = [8, 128], strides = [1, 1]} : vector<8x512xf32> to vector<8x128xf32>
    %54 = arith.negf %53 : vector<8x128xf32>
    %55 = math.exp %54 : vector<8x128xf32>
    %cst_25 = arith.constant 1.000000e+00 : f32
    %56 = vector.broadcast %cst_25 : f32 to vector<8x128xf32>
    %57 = arith.addf %56, %55 : vector<8x128xf32>
    %58 = arith.divf %56, %57 : vector<8x128xf32>
    %59 = vector.extract_strided_slice %21 {offsets = [0, 256], sizes = [8, 128], strides = [1, 1]} : vector<8x512xf32> to vector<8x128xf32>
    %60 = math.tanh %59 : vector<8x128xf32>
    %61 = vector.extract_strided_slice %21 {offsets = [0, 384], sizes = [8, 128], strides = [1, 1]} : vector<8x512xf32> to vector<8x128xf32>
    %62 = arith.negf %61 : vector<8x128xf32>
    %63 = math.exp %62 : vector<8x128xf32>
    %cst_26 = arith.constant 1.000000e+00 : f32
    %64 = vector.broadcast %cst_26 : f32 to vector<8x128xf32>
    %65 = arith.addf %64, %63 : vector<8x128xf32>
    %66 = arith.divf %64, %65 : vector<8x128xf32>
    %67 = arith.mulf %58, %11 : vector<8x128xf32>
    %68 = arith.mulf %52, %60 : vector<8x128xf32>
    %69 = arith.addf %67, %68 : vector<8x128xf32>
    %70 = math.tanh %69 : vector<8x128xf32>
    %71 = arith.mulf %66, %70 : vector<8x128xf32>
    %c0_27 = arith.constant 0 : index
    %c0_28 = arith.constant 0 : index
    %72 = vector.load %arg10[%c0_27, %c0_28] : memref<64x128xf32, #tpu.memory_space<vmem>>, vector<8x128xf32>
    tpu.vector_store %arg10[%c0_27, %c0_28], %46 {strides = array<i32>} : memref<64x128xf32, #tpu.memory_space<vmem>>, vector<8x128xf32>,
    %c56_29 = arith.constant 56 : index
    %c0_30 = arith.constant 0 : index
    %73 = vector.load %arg11[%c56_29, %c0_30] : memref<64x128xf32, #tpu.memory_space<vmem>>, vector<8x128xf32>
    tpu.vector_store %arg11[%c56_29, %c0_30], %71 {strides = array<i32>} : memref<64x128xf32, #tpu.memory_space<vmem>>, vector<8x128xf32>,
    %c8 = arith.constant 8 : index
    %c0_31 = arith.constant 0 : index
    %74 = vector.load %arg9[%c8, %c0_31] : memref<64x1024xf32, #tpu.memory_space<vmem>>, vector<8x1024xf32>
    %c48 = arith.constant 48 : index
    %c0_32 = arith.constant 0 : index
    %75 = vector.load %arg9[%c48, %c0_32] : memref<64x1024xf32, #tpu.memory_space<vmem>>, vector<8x1024xf32>
    %76 = vector.extract_strided_slice %74 {offsets = [0, 0], sizes = [8, 512], strides = [1, 1]} : vector<8x1024xf32> to vector<8x512xf32>
    %c0_33 = arith.constant 0 : index
    %c0_34 = arith.constant 0 : index
    %77 = vector.load %arg3[%c0_33, %c0_34] : memref<128x512xf32, #tpu.memory_space<vmem>>, vector<128x512xf32>
    %cst_35 = arith.constant dense<0.000000e+00> : vector<8x512xf32>
    %78 = tpu.matmul %46, %77, %cst_35 {dimension_numbers = #tpu.dot_dimension_numbers<[1], [0], [0], [1], [0, 0, 1, 1], [], []>} : vector<8x128xf32>, vector<128x512xf32>, vector<8x512xf32> -> vector<8x512xf32>
    %79 = arith.addf %76, %78 : vector<8x512xf32>
    %80 = vector.extract_strided_slice %75 {offsets = [0, 512], sizes = [8, 512], strides = [1, 1]} : vector<8x1024xf32> to vector<8x512xf32>
    %c0_36 = arith.constant 0 : index
    %c0_37 = arith.constant 0 : index
    %81 = vector.load %arg4[%c0_36, %c0_37] : memref<128x512xf32, #tpu.memory_space<vmem>>, vector<128x512xf32>
    %cst_38 = arith.constant dense<0.000000e+00> : vector<8x512xf32>
    %82 = tpu.matmul %71, %81, %cst_38 {dimension_numbers = #tpu.dot_dimension_numbers<[1], [0], [0], [1], [0, 0, 1, 1], [], []>} : vector<8x128xf32>, vector<128x512xf32>, vector<8x512xf32> -> vector<8x512xf32>
    %83 = arith.addf %80, %82 : vector<8x512xf32>
    %84 = vector.extract_strided_slice %79 {offsets = [0, 0], sizes = [8, 128], strides = [1, 1]} : vector<8x512xf32> to vector<8x128xf32>
    %85 = arith.negf %84 : vector<8x128xf32>
    %86 = math.exp %85 : vector<8x128xf32>
    %cst_39 = arith.constant 1.000000e+00 : f32
    %87 = vector.broadcast %cst_39 : f32 to vector<8x128xf32>
    %88 = arith.addf %87, %86 : vector<8x128xf32>
    %89 = arith.divf %87, %88 : vector<8x128xf32>
    %90 = vector.extract_strided_slice %79 {offsets = [0, 128], sizes = [8, 128], strides = [1, 1]} : vector<8x512xf32> to vector<8x128xf32>
    %91 = arith.negf %90 : vector<8x128xf32>
    %92 = math.exp %91 : vector<8x128xf32>
    %cst_40 = arith.constant 1.000000e+00 : f32
    %93 = vector.broadcast %cst_40 : f32 to vector<8x128xf32>
    %94 = arith.addf %93, %92 : vector<8x128xf32>
    %95 = arith.divf %93, %94 : vector<8x128xf32>
    %96 = vector.extract_strided_slice %79 {offsets = [0, 256], sizes = [8, 128], strides = [1, 1]} : vector<8x512xf32> to vector<8x128xf32>
    %97 = math.tanh %96 : vector<8x128xf32>
    %98 = vector.extract_strided_slice %79 {offsets = [0, 384], sizes = [8, 128], strides = [1, 1]} : vector<8x512xf32> to vector<8x128xf32>
    %99 = arith.negf %98 : vector<8x128xf32>
    %100 = math.exp %99 : vector<8x128xf32>
    %cst_41 = arith.constant 1.000000e+00 : f32
    %101 = vector.broadcast %cst_41 : f32 to vector<8x128xf32>
    %102 = arith.addf %101, %100 : vector<8x128xf32>
    %103 = arith.divf %101, %102 : vector<8x128xf32>
    %104 = arith.mulf %95, %44 : vector<8x128xf32>
    %105 = arith.mulf %89, %97 : vector<8x128xf32>
    %106 = arith.addf %104, %105 : vector<8x128xf32>
    %107 = math.tanh %106 : vector<8x128xf32>
    %108 = arith.mulf %103, %107 : vector<8x128xf32>
    %109 = vector.extract_strided_slice %83 {offsets = [0, 0], sizes = [8, 128], strides = [1, 1]} : vector<8x512xf32> to vector<8x128xf32>
    %110 = arith.negf %109 : vector<8x128xf32>
    %111 = math.exp %110 : vector<8x128xf32>
    %cst_42 = arith.constant 1.000000e+00 : f32
    %112 = vector.broadcast %cst_42 : f32 to vector<8x128xf32>
    %113 = arith.addf %112, %111 : vector<8x128xf32>
    %114 = arith.divf %112, %113 : vector<8x128xf32>
    %115 = vector.extract_strided_slice %83 {offsets = [0, 128], sizes = [8, 128], strides = [1, 1]} : vector<8x512xf32> to vector<8x128xf32>
    %116 = arith.negf %115 : vector<8x128xf32>
    %117 = math.exp %116 : vector<8x128xf32>
    %cst_43 = arith.constant 1.000000e+00 : f32
    %118 = vector.broadcast %cst_43 : f32 to vector<8x128xf32>
    %119 = arith.addf %118, %117 : vector<8x128xf32>
    %120 = arith.divf %118, %119 : vector<8x128xf32>
    %121 = vector.extract_strided_slice %83 {offsets = [0, 256], sizes = [8, 128], strides = [1, 1]} : vector<8x512xf32> to vector<8x128xf32>
    %122 = math.tanh %121 : vector<8x128xf32>
    %123 = vector.extract_strided_slice %83 {offsets = [0, 384], sizes = [8, 128], strides = [1, 1]} : vector<8x512xf32> to vector<8x128xf32>
    %124 = arith.negf %123 : vector<8x128xf32>
    %125 = math.exp %124 : vector<8x128xf32>
    %cst_44 = arith.constant 1.000000e+00 : f32
    %126 = vector.broadcast %cst_44 : f32 to vector<8x128xf32>
    %127 = arith.addf %126, %125 : vector<8x128xf32>
    %128 = arith.divf %126, %127 : vector<8x128xf32>
    %129 = arith.mulf %120, %69 : vector<8x128xf32>
    %130 = arith.mulf %114, %122 : vector<8x128xf32>
    %131 = arith.addf %129, %130 : vector<8x128xf32>
    %132 = math.tanh %131 : vector<8x128xf32>
    %133 = arith.mulf %128, %132 : vector<8x128xf32>
    %c8_45 = arith.constant 8 : index
    %c0_46 = arith.constant 0 : index
    %134 = vector.load %arg10[%c8_45, %c0_46] : memref<64x128xf32, #tpu.memory_space<vmem>>, vector<8x128xf32>
    tpu.vector_store %arg10[%c8_45, %c0_46], %108 {strides = array<i32>} : memref<64x128xf32, #tpu.memory_space<vmem>>, vector<8x128xf32>,
    %c48_47 = arith.constant 48 : index
    %c0_48 = arith.constant 0 : index
    %135 = vector.load %arg11[%c48_47, %c0_48] : memref<64x128xf32, #tpu.memory_space<vmem>>, vector<8x128xf32>
    tpu.vector_store %arg11[%c48_47, %c0_48], %133 {strides = array<i32>} : memref<64x128xf32, #tpu.memory_space<vmem>>, vector<8x128xf32>,
    %c16 = arith.constant 16 : index
    %c0_49 = arith.constant 0 : index
    %136 = vector.load %arg9[%c16, %c0_49] : memref<64x1024xf32, #tpu.memory_space<vmem>>, vector<8x1024xf32>
    %c40 = arith.constant 40 : index
    %c0_50 = arith.constant 0 : index
    %137 = vector.load %arg9[%c40, %c0_50] : memref<64x1024xf32, #tpu.memory_space<vmem>>, vector<8x1024xf32>
    %138 = vector.extract_strided_slice %136 {offsets = [0, 0], sizes = [8, 512], strides = [1, 1]} : vector<8x1024xf32> to vector<8x512xf32>
    %c0_51 = arith.constant 0 : index
    %c0_52 = arith.constant 0 : index
    %139 = vector.load %arg3[%c0_51, %c0_52] : memref<128x512xf32, #tpu.memory_space<vmem>>, vector<128x512xf32>
    %cst_53 = arith.constant dense<0.000000e+00> : vector<8x512xf32>
    %140 = tpu.matmul %108, %139, %cst_53 {dimension_numbers = #tpu.dot_dimension_numbers<[1], [0], [0], [1], [0, 0, 1, 1], [], []>} : vector<8x128xf32>, vector<128x512xf32>, vector<8x512xf32> -> vector<8x512xf32>
    %141 = arith.addf %138, %140 : vector<8x512xf32>
    %142 = vector.extract_strided_slice %137 {offsets = [0, 512], sizes = [8, 512], strides = [1, 1]} : vector<8x1024xf32> to vector<8x512xf32>
    %c0_54 = arith.constant 0 : index
    %c0_55 = arith.constant 0 : index
    %143 = vector.load %arg4[%c0_54, %c0_55] : memref<128x512xf32, #tpu.memory_space<vmem>>, vector<128x512xf32>
    %cst_56 = arith.constant dense<0.000000e+00> : vector<8x512xf32>
    %144 = tpu.matmul %133, %143, %cst_56 {dimension_numbers = #tpu.dot_dimension_numbers<[1], [0], [0], [1], [0, 0, 1, 1], [], []>} : vector<8x128xf32>, vector<128x512xf32>, vector<8x512xf32> -> vector<8x512xf32>
    %145 = arith.addf %142, %144 : vector<8x512xf32>
    %146 = vector.extract_strided_slice %141 {offsets = [0, 0], sizes = [8, 128], strides = [1, 1]} : vector<8x512xf32> to vector<8x128xf32>
    %147 = arith.negf %146 : vector<8x128xf32>
    %148 = math.exp %147 : vector<8x128xf32>
    %cst_57 = arith.constant 1.000000e+00 : f32
    %149 = vector.broadcast %cst_57 : f32 to vector<8x128xf32>
    %150 = arith.addf %149, %148 : vector<8x128xf32>
    %151 = arith.divf %149, %150 : vector<8x128xf32>
    %152 = vector.extract_strided_slice %141 {offsets = [0, 128], sizes = [8, 128], strides = [1, 1]} : vector<8x512xf32> to vector<8x128xf32>
    %153 = arith.negf %152 : vector<8x128xf32>
    %154 = math.exp %153 : vector<8x128xf32>
    %cst_58 = arith.constant 1.000000e+00 : f32
    %155 = vector.broadcast %cst_58 : f32 to vector<8x128xf32>
    %156 = arith.addf %155, %154 : vector<8x128xf32>
    %157 = arith.divf %155, %156 : vector<8x128xf32>
    %158 = vector.extract_strided_slice %141 {offsets = [0, 256], sizes = [8, 128], strides = [1, 1]} : vector<8x512xf32> to vector<8x128xf32>
    %159 = math.tanh %158 : vector<8x128xf32>
    %160 = vector.extract_strided_slice %141 {offsets = [0, 384], sizes = [8, 128], strides = [1, 1]} : vector<8x512xf32> to vector<8x128xf32>
    %161 = arith.negf %160 : vector<8x128xf32>
    %162 = math.exp %161 : vector<8x128xf32>
    %cst_59 = arith.constant 1.000000e+00 : f32
    %163 = vector.broadcast %cst_59 : f32 to vector<8x128xf32>
    %164 = arith.addf %163, %162 : vector<8x128xf32>
    %165 = arith.divf %163, %164 : vector<8x128xf32>
    %166 = arith.mulf %157, %106 : vector<8x128xf32>
    %167 = arith.mulf %151, %159 : vector<8x128xf32>
    %168 = arith.addf %166, %167 : vector<8x128xf32>
    %169 = math.tanh %168 : vector<8x128xf32>
    %170 = arith.mulf %165, %169 : vector<8x128xf32>
    %171 = vector.extract_strided_slice %145 {offsets = [0, 0], sizes = [8, 128], strides = [1, 1]} : vector<8x512xf32> to vector<8x128xf32>
    %172 = arith.negf %171 : vector<8x128xf32>
    %173 = math.exp %172 : vector<8x128xf32>
    %cst_60 = arith.constant 1.000000e+00 : f32
    %174 = vector.broadcast %cst_60 : f32 to vector<8x128xf32>
    %175 = arith.addf %174, %173 : vector<8x128xf32>
    %176 = arith.divf %174, %175 : vector<8x128xf32>
    %177 = vector.extract_strided_slice %145 {offsets = [0, 128], sizes = [8, 128], strides = [1, 1]} : vector<8x512xf32> to vector<8x128xf32>
    %178 = arith.negf %177 : vector<8x128xf32>
    %179 = math.exp %178 : vector<8x128xf32>
    %cst_61 = arith.constant 1.000000e+00 : f32
    %180 = vector.broadcast %cst_61 : f32 to vector<8x128xf32>
    %181 = arith.addf %180, %179 : vector<8x128xf32>
    %182 = arith.divf %180, %181 : vector<8x128xf32>
    %183 = vector.extract_strided_slice %145 {offsets = [0, 256], sizes = [8, 128], strides = [1, 1]} : vector<8x512xf32> to vector<8x128xf32>
    %184 = math.tanh %183 : vector<8x128xf32>
    %185 = vector.extract_strided_slice %145 {offsets = [0, 384], sizes = [8, 128], strides = [1, 1]} : vector<8x512xf32> to vector<8x128xf32>
    %186 = arith.negf %185 : vector<8x128xf32>
    %187 = math.exp %186 : vector<8x128xf32>
    %cst_62 = arith.constant 1.000000e+00 : f32
    %188 = vector.broadcast %cst_62 : f32 to vector<8x128xf32>
    %189 = arith.addf %188, %187 : vector<8x128xf32>
    %190 = arith.divf %188, %189 : vector<8x128xf32>
    %191 = arith.mulf %182, %131 : vector<8x128xf32>
    %192 = arith.mulf %176, %184 : vector<8x128xf32>
    %193 = arith.addf %191, %192 : vector<8x128xf32>
    %194 = math.tanh %193 : vector<8x128xf32>
    %195 = arith.mulf %190, %194 : vector<8x128xf32>
    %c16_63 = arith.constant 16 : index
    %c0_64 = arith.constant 0 : index
    %196 = vector.load %arg10[%c16_63, %c0_64] : memref<64x128xf32, #tpu.memory_space<vmem>>, vector<8x128xf32>
    tpu.vector_store %arg10[%c16_63, %c0_64], %170 {strides = array<i32>} : memref<64x128xf32, #tpu.memory_space<vmem>>, vector<8x128xf32>,
    %c40_65 = arith.constant 40 : index
    %c0_66 = arith.constant 0 : index
    %197 = vector.load %arg11[%c40_65, %c0_66] : memref<64x128xf32, #tpu.memory_space<vmem>>, vector<8x128xf32>
    tpu.vector_store %arg11[%c40_65, %c0_66], %195 {strides = array<i32>} : memref<64x128xf32, #tpu.memory_space<vmem>>, vector<8x128xf32>,
    %c24 = arith.constant 24 : index
    %c0_67 = arith.constant 0 : index
    %198 = vector.load %arg9[%c24, %c0_67] : memref<64x1024xf32, #tpu.memory_space<vmem>>, vector<8x1024xf32>
    %c32 = arith.constant 32 : index
    %c0_68 = arith.constant 0 : index
    %199 = vector.load %arg9[%c32, %c0_68] : memref<64x1024xf32, #tpu.memory_space<vmem>>, vector<8x1024xf32>
    %200 = vector.extract_strided_slice %198 {offsets = [0, 0], sizes = [8, 512], strides = [1, 1]} : vector<8x1024xf32> to vector<8x512xf32>
    %c0_69 = arith.constant 0 : index
    %c0_70 = arith.constant 0 : index
    %201 = vector.load %arg3[%c0_69, %c0_70] : memref<128x512xf32, #tpu.memory_space<vmem>>, vector<128x512xf32>
    %cst_71 = arith.constant dense<0.000000e+00> : vector<8x512xf32>
    %202 = tpu.matmul %170, %201, %cst_71 {dimension_numbers = #tpu.dot_dimension_numbers<[1], [0], [0], [1], [0, 0, 1, 1], [], []>} : vector<8x128xf32>, vector<128x512xf32>, vector<8x512xf32> -> vector<8x512xf32>
    %203 = arith.addf %200, %202 : vector<8x512xf32>
    %204 = vector.extract_strided_slice %199 {offsets = [0, 512], sizes = [8, 512], strides = [1, 1]} : vector<8x1024xf32> to vector<8x512xf32>
    %c0_72 = arith.constant 0 : index
    %c0_73 = arith.constant 0 : index
    %205 = vector.load %arg4[%c0_72, %c0_73] : memref<128x512xf32, #tpu.memory_space<vmem>>, vector<128x512xf32>
    %cst_74 = arith.constant dense<0.000000e+00> : vector<8x512xf32>
    %206 = tpu.matmul %195, %205, %cst_74 {dimension_numbers = #tpu.dot_dimension_numbers<[1], [0], [0], [1], [0, 0, 1, 1], [], []>} : vector<8x128xf32>, vector<128x512xf32>, vector<8x512xf32> -> vector<8x512xf32>
    %207 = arith.addf %204, %206 : vector<8x512xf32>
    %208 = vector.extract_strided_slice %203 {offsets = [0, 0], sizes = [8, 128], strides = [1, 1]} : vector<8x512xf32> to vector<8x128xf32>
    %209 = arith.negf %208 : vector<8x128xf32>
    %210 = math.exp %209 : vector<8x128xf32>
    %cst_75 = arith.constant 1.000000e+00 : f32
    %211 = vector.broadcast %cst_75 : f32 to vector<8x128xf32>
    %212 = arith.addf %211, %210 : vector<8x128xf32>
    %213 = arith.divf %211, %212 : vector<8x128xf32>
    %214 = vector.extract_strided_slice %203 {offsets = [0, 128], sizes = [8, 128], strides = [1, 1]} : vector<8x512xf32> to vector<8x128xf32>
    %215 = arith.negf %214 : vector<8x128xf32>
    %216 = math.exp %215 : vector<8x128xf32>
    %cst_76 = arith.constant 1.000000e+00 : f32
    %217 = vector.broadcast %cst_76 : f32 to vector<8x128xf32>
    %218 = arith.addf %217, %216 : vector<8x128xf32>
    %219 = arith.divf %217, %218 : vector<8x128xf32>
    %220 = vector.extract_strided_slice %203 {offsets = [0, 256], sizes = [8, 128], strides = [1, 1]} : vector<8x512xf32> to vector<8x128xf32>
    %221 = math.tanh %220 : vector<8x128xf32>
    %222 = vector.extract_strided_slice %203 {offsets = [0, 384], sizes = [8, 128], strides = [1, 1]} : vector<8x512xf32> to vector<8x128xf32>
    %223 = arith.negf %222 : vector<8x128xf32>
    %224 = math.exp %223 : vector<8x128xf32>
    %cst_77 = arith.constant 1.000000e+00 : f32
    %225 = vector.broadcast %cst_77 : f32 to vector<8x128xf32>
    %226 = arith.addf %225, %224 : vector<8x128xf32>
    %227 = arith.divf %225, %226 : vector<8x128xf32>
    %228 = arith.mulf %219, %168 : vector<8x128xf32>
    %229 = arith.mulf %213, %221 : vector<8x128xf32>
    %230 = arith.addf %228, %229 : vector<8x128xf32>
    %231 = math.tanh %230 : vector<8x128xf32>
    %232 = arith.mulf %227, %231 : vector<8x128xf32>
    %233 = vector.extract_strided_slice %207 {offsets = [0, 0], sizes = [8, 128], strides = [1, 1]} : vector<8x512xf32> to vector<8x128xf32>
    %234 = arith.negf %233 : vector<8x128xf32>
    %235 = math.exp %234 : vector<8x128xf32>
    %cst_78 = arith.constant 1.000000e+00 : f32
    %236 = vector.broadcast %cst_78 : f32 to vector<8x128xf32>
    %237 = arith.addf %236, %235 : vector<8x128xf32>
    %238 = arith.divf %236, %237 : vector<8x128xf32>
    %239 = vector.extract_strided_slice %207 {offsets = [0, 128], sizes = [8, 128], strides = [1, 1]} : vector<8x512xf32> to vector<8x128xf32>
    %240 = arith.negf %239 : vector<8x128xf32>
    %241 = math.exp %240 : vector<8x128xf32>
    %cst_79 = arith.constant 1.000000e+00 : f32
    %242 = vector.broadcast %cst_79 : f32 to vector<8x128xf32>
    %243 = arith.addf %242, %241 : vector<8x128xf32>
    %244 = arith.divf %242, %243 : vector<8x128xf32>
    %245 = vector.extract_strided_slice %207 {offsets = [0, 256], sizes = [8, 128], strides = [1, 1]} : vector<8x512xf32> to vector<8x128xf32>
    %246 = math.tanh %245 : vector<8x128xf32>
    %247 = vector.extract_strided_slice %207 {offsets = [0, 384], sizes = [8, 128], strides = [1, 1]} : vector<8x512xf32> to vector<8x128xf32>
    %248 = arith.negf %247 : vector<8x128xf32>
    %249 = math.exp %248 : vector<8x128xf32>
    %cst_80 = arith.constant 1.000000e+00 : f32
    %250 = vector.broadcast %cst_80 : f32 to vector<8x128xf32>
    %251 = arith.addf %250, %249 : vector<8x128xf32>
    %252 = arith.divf %250, %251 : vector<8x128xf32>
    %253 = arith.mulf %244, %193 : vector<8x128xf32>
    %254 = arith.mulf %238, %246 : vector<8x128xf32>
    %255 = arith.addf %253, %254 : vector<8x128xf32>
    %256 = math.tanh %255 : vector<8x128xf32>
    %257 = arith.mulf %252, %256 : vector<8x128xf32>
    %c24_81 = arith.constant 24 : index
    %c0_82 = arith.constant 0 : index
    %258 = vector.load %arg10[%c24_81, %c0_82] : memref<64x128xf32, #tpu.memory_space<vmem>>, vector<8x128xf32>
    tpu.vector_store %arg10[%c24_81, %c0_82], %232 {strides = array<i32>} : memref<64x128xf32, #tpu.memory_space<vmem>>, vector<8x128xf32>,
    %c32_83 = arith.constant 32 : index
    %c0_84 = arith.constant 0 : index
    %259 = vector.load %arg11[%c32_83, %c0_84] : memref<64x128xf32, #tpu.memory_space<vmem>>, vector<8x128xf32>
    tpu.vector_store %arg11[%c32_83, %c0_84], %257 {strides = array<i32>} : memref<64x128xf32, #tpu.memory_space<vmem>>, vector<8x128xf32>,
    %c32_85 = arith.constant 32 : index
    %c0_86 = arith.constant 0 : index
    %260 = vector.load %arg9[%c32_85, %c0_86] : memref<64x1024xf32, #tpu.memory_space<vmem>>, vector<8x1024xf32>
    %c24_87 = arith.constant 24 : index
    %c0_88 = arith.constant 0 : index
    %261 = vector.load %arg9[%c24_87, %c0_88] : memref<64x1024xf32, #tpu.memory_space<vmem>>, vector<8x1024xf32>
    %262 = vector.extract_strided_slice %260 {offsets = [0, 0], sizes = [8, 512], strides = [1, 1]} : vector<8x1024xf32> to vector<8x512xf32>
    %c0_89 = arith.constant 0 : index
    %c0_90 = arith.constant 0 : index
    %263 = vector.load %arg3[%c0_89, %c0_90] : memref<128x512xf32, #tpu.memory_space<vmem>>, vector<128x512xf32>
    %cst_91 = arith.constant dense<0.000000e+00> : vector<8x512xf32>
    %264 = tpu.matmul %232, %263, %cst_91 {dimension_numbers = #tpu.dot_dimension_numbers<[1], [0], [0], [1], [0, 0, 1, 1], [], []>} : vector<8x128xf32>, vector<128x512xf32>, vector<8x512xf32> -> vector<8x512xf32>
    %265 = arith.addf %262, %264 : vector<8x512xf32>
    %266 = vector.extract_strided_slice %261 {offsets = [0, 512], sizes = [8, 512], strides = [1, 1]} : vector<8x1024xf32> to vector<8x512xf32>
    %c0_92 = arith.constant 0 : index
    %c0_93 = arith.constant 0 : index
    %267 = vector.load %arg4[%c0_92, %c0_93] : memref<128x512xf32, #tpu.memory_space<vmem>>, vector<128x512xf32>
    %cst_94 = arith.constant dense<0.000000e+00> : vector<8x512xf32>
    %268 = tpu.matmul %257, %267, %cst_94 {dimension_numbers = #tpu.dot_dimension_numbers<[1], [0], [0], [1], [0, 0, 1, 1], [], []>} : vector<8x128xf32>, vector<128x512xf32>, vector<8x512xf32> -> vector<8x512xf32>
    %269 = arith.addf %266, %268 : vector<8x512xf32>
    %270 = vector.extract_strided_slice %265 {offsets = [0, 0], sizes = [8, 128], strides = [1, 1]} : vector<8x512xf32> to vector<8x128xf32>
    %271 = arith.negf %270 : vector<8x128xf32>
    %272 = math.exp %271 : vector<8x128xf32>
    %cst_95 = arith.constant 1.000000e+00 : f32
    %273 = vector.broadcast %cst_95 : f32 to vector<8x128xf32>
    %274 = arith.addf %273, %272 : vector<8x128xf32>
    %275 = arith.divf %273, %274 : vector<8x128xf32>
    %276 = vector.extract_strided_slice %265 {offsets = [0, 128], sizes = [8, 128], strides = [1, 1]} : vector<8x512xf32> to vector<8x128xf32>
    %277 = arith.negf %276 : vector<8x128xf32>
    %278 = math.exp %277 : vector<8x128xf32>
    %cst_96 = arith.constant 1.000000e+00 : f32
    %279 = vector.broadcast %cst_96 : f32 to vector<8x128xf32>
    %280 = arith.addf %279, %278 : vector<8x128xf32>
    %281 = arith.divf %279, %280 : vector<8x128xf32>
    %282 = vector.extract_strided_slice %265 {offsets = [0, 256], sizes = [8, 128], strides = [1, 1]} : vector<8x512xf32> to vector<8x128xf32>
    %283 = math.tanh %282 : vector<8x128xf32>
    %284 = vector.extract_strided_slice %265 {offsets = [0, 384], sizes = [8, 128], strides = [1, 1]} : vector<8x512xf32> to vector<8x128xf32>
    %285 = arith.negf %284 : vector<8x128xf32>
    %286 = math.exp %285 : vector<8x128xf32>
    %cst_97 = arith.constant 1.000000e+00 : f32
    %287 = vector.broadcast %cst_97 : f32 to vector<8x128xf32>
    %288 = arith.addf %287, %286 : vector<8x128xf32>
    %289 = arith.divf %287, %288 : vector<8x128xf32>
    %290 = arith.mulf %281, %230 : vector<8x128xf32>
    %291 = arith.mulf %275, %283 : vector<8x128xf32>
    %292 = arith.addf %290, %291 : vector<8x128xf32>
    %293 = math.tanh %292 : vector<8x128xf32>
    %294 = arith.mulf %289, %293 : vector<8x128xf32>
    %295 = vector.extract_strided_slice %269 {offsets = [0, 0], sizes = [8, 128], strides = [1, 1]} : vector<8x512xf32> to vector<8x128xf32>
    %296 = arith.negf %295 : vector<8x128xf32>
    %297 = math.exp %296 : vector<8x128xf32>
    %cst_98 = arith.constant 1.000000e+00 : f32
    %298 = vector.broadcast %cst_98 : f32 to vector<8x128xf32>
    %299 = arith.addf %298, %297 : vector<8x128xf32>
    %300 = arith.divf %298, %299 : vector<8x128xf32>
    %301 = vector.extract_strided_slice %269 {offsets = [0, 128], sizes = [8, 128], strides = [1, 1]} : vector<8x512xf32> to vector<8x128xf32>
    %302 = arith.negf %301 : vector<8x128xf32>
    %303 = math.exp %302 : vector<8x128xf32>
    %cst_99 = arith.constant 1.000000e+00 : f32
    %304 = vector.broadcast %cst_99 : f32 to vector<8x128xf32>
    %305 = arith.addf %304, %303 : vector<8x128xf32>
    %306 = arith.divf %304, %305 : vector<8x128xf32>
    %307 = vector.extract_strided_slice %269 {offsets = [0, 256], sizes = [8, 128], strides = [1, 1]} : vector<8x512xf32> to vector<8x128xf32>
    %308 = math.tanh %307 : vector<8x128xf32>
    %309 = vector.extract_strided_slice %269 {offsets = [0, 384], sizes = [8, 128], strides = [1, 1]} : vector<8x512xf32> to vector<8x128xf32>
    %310 = arith.negf %309 : vector<8x128xf32>
    %311 = math.exp %310 : vector<8x128xf32>
    %cst_100 = arith.constant 1.000000e+00 : f32
    %312 = vector.broadcast %cst_100 : f32 to vector<8x128xf32>
    %313 = arith.addf %312, %311 : vector<8x128xf32>
    %314 = arith.divf %312, %313 : vector<8x128xf32>
    %315 = arith.mulf %306, %255 : vector<8x128xf32>
    %316 = arith.mulf %300, %308 : vector<8x128xf32>
    %317 = arith.addf %315, %316 : vector<8x128xf32>
    %318 = math.tanh %317 : vector<8x128xf32>
    %319 = arith.mulf %314, %318 : vector<8x128xf32>
    %c32_101 = arith.constant 32 : index
    %c0_102 = arith.constant 0 : index
    %320 = vector.load %arg10[%c32_101, %c0_102] : memref<64x128xf32, #tpu.memory_space<vmem>>, vector<8x128xf32>
    tpu.vector_store %arg10[%c32_101, %c0_102], %294 {strides = array<i32>} : memref<64x128xf32, #tpu.memory_space<vmem>>, vector<8x128xf32>,
    %c24_103 = arith.constant 24 : index
    %c0_104 = arith.constant 0 : index
    %321 = vector.load %arg11[%c24_103, %c0_104] : memref<64x128xf32, #tpu.memory_space<vmem>>, vector<8x128xf32>
    tpu.vector_store %arg11[%c24_103, %c0_104], %319 {strides = array<i32>} : memref<64x128xf32, #tpu.memory_space<vmem>>, vector<8x128xf32>,
    %c40_105 = arith.constant 40 : index
    %c0_106 = arith.constant 0 : index
    %322 = vector.load %arg9[%c40_105, %c0_106] : memref<64x1024xf32, #tpu.memory_space<vmem>>, vector<8x1024xf32>
    %c16_107 = arith.constant 16 : index
    %c0_108 = arith.constant 0 : index
    %323 = vector.load %arg9[%c16_107, %c0_108] : memref<64x1024xf32, #tpu.memory_space<vmem>>, vector<8x1024xf32>
    %324 = vector.extract_strided_slice %322 {offsets = [0, 0], sizes = [8, 512], strides = [1, 1]} : vector<8x1024xf32> to vector<8x512xf32>
    %c0_109 = arith.constant 0 : index
    %c0_110 = arith.constant 0 : index
    %325 = vector.load %arg3[%c0_109, %c0_110] : memref<128x512xf32, #tpu.memory_space<vmem>>, vector<128x512xf32>
    %cst_111 = arith.constant dense<0.000000e+00> : vector<8x512xf32>
    %326 = tpu.matmul %294, %325, %cst_111 {dimension_numbers = #tpu.dot_dimension_numbers<[1], [0], [0], [1], [0, 0, 1, 1], [], []>} : vector<8x128xf32>, vector<128x512xf32>, vector<8x512xf32> -> vector<8x512xf32>
    %327 = arith.addf %324, %326 : vector<8x512xf32>
    %328 = vector.extract_strided_slice %323 {offsets = [0, 512], sizes = [8, 512], strides = [1, 1]} : vector<8x1024xf32> to vector<8x512xf32>
    %c0_112 = arith.constant 0 : index
    %c0_113 = arith.constant 0 : index
    %329 = vector.load %arg4[%c0_112, %c0_113] : memref<128x512xf32, #tpu.memory_space<vmem>>, vector<128x512xf32>
    %cst_114 = arith.constant dense<0.000000e+00> : vector<8x512xf32>
    %330 = tpu.matmul %319, %329, %cst_114 {dimension_numbers = #tpu.dot_dimension_numbers<[1], [0], [0], [1], [0, 0, 1, 1], [], []>} : vector<8x128xf32>, vector<128x512xf32>, vector<8x512xf32> -> vector<8x512xf32>
    %331 = arith.addf %328, %330 : vector<8x512xf32>
    %332 = vector.extract_strided_slice %327 {offsets = [0, 0], sizes = [8, 128], strides = [1, 1]} : vector<8x512xf32> to vector<8x128xf32>
    %333 = arith.negf %332 : vector<8x128xf32>
    %334 = math.exp %333 : vector<8x128xf32>
    %cst_115 = arith.constant 1.000000e+00 : f32
    %335 = vector.broadcast %cst_115 : f32 to vector<8x128xf32>
    %336 = arith.addf %335, %334 : vector<8x128xf32>
    %337 = arith.divf %335, %336 : vector<8x128xf32>
    %338 = vector.extract_strided_slice %327 {offsets = [0, 128], sizes = [8, 128], strides = [1, 1]} : vector<8x512xf32> to vector<8x128xf32>
    %339 = arith.negf %338 : vector<8x128xf32>
    %340 = math.exp %339 : vector<8x128xf32>
    %cst_116 = arith.constant 1.000000e+00 : f32
    %341 = vector.broadcast %cst_116 : f32 to vector<8x128xf32>
    %342 = arith.addf %341, %340 : vector<8x128xf32>
    %343 = arith.divf %341, %342 : vector<8x128xf32>
    %344 = vector.extract_strided_slice %327 {offsets = [0, 256], sizes = [8, 128], strides = [1, 1]} : vector<8x512xf32> to vector<8x128xf32>
    %345 = math.tanh %344 : vector<8x128xf32>
    %346 = vector.extract_strided_slice %327 {offsets = [0, 384], sizes = [8, 128], strides = [1, 1]} : vector<8x512xf32> to vector<8x128xf32>
    %347 = arith.negf %346 : vector<8x128xf32>
    %348 = math.exp %347 : vector<8x128xf32>
    %cst_117 = arith.constant 1.000000e+00 : f32
    %349 = vector.broadcast %cst_117 : f32 to vector<8x128xf32>
    %350 = arith.addf %349, %348 : vector<8x128xf32>
    %351 = arith.divf %349, %350 : vector<8x128xf32>
    %352 = arith.mulf %343, %292 : vector<8x128xf32>
    %353 = arith.mulf %337, %345 : vector<8x128xf32>
    %354 = arith.addf %352, %353 : vector<8x128xf32>
    %355 = math.tanh %354 : vector<8x128xf32>
    %356 = arith.mulf %351, %355 : vector<8x128xf32>
    %357 = vector.extract_strided_slice %331 {offsets = [0, 0], sizes = [8, 128], strides = [1, 1]} : vector<8x512xf32> to vector<8x128xf32>
    %358 = arith.negf %357 : vector<8x128xf32>
    %359 = math.exp %358 : vector<8x128xf32>
    %cst_118 = arith.constant 1.000000e+00 : f32
    %360 = vector.broadcast %cst_118 : f32 to vector<8x128xf32>
    %361 = arith.addf %360, %359 : vector<8x128xf32>
    %362 = arith.divf %360, %361 : vector<8x128xf32>
    %363 = vector.extract_strided_slice %331 {offsets = [0, 128], sizes = [8, 128], strides = [1, 1]} : vector<8x512xf32> to vector<8x128xf32>
    %364 = arith.negf %363 : vector<8x128xf32>
    %365 = math.exp %364 : vector<8x128xf32>
    %cst_119 = arith.constant 1.000000e+00 : f32
    %366 = vector.broadcast %cst_119 : f32 to vector<8x128xf32>
    %367 = arith.addf %366, %365 : vector<8x128xf32>
    %368 = arith.divf %366, %367 : vector<8x128xf32>
    %369 = vector.extract_strided_slice %331 {offsets = [0, 256], sizes = [8, 128], strides = [1, 1]} : vector<8x512xf32> to vector<8x128xf32>
    %370 = math.tanh %369 : vector<8x128xf32>
    %371 = vector.extract_strided_slice %331 {offsets = [0, 384], sizes = [8, 128], strides = [1, 1]} : vector<8x512xf32> to vector<8x128xf32>
    %372 = arith.negf %371 : vector<8x128xf32>
    %373 = math.exp %372 : vector<8x128xf32>
    %cst_120 = arith.constant 1.000000e+00 : f32
    %374 = vector.broadcast %cst_120 : f32 to vector<8x128xf32>
    %375 = arith.addf %374, %373 : vector<8x128xf32>
    %376 = arith.divf %374, %375 : vector<8x128xf32>
    %377 = arith.mulf %368, %317 : vector<8x128xf32>
    %378 = arith.mulf %362, %370 : vector<8x128xf32>
    %379 = arith.addf %377, %378 : vector<8x128xf32>
    %380 = math.tanh %379 : vector<8x128xf32>
    %381 = arith.mulf %376, %380 : vector<8x128xf32>
    %c40_121 = arith.constant 40 : index
    %c0_122 = arith.constant 0 : index
    %382 = vector.load %arg10[%c40_121, %c0_122] : memref<64x128xf32, #tpu.memory_space<vmem>>, vector<8x128xf32>
    tpu.vector_store %arg10[%c40_121, %c0_122], %356 {strides = array<i32>} : memref<64x128xf32, #tpu.memory_space<vmem>>, vector<8x128xf32>,
    %c16_123 = arith.constant 16 : index
    %c0_124 = arith.constant 0 : index
    %383 = vector.load %arg11[%c16_123, %c0_124] : memref<64x128xf32, #tpu.memory_space<vmem>>, vector<8x128xf32>
    tpu.vector_store %arg11[%c16_123, %c0_124], %381 {strides = array<i32>} : memref<64x128xf32, #tpu.memory_space<vmem>>, vector<8x128xf32>,
    %c48_125 = arith.constant 48 : index
    %c0_126 = arith.constant 0 : index
    %384 = vector.load %arg9[%c48_125, %c0_126] : memref<64x1024xf32, #tpu.memory_space<vmem>>, vector<8x1024xf32>
    %c8_127 = arith.constant 8 : index
    %c0_128 = arith.constant 0 : index
    %385 = vector.load %arg9[%c8_127, %c0_128] : memref<64x1024xf32, #tpu.memory_space<vmem>>, vector<8x1024xf32>
    %386 = vector.extract_strided_slice %384 {offsets = [0, 0], sizes = [8, 512], strides = [1, 1]} : vector<8x1024xf32> to vector<8x512xf32>
    %c0_129 = arith.constant 0 : index
    %c0_130 = arith.constant 0 : index
    %387 = vector.load %arg3[%c0_129, %c0_130] : memref<128x512xf32, #tpu.memory_space<vmem>>, vector<128x512xf32>
    %cst_131 = arith.constant dense<0.000000e+00> : vector<8x512xf32>
    %388 = tpu.matmul %356, %387, %cst_131 {dimension_numbers = #tpu.dot_dimension_numbers<[1], [0], [0], [1], [0, 0, 1, 1], [], []>} : vector<8x128xf32>, vector<128x512xf32>, vector<8x512xf32> -> vector<8x512xf32>
    %389 = arith.addf %386, %388 : vector<8x512xf32>
    %390 = vector.extract_strided_slice %385 {offsets = [0, 512], sizes = [8, 512], strides = [1, 1]} : vector<8x1024xf32> to vector<8x512xf32>
    %c0_132 = arith.constant 0 : index
    %c0_133 = arith.constant 0 : index
    %391 = vector.load %arg4[%c0_132, %c0_133] : memref<128x512xf32, #tpu.memory_space<vmem>>, vector<128x512xf32>
    %cst_134 = arith.constant dense<0.000000e+00> : vector<8x512xf32>
    %392 = tpu.matmul %381, %391, %cst_134 {dimension_numbers = #tpu.dot_dimension_numbers<[1], [0], [0], [1], [0, 0, 1, 1], [], []>} : vector<8x128xf32>, vector<128x512xf32>, vector<8x512xf32> -> vector<8x512xf32>
    %393 = arith.addf %390, %392 : vector<8x512xf32>
    %394 = vector.extract_strided_slice %389 {offsets = [0, 0], sizes = [8, 128], strides = [1, 1]} : vector<8x512xf32> to vector<8x128xf32>
    %395 = arith.negf %394 : vector<8x128xf32>
    %396 = math.exp %395 : vector<8x128xf32>
    %cst_135 = arith.constant 1.000000e+00 : f32
    %397 = vector.broadcast %cst_135 : f32 to vector<8x128xf32>
    %398 = arith.addf %397, %396 : vector<8x128xf32>
    %399 = arith.divf %397, %398 : vector<8x128xf32>
    %400 = vector.extract_strided_slice %389 {offsets = [0, 128], sizes = [8, 128], strides = [1, 1]} : vector<8x512xf32> to vector<8x128xf32>
    %401 = arith.negf %400 : vector<8x128xf32>
    %402 = math.exp %401 : vector<8x128xf32>
    %cst_136 = arith.constant 1.000000e+00 : f32
    %403 = vector.broadcast %cst_136 : f32 to vector<8x128xf32>
    %404 = arith.addf %403, %402 : vector<8x128xf32>
    %405 = arith.divf %403, %404 : vector<8x128xf32>
    %406 = vector.extract_strided_slice %389 {offsets = [0, 256], sizes = [8, 128], strides = [1, 1]} : vector<8x512xf32> to vector<8x128xf32>
    %407 = math.tanh %406 : vector<8x128xf32>
    %408 = vector.extract_strided_slice %389 {offsets = [0, 384], sizes = [8, 128], strides = [1, 1]} : vector<8x512xf32> to vector<8x128xf32>
    %409 = arith.negf %408 : vector<8x128xf32>
    %410 = math.exp %409 : vector<8x128xf32>
    %cst_137 = arith.constant 1.000000e+00 : f32
    %411 = vector.broadcast %cst_137 : f32 to vector<8x128xf32>
    %412 = arith.addf %411, %410 : vector<8x128xf32>
    %413 = arith.divf %411, %412 : vector<8x128xf32>
    %414 = arith.mulf %405, %354 : vector<8x128xf32>
    %415 = arith.mulf %399, %407 : vector<8x128xf32>
    %416 = arith.addf %414, %415 : vector<8x128xf32>
    %417 = math.tanh %416 : vector<8x128xf32>
    %418 = arith.mulf %413, %417 : vector<8x128xf32>
    %419 = vector.extract_strided_slice %393 {offsets = [0, 0], sizes = [8, 128], strides = [1, 1]} : vector<8x512xf32> to vector<8x128xf32>
    %420 = arith.negf %419 : vector<8x128xf32>
    %421 = math.exp %420 : vector<8x128xf32>
    %cst_138 = arith.constant 1.000000e+00 : f32
    %422 = vector.broadcast %cst_138 : f32 to vector<8x128xf32>
    %423 = arith.addf %422, %421 : vector<8x128xf32>
    %424 = arith.divf %422, %423 : vector<8x128xf32>
    %425 = vector.extract_strided_slice %393 {offsets = [0, 128], sizes = [8, 128], strides = [1, 1]} : vector<8x512xf32> to vector<8x128xf32>
    %426 = arith.negf %425 : vector<8x128xf32>
    %427 = math.exp %426 : vector<8x128xf32>
    %cst_139 = arith.constant 1.000000e+00 : f32
    %428 = vector.broadcast %cst_139 : f32 to vector<8x128xf32>
    %429 = arith.addf %428, %427 : vector<8x128xf32>
    %430 = arith.divf %428, %429 : vector<8x128xf32>
    %431 = vector.extract_strided_slice %393 {offsets = [0, 256], sizes = [8, 128], strides = [1, 1]} : vector<8x512xf32> to vector<8x128xf32>
    %432 = math.tanh %431 : vector<8x128xf32>
    %433 = vector.extract_strided_slice %393 {offsets = [0, 384], sizes = [8, 128], strides = [1, 1]} : vector<8x512xf32> to vector<8x128xf32>
    %434 = arith.negf %433 : vector<8x128xf32>
    %435 = math.exp %434 : vector<8x128xf32>
    %cst_140 = arith.constant 1.000000e+00 : f32
    %436 = vector.broadcast %cst_140 : f32 to vector<8x128xf32>
    %437 = arith.addf %436, %435 : vector<8x128xf32>
    %438 = arith.divf %436, %437 : vector<8x128xf32>
    %439 = arith.mulf %430, %379 : vector<8x128xf32>
    %440 = arith.mulf %424, %432 : vector<8x128xf32>
    %441 = arith.addf %439, %440 : vector<8x128xf32>
    %442 = math.tanh %441 : vector<8x128xf32>
    %443 = arith.mulf %438, %442 : vector<8x128xf32>
    %c48_141 = arith.constant 48 : index
    %c0_142 = arith.constant 0 : index
    %444 = vector.load %arg10[%c48_141, %c0_142] : memref<64x128xf32, #tpu.memory_space<vmem>>, vector<8x128xf32>
    tpu.vector_store %arg10[%c48_141, %c0_142], %418 {strides = array<i32>} : memref<64x128xf32, #tpu.memory_space<vmem>>, vector<8x128xf32>,
    %c8_143 = arith.constant 8 : index
    %c0_144 = arith.constant 0 : index
    %445 = vector.load %arg11[%c8_143, %c0_144] : memref<64x128xf32, #tpu.memory_space<vmem>>, vector<8x128xf32>
    tpu.vector_store %arg11[%c8_143, %c0_144], %443 {strides = array<i32>} : memref<64x128xf32, #tpu.memory_space<vmem>>, vector<8x128xf32>,
    %c56_145 = arith.constant 56 : index
    %c0_146 = arith.constant 0 : index
    %446 = vector.load %arg9[%c56_145, %c0_146] : memref<64x1024xf32, #tpu.memory_space<vmem>>, vector<8x1024xf32>
    %c0_147 = arith.constant 0 : index
    %c0_148 = arith.constant 0 : index
    %447 = vector.load %arg9[%c0_147, %c0_148] : memref<64x1024xf32, #tpu.memory_space<vmem>>, vector<8x1024xf32>
    %448 = vector.extract_strided_slice %446 {offsets = [0, 0], sizes = [8, 512], strides = [1, 1]} : vector<8x1024xf32> to vector<8x512xf32>
    %c0_149 = arith.constant 0 : index
    %c0_150 = arith.constant 0 : index
    %449 = vector.load %arg3[%c0_149, %c0_150] : memref<128x512xf32, #tpu.memory_space<vmem>>, vector<128x512xf32>
    %cst_151 = arith.constant dense<0.000000e+00> : vector<8x512xf32>
    %450 = tpu.matmul %418, %449, %cst_151 {dimension_numbers = #tpu.dot_dimension_numbers<[1], [0], [0], [1], [0, 0, 1, 1], [], []>} : vector<8x128xf32>, vector<128x512xf32>, vector<8x512xf32> -> vector<8x512xf32>
    %451 = arith.addf %448, %450 : vector<8x512xf32>
    %452 = vector.extract_strided_slice %447 {offsets = [0, 512], sizes = [8, 512], strides = [1, 1]} : vector<8x1024xf32> to vector<8x512xf32>
    %c0_152 = arith.constant 0 : index
    %c0_153 = arith.constant 0 : index
    %453 = vector.load %arg4[%c0_152, %c0_153] : memref<128x512xf32, #tpu.memory_space<vmem>>, vector<128x512xf32>
    %cst_154 = arith.constant dense<0.000000e+00> : vector<8x512xf32>
    %454 = tpu.matmul %443, %453, %cst_154 {dimension_numbers = #tpu.dot_dimension_numbers<[1], [0], [0], [1], [0, 0, 1, 1], [], []>} : vector<8x128xf32>, vector<128x512xf32>, vector<8x512xf32> -> vector<8x512xf32>
    %455 = arith.addf %452, %454 : vector<8x512xf32>
    %456 = vector.extract_strided_slice %451 {offsets = [0, 0], sizes = [8, 128], strides = [1, 1]} : vector<8x512xf32> to vector<8x128xf32>
    %457 = arith.negf %456 : vector<8x128xf32>
    %458 = math.exp %457 : vector<8x128xf32>
    %cst_155 = arith.constant 1.000000e+00 : f32
    %459 = vector.broadcast %cst_155 : f32 to vector<8x128xf32>
    %460 = arith.addf %459, %458 : vector<8x128xf32>
    %461 = arith.divf %459, %460 : vector<8x128xf32>
    %462 = vector.extract_strided_slice %451 {offsets = [0, 128], sizes = [8, 128], strides = [1, 1]} : vector<8x512xf32> to vector<8x128xf32>
    %463 = arith.negf %462 : vector<8x128xf32>
    %464 = math.exp %463 : vector<8x128xf32>
    %cst_156 = arith.constant 1.000000e+00 : f32
    %465 = vector.broadcast %cst_156 : f32 to vector<8x128xf32>
    %466 = arith.addf %465, %464 : vector<8x128xf32>
    %467 = arith.divf %465, %466 : vector<8x128xf32>
    %468 = vector.extract_strided_slice %451 {offsets = [0, 256], sizes = [8, 128], strides = [1, 1]} : vector<8x512xf32> to vector<8x128xf32>
    %469 = math.tanh %468 : vector<8x128xf32>
    %470 = vector.extract_strided_slice %451 {offsets = [0, 384], sizes = [8, 128], strides = [1, 1]} : vector<8x512xf32> to vector<8x128xf32>
    %471 = arith.negf %470 : vector<8x128xf32>
    %472 = math.exp %471 : vector<8x128xf32>
    %cst_157 = arith.constant 1.000000e+00 : f32
    %473 = vector.broadcast %cst_157 : f32 to vector<8x128xf32>
    %474 = arith.addf %473, %472 : vector<8x128xf32>
    %475 = arith.divf %473, %474 : vector<8x128xf32>
    %476 = arith.mulf %467, %416 : vector<8x128xf32>
    %477 = arith.mulf %461, %469 : vector<8x128xf32>
    %478 = arith.addf %476, %477 : vector<8x128xf32>
    %479 = math.tanh %478 : vector<8x128xf32>
    %480 = arith.mulf %475, %479 : vector<8x128xf32>
    %481 = vector.extract_strided_slice %455 {offsets = [0, 0], sizes = [8, 128], strides = [1, 1]} : vector<8x512xf32> to vector<8x128xf32>
    %482 = arith.negf %481 : vector<8x128xf32>
    %483 = math.exp %482 : vector<8x128xf32>
    %cst_158 = arith.constant 1.000000e+00 : f32
    %484 = vector.broadcast %cst_158 : f32 to vector<8x128xf32>
    %485 = arith.addf %484, %483 : vector<8x128xf32>
    %486 = arith.divf %484, %485 : vector<8x128xf32>
    %487 = vector.extract_strided_slice %455 {offsets = [0, 128], sizes = [8, 128], strides = [1, 1]} : vector<8x512xf32> to vector<8x128xf32>
    %488 = arith.negf %487 : vector<8x128xf32>
    %489 = math.exp %488 : vector<8x128xf32>
    %cst_159 = arith.constant 1.000000e+00 : f32
    %490 = vector.broadcast %cst_159 : f32 to vector<8x128xf32>
    %491 = arith.addf %490, %489 : vector<8x128xf32>
    %492 = arith.divf %490, %491 : vector<8x128xf32>
    %493 = vector.extract_strided_slice %455 {offsets = [0, 256], sizes = [8, 128], strides = [1, 1]} : vector<8x512xf32> to vector<8x128xf32>
    %494 = math.tanh %493 : vector<8x128xf32>
    %495 = vector.extract_strided_slice %455 {offsets = [0, 384], sizes = [8, 128], strides = [1, 1]} : vector<8x512xf32> to vector<8x128xf32>
    %496 = arith.negf %495 : vector<8x128xf32>
    %497 = math.exp %496 : vector<8x128xf32>
    %cst_160 = arith.constant 1.000000e+00 : f32
    %498 = vector.broadcast %cst_160 : f32 to vector<8x128xf32>
    %499 = arith.addf %498, %497 : vector<8x128xf32>
    %500 = arith.divf %498, %499 : vector<8x128xf32>
    %501 = arith.mulf %492, %441 : vector<8x128xf32>
    %502 = arith.mulf %486, %494 : vector<8x128xf32>
    %503 = arith.addf %501, %502 : vector<8x128xf32>
    %504 = math.tanh %503 : vector<8x128xf32>
    %505 = arith.mulf %500, %504 : vector<8x128xf32>
    %c56_161 = arith.constant 56 : index
    %c0_162 = arith.constant 0 : index
    %506 = vector.load %arg10[%c56_161, %c0_162] : memref<64x128xf32, #tpu.memory_space<vmem>>, vector<8x128xf32>
    tpu.vector_store %arg10[%c56_161, %c0_162], %480 {strides = array<i32>} : memref<64x128xf32, #tpu.memory_space<vmem>>, vector<8x128xf32>,
    %c0_163 = arith.constant 0 : index
    %c0_164 = arith.constant 0 : index
    %507 = vector.load %arg11[%c0_163, %c0_164] : memref<64x128xf32, #tpu.memory_space<vmem>>, vector<8x128xf32>
    tpu.vector_store %arg11[%c0_163, %c0_164], %505 {strides = array<i32>} : memref<64x128xf32, #tpu.memory_space<vmem>>, vector<8x128xf32>,
    %c0_165 = arith.constant 0 : index
    %c0_166 = arith.constant 0 : index
    %508 = vector.load %arg7[%c0_165, %c0_166] : memref<8x256xf32, #tpu.memory_space<vmem>>, vector<8x128xf32>
    tpu.vector_store %arg7[%c0_165, %c0_166], %480 {strides = array<i32>} : memref<8x256xf32, #tpu.memory_space<vmem>>, vector<8x128xf32>,
    %c0_167 = arith.constant 0 : index
    %c128_168 = arith.constant 128 : index
    %509 = vector.load %arg7[%c0_167, %c128_168] : memref<8x256xf32, #tpu.memory_space<vmem>>, vector<8x128xf32>
    tpu.vector_store %arg7[%c0_167, %c128_168], %505 {strides = array<i32>} : memref<8x256xf32, #tpu.memory_space<vmem>>, vector<8x128xf32>,
    %c0_169 = arith.constant 0 : index
    %c0_170 = arith.constant 0 : index
    %510 = vector.load %arg8[%c0_169, %c0_170] : memref<8x256xf32, #tpu.memory_space<vmem>>, vector<8x128xf32>
    tpu.vector_store %arg8[%c0_169, %c0_170], %478 {strides = array<i32>} : memref<8x256xf32, #tpu.memory_space<vmem>>, vector<8x128xf32>,
    %c0_171 = arith.constant 0 : index
    %c128_172 = arith.constant 128 : index
    %511 = vector.load %arg8[%c0_171, %c128_172] : memref<8x256xf32, #tpu.memory_space<vmem>>, vector<8x128xf32>
    tpu.vector_store %arg8[%c0_171, %c128_172], %503 {strides = array<i32>} : memref<8x256xf32, #tpu.memory_space<vmem>>, vector<8x128xf32>,
    %c0_173 = arith.constant 0 : index
    %c0_174 = arith.constant 0 : index
    %512 = vector.load %arg10[%c0_173, %c0_174] : memref<64x128xf32, #tpu.memory_space<vmem>>, vector<64x128xf32>
    %c0_175 = arith.constant 0 : index
    %c0_176 = arith.constant 0 : index
    %513 = vector.load %arg11[%c0_175, %c0_176] : memref<64x128xf32, #tpu.memory_space<vmem>>, vector<64x128xf32>
    %514 = arith.addf %512, %513 : vector<64x128xf32>
    %c0_177 = arith.constant 0 : index
    %c0_178 = arith.constant 0 : index
    %515 = vector.load %arg6[%c0_177, %c0_178] : memref<64x128xf32, #tpu.memory_space<vmem>>, vector<64x128xf32>
    tpu.vector_store %arg6[%c0_177, %c0_178], %514 {strides = array<i32>} : memref<64x128xf32, #tpu.memory_space<vmem>>, vector<64x128xf32>,
    return
  }
}

module attributes {stable_mosaic.version = 11 : i64} {
  func.func @_bilstm_layer_kernel(%arg0: memref<64x128xf32, #tpu.memory_space<vmem>>, %arg1: memref<128x1024xf32, #tpu.memory_space<vmem>>, %arg2: memref<128x512xf32, #tpu.memory_space<vmem>>, %arg3: memref<128x512xf32, #tpu.memory_space<vmem>>, %arg4: memref<1x1024xf32, #tpu.memory_space<vmem>>, %arg5: memref<64x128xf32, #tpu.memory_space<vmem>>, %arg6: memref<64x128xf32, #tpu.memory_space<vmem>>, %arg7: memref<8x256xf32, #tpu.memory_space<vmem>>, %arg8: memref<8x256xf32, #tpu.memory_space<vmem>>, %arg9: memref<64x1024xf32, #tpu.memory_space<vmem>>) attributes {dimension_semantics = [], scalar_prefetch = 0 : i64, scratch_operands = 1 : i64, tpu.core_type = #tpu.core_type<tc>} {
    %c0 = arith.constant 0 : index
    %c0_0 = arith.constant 0 : index
    %0 = vector.load %arg0[%c0, %c0_0] : memref<64x128xf32, #tpu.memory_space<vmem>>, vector<64x128xf32>
    %c0_1 = arith.constant 0 : index
    %c0_2 = arith.constant 0 : index
    %1 = vector.load %arg1[%c0_1, %c0_2] : memref<128x1024xf32, #tpu.memory_space<vmem>>, vector<128x1024xf32>
    %cst = arith.constant dense<0.000000e+00> : vector<64x1024xf32>
    %2 = tpu.matmul %0, %1, %cst {dimension_numbers = #tpu.dot_dimension_numbers<[1], [0], [0], [1], [0, 0, 1, 1], [], []>} : vector<64x128xf32>, vector<128x1024xf32>, vector<64x1024xf32> -> vector<64x1024xf32>
    %c0_3 = arith.constant 0 : index
    %c0_4 = arith.constant 0 : index
    %3 = vector.load %arg4[%c0_3, %c0_4] : memref<1x1024xf32, #tpu.memory_space<vmem>>, vector<1x1024xf32>
    %4 = vector.broadcast %3 : vector<1x1024xf32> to vector<64x1024xf32>
    %5 = arith.addf %2, %4 : vector<64x1024xf32>
    %c0_5 = arith.constant 0 : index
    %c0_6 = arith.constant 0 : index
    %6 = vector.load %arg9[%c0_5, %c0_6] : memref<64x1024xf32, #tpu.memory_space<vmem>>, vector<64x1024xf32>
    tpu.vector_store %arg9[%c0_5, %c0_6], %5 {strides = array<i32>} : memref<64x1024xf32, #tpu.memory_space<vmem>>, vector<64x1024xf32>,
    %cst_7 = arith.constant 0.000000e+00 : f32
    %7 = vector.broadcast %cst_7 : f32 to vector<8x128xf32>
    %c0_8 = arith.constant 0 : index
    %c0_9 = arith.constant 0 : index
    %8 = vector.load %arg9[%c0_8, %c0_9] : memref<64x1024xf32, #tpu.memory_space<vmem>>, vector<8x1024xf32>
    %c56 = arith.constant 56 : index
    %c0_10 = arith.constant 0 : index
    %9 = vector.load %arg9[%c56, %c0_10] : memref<64x1024xf32, #tpu.memory_space<vmem>>, vector<8x1024xf32>
    %10 = vector.extract_strided_slice %8 {offsets = [0, 0], sizes = [8, 512], strides = [1, 1]} : vector<8x1024xf32> to vector<8x512xf32>
    %c0_11 = arith.constant 0 : index
    %c0_12 = arith.constant 0 : index
    %11 = vector.load %arg2[%c0_11, %c0_12] : memref<128x512xf32, #tpu.memory_space<vmem>>, vector<128x512xf32>
    %cst_13 = arith.constant dense<0.000000e+00> : vector<8x512xf32>
    %12 = tpu.matmul %7, %11, %cst_13 {dimension_numbers = #tpu.dot_dimension_numbers<[1], [0], [0], [1], [0, 0, 1, 1], [], []>} : vector<8x128xf32>, vector<128x512xf32>, vector<8x512xf32> -> vector<8x512xf32>
    %13 = arith.addf %10, %12 : vector<8x512xf32>
    %14 = vector.extract_strided_slice %9 {offsets = [0, 512], sizes = [8, 512], strides = [1, 1]} : vector<8x1024xf32> to vector<8x512xf32>
    %c0_14 = arith.constant 0 : index
    %c0_15 = arith.constant 0 : index
    %15 = vector.load %arg3[%c0_14, %c0_15] : memref<128x512xf32, #tpu.memory_space<vmem>>, vector<128x512xf32>
    %cst_16 = arith.constant dense<0.000000e+00> : vector<8x512xf32>
    %16 = tpu.matmul %7, %15, %cst_16 {dimension_numbers = #tpu.dot_dimension_numbers<[1], [0], [0], [1], [0, 0, 1, 1], [], []>} : vector<8x128xf32>, vector<128x512xf32>, vector<8x512xf32> -> vector<8x512xf32>
    %17 = arith.addf %14, %16 : vector<8x512xf32>
    %18 = vector.extract_strided_slice %13 {offsets = [0, 0], sizes = [8, 128], strides = [1, 1]} : vector<8x512xf32> to vector<8x128xf32>
    %19 = arith.negf %18 : vector<8x128xf32>
    %20 = math.exp %19 : vector<8x128xf32>
    %cst_17 = arith.constant 1.000000e+00 : f32
    %21 = vector.broadcast %cst_17 : f32 to vector<8x128xf32>
    %22 = arith.addf %21, %20 : vector<8x128xf32>
    %23 = arith.divf %21, %22 : vector<8x128xf32>
    %24 = vector.extract_strided_slice %13 {offsets = [0, 128], sizes = [8, 128], strides = [1, 1]} : vector<8x512xf32> to vector<8x128xf32>
    %25 = arith.negf %24 : vector<8x128xf32>
    %26 = math.exp %25 : vector<8x128xf32>
    %cst_18 = arith.constant 1.000000e+00 : f32
    %27 = vector.broadcast %cst_18 : f32 to vector<8x128xf32>
    %28 = arith.addf %27, %26 : vector<8x128xf32>
    %29 = arith.divf %27, %28 : vector<8x128xf32>
    %30 = vector.extract_strided_slice %13 {offsets = [0, 256], sizes = [8, 128], strides = [1, 1]} : vector<8x512xf32> to vector<8x128xf32>
    %31 = math.tanh %30 : vector<8x128xf32>
    %32 = vector.extract_strided_slice %13 {offsets = [0, 384], sizes = [8, 128], strides = [1, 1]} : vector<8x512xf32> to vector<8x128xf32>
    %33 = arith.negf %32 : vector<8x128xf32>
    %34 = math.exp %33 : vector<8x128xf32>
    %cst_19 = arith.constant 1.000000e+00 : f32
    %35 = vector.broadcast %cst_19 : f32 to vector<8x128xf32>
    %36 = arith.addf %35, %34 : vector<8x128xf32>
    %37 = arith.divf %35, %36 : vector<8x128xf32>
    %38 = arith.mulf %29, %7 : vector<8x128xf32>
    %39 = arith.mulf %23, %31 : vector<8x128xf32>
    %40 = arith.addf %38, %39 : vector<8x128xf32>
    %41 = math.tanh %40 : vector<8x128xf32>
    %42 = arith.mulf %37, %41 : vector<8x128xf32>
    %43 = vector.extract_strided_slice %17 {offsets = [0, 0], sizes = [8, 128], strides = [1, 1]} : vector<8x512xf32> to vector<8x128xf32>
    %44 = arith.negf %43 : vector<8x128xf32>
    %45 = math.exp %44 : vector<8x128xf32>
    %cst_20 = arith.constant 1.000000e+00 : f32
    %46 = vector.broadcast %cst_20 : f32 to vector<8x128xf32>
    %47 = arith.addf %46, %45 : vector<8x128xf32>
    %48 = arith.divf %46, %47 : vector<8x128xf32>
    %49 = vector.extract_strided_slice %17 {offsets = [0, 128], sizes = [8, 128], strides = [1, 1]} : vector<8x512xf32> to vector<8x128xf32>
    %50 = arith.negf %49 : vector<8x128xf32>
    %51 = math.exp %50 : vector<8x128xf32>
    %cst_21 = arith.constant 1.000000e+00 : f32
    %52 = vector.broadcast %cst_21 : f32 to vector<8x128xf32>
    %53 = arith.addf %52, %51 : vector<8x128xf32>
    %54 = arith.divf %52, %53 : vector<8x128xf32>
    %55 = vector.extract_strided_slice %17 {offsets = [0, 256], sizes = [8, 128], strides = [1, 1]} : vector<8x512xf32> to vector<8x128xf32>
    %56 = math.tanh %55 : vector<8x128xf32>
    %57 = vector.extract_strided_slice %17 {offsets = [0, 384], sizes = [8, 128], strides = [1, 1]} : vector<8x512xf32> to vector<8x128xf32>
    %58 = arith.negf %57 : vector<8x128xf32>
    %59 = math.exp %58 : vector<8x128xf32>
    %cst_22 = arith.constant 1.000000e+00 : f32
    %60 = vector.broadcast %cst_22 : f32 to vector<8x128xf32>
    %61 = arith.addf %60, %59 : vector<8x128xf32>
    %62 = arith.divf %60, %61 : vector<8x128xf32>
    %63 = arith.mulf %54, %7 : vector<8x128xf32>
    %64 = arith.mulf %48, %56 : vector<8x128xf32>
    %65 = arith.addf %63, %64 : vector<8x128xf32>
    %66 = math.tanh %65 : vector<8x128xf32>
    %67 = arith.mulf %62, %66 : vector<8x128xf32>
    %c0_23 = arith.constant 0 : index
    %c0_24 = arith.constant 0 : index
    %68 = vector.load %arg5[%c0_23, %c0_24] : memref<64x128xf32, #tpu.memory_space<vmem>>, vector<8x128xf32>
    tpu.vector_store %arg5[%c0_23, %c0_24], %42 {strides = array<i32>} : memref<64x128xf32, #tpu.memory_space<vmem>>, vector<8x128xf32>,
    %c56_25 = arith.constant 56 : index
    %c0_26 = arith.constant 0 : index
    %69 = vector.load %arg6[%c56_25, %c0_26] : memref<64x128xf32, #tpu.memory_space<vmem>>, vector<8x128xf32>
    tpu.vector_store %arg6[%c56_25, %c0_26], %67 {strides = array<i32>} : memref<64x128xf32, #tpu.memory_space<vmem>>, vector<8x128xf32>,
    %c8 = arith.constant 8 : index
    %c0_27 = arith.constant 0 : index
    %70 = vector.load %arg9[%c8, %c0_27] : memref<64x1024xf32, #tpu.memory_space<vmem>>, vector<8x1024xf32>
    %c48 = arith.constant 48 : index
    %c0_28 = arith.constant 0 : index
    %71 = vector.load %arg9[%c48, %c0_28] : memref<64x1024xf32, #tpu.memory_space<vmem>>, vector<8x1024xf32>
    %72 = vector.extract_strided_slice %70 {offsets = [0, 0], sizes = [8, 512], strides = [1, 1]} : vector<8x1024xf32> to vector<8x512xf32>
    %c0_29 = arith.constant 0 : index
    %c0_30 = arith.constant 0 : index
    %73 = vector.load %arg2[%c0_29, %c0_30] : memref<128x512xf32, #tpu.memory_space<vmem>>, vector<128x512xf32>
    %cst_31 = arith.constant dense<0.000000e+00> : vector<8x512xf32>
    %74 = tpu.matmul %42, %73, %cst_31 {dimension_numbers = #tpu.dot_dimension_numbers<[1], [0], [0], [1], [0, 0, 1, 1], [], []>} : vector<8x128xf32>, vector<128x512xf32>, vector<8x512xf32> -> vector<8x512xf32>
    %75 = arith.addf %72, %74 : vector<8x512xf32>
    %76 = vector.extract_strided_slice %71 {offsets = [0, 512], sizes = [8, 512], strides = [1, 1]} : vector<8x1024xf32> to vector<8x512xf32>
    %c0_32 = arith.constant 0 : index
    %c0_33 = arith.constant 0 : index
    %77 = vector.load %arg3[%c0_32, %c0_33] : memref<128x512xf32, #tpu.memory_space<vmem>>, vector<128x512xf32>
    %cst_34 = arith.constant dense<0.000000e+00> : vector<8x512xf32>
    %78 = tpu.matmul %67, %77, %cst_34 {dimension_numbers = #tpu.dot_dimension_numbers<[1], [0], [0], [1], [0, 0, 1, 1], [], []>} : vector<8x128xf32>, vector<128x512xf32>, vector<8x512xf32> -> vector<8x512xf32>
    %79 = arith.addf %76, %78 : vector<8x512xf32>
    %80 = vector.extract_strided_slice %75 {offsets = [0, 0], sizes = [8, 128], strides = [1, 1]} : vector<8x512xf32> to vector<8x128xf32>
    %81 = arith.negf %80 : vector<8x128xf32>
    %82 = math.exp %81 : vector<8x128xf32>
    %cst_35 = arith.constant 1.000000e+00 : f32
    %83 = vector.broadcast %cst_35 : f32 to vector<8x128xf32>
    %84 = arith.addf %83, %82 : vector<8x128xf32>
    %85 = arith.divf %83, %84 : vector<8x128xf32>
    %86 = vector.extract_strided_slice %75 {offsets = [0, 128], sizes = [8, 128], strides = [1, 1]} : vector<8x512xf32> to vector<8x128xf32>
    %87 = arith.negf %86 : vector<8x128xf32>
    %88 = math.exp %87 : vector<8x128xf32>
    %cst_36 = arith.constant 1.000000e+00 : f32
    %89 = vector.broadcast %cst_36 : f32 to vector<8x128xf32>
    %90 = arith.addf %89, %88 : vector<8x128xf32>
    %91 = arith.divf %89, %90 : vector<8x128xf32>
    %92 = vector.extract_strided_slice %75 {offsets = [0, 256], sizes = [8, 128], strides = [1, 1]} : vector<8x512xf32> to vector<8x128xf32>
    %93 = math.tanh %92 : vector<8x128xf32>
    %94 = vector.extract_strided_slice %75 {offsets = [0, 384], sizes = [8, 128], strides = [1, 1]} : vector<8x512xf32> to vector<8x128xf32>
    %95 = arith.negf %94 : vector<8x128xf32>
    %96 = math.exp %95 : vector<8x128xf32>
    %cst_37 = arith.constant 1.000000e+00 : f32
    %97 = vector.broadcast %cst_37 : f32 to vector<8x128xf32>
    %98 = arith.addf %97, %96 : vector<8x128xf32>
    %99 = arith.divf %97, %98 : vector<8x128xf32>
    %100 = arith.mulf %91, %40 : vector<8x128xf32>
    %101 = arith.mulf %85, %93 : vector<8x128xf32>
    %102 = arith.addf %100, %101 : vector<8x128xf32>
    %103 = math.tanh %102 : vector<8x128xf32>
    %104 = arith.mulf %99, %103 : vector<8x128xf32>
    %105 = vector.extract_strided_slice %79 {offsets = [0, 0], sizes = [8, 128], strides = [1, 1]} : vector<8x512xf32> to vector<8x128xf32>
    %106 = arith.negf %105 : vector<8x128xf32>
    %107 = math.exp %106 : vector<8x128xf32>
    %cst_38 = arith.constant 1.000000e+00 : f32
    %108 = vector.broadcast %cst_38 : f32 to vector<8x128xf32>
    %109 = arith.addf %108, %107 : vector<8x128xf32>
    %110 = arith.divf %108, %109 : vector<8x128xf32>
    %111 = vector.extract_strided_slice %79 {offsets = [0, 128], sizes = [8, 128], strides = [1, 1]} : vector<8x512xf32> to vector<8x128xf32>
    %112 = arith.negf %111 : vector<8x128xf32>
    %113 = math.exp %112 : vector<8x128xf32>
    %cst_39 = arith.constant 1.000000e+00 : f32
    %114 = vector.broadcast %cst_39 : f32 to vector<8x128xf32>
    %115 = arith.addf %114, %113 : vector<8x128xf32>
    %116 = arith.divf %114, %115 : vector<8x128xf32>
    %117 = vector.extract_strided_slice %79 {offsets = [0, 256], sizes = [8, 128], strides = [1, 1]} : vector<8x512xf32> to vector<8x128xf32>
    %118 = math.tanh %117 : vector<8x128xf32>
    %119 = vector.extract_strided_slice %79 {offsets = [0, 384], sizes = [8, 128], strides = [1, 1]} : vector<8x512xf32> to vector<8x128xf32>
    %120 = arith.negf %119 : vector<8x128xf32>
    %121 = math.exp %120 : vector<8x128xf32>
    %cst_40 = arith.constant 1.000000e+00 : f32
    %122 = vector.broadcast %cst_40 : f32 to vector<8x128xf32>
    %123 = arith.addf %122, %121 : vector<8x128xf32>
    %124 = arith.divf %122, %123 : vector<8x128xf32>
    %125 = arith.mulf %116, %65 : vector<8x128xf32>
    %126 = arith.mulf %110, %118 : vector<8x128xf32>
    %127 = arith.addf %125, %126 : vector<8x128xf32>
    %128 = math.tanh %127 : vector<8x128xf32>
    %129 = arith.mulf %124, %128 : vector<8x128xf32>
    %c8_41 = arith.constant 8 : index
    %c0_42 = arith.constant 0 : index
    %130 = vector.load %arg5[%c8_41, %c0_42] : memref<64x128xf32, #tpu.memory_space<vmem>>, vector<8x128xf32>
    tpu.vector_store %arg5[%c8_41, %c0_42], %104 {strides = array<i32>} : memref<64x128xf32, #tpu.memory_space<vmem>>, vector<8x128xf32>,
    %c48_43 = arith.constant 48 : index
    %c0_44 = arith.constant 0 : index
    %131 = vector.load %arg6[%c48_43, %c0_44] : memref<64x128xf32, #tpu.memory_space<vmem>>, vector<8x128xf32>
    tpu.vector_store %arg6[%c48_43, %c0_44], %129 {strides = array<i32>} : memref<64x128xf32, #tpu.memory_space<vmem>>, vector<8x128xf32>,
    %c16 = arith.constant 16 : index
    %c0_45 = arith.constant 0 : index
    %132 = vector.load %arg9[%c16, %c0_45] : memref<64x1024xf32, #tpu.memory_space<vmem>>, vector<8x1024xf32>
    %c40 = arith.constant 40 : index
    %c0_46 = arith.constant 0 : index
    %133 = vector.load %arg9[%c40, %c0_46] : memref<64x1024xf32, #tpu.memory_space<vmem>>, vector<8x1024xf32>
    %134 = vector.extract_strided_slice %132 {offsets = [0, 0], sizes = [8, 512], strides = [1, 1]} : vector<8x1024xf32> to vector<8x512xf32>
    %c0_47 = arith.constant 0 : index
    %c0_48 = arith.constant 0 : index
    %135 = vector.load %arg2[%c0_47, %c0_48] : memref<128x512xf32, #tpu.memory_space<vmem>>, vector<128x512xf32>
    %cst_49 = arith.constant dense<0.000000e+00> : vector<8x512xf32>
    %136 = tpu.matmul %104, %135, %cst_49 {dimension_numbers = #tpu.dot_dimension_numbers<[1], [0], [0], [1], [0, 0, 1, 1], [], []>} : vector<8x128xf32>, vector<128x512xf32>, vector<8x512xf32> -> vector<8x512xf32>
    %137 = arith.addf %134, %136 : vector<8x512xf32>
    %138 = vector.extract_strided_slice %133 {offsets = [0, 512], sizes = [8, 512], strides = [1, 1]} : vector<8x1024xf32> to vector<8x512xf32>
    %c0_50 = arith.constant 0 : index
    %c0_51 = arith.constant 0 : index
    %139 = vector.load %arg3[%c0_50, %c0_51] : memref<128x512xf32, #tpu.memory_space<vmem>>, vector<128x512xf32>
    %cst_52 = arith.constant dense<0.000000e+00> : vector<8x512xf32>
    %140 = tpu.matmul %129, %139, %cst_52 {dimension_numbers = #tpu.dot_dimension_numbers<[1], [0], [0], [1], [0, 0, 1, 1], [], []>} : vector<8x128xf32>, vector<128x512xf32>, vector<8x512xf32> -> vector<8x512xf32>
    %141 = arith.addf %138, %140 : vector<8x512xf32>
    %142 = vector.extract_strided_slice %137 {offsets = [0, 0], sizes = [8, 128], strides = [1, 1]} : vector<8x512xf32> to vector<8x128xf32>
    %143 = arith.negf %142 : vector<8x128xf32>
    %144 = math.exp %143 : vector<8x128xf32>
    %cst_53 = arith.constant 1.000000e+00 : f32
    %145 = vector.broadcast %cst_53 : f32 to vector<8x128xf32>
    %146 = arith.addf %145, %144 : vector<8x128xf32>
    %147 = arith.divf %145, %146 : vector<8x128xf32>
    %148 = vector.extract_strided_slice %137 {offsets = [0, 128], sizes = [8, 128], strides = [1, 1]} : vector<8x512xf32> to vector<8x128xf32>
    %149 = arith.negf %148 : vector<8x128xf32>
    %150 = math.exp %149 : vector<8x128xf32>
    %cst_54 = arith.constant 1.000000e+00 : f32
    %151 = vector.broadcast %cst_54 : f32 to vector<8x128xf32>
    %152 = arith.addf %151, %150 : vector<8x128xf32>
    %153 = arith.divf %151, %152 : vector<8x128xf32>
    %154 = vector.extract_strided_slice %137 {offsets = [0, 256], sizes = [8, 128], strides = [1, 1]} : vector<8x512xf32> to vector<8x128xf32>
    %155 = math.tanh %154 : vector<8x128xf32>
    %156 = vector.extract_strided_slice %137 {offsets = [0, 384], sizes = [8, 128], strides = [1, 1]} : vector<8x512xf32> to vector<8x128xf32>
    %157 = arith.negf %156 : vector<8x128xf32>
    %158 = math.exp %157 : vector<8x128xf32>
    %cst_55 = arith.constant 1.000000e+00 : f32
    %159 = vector.broadcast %cst_55 : f32 to vector<8x128xf32>
    %160 = arith.addf %159, %158 : vector<8x128xf32>
    %161 = arith.divf %159, %160 : vector<8x128xf32>
    %162 = arith.mulf %153, %102 : vector<8x128xf32>
    %163 = arith.mulf %147, %155 : vector<8x128xf32>
    %164 = arith.addf %162, %163 : vector<8x128xf32>
    %165 = math.tanh %164 : vector<8x128xf32>
    %166 = arith.mulf %161, %165 : vector<8x128xf32>
    %167 = vector.extract_strided_slice %141 {offsets = [0, 0], sizes = [8, 128], strides = [1, 1]} : vector<8x512xf32> to vector<8x128xf32>
    %168 = arith.negf %167 : vector<8x128xf32>
    %169 = math.exp %168 : vector<8x128xf32>
    %cst_56 = arith.constant 1.000000e+00 : f32
    %170 = vector.broadcast %cst_56 : f32 to vector<8x128xf32>
    %171 = arith.addf %170, %169 : vector<8x128xf32>
    %172 = arith.divf %170, %171 : vector<8x128xf32>
    %173 = vector.extract_strided_slice %141 {offsets = [0, 128], sizes = [8, 128], strides = [1, 1]} : vector<8x512xf32> to vector<8x128xf32>
    %174 = arith.negf %173 : vector<8x128xf32>
    %175 = math.exp %174 : vector<8x128xf32>
    %cst_57 = arith.constant 1.000000e+00 : f32
    %176 = vector.broadcast %cst_57 : f32 to vector<8x128xf32>
    %177 = arith.addf %176, %175 : vector<8x128xf32>
    %178 = arith.divf %176, %177 : vector<8x128xf32>
    %179 = vector.extract_strided_slice %141 {offsets = [0, 256], sizes = [8, 128], strides = [1, 1]} : vector<8x512xf32> to vector<8x128xf32>
    %180 = math.tanh %179 : vector<8x128xf32>
    %181 = vector.extract_strided_slice %141 {offsets = [0, 384], sizes = [8, 128], strides = [1, 1]} : vector<8x512xf32> to vector<8x128xf32>
    %182 = arith.negf %181 : vector<8x128xf32>
    %183 = math.exp %182 : vector<8x128xf32>
    %cst_58 = arith.constant 1.000000e+00 : f32
    %184 = vector.broadcast %cst_58 : f32 to vector<8x128xf32>
    %185 = arith.addf %184, %183 : vector<8x128xf32>
    %186 = arith.divf %184, %185 : vector<8x128xf32>
    %187 = arith.mulf %178, %127 : vector<8x128xf32>
    %188 = arith.mulf %172, %180 : vector<8x128xf32>
    %189 = arith.addf %187, %188 : vector<8x128xf32>
    %190 = math.tanh %189 : vector<8x128xf32>
    %191 = arith.mulf %186, %190 : vector<8x128xf32>
    %c16_59 = arith.constant 16 : index
    %c0_60 = arith.constant 0 : index
    %192 = vector.load %arg5[%c16_59, %c0_60] : memref<64x128xf32, #tpu.memory_space<vmem>>, vector<8x128xf32>
    tpu.vector_store %arg5[%c16_59, %c0_60], %166 {strides = array<i32>} : memref<64x128xf32, #tpu.memory_space<vmem>>, vector<8x128xf32>,
    %c40_61 = arith.constant 40 : index
    %c0_62 = arith.constant 0 : index
    %193 = vector.load %arg6[%c40_61, %c0_62] : memref<64x128xf32, #tpu.memory_space<vmem>>, vector<8x128xf32>
    tpu.vector_store %arg6[%c40_61, %c0_62], %191 {strides = array<i32>} : memref<64x128xf32, #tpu.memory_space<vmem>>, vector<8x128xf32>,
    %c24 = arith.constant 24 : index
    %c0_63 = arith.constant 0 : index
    %194 = vector.load %arg9[%c24, %c0_63] : memref<64x1024xf32, #tpu.memory_space<vmem>>, vector<8x1024xf32>
    %c32 = arith.constant 32 : index
    %c0_64 = arith.constant 0 : index
    %195 = vector.load %arg9[%c32, %c0_64] : memref<64x1024xf32, #tpu.memory_space<vmem>>, vector<8x1024xf32>
    %196 = vector.extract_strided_slice %194 {offsets = [0, 0], sizes = [8, 512], strides = [1, 1]} : vector<8x1024xf32> to vector<8x512xf32>
    %c0_65 = arith.constant 0 : index
    %c0_66 = arith.constant 0 : index
    %197 = vector.load %arg2[%c0_65, %c0_66] : memref<128x512xf32, #tpu.memory_space<vmem>>, vector<128x512xf32>
    %cst_67 = arith.constant dense<0.000000e+00> : vector<8x512xf32>
    %198 = tpu.matmul %166, %197, %cst_67 {dimension_numbers = #tpu.dot_dimension_numbers<[1], [0], [0], [1], [0, 0, 1, 1], [], []>} : vector<8x128xf32>, vector<128x512xf32>, vector<8x512xf32> -> vector<8x512xf32>
    %199 = arith.addf %196, %198 : vector<8x512xf32>
    %200 = vector.extract_strided_slice %195 {offsets = [0, 512], sizes = [8, 512], strides = [1, 1]} : vector<8x1024xf32> to vector<8x512xf32>
    %c0_68 = arith.constant 0 : index
    %c0_69 = arith.constant 0 : index
    %201 = vector.load %arg3[%c0_68, %c0_69] : memref<128x512xf32, #tpu.memory_space<vmem>>, vector<128x512xf32>
    %cst_70 = arith.constant dense<0.000000e+00> : vector<8x512xf32>
    %202 = tpu.matmul %191, %201, %cst_70 {dimension_numbers = #tpu.dot_dimension_numbers<[1], [0], [0], [1], [0, 0, 1, 1], [], []>} : vector<8x128xf32>, vector<128x512xf32>, vector<8x512xf32> -> vector<8x512xf32>
    %203 = arith.addf %200, %202 : vector<8x512xf32>
    %204 = vector.extract_strided_slice %199 {offsets = [0, 0], sizes = [8, 128], strides = [1, 1]} : vector<8x512xf32> to vector<8x128xf32>
    %205 = arith.negf %204 : vector<8x128xf32>
    %206 = math.exp %205 : vector<8x128xf32>
    %cst_71 = arith.constant 1.000000e+00 : f32
    %207 = vector.broadcast %cst_71 : f32 to vector<8x128xf32>
    %208 = arith.addf %207, %206 : vector<8x128xf32>
    %209 = arith.divf %207, %208 : vector<8x128xf32>
    %210 = vector.extract_strided_slice %199 {offsets = [0, 128], sizes = [8, 128], strides = [1, 1]} : vector<8x512xf32> to vector<8x128xf32>
    %211 = arith.negf %210 : vector<8x128xf32>
    %212 = math.exp %211 : vector<8x128xf32>
    %cst_72 = arith.constant 1.000000e+00 : f32
    %213 = vector.broadcast %cst_72 : f32 to vector<8x128xf32>
    %214 = arith.addf %213, %212 : vector<8x128xf32>
    %215 = arith.divf %213, %214 : vector<8x128xf32>
    %216 = vector.extract_strided_slice %199 {offsets = [0, 256], sizes = [8, 128], strides = [1, 1]} : vector<8x512xf32> to vector<8x128xf32>
    %217 = math.tanh %216 : vector<8x128xf32>
    %218 = vector.extract_strided_slice %199 {offsets = [0, 384], sizes = [8, 128], strides = [1, 1]} : vector<8x512xf32> to vector<8x128xf32>
    %219 = arith.negf %218 : vector<8x128xf32>
    %220 = math.exp %219 : vector<8x128xf32>
    %cst_73 = arith.constant 1.000000e+00 : f32
    %221 = vector.broadcast %cst_73 : f32 to vector<8x128xf32>
    %222 = arith.addf %221, %220 : vector<8x128xf32>
    %223 = arith.divf %221, %222 : vector<8x128xf32>
    %224 = arith.mulf %215, %164 : vector<8x128xf32>
    %225 = arith.mulf %209, %217 : vector<8x128xf32>
    %226 = arith.addf %224, %225 : vector<8x128xf32>
    %227 = math.tanh %226 : vector<8x128xf32>
    %228 = arith.mulf %223, %227 : vector<8x128xf32>
    %229 = vector.extract_strided_slice %203 {offsets = [0, 0], sizes = [8, 128], strides = [1, 1]} : vector<8x512xf32> to vector<8x128xf32>
    %230 = arith.negf %229 : vector<8x128xf32>
    %231 = math.exp %230 : vector<8x128xf32>
    %cst_74 = arith.constant 1.000000e+00 : f32
    %232 = vector.broadcast %cst_74 : f32 to vector<8x128xf32>
    %233 = arith.addf %232, %231 : vector<8x128xf32>
    %234 = arith.divf %232, %233 : vector<8x128xf32>
    %235 = vector.extract_strided_slice %203 {offsets = [0, 128], sizes = [8, 128], strides = [1, 1]} : vector<8x512xf32> to vector<8x128xf32>
    %236 = arith.negf %235 : vector<8x128xf32>
    %237 = math.exp %236 : vector<8x128xf32>
    %cst_75 = arith.constant 1.000000e+00 : f32
    %238 = vector.broadcast %cst_75 : f32 to vector<8x128xf32>
    %239 = arith.addf %238, %237 : vector<8x128xf32>
    %240 = arith.divf %238, %239 : vector<8x128xf32>
    %241 = vector.extract_strided_slice %203 {offsets = [0, 256], sizes = [8, 128], strides = [1, 1]} : vector<8x512xf32> to vector<8x128xf32>
    %242 = math.tanh %241 : vector<8x128xf32>
    %243 = vector.extract_strided_slice %203 {offsets = [0, 384], sizes = [8, 128], strides = [1, 1]} : vector<8x512xf32> to vector<8x128xf32>
    %244 = arith.negf %243 : vector<8x128xf32>
    %245 = math.exp %244 : vector<8x128xf32>
    %cst_76 = arith.constant 1.000000e+00 : f32
    %246 = vector.broadcast %cst_76 : f32 to vector<8x128xf32>
    %247 = arith.addf %246, %245 : vector<8x128xf32>
    %248 = arith.divf %246, %247 : vector<8x128xf32>
    %249 = arith.mulf %240, %189 : vector<8x128xf32>
    %250 = arith.mulf %234, %242 : vector<8x128xf32>
    %251 = arith.addf %249, %250 : vector<8x128xf32>
    %252 = math.tanh %251 : vector<8x128xf32>
    %253 = arith.mulf %248, %252 : vector<8x128xf32>
    %c24_77 = arith.constant 24 : index
    %c0_78 = arith.constant 0 : index
    %254 = vector.load %arg5[%c24_77, %c0_78] : memref<64x128xf32, #tpu.memory_space<vmem>>, vector<8x128xf32>
    tpu.vector_store %arg5[%c24_77, %c0_78], %228 {strides = array<i32>} : memref<64x128xf32, #tpu.memory_space<vmem>>, vector<8x128xf32>,
    %c32_79 = arith.constant 32 : index
    %c0_80 = arith.constant 0 : index
    %255 = vector.load %arg6[%c32_79, %c0_80] : memref<64x128xf32, #tpu.memory_space<vmem>>, vector<8x128xf32>
    tpu.vector_store %arg6[%c32_79, %c0_80], %253 {strides = array<i32>} : memref<64x128xf32, #tpu.memory_space<vmem>>, vector<8x128xf32>,
    %c32_81 = arith.constant 32 : index
    %c0_82 = arith.constant 0 : index
    %256 = vector.load %arg9[%c32_81, %c0_82] : memref<64x1024xf32, #tpu.memory_space<vmem>>, vector<8x1024xf32>
    %c24_83 = arith.constant 24 : index
    %c0_84 = arith.constant 0 : index
    %257 = vector.load %arg9[%c24_83, %c0_84] : memref<64x1024xf32, #tpu.memory_space<vmem>>, vector<8x1024xf32>
    %258 = vector.extract_strided_slice %256 {offsets = [0, 0], sizes = [8, 512], strides = [1, 1]} : vector<8x1024xf32> to vector<8x512xf32>
    %c0_85 = arith.constant 0 : index
    %c0_86 = arith.constant 0 : index
    %259 = vector.load %arg2[%c0_85, %c0_86] : memref<128x512xf32, #tpu.memory_space<vmem>>, vector<128x512xf32>
    %cst_87 = arith.constant dense<0.000000e+00> : vector<8x512xf32>
    %260 = tpu.matmul %228, %259, %cst_87 {dimension_numbers = #tpu.dot_dimension_numbers<[1], [0], [0], [1], [0, 0, 1, 1], [], []>} : vector<8x128xf32>, vector<128x512xf32>, vector<8x512xf32> -> vector<8x512xf32>
    %261 = arith.addf %258, %260 : vector<8x512xf32>
    %262 = vector.extract_strided_slice %257 {offsets = [0, 512], sizes = [8, 512], strides = [1, 1]} : vector<8x1024xf32> to vector<8x512xf32>
    %c0_88 = arith.constant 0 : index
    %c0_89 = arith.constant 0 : index
    %263 = vector.load %arg3[%c0_88, %c0_89] : memref<128x512xf32, #tpu.memory_space<vmem>>, vector<128x512xf32>
    %cst_90 = arith.constant dense<0.000000e+00> : vector<8x512xf32>
    %264 = tpu.matmul %253, %263, %cst_90 {dimension_numbers = #tpu.dot_dimension_numbers<[1], [0], [0], [1], [0, 0, 1, 1], [], []>} : vector<8x128xf32>, vector<128x512xf32>, vector<8x512xf32> -> vector<8x512xf32>
    %265 = arith.addf %262, %264 : vector<8x512xf32>
    %266 = vector.extract_strided_slice %261 {offsets = [0, 0], sizes = [8, 128], strides = [1, 1]} : vector<8x512xf32> to vector<8x128xf32>
    %267 = arith.negf %266 : vector<8x128xf32>
    %268 = math.exp %267 : vector<8x128xf32>
    %cst_91 = arith.constant 1.000000e+00 : f32
    %269 = vector.broadcast %cst_91 : f32 to vector<8x128xf32>
    %270 = arith.addf %269, %268 : vector<8x128xf32>
    %271 = arith.divf %269, %270 : vector<8x128xf32>
    %272 = vector.extract_strided_slice %261 {offsets = [0, 128], sizes = [8, 128], strides = [1, 1]} : vector<8x512xf32> to vector<8x128xf32>
    %273 = arith.negf %272 : vector<8x128xf32>
    %274 = math.exp %273 : vector<8x128xf32>
    %cst_92 = arith.constant 1.000000e+00 : f32
    %275 = vector.broadcast %cst_92 : f32 to vector<8x128xf32>
    %276 = arith.addf %275, %274 : vector<8x128xf32>
    %277 = arith.divf %275, %276 : vector<8x128xf32>
    %278 = vector.extract_strided_slice %261 {offsets = [0, 256], sizes = [8, 128], strides = [1, 1]} : vector<8x512xf32> to vector<8x128xf32>
    %279 = math.tanh %278 : vector<8x128xf32>
    %280 = vector.extract_strided_slice %261 {offsets = [0, 384], sizes = [8, 128], strides = [1, 1]} : vector<8x512xf32> to vector<8x128xf32>
    %281 = arith.negf %280 : vector<8x128xf32>
    %282 = math.exp %281 : vector<8x128xf32>
    %cst_93 = arith.constant 1.000000e+00 : f32
    %283 = vector.broadcast %cst_93 : f32 to vector<8x128xf32>
    %284 = arith.addf %283, %282 : vector<8x128xf32>
    %285 = arith.divf %283, %284 : vector<8x128xf32>
    %286 = arith.mulf %277, %226 : vector<8x128xf32>
    %287 = arith.mulf %271, %279 : vector<8x128xf32>
    %288 = arith.addf %286, %287 : vector<8x128xf32>
    %289 = math.tanh %288 : vector<8x128xf32>
    %290 = arith.mulf %285, %289 : vector<8x128xf32>
    %291 = vector.extract_strided_slice %265 {offsets = [0, 0], sizes = [8, 128], strides = [1, 1]} : vector<8x512xf32> to vector<8x128xf32>
    %292 = arith.negf %291 : vector<8x128xf32>
    %293 = math.exp %292 : vector<8x128xf32>
    %cst_94 = arith.constant 1.000000e+00 : f32
    %294 = vector.broadcast %cst_94 : f32 to vector<8x128xf32>
    %295 = arith.addf %294, %293 : vector<8x128xf32>
    %296 = arith.divf %294, %295 : vector<8x128xf32>
    %297 = vector.extract_strided_slice %265 {offsets = [0, 128], sizes = [8, 128], strides = [1, 1]} : vector<8x512xf32> to vector<8x128xf32>
    %298 = arith.negf %297 : vector<8x128xf32>
    %299 = math.exp %298 : vector<8x128xf32>
    %cst_95 = arith.constant 1.000000e+00 : f32
    %300 = vector.broadcast %cst_95 : f32 to vector<8x128xf32>
    %301 = arith.addf %300, %299 : vector<8x128xf32>
    %302 = arith.divf %300, %301 : vector<8x128xf32>
    %303 = vector.extract_strided_slice %265 {offsets = [0, 256], sizes = [8, 128], strides = [1, 1]} : vector<8x512xf32> to vector<8x128xf32>
    %304 = math.tanh %303 : vector<8x128xf32>
    %305 = vector.extract_strided_slice %265 {offsets = [0, 384], sizes = [8, 128], strides = [1, 1]} : vector<8x512xf32> to vector<8x128xf32>
    %306 = arith.negf %305 : vector<8x128xf32>
    %307 = math.exp %306 : vector<8x128xf32>
    %cst_96 = arith.constant 1.000000e+00 : f32
    %308 = vector.broadcast %cst_96 : f32 to vector<8x128xf32>
    %309 = arith.addf %308, %307 : vector<8x128xf32>
    %310 = arith.divf %308, %309 : vector<8x128xf32>
    %311 = arith.mulf %302, %251 : vector<8x128xf32>
    %312 = arith.mulf %296, %304 : vector<8x128xf32>
    %313 = arith.addf %311, %312 : vector<8x128xf32>
    %314 = math.tanh %313 : vector<8x128xf32>
    %315 = arith.mulf %310, %314 : vector<8x128xf32>
    %c32_97 = arith.constant 32 : index
    %c0_98 = arith.constant 0 : index
    %316 = vector.load %arg5[%c32_97, %c0_98] : memref<64x128xf32, #tpu.memory_space<vmem>>, vector<8x128xf32>
    tpu.vector_store %arg5[%c32_97, %c0_98], %290 {strides = array<i32>} : memref<64x128xf32, #tpu.memory_space<vmem>>, vector<8x128xf32>,
    %c24_99 = arith.constant 24 : index
    %c0_100 = arith.constant 0 : index
    %317 = vector.load %arg6[%c24_99, %c0_100] : memref<64x128xf32, #tpu.memory_space<vmem>>, vector<8x128xf32>
    tpu.vector_store %arg6[%c24_99, %c0_100], %315 {strides = array<i32>} : memref<64x128xf32, #tpu.memory_space<vmem>>, vector<8x128xf32>,
    %c40_101 = arith.constant 40 : index
    %c0_102 = arith.constant 0 : index
    %318 = vector.load %arg9[%c40_101, %c0_102] : memref<64x1024xf32, #tpu.memory_space<vmem>>, vector<8x1024xf32>
    %c16_103 = arith.constant 16 : index
    %c0_104 = arith.constant 0 : index
    %319 = vector.load %arg9[%c16_103, %c0_104] : memref<64x1024xf32, #tpu.memory_space<vmem>>, vector<8x1024xf32>
    %320 = vector.extract_strided_slice %318 {offsets = [0, 0], sizes = [8, 512], strides = [1, 1]} : vector<8x1024xf32> to vector<8x512xf32>
    %c0_105 = arith.constant 0 : index
    %c0_106 = arith.constant 0 : index
    %321 = vector.load %arg2[%c0_105, %c0_106] : memref<128x512xf32, #tpu.memory_space<vmem>>, vector<128x512xf32>
    %cst_107 = arith.constant dense<0.000000e+00> : vector<8x512xf32>
    %322 = tpu.matmul %290, %321, %cst_107 {dimension_numbers = #tpu.dot_dimension_numbers<[1], [0], [0], [1], [0, 0, 1, 1], [], []>} : vector<8x128xf32>, vector<128x512xf32>, vector<8x512xf32> -> vector<8x512xf32>
    %323 = arith.addf %320, %322 : vector<8x512xf32>
    %324 = vector.extract_strided_slice %319 {offsets = [0, 512], sizes = [8, 512], strides = [1, 1]} : vector<8x1024xf32> to vector<8x512xf32>
    %c0_108 = arith.constant 0 : index
    %c0_109 = arith.constant 0 : index
    %325 = vector.load %arg3[%c0_108, %c0_109] : memref<128x512xf32, #tpu.memory_space<vmem>>, vector<128x512xf32>
    %cst_110 = arith.constant dense<0.000000e+00> : vector<8x512xf32>
    %326 = tpu.matmul %315, %325, %cst_110 {dimension_numbers = #tpu.dot_dimension_numbers<[1], [0], [0], [1], [0, 0, 1, 1], [], []>} : vector<8x128xf32>, vector<128x512xf32>, vector<8x512xf32> -> vector<8x512xf32>
    %327 = arith.addf %324, %326 : vector<8x512xf32>
    %328 = vector.extract_strided_slice %323 {offsets = [0, 0], sizes = [8, 128], strides = [1, 1]} : vector<8x512xf32> to vector<8x128xf32>
    %329 = arith.negf %328 : vector<8x128xf32>
    %330 = math.exp %329 : vector<8x128xf32>
    %cst_111 = arith.constant 1.000000e+00 : f32
    %331 = vector.broadcast %cst_111 : f32 to vector<8x128xf32>
    %332 = arith.addf %331, %330 : vector<8x128xf32>
    %333 = arith.divf %331, %332 : vector<8x128xf32>
    %334 = vector.extract_strided_slice %323 {offsets = [0, 128], sizes = [8, 128], strides = [1, 1]} : vector<8x512xf32> to vector<8x128xf32>
    %335 = arith.negf %334 : vector<8x128xf32>
    %336 = math.exp %335 : vector<8x128xf32>
    %cst_112 = arith.constant 1.000000e+00 : f32
    %337 = vector.broadcast %cst_112 : f32 to vector<8x128xf32>
    %338 = arith.addf %337, %336 : vector<8x128xf32>
    %339 = arith.divf %337, %338 : vector<8x128xf32>
    %340 = vector.extract_strided_slice %323 {offsets = [0, 256], sizes = [8, 128], strides = [1, 1]} : vector<8x512xf32> to vector<8x128xf32>
    %341 = math.tanh %340 : vector<8x128xf32>
    %342 = vector.extract_strided_slice %323 {offsets = [0, 384], sizes = [8, 128], strides = [1, 1]} : vector<8x512xf32> to vector<8x128xf32>
    %343 = arith.negf %342 : vector<8x128xf32>
    %344 = math.exp %343 : vector<8x128xf32>
    %cst_113 = arith.constant 1.000000e+00 : f32
    %345 = vector.broadcast %cst_113 : f32 to vector<8x128xf32>
    %346 = arith.addf %345, %344 : vector<8x128xf32>
    %347 = arith.divf %345, %346 : vector<8x128xf32>
    %348 = arith.mulf %339, %288 : vector<8x128xf32>
    %349 = arith.mulf %333, %341 : vector<8x128xf32>
    %350 = arith.addf %348, %349 : vector<8x128xf32>
    %351 = math.tanh %350 : vector<8x128xf32>
    %352 = arith.mulf %347, %351 : vector<8x128xf32>
    %353 = vector.extract_strided_slice %327 {offsets = [0, 0], sizes = [8, 128], strides = [1, 1]} : vector<8x512xf32> to vector<8x128xf32>
    %354 = arith.negf %353 : vector<8x128xf32>
    %355 = math.exp %354 : vector<8x128xf32>
    %cst_114 = arith.constant 1.000000e+00 : f32
    %356 = vector.broadcast %cst_114 : f32 to vector<8x128xf32>
    %357 = arith.addf %356, %355 : vector<8x128xf32>
    %358 = arith.divf %356, %357 : vector<8x128xf32>
    %359 = vector.extract_strided_slice %327 {offsets = [0, 128], sizes = [8, 128], strides = [1, 1]} : vector<8x512xf32> to vector<8x128xf32>
    %360 = arith.negf %359 : vector<8x128xf32>
    %361 = math.exp %360 : vector<8x128xf32>
    %cst_115 = arith.constant 1.000000e+00 : f32
    %362 = vector.broadcast %cst_115 : f32 to vector<8x128xf32>
    %363 = arith.addf %362, %361 : vector<8x128xf32>
    %364 = arith.divf %362, %363 : vector<8x128xf32>
    %365 = vector.extract_strided_slice %327 {offsets = [0, 256], sizes = [8, 128], strides = [1, 1]} : vector<8x512xf32> to vector<8x128xf32>
    %366 = math.tanh %365 : vector<8x128xf32>
    %367 = vector.extract_strided_slice %327 {offsets = [0, 384], sizes = [8, 128], strides = [1, 1]} : vector<8x512xf32> to vector<8x128xf32>
    %368 = arith.negf %367 : vector<8x128xf32>
    %369 = math.exp %368 : vector<8x128xf32>
    %cst_116 = arith.constant 1.000000e+00 : f32
    %370 = vector.broadcast %cst_116 : f32 to vector<8x128xf32>
    %371 = arith.addf %370, %369 : vector<8x128xf32>
    %372 = arith.divf %370, %371 : vector<8x128xf32>
    %373 = arith.mulf %364, %313 : vector<8x128xf32>
    %374 = arith.mulf %358, %366 : vector<8x128xf32>
    %375 = arith.addf %373, %374 : vector<8x128xf32>
    %376 = math.tanh %375 : vector<8x128xf32>
    %377 = arith.mulf %372, %376 : vector<8x128xf32>
    %c40_117 = arith.constant 40 : index
    %c0_118 = arith.constant 0 : index
    %378 = vector.load %arg5[%c40_117, %c0_118] : memref<64x128xf32, #tpu.memory_space<vmem>>, vector<8x128xf32>
    tpu.vector_store %arg5[%c40_117, %c0_118], %352 {strides = array<i32>} : memref<64x128xf32, #tpu.memory_space<vmem>>, vector<8x128xf32>,
    %c16_119 = arith.constant 16 : index
    %c0_120 = arith.constant 0 : index
    %379 = vector.load %arg6[%c16_119, %c0_120] : memref<64x128xf32, #tpu.memory_space<vmem>>, vector<8x128xf32>
    tpu.vector_store %arg6[%c16_119, %c0_120], %377 {strides = array<i32>} : memref<64x128xf32, #tpu.memory_space<vmem>>, vector<8x128xf32>,
    %c48_121 = arith.constant 48 : index
    %c0_122 = arith.constant 0 : index
    %380 = vector.load %arg9[%c48_121, %c0_122] : memref<64x1024xf32, #tpu.memory_space<vmem>>, vector<8x1024xf32>
    %c8_123 = arith.constant 8 : index
    %c0_124 = arith.constant 0 : index
    %381 = vector.load %arg9[%c8_123, %c0_124] : memref<64x1024xf32, #tpu.memory_space<vmem>>, vector<8x1024xf32>
    %382 = vector.extract_strided_slice %380 {offsets = [0, 0], sizes = [8, 512], strides = [1, 1]} : vector<8x1024xf32> to vector<8x512xf32>
    %c0_125 = arith.constant 0 : index
    %c0_126 = arith.constant 0 : index
    %383 = vector.load %arg2[%c0_125, %c0_126] : memref<128x512xf32, #tpu.memory_space<vmem>>, vector<128x512xf32>
    %cst_127 = arith.constant dense<0.000000e+00> : vector<8x512xf32>
    %384 = tpu.matmul %352, %383, %cst_127 {dimension_numbers = #tpu.dot_dimension_numbers<[1], [0], [0], [1], [0, 0, 1, 1], [], []>} : vector<8x128xf32>, vector<128x512xf32>, vector<8x512xf32> -> vector<8x512xf32>
    %385 = arith.addf %382, %384 : vector<8x512xf32>
    %386 = vector.extract_strided_slice %381 {offsets = [0, 512], sizes = [8, 512], strides = [1, 1]} : vector<8x1024xf32> to vector<8x512xf32>
    %c0_128 = arith.constant 0 : index
    %c0_129 = arith.constant 0 : index
    %387 = vector.load %arg3[%c0_128, %c0_129] : memref<128x512xf32, #tpu.memory_space<vmem>>, vector<128x512xf32>
    %cst_130 = arith.constant dense<0.000000e+00> : vector<8x512xf32>
    %388 = tpu.matmul %377, %387, %cst_130 {dimension_numbers = #tpu.dot_dimension_numbers<[1], [0], [0], [1], [0, 0, 1, 1], [], []>} : vector<8x128xf32>, vector<128x512xf32>, vector<8x512xf32> -> vector<8x512xf32>
    %389 = arith.addf %386, %388 : vector<8x512xf32>
    %390 = vector.extract_strided_slice %385 {offsets = [0, 0], sizes = [8, 128], strides = [1, 1]} : vector<8x512xf32> to vector<8x128xf32>
    %391 = arith.negf %390 : vector<8x128xf32>
    %392 = math.exp %391 : vector<8x128xf32>
    %cst_131 = arith.constant 1.000000e+00 : f32
    %393 = vector.broadcast %cst_131 : f32 to vector<8x128xf32>
    %394 = arith.addf %393, %392 : vector<8x128xf32>
    %395 = arith.divf %393, %394 : vector<8x128xf32>
    %396 = vector.extract_strided_slice %385 {offsets = [0, 128], sizes = [8, 128], strides = [1, 1]} : vector<8x512xf32> to vector<8x128xf32>
    %397 = arith.negf %396 : vector<8x128xf32>
    %398 = math.exp %397 : vector<8x128xf32>
    %cst_132 = arith.constant 1.000000e+00 : f32
    %399 = vector.broadcast %cst_132 : f32 to vector<8x128xf32>
    %400 = arith.addf %399, %398 : vector<8x128xf32>
    %401 = arith.divf %399, %400 : vector<8x128xf32>
    %402 = vector.extract_strided_slice %385 {offsets = [0, 256], sizes = [8, 128], strides = [1, 1]} : vector<8x512xf32> to vector<8x128xf32>
    %403 = math.tanh %402 : vector<8x128xf32>
    %404 = vector.extract_strided_slice %385 {offsets = [0, 384], sizes = [8, 128], strides = [1, 1]} : vector<8x512xf32> to vector<8x128xf32>
    %405 = arith.negf %404 : vector<8x128xf32>
    %406 = math.exp %405 : vector<8x128xf32>
    %cst_133 = arith.constant 1.000000e+00 : f32
    %407 = vector.broadcast %cst_133 : f32 to vector<8x128xf32>
    %408 = arith.addf %407, %406 : vector<8x128xf32>
    %409 = arith.divf %407, %408 : vector<8x128xf32>
    %410 = arith.mulf %401, %350 : vector<8x128xf32>
    %411 = arith.mulf %395, %403 : vector<8x128xf32>
    %412 = arith.addf %410, %411 : vector<8x128xf32>
    %413 = math.tanh %412 : vector<8x128xf32>
    %414 = arith.mulf %409, %413 : vector<8x128xf32>
    %415 = vector.extract_strided_slice %389 {offsets = [0, 0], sizes = [8, 128], strides = [1, 1]} : vector<8x512xf32> to vector<8x128xf32>
    %416 = arith.negf %415 : vector<8x128xf32>
    %417 = math.exp %416 : vector<8x128xf32>
    %cst_134 = arith.constant 1.000000e+00 : f32
    %418 = vector.broadcast %cst_134 : f32 to vector<8x128xf32>
    %419 = arith.addf %418, %417 : vector<8x128xf32>
    %420 = arith.divf %418, %419 : vector<8x128xf32>
    %421 = vector.extract_strided_slice %389 {offsets = [0, 128], sizes = [8, 128], strides = [1, 1]} : vector<8x512xf32> to vector<8x128xf32>
    %422 = arith.negf %421 : vector<8x128xf32>
    %423 = math.exp %422 : vector<8x128xf32>
    %cst_135 = arith.constant 1.000000e+00 : f32
    %424 = vector.broadcast %cst_135 : f32 to vector<8x128xf32>
    %425 = arith.addf %424, %423 : vector<8x128xf32>
    %426 = arith.divf %424, %425 : vector<8x128xf32>
    %427 = vector.extract_strided_slice %389 {offsets = [0, 256], sizes = [8, 128], strides = [1, 1]} : vector<8x512xf32> to vector<8x128xf32>
    %428 = math.tanh %427 : vector<8x128xf32>
    %429 = vector.extract_strided_slice %389 {offsets = [0, 384], sizes = [8, 128], strides = [1, 1]} : vector<8x512xf32> to vector<8x128xf32>
    %430 = arith.negf %429 : vector<8x128xf32>
    %431 = math.exp %430 : vector<8x128xf32>
    %cst_136 = arith.constant 1.000000e+00 : f32
    %432 = vector.broadcast %cst_136 : f32 to vector<8x128xf32>
    %433 = arith.addf %432, %431 : vector<8x128xf32>
    %434 = arith.divf %432, %433 : vector<8x128xf32>
    %435 = arith.mulf %426, %375 : vector<8x128xf32>
    %436 = arith.mulf %420, %428 : vector<8x128xf32>
    %437 = arith.addf %435, %436 : vector<8x128xf32>
    %438 = math.tanh %437 : vector<8x128xf32>
    %439 = arith.mulf %434, %438 : vector<8x128xf32>
    %c48_137 = arith.constant 48 : index
    %c0_138 = arith.constant 0 : index
    %440 = vector.load %arg5[%c48_137, %c0_138] : memref<64x128xf32, #tpu.memory_space<vmem>>, vector<8x128xf32>
    tpu.vector_store %arg5[%c48_137, %c0_138], %414 {strides = array<i32>} : memref<64x128xf32, #tpu.memory_space<vmem>>, vector<8x128xf32>,
    %c8_139 = arith.constant 8 : index
    %c0_140 = arith.constant 0 : index
    %441 = vector.load %arg6[%c8_139, %c0_140] : memref<64x128xf32, #tpu.memory_space<vmem>>, vector<8x128xf32>
    tpu.vector_store %arg6[%c8_139, %c0_140], %439 {strides = array<i32>} : memref<64x128xf32, #tpu.memory_space<vmem>>, vector<8x128xf32>,
    %c56_141 = arith.constant 56 : index
    %c0_142 = arith.constant 0 : index
    %442 = vector.load %arg9[%c56_141, %c0_142] : memref<64x1024xf32, #tpu.memory_space<vmem>>, vector<8x1024xf32>
    %c0_143 = arith.constant 0 : index
    %c0_144 = arith.constant 0 : index
    %443 = vector.load %arg9[%c0_143, %c0_144] : memref<64x1024xf32, #tpu.memory_space<vmem>>, vector<8x1024xf32>
    %444 = vector.extract_strided_slice %442 {offsets = [0, 0], sizes = [8, 512], strides = [1, 1]} : vector<8x1024xf32> to vector<8x512xf32>
    %c0_145 = arith.constant 0 : index
    %c0_146 = arith.constant 0 : index
    %445 = vector.load %arg2[%c0_145, %c0_146] : memref<128x512xf32, #tpu.memory_space<vmem>>, vector<128x512xf32>
    %cst_147 = arith.constant dense<0.000000e+00> : vector<8x512xf32>
    %446 = tpu.matmul %414, %445, %cst_147 {dimension_numbers = #tpu.dot_dimension_numbers<[1], [0], [0], [1], [0, 0, 1, 1], [], []>} : vector<8x128xf32>, vector<128x512xf32>, vector<8x512xf32> -> vector<8x512xf32>
    %447 = arith.addf %444, %446 : vector<8x512xf32>
    %448 = vector.extract_strided_slice %443 {offsets = [0, 512], sizes = [8, 512], strides = [1, 1]} : vector<8x1024xf32> to vector<8x512xf32>
    %c0_148 = arith.constant 0 : index
    %c0_149 = arith.constant 0 : index
    %449 = vector.load %arg3[%c0_148, %c0_149] : memref<128x512xf32, #tpu.memory_space<vmem>>, vector<128x512xf32>
    %cst_150 = arith.constant dense<0.000000e+00> : vector<8x512xf32>
    %450 = tpu.matmul %439, %449, %cst_150 {dimension_numbers = #tpu.dot_dimension_numbers<[1], [0], [0], [1], [0, 0, 1, 1], [], []>} : vector<8x128xf32>, vector<128x512xf32>, vector<8x512xf32> -> vector<8x512xf32>
    %451 = arith.addf %448, %450 : vector<8x512xf32>
    %452 = vector.extract_strided_slice %447 {offsets = [0, 0], sizes = [8, 128], strides = [1, 1]} : vector<8x512xf32> to vector<8x128xf32>
    %453 = arith.negf %452 : vector<8x128xf32>
    %454 = math.exp %453 : vector<8x128xf32>
    %cst_151 = arith.constant 1.000000e+00 : f32
    %455 = vector.broadcast %cst_151 : f32 to vector<8x128xf32>
    %456 = arith.addf %455, %454 : vector<8x128xf32>
    %457 = arith.divf %455, %456 : vector<8x128xf32>
    %458 = vector.extract_strided_slice %447 {offsets = [0, 128], sizes = [8, 128], strides = [1, 1]} : vector<8x512xf32> to vector<8x128xf32>
    %459 = arith.negf %458 : vector<8x128xf32>
    %460 = math.exp %459 : vector<8x128xf32>
    %cst_152 = arith.constant 1.000000e+00 : f32
    %461 = vector.broadcast %cst_152 : f32 to vector<8x128xf32>
    %462 = arith.addf %461, %460 : vector<8x128xf32>
    %463 = arith.divf %461, %462 : vector<8x128xf32>
    %464 = vector.extract_strided_slice %447 {offsets = [0, 256], sizes = [8, 128], strides = [1, 1]} : vector<8x512xf32> to vector<8x128xf32>
    %465 = math.tanh %464 : vector<8x128xf32>
    %466 = vector.extract_strided_slice %447 {offsets = [0, 384], sizes = [8, 128], strides = [1, 1]} : vector<8x512xf32> to vector<8x128xf32>
    %467 = arith.negf %466 : vector<8x128xf32>
    %468 = math.exp %467 : vector<8x128xf32>
    %cst_153 = arith.constant 1.000000e+00 : f32
    %469 = vector.broadcast %cst_153 : f32 to vector<8x128xf32>
    %470 = arith.addf %469, %468 : vector<8x128xf32>
    %471 = arith.divf %469, %470 : vector<8x128xf32>
    %472 = arith.mulf %463, %412 : vector<8x128xf32>
    %473 = arith.mulf %457, %465 : vector<8x128xf32>
    %474 = arith.addf %472, %473 : vector<8x128xf32>
    %475 = math.tanh %474 : vector<8x128xf32>
    %476 = arith.mulf %471, %475 : vector<8x128xf32>
    %477 = vector.extract_strided_slice %451 {offsets = [0, 0], sizes = [8, 128], strides = [1, 1]} : vector<8x512xf32> to vector<8x128xf32>
    %478 = arith.negf %477 : vector<8x128xf32>
    %479 = math.exp %478 : vector<8x128xf32>
    %cst_154 = arith.constant 1.000000e+00 : f32
    %480 = vector.broadcast %cst_154 : f32 to vector<8x128xf32>
    %481 = arith.addf %480, %479 : vector<8x128xf32>
    %482 = arith.divf %480, %481 : vector<8x128xf32>
    %483 = vector.extract_strided_slice %451 {offsets = [0, 128], sizes = [8, 128], strides = [1, 1]} : vector<8x512xf32> to vector<8x128xf32>
    %484 = arith.negf %483 : vector<8x128xf32>
    %485 = math.exp %484 : vector<8x128xf32>
    %cst_155 = arith.constant 1.000000e+00 : f32
    %486 = vector.broadcast %cst_155 : f32 to vector<8x128xf32>
    %487 = arith.addf %486, %485 : vector<8x128xf32>
    %488 = arith.divf %486, %487 : vector<8x128xf32>
    %489 = vector.extract_strided_slice %451 {offsets = [0, 256], sizes = [8, 128], strides = [1, 1]} : vector<8x512xf32> to vector<8x128xf32>
    %490 = math.tanh %489 : vector<8x128xf32>
    %491 = vector.extract_strided_slice %451 {offsets = [0, 384], sizes = [8, 128], strides = [1, 1]} : vector<8x512xf32> to vector<8x128xf32>
    %492 = arith.negf %491 : vector<8x128xf32>
    %493 = math.exp %492 : vector<8x128xf32>
    %cst_156 = arith.constant 1.000000e+00 : f32
    %494 = vector.broadcast %cst_156 : f32 to vector<8x128xf32>
    %495 = arith.addf %494, %493 : vector<8x128xf32>
    %496 = arith.divf %494, %495 : vector<8x128xf32>
    %497 = arith.mulf %488, %437 : vector<8x128xf32>
    %498 = arith.mulf %482, %490 : vector<8x128xf32>
    %499 = arith.addf %497, %498 : vector<8x128xf32>
    %500 = math.tanh %499 : vector<8x128xf32>
    %501 = arith.mulf %496, %500 : vector<8x128xf32>
    %c56_157 = arith.constant 56 : index
    %c0_158 = arith.constant 0 : index
    %502 = vector.load %arg5[%c56_157, %c0_158] : memref<64x128xf32, #tpu.memory_space<vmem>>, vector<8x128xf32>
    tpu.vector_store %arg5[%c56_157, %c0_158], %476 {strides = array<i32>} : memref<64x128xf32, #tpu.memory_space<vmem>>, vector<8x128xf32>,
    %c0_159 = arith.constant 0 : index
    %c0_160 = arith.constant 0 : index
    %503 = vector.load %arg6[%c0_159, %c0_160] : memref<64x128xf32, #tpu.memory_space<vmem>>, vector<8x128xf32>
    tpu.vector_store %arg6[%c0_159, %c0_160], %501 {strides = array<i32>} : memref<64x128xf32, #tpu.memory_space<vmem>>, vector<8x128xf32>,
    %c0_161 = arith.constant 0 : index
    %c0_162 = arith.constant 0 : index
    %504 = vector.load %arg7[%c0_161, %c0_162] : memref<8x256xf32, #tpu.memory_space<vmem>>, vector<8x128xf32>
    tpu.vector_store %arg7[%c0_161, %c0_162], %476 {strides = array<i32>} : memref<8x256xf32, #tpu.memory_space<vmem>>, vector<8x128xf32>,
    %c0_163 = arith.constant 0 : index
    %c128 = arith.constant 128 : index
    %505 = vector.load %arg7[%c0_163, %c128] : memref<8x256xf32, #tpu.memory_space<vmem>>, vector<8x128xf32>
    tpu.vector_store %arg7[%c0_163, %c128], %501 {strides = array<i32>} : memref<8x256xf32, #tpu.memory_space<vmem>>, vector<8x128xf32>,
    %c0_164 = arith.constant 0 : index
    %c0_165 = arith.constant 0 : index
    %506 = vector.load %arg8[%c0_164, %c0_165] : memref<8x256xf32, #tpu.memory_space<vmem>>, vector<8x128xf32>
    tpu.vector_store %arg8[%c0_164, %c0_165], %474 {strides = array<i32>} : memref<8x256xf32, #tpu.memory_space<vmem>>, vector<8x128xf32>,
    %c0_166 = arith.constant 0 : index
    %c128_167 = arith.constant 128 : index
    %507 = vector.load %arg8[%c0_166, %c128_167] : memref<8x256xf32, #tpu.memory_space<vmem>>, vector<8x128xf32>
    tpu.vector_store %arg8[%c0_166, %c128_167], %499 {strides = array<i32>} : memref<8x256xf32, #tpu.memory_space<vmem>>, vector<8x128xf32>,
    return
  }
}

</mosaic_0001>

<bundles_post_ra>
// kernel: _encoder_forward_impl.2
= control target key start
LH: loop header
LB: loop body
LE: loop exit
PB: predicated region body
PF: predicated region fallthrough
CT: control target
= control target key end

     0   :  { %14 = vsyncpa [#allocation4], 0  ;;  %s7773_s0 = inlined_call_operand.vmem [shape: f32[64,128], index: 0, kind: input, shape index: {}]   ;;  %s7774_s1 = inlined_call_operand.hbm [shape: f32[128,1024], index: 1, kind: input, shape index: {}]   ;;  %s7775_s2 = inlined_call_operand.hbm [shape: f32[128,512], index: 2, kind: input, shape index: {}]   ;;  %s7776_s3 = inlined_call_operand.hbm [shape: f32[128,512], index: 3, kind: input, shape index: {}]   ;;  %s7777_s4 = inlined_call_operand.hbm [shape: f32[1,1024], index: 4, kind: input, shape index: {}]   ;;  %s7778_s5 = inlined_call_operand.vmem [shape: f32[64,128], index: 5, kind: output, shape index: {0}]   ;;  %s7779_s6 = inlined_call_operand.vmem [shape: f32[64,128], index: 6, kind: output, shape index: {1}]   ;;  %s7780_s7 = inlined_call_operand.vmem [shape: f32[8,256], index: 7, kind: output, shape index: {2}]   ;;  %s7781_s8 = inlined_call_operand.vmem [shape: f32[8,256], index: 8, kind: output, shape index: {3}]  }
   0x1   :  { %15 = vsyncpa [#allocation6], 0 }
   0x2   :  { %16 = vsyncpa [#allocation9], 0  ;;  %s6305_s27 = smov [#allocation5]   ;;  %s6211_s9 = scalar_lea.hbm %s7775_s2, 8192 }
   0x3   :  { %s36_s28 = sshll.u32 %s6305_s27, 4  ;;  %p6212_p0 = scmp.ne.s32.totalorder %s7775_s2, %s6211_s9  ;;  %s37_s28 = int_to_ptr.vmem [resolvable:$true] %s36_s28 }
   0x4   :  { %p6215_p1 = scmp.lt.u32.totalorder %s6211_s9, %s7775_s2 }
   0x6   :  { %p6217_p2 = pnand %p6215_p1, %p6212_p0 }
   0x8   :  { %6220 = shalt.err (!%p6217_p2)
}
   0x9   :  { %s6221_s14 = scalar_lea.vmem %s37_s28, 8192  ;;  %p6226_p4 = scmp.lt.s32.totalorder %s37_s28, %s37_s28 }
   0xa   :  { %p6222_p3 = scmp.ne.s32.totalorder %s37_s28, %s6221_s14  ;;  %p6227_p5 = scmp.lt.s32.totalorder %s6221_s14, %s6221_s14 }
   0xc   :  { %p6228_p6 = por %p6227_p5, %p6226_p4 }
   0xe   :  { %p6229_p7 = pnand %p6228_p6, %p6222_p3 }
  0x10   :  { %6232 = shalt.err (!%p6229_p7)
}
  0x11   :  { %s6306_s15 = smov 512   ;;  %s6307_s16 = smov 32  }
  0x12   :  { %42 = dma.hbm_to_vmem [thread:$0]  %s7775_s2, 8192, %s37_s28, [#allocation6], %s6306_s15, %s6306_s15, %s6307_s16  }
  0x13   :  { %s6308_s19 = smov [#allocation3]   ;;  %s6233_s23 = scalar_lea.hbm %s7774_s1, 16384 }
  0x14   :  { %s24_s20 = sshll.u32 %s6308_s19, 4  ;;  %p6234_p8 = scmp.ne.s32.totalorder %s7774_s1, %s6233_s23  ;;  %s25_s20 = int_to_ptr.vmem [resolvable:$true] %s24_s20 }
  0x15   :  { %p6237_p9 = scmp.lt.u32.totalorder %s6233_s23, %s7774_s1 }
  0x17   :  { %p6239_p10 = pnand %p6237_p9, %p6234_p8 }
  0x19   :  { %6242 = shalt.err (!%p6239_p10)
}
  0x1a   :  { %s6243_s29 = scalar_lea.vmem %s25_s20, 16384  ;;  %p6248_p12 = scmp.lt.s32.totalorder %s25_s20, %s25_s20 }
  0x1b   :  { %p6244_p11 = scmp.ne.s32.totalorder %s25_s20, %s6243_s29  ;;  %p6249_p13 = scmp.lt.s32.totalorder %s6243_s29, %s6243_s29 }
  0x1d   :  { %p6250_p0 = por %p6249_p13, %p6248_p12 }
  0x1f   :  { %p6251_p1 = pnand %p6250_p0, %p6244_p11 }
  0x21   :  { %6254 = shalt.err (!%p6251_p1)
}
  0x22   :  { %s6309_s2 = smov 1024   ;;  %s6310_s28 = smov 64  }
  0x23   :  { %30 = dma.hbm_to_vmem [thread:$0]  %s7774_s1, 16384, %s25_s20, [#allocation4], %s6309_s2, %s6309_s2, %s6310_s28  }
  0x24   :  { %s6311_s10 = smov [#allocation7]   ;;  %s6312_s12 = smov [#allocation8]  }
  0x25   :  { %s48_s11 = sshll.u32 %s6311_s10, 4  ;;  %s61_s13 = sshll.u32 %s6312_s12, 4  ;;  %s49_s11 = int_to_ptr.vmem [resolvable:$true] %s48_s11  ;;  %s62_s13 = int_to_ptr.vmem [resolvable:$true] %s61_s13 }
  0x26   :  { %s6255_s18 = scalar_lea.hbm %s7776_s3, 8192 }
  0x27   :  { %p6256_p2 = scmp.ne.s32.totalorder %s7776_s3, %s6255_s18  ;;  %p6259_p3 = scmp.lt.u32.totalorder %s6255_s18, %s7776_s3 }
  0x29   :  { %p6261_p4 = pnand %p6259_p3, %p6256_p2 }
  0x2b   :  { %6264 = shalt.err (!%p6261_p4)
}
  0x2c   :  { %s6265_s1 = scalar_lea.vmem %s49_s11, 8192  ;;  %p6270_p6 = scmp.lt.s32.totalorder %s49_s11, %s49_s11 }
  0x2d   :  { %p6266_p5 = scmp.ne.s32.totalorder %s49_s11, %s6265_s1  ;;  %p6271_p7 = scmp.lt.s32.totalorder %s6265_s1, %s6265_s1 }
  0x2f   :  { %p6272_p8 = por %p6271_p7, %p6270_p6 }
  0x31   :  { %p6273_p9 = pnand %p6272_p8, %p6266_p5 }
  0x33   :  { %6276 = shalt.err (!%p6273_p9)
}
  0x34   :  { %54 = dma.hbm_to_vmem [thread:$0]  %s7776_s3, 8192, %s49_s11, [#allocation6], %s6306_s15, %s6306_s15, %s6307_s16  }
  0x35   :  { %s6277_s27 = scalar_lea.hbm %s7777_s4, 128 }
  0x36   :  { %p6278_p10 = scmp.ne.s32.totalorder %s7777_s4, %s6277_s27  ;;  %p6281_p11 = scmp.lt.u32.totalorder %s6277_s27, %s7777_s4 }
  0x38   :  { %p6283_p12 = pnand %p6281_p11, %p6278_p10 }
  0x3a   :  { %6286 = shalt.err (!%p6283_p12)
}
  0x3b   :  { %s6287_s9 = scalar_lea.vmem %s62_s13, 128  ;;  %p6292_p0 = scmp.lt.s32.totalorder %s62_s13, %s62_s13 }
  0x3c   :  { %p6288_p13 = scmp.ne.s32.totalorder %s62_s13, %s6287_s9  ;;  %p6293_p1 = scmp.lt.s32.totalorder %s6287_s9, %s6287_s9 }
  0x3e   :  { %p6294_p2 = por %p6293_p1, %p6292_p0 }
  0x40   :  { %p6295_p3 = pnand %p6294_p2, %p6288_p13 }
  0x42   :  { %6298 = shalt.err (!%p6295_p3)
}
  0x43   :  { %64 = dma.hbm_to_vmem [thread:$0]  %s7777_s4, 128, %s62_s13, [#allocation9]  }
  0x44   :  { %6299 = dma.done.wait [#allocation4], 16384  }
  0x45   :  { %6300 = vsyncadd [#allocation4], 4294950912 }
  0x46   :  { %6301 = dma.done.wait [#allocation6], 16384  }
  0x47   :  { %6302 = vsyncadd [#allocation6], 4294950912 }
  0x48   :  { %6303 = dma.done.wait [#allocation9], 128  }
  0x49   :  { %6304 = vsyncadd [#allocation9], 4294967168  ;;  %v7782_v0 = vmov 0.0   ;;  %v86_v1 = vld [vmem:[#allocation3 + $0x8] sm:$0xff]  ;;  %v88_v3 = vld [vmem:[#allocation3 + $0x18] sm:$0xff] }
  0x4a   :  { %319 = vmatprep.mubr.f32.mxu0 %v7782_v0  ;;  %432 = vmatprep.mubr.f32.mxu1 %v7782_v0  ;;  %v94_v2 = vld [vmem:[#allocation3 + $0x48] sm:$0xff]  ;;  %v96_v5 = vld [vmem:[#allocation3 + $0x58] sm:$0xff]  ;;  %v85_v6 = vld [vmem:[#allocation3] sm:$0xff] }
  0x4b   :  { %v4666_v4 = vpack.c.bf16 %v94_v2, %v86_v1  ;;  %v93_v7 = vld [vmem:[#allocation3 + $0x40] sm:$0xff]  ;;  %v4698_v8 = vpack.c.bf16 %v96_v5, %v88_v3  ;;  %v87_v10 = vld [vmem:[#allocation3 + $0x10] sm:$0xff]  ;;  %v102_v12 = vld [vmem:[#allocation3 + $0x88] sm:$0xff] }
  0x4c   :  { %v4668_v9 = vpack.c.bf16 %v93_v7, %v85_v6  ;;  %v95_v11 = vld [vmem:[#allocation3 + $0x50] sm:$0xff]  ;;  %v110_v14 = vld [vmem:[#allocation3 + $0xc8] sm:$0xff]  ;;  %v104_v15 = vld [vmem:[#allocation3 + $0x98] sm:$0xff] }
  0x4d   :  { %4667 = vmatprep.subr.bf16.mxu0 %v4666_v4  ;;  %v4700_v13 = vpack.c.bf16 %v95_v11, %v87_v10  ;;  %v112_v16 = vld [vmem:[#allocation3 + $0xd8] sm:$0xff]  ;;  %4699 = vmatprep.subr.bf16.mxu1 %v4698_v8  ;;  %v4670_v17 = vpack.c.bf16 %v110_v14, %v102_v12  ;;  %v101_v19 = vld [vmem:[#allocation3 + $0x80] sm:$0xff]  ;;  %v103_v21 = vld [vmem:[#allocation3 + $0x90] sm:$0xff] }
  0x4e   :  { %4669 = vmatpush1.bf16.msra.mxu0 %v4668_v9  ;;  %v4702_v18 = vpack.c.bf16 %v112_v16, %v104_v15  ;;  %v109_v20 = vld [vmem:[#allocation3 + $0xc0] sm:$0xff]  ;;  %v111_v23 = vld [vmem:[#allocation3 + $0xd0] sm:$0xff]  ;;  %v118_v24 = vld [vmem:[#allocation3 + $0x108] sm:$0xff] }
  0x4f   :  { %4701 = vmatpush1.bf16.msra.mxu1 %v4700_v13  ;;  %v4672_v22 = vpack.c.bf16 %v109_v20, %v101_v19  ;;  %v126_v25 = vld [vmem:[#allocation3 + $0x148] sm:$0xff]  ;;  %4671 = vmatprep.subr.bf16.mxu0 %v4670_v17  ;;  %v4704_v26 = vpack.c.bf16 %v111_v23, %v103_v21  ;;  %v120_v28 = vld [vmem:[#allocation3 + $0x118] sm:$0xff]  ;;  %v117_v30 = vld [vmem:[#allocation3 + $0x100] sm:$0xff] }
  0x50   :  { %4703 = vmatprep.subr.bf16.mxu1 %v4702_v18  ;;  %v4674_v27 = vpack.c.bf16 %v126_v25, %v118_v24  ;;  %v128_v29 = vld [vmem:[#allocation3 + $0x158] sm:$0xff]  ;;  %v125_v32 = vld [vmem:[#allocation3 + $0x140] sm:$0xff]  ;;  %v119_v33 = vld [vmem:[#allocation3 + $0x110] sm:$0xff] }
  0x51   :  { %v4706_v31 = vpack.c.bf16 %v128_v29, %v120_v28  ;;  %v127_v34 = vld [vmem:[#allocation3 + $0x150] sm:$0xff]  ;;  %v4676_v35 = vpack.c.bf16 %v125_v32, %v117_v30  ;;  %v134_v36 = vld [vmem:[#allocation3 + $0x188] sm:$0xff]  ;;  %v136_v38 = vld [vmem:[#allocation3 + $0x198] sm:$0xff] }
  0x52   :  { %4673 = vmatpush1.bf16.msra.mxu0 %v4672_v22  ;;  %v142_v37 = vld [vmem:[#allocation3 + $0x1c8] sm:$0xff]  ;;  %v4708_v39 = vpack.c.bf16 %v127_v34, %v119_v33  ;;  %v144_v41 = vld [vmem:[#allocation3 + $0x1d8] sm:$0xff]  ;;  %v133_v42 = vld [vmem:[#allocation3 + $0x180] sm:$0xff] }
  0x53   :  { %4705 = vmatpush1.bf16.msra.mxu1 %v4704_v26  ;;  %4675 = vmatprep.subr.bf16.mxu0 %v4674_v27  ;;  %v4678_v40 = vpack.c.bf16 %v142_v37, %v134_v36  ;;  %v141_v43 = vld [vmem:[#allocation3 + $0x1c0] sm:$0xff]  ;;  %v4710_v44 = vpack.c.bf16 %v144_v41, %v136_v38  ;;  %v135_v45 = vld [vmem:[#allocation3 + $0x190] sm:$0xff]  ;;  %v150_v47 = vld [vmem:[#allocation3 + $0x208] sm:$0xff] }
  0x54   :  { %4707 = vmatprep.subr.bf16.mxu1 %v4706_v31  ;;  %v143_v46 = vld [vmem:[#allocation3 + $0x1d0] sm:$0xff]  ;;  %v158_v48 = vld [vmem:[#allocation3 + $0x248] sm:$0xff]  ;;  %v152_v49 = vld [vmem:[#allocation3 + $0x218] sm:$0xff]  ;;  %v4680_v51 = vpack.c.bf16 %v141_v43, %v133_v42 }
  0x55   :  { %v160_v50 = vld [vmem:[#allocation3 + $0x258] sm:$0xff]  ;;  %v4712_v52 = vpack.c.bf16 %v143_v46, %v135_v45  ;;  %v4682_v53 = vpack.c.bf16 %v158_v48, %v150_v47  ;;  %v149_v54 = vld [vmem:[#allocation3 + $0x200] sm:$0xff]  ;;  %v151_v56 = vld [vmem:[#allocation3 + $0x210] sm:$0xff] }
  0x56   :  { %4677 = vmatpush1.bf16.msra.mxu0 %v4676_v35  ;;  %v157_v55 = vld [vmem:[#allocation3 + $0x240] sm:$0xff]  ;;  %v4714_v57 = vpack.c.bf16 %v160_v50, %v152_v49  ;;  %v159_v58 = vld [vmem:[#allocation3 + $0x250] sm:$0xff]  ;;  %v166_v59 = vld [vmem:[#allocation3 + $0x288] sm:$0xff] }
  0x57   :  { %4709 = vmatpush1.bf16.msra.mxu1 %v4708_v39  ;;  %4679 = vmatprep.subr.bf16.mxu0 %v4678_v40  ;;  %v174_v60 = vld [vmem:[#allocation3 + $0x2c8] sm:$0xff]  ;;  %v168_v61 = vld [vmem:[#allocation3 + $0x298] sm:$0xff]  ;;  %v4684_v63 = vpack.c.bf16 %v157_v55, %v149_v54  ;;  %v4716_v1 = vpack.c.bf16 %v159_v58, %v151_v56  ;;  %v165_v3 = vld [vmem:[#allocation3 + $0x280] sm:$0xff] }
  0x58   :  { %4711 = vmatprep.subr.bf16.mxu1 %v4710_v44  ;;  %v176_v62 = vld [vmem:[#allocation3 + $0x2d8] sm:$0xff]  ;;  %v4686_v2 = vpack.c.bf16 %v174_v60, %v166_v59  ;;  %v173_v4 = vld [vmem:[#allocation3 + $0x2c0] sm:$0xff]  ;;  %v167_v5 = vld [vmem:[#allocation3 + $0x290] sm:$0xff] }
  0x59   :  { %v4718_v6 = vpack.c.bf16 %v176_v62, %v168_v61  ;;  %v175_v7 = vld [vmem:[#allocation3 + $0x2d0] sm:$0xff]  ;;  %v182_v8 = vld [vmem:[#allocation3 + $0x308] sm:$0xff]  ;;  %v184_v10 = vld [vmem:[#allocation3 + $0x318] sm:$0xff]  ;;  %v4688_v12 = vpack.c.bf16 %v173_v4, %v165_v3 }
  0x5a   :  { %4681 = vmatpush1.bf16.msra.mxu0 %v4680_v51  ;;  %v190_v9 = vld [vmem:[#allocation3 + $0x348] sm:$0xff]  ;;  %v192_v11 = vld [vmem:[#allocation3 + $0x358] sm:$0xff]  ;;  %v4720_v13 = vpack.c.bf16 %v175_v7, %v167_v5  ;;  %v181_v15 = vld [vmem:[#allocation3 + $0x300] sm:$0xff] }
  0x5b   :  { %4713 = vmatpush1.bf16.msra.mxu1 %v4712_v52  ;;  %4683 = vmatprep.subr.bf16.mxu0 %v4682_v53  ;;  %v4690_v14 = vpack.c.bf16 %v190_v9, %v182_v8  ;;  %v189_v16 = vld [vmem:[#allocation3 + $0x340] sm:$0xff]  ;;  %v183_v17 = vld [vmem:[#allocation3 + $0x310] sm:$0xff]  ;;  %v4722_v18 = vpack.c.bf16 %v192_v11, %v184_v10  ;;  %v198_v20 = vld [vmem:[#allocation3 + $0x388] sm:$0xff] }
  0x5c   :  { %4715 = vmatprep.subr.bf16.mxu1 %v4714_v57  ;;  %v191_v19 = vld [vmem:[#allocation3 + $0x350] sm:$0xff]  ;;  %v206_v21 = vld [vmem:[#allocation3 + $0x3c8] sm:$0xff]  ;;  %v200_v22 = vld [vmem:[#allocation3 + $0x398] sm:$0xff]  ;;  %v4692_v24 = vpack.c.bf16 %v189_v16, %v181_v15 }
  0x5d   :  { %v208_v23 = vld [vmem:[#allocation3 + $0x3d8] sm:$0xff]  ;;  %v4724_v25 = vpack.c.bf16 %v191_v19, %v183_v17  ;;  %v4694_v26 = vpack.c.bf16 %v206_v21, %v198_v20  ;;  %v197_v27 = vld [vmem:[#allocation3 + $0x380] sm:$0xff]  ;;  %v199_v29 = vld [vmem:[#allocation3 + $0x390] sm:$0xff] }
  0x5e   :  { %4685 = vmatpush1.bf16.msra.mxu0 %v4684_v63  ;;  %v205_v28 = vld [vmem:[#allocation3 + $0x3c0] sm:$0xff]  ;;  %v4726_v30 = vpack.c.bf16 %v208_v23, %v200_v22  ;;  %v207_v31 = vld [vmem:[#allocation3 + $0x3d0] sm:$0xff]  ;;  %v90_v32 = vld [vmem:[#allocation3 + $0x28] sm:$0xff] }
  0x5f   :  { %4717 = vmatpush1.bf16.msra.mxu1 %v4716_v1  ;;  %4687 = vmatprep.subr.bf16.mxu0 %v4686_v2  ;;  %v98_v33 = vld [vmem:[#allocation3 + $0x68] sm:$0xff]  ;;  %v92_v34 = vld [vmem:[#allocation3 + $0x38] sm:$0xff]  ;;  %v4696_v36 = vpack.c.bf16 %v205_v28, %v197_v27  ;;  %v4728_v37 = vpack.c.bf16 %v207_v31, %v199_v29  ;;  %v89_v39 = vld [vmem:[#allocation3 + $0x20] sm:$0xff] }
  0x60   :  { %4719 = vmatprep.subr.bf16.mxu1 %v4718_v6  ;;  %v100_v35 = vld [vmem:[#allocation3 + $0x78] sm:$0xff]  ;;  %v4730_v38 = vpack.c.bf16 %v98_v33, %v90_v32  ;;  %v97_v40 = vld [vmem:[#allocation3 + $0x60] sm:$0xff]  ;;  %v91_v42 = vld [vmem:[#allocation3 + $0x30] sm:$0xff] }
  0x61   :  { %v4762_v41 = vpack.c.bf16 %v100_v35, %v92_v34  ;;  %v99_v43 = vld [vmem:[#allocation3 + $0x70] sm:$0xff]  ;;  %v106_v44 = vld [vmem:[#allocation3 + $0xa8] sm:$0xff]  ;;  %v6418_v46 = vld [vmem:[%s7773_s0] sm:$0xff]  ;;  %v4732_v47 = vpack.c.bf16 %v97_v40, %v89_v39 }
  0x62   :  { %4689 = vmatpush1.bf16.msra.mxu0 %v4688_v12  ;;  %v114_v45 = vld [vmem:[#allocation3 + $0xe8] sm:$0xff]  ;;  %v108_v48 = vld [vmem:[#allocation3 + $0xb8] sm:$0xff]  ;;  %v4764_v50 = vpack.c.bf16 %v99_v43, %v91_v42  ;;  %v105_v51 = vld [vmem:[#allocation3 + $0xa0] sm:$0xff] }
  0x63   :  { %4721 = vmatpush1.bf16.msra.mxu1 %v4720_v13  ;;  %4691 = vmatprep.subr.bf16.mxu0 %v4690_v14  ;;  %v116_v49 = vld [vmem:[#allocation3 + $0xf8] sm:$0xff]  ;;  %v113_v52 = vld [vmem:[#allocation3 + $0xe0] sm:$0xff]  ;;  %v4734_v53 = vpack.c.bf16 %v114_v45, %v106_v44  ;;  %v107_v54 = vld [vmem:[#allocation3 + $0xb0] sm:$0xff] }
  0x64   :  { %4723 = vmatprep.subr.bf16.mxu1 %v4722_v18  ;;  %v115_v55 = vld [vmem:[#allocation3 + $0xf0] sm:$0xff]  ;;  %v4766_v56 = vpack.c.bf16 %v116_v49, %v108_v48  ;;  %v122_v57 = vld [vmem:[#allocation3 + $0x128] sm:$0xff]  ;;  %v4736_v60 = vpack.c.bf16 %v113_v52, %v105_v51  ;;  %v124_v61 = vld [vmem:[#allocation3 + $0x138] sm:$0xff] }
  0x65   :  { %v130_v58 = vld [vmem:[#allocation3 + $0x168] sm:$0xff]  ;;  %v132_v62 = vld [vmem:[#allocation3 + $0x178] sm:$0xff]  ;;  %v4768_v63 = vpack.c.bf16 %v115_v55, %v107_v54  ;;  %v121_v1 = vld [vmem:[#allocation3 + $0x120] sm:$0xff] }
  0x66   :  { %4693 = vmatpush1.bf16.msra.mxu0 %v4692_v24  ;;  %v6425_v59 = vld [vmem:[%s7773_s0 + $0x8] sm:$0xff]  ;;  %v129_v2 = vld [vmem:[#allocation3 + $0x160] sm:$0xff]  ;;  %v4738_v3 = vpack.c.bf16 %v130_v58, %v122_v57  ;;  %v123_v4 = vld [vmem:[#allocation3 + $0x130] sm:$0xff]  ;;  %v4770_v6 = vpack.c.bf16 %v132_v62, %v124_v61 }
  0x67   :  { %4725 = vmatpush1.bf16.msra.mxu1 %v4724_v25  ;;  %4695 = vmatprep.subr.bf16.mxu0 %v4694_v26  ;;  %v131_v5 = vld [vmem:[#allocation3 + $0x170] sm:$0xff]  ;;  %v138_v7 = vld [vmem:[#allocation3 + $0x1a8] sm:$0xff]  ;;  %v4740_v10 = vpack.c.bf16 %v129_v2, %v121_v1  ;;  %v140_v11 = vld [vmem:[#allocation3 + $0x1b8] sm:$0xff] }
  0x68   :  { %4727 = vmatprep.subr.bf16.mxu1 %v4726_v30  ;;  %v146_v8 = vld [vmem:[#allocation3 + $0x1e8] sm:$0xff]  ;;  %v6434_v9 = vld [vmem:[%s7773_s0 + $0x10] sm:$0xff]  ;;  %v148_v12 = vld [vmem:[#allocation3 + $0x1f8] sm:$0xff]  ;;  %v4772_v13 = vpack.c.bf16 %v131_v5, %v123_v4 }
  0x69   :  { %v137_v14 = vld [vmem:[#allocation3 + $0x1a0] sm:$0xff]  ;;  %v4742_v16 = vpack.c.bf16 %v146_v8, %v138_v7  ;;  %v139_v17 = vld [vmem:[#allocation3 + $0x1b0] sm:$0xff]  ;;  %v4774_v19 = vpack.c.bf16 %v148_v12, %v140_v11  ;;  %v154_v20 = vld [vmem:[#allocation3 + $0x228] sm:$0xff] }
  0x6a   :  { %4697 = vmatpush1.bf16.msra.mxu0 %v4696_v36  ;;  %v145_v15 = vld [vmem:[#allocation3 + $0x1e0] sm:$0xff]  ;;  %v147_v18 = vld [vmem:[#allocation3 + $0x1f0] sm:$0xff]  ;;  %v162_v21 = vld [vmem:[#allocation3 + $0x268] sm:$0xff] }
  0x6b   :  { %4729 = vmatpush1.bf16.msra.mxu1 %v4728_v37  ;;  %4731 = vmatprep.subr.bf16.mxu0 %v4730_v38  ;;  %v6443_v22 = vld [vmem:[%s7773_s0 + $0x18] sm:$0xff]  ;;  %v4744_v23 = vpack.c.bf16 %v145_v15, %v137_v14  ;;  %v4776_v26 = vpack.c.bf16 %v147_v18, %v139_v17  ;;  %v153_v27 = vld [vmem:[#allocation3 + $0x220] sm:$0xff]  ;;  %v4746_v29 = vpack.c.bf16 %v162_v21, %v154_v20  ;;  %v155_v30 = vld [vmem:[#allocation3 + $0x230] sm:$0xff] }
  0x6c   :  { %4763 = vmatprep.subr.bf16.mxu1 %v4762_v41  ;;  %v156_v24 = vld [vmem:[#allocation3 + $0x238] sm:$0xff]  ;;  %v161_v28 = vld [vmem:[#allocation3 + $0x260] sm:$0xff]  ;;  %v163_v31 = vld [vmem:[#allocation3 + $0x270] sm:$0xff] }
  0x6d   :  { %320 = vmatmul.mubr.f32.vlgmr.msra.gmra.mrb[0].mxu0 %v6418_v46  ;;  %v164_v25 = vld [vmem:[#allocation3 + $0x278] sm:$0xff]  ;;  %v170_v33 = vld [vmem:[#allocation3 + $0x2a8] sm:$0xff]  ;;  %v6452_v35 = vld [vmem:[%s7773_s0 + $0x20] sm:$0xff]  ;;  %v4748_v36 = vpack.c.bf16 %v161_v28, %v153_v27  ;;  %v4780_v39 = vpack.c.bf16 %v163_v31, %v155_v30 }
  0x6e   :  { %433 = vmatmul.mubr.f32.vlgmr.msra.gmra.mrb[0].mxu1 %v6418_v46  ;;  %4733 = vmatpush1.bf16.msra.mxu0 %v4732_v47  ;;  %v4778_v32 = vpack.c.bf16 %v164_v25, %v156_v24  ;;  %v178_v34 = vld [vmem:[#allocation3 + $0x2e8] sm:$0xff]  ;;  %v172_v37 = vld [vmem:[#allocation3 + $0x2b8] sm:$0xff]  ;;  %v169_v40 = vld [vmem:[#allocation3 + $0x2a0] sm:$0xff] }
  0x6f   :  { %4765 = vmatpush1.bf16.msra.mxu1 %v4764_v50  ;;  %325 = vmatprep.mubr.f32.mxu0 %v7782_v0  ;;  %v180_v38 = vld [vmem:[#allocation3 + $0x2f8] sm:$0xff]  ;;  %v177_v41 = vld [vmem:[#allocation3 + $0x2e0] sm:$0xff]  ;;  %v4750_v42 = vpack.c.bf16 %v178_v34, %v170_v33  ;;  %v171_v43 = vld [vmem:[#allocation3 + $0x2b0] sm:$0xff] }
  0x70   :  { %438 = vmatprep.mubr.f32.mxu1 %v7782_v0  ;;  %4735 = vmatprep.subr.bf16.mxu0 %v4734_v53  ;;  %v179_v44 = vld [vmem:[#allocation3 + $0x2f0] sm:$0xff]  ;;  %v4782_v45 = vpack.c.bf16 %v180_v38, %v172_v37  ;;  %v186_v47 = vld [vmem:[#allocation3 + $0x328] sm:$0xff]  ;;  %v4752_v50 = vpack.c.bf16 %v177_v41, %v169_v40  ;;  %v188_v51 = vld [vmem:[#allocation3 + $0x338] sm:$0xff] }
  0x71   :  { %326 = vmatmul.mubr.f32.gmra.mrb[2].mxu0 %v6425_v59  ;;  %4767 = vmatprep.subr.bf16.mxu1 %v4766_v56  ;;  %v194_v48 = vld [vmem:[#allocation3 + $0x368] sm:$0xff]  ;;  %v196_v52 = vld [vmem:[#allocation3 + $0x378] sm:$0xff]  ;;  %v4784_v53 = vpack.c.bf16 %v179_v44, %v171_v43  ;;  %v185_v54 = vld [vmem:[#allocation3 + $0x320] sm:$0xff] }
  0x72   :  { %439 = vmatmul.mubr.f32.gmra.mrb[2].mxu1 %v6425_v59  ;;  %4737 = vmatpush1.bf16.msra.mxu0 %v4736_v60  ;;  %v6461_v49 = vld [vmem:[%s7773_s0 + $0x28] sm:$0xff]  ;;  %v193_v55 = vld [vmem:[#allocation3 + $0x360] sm:$0xff]  ;;  %v4754_v56 = vpack.c.bf16 %v194_v48, %v186_v47  ;;  %v187_v57 = vld [vmem:[#allocation3 + $0x330] sm:$0xff]  ;;  %v4786_v60 = vpack.c.bf16 %v196_v52, %v188_v51 }
  0x73   :  { %4769 = vmatpush1.bf16.msra.mxu1 %v4768_v63  ;;  %331 = vmatprep.mubr.f32.mxu0 %v7782_v0  ;;  %v195_v58 = vld [vmem:[#allocation3 + $0x370] sm:$0xff]  ;;  %v202_v61 = vld [vmem:[#allocation3 + $0x3a8] sm:$0xff]  ;;  %v4756_v1 = vpack.c.bf16 %v193_v55, %v185_v54  ;;  %v204_v2 = vld [vmem:[#allocation3 + $0x3b8] sm:$0xff] }
  0x74   :  { %444 = vmatprep.mubr.f32.mxu1 %v7782_v0  ;;  %4739 = vmatprep.subr.bf16.mxu0 %v4738_v3  ;;  %v210_v62 = vld [vmem:[#allocation3 + $0x3e8] sm:$0xff]  ;;  %v6470_v63 = vld [vmem:[%s7773_s0 + $0x30] sm:$0xff]  ;;  %v212_v3 = vld [vmem:[#allocation3 + $0x3f8] sm:$0xff]  ;;  %v4788_v4 = vpack.c.bf16 %v195_v58, %v187_v57 }
  0x75   :  { %332 = vmatmul.mubr.f32.gmra.mrb[4].mxu0 %v6434_v9  ;;  %4771 = vmatprep.subr.bf16.mxu1 %v4770_v6  ;;  %v201_v5 = vld [vmem:[#allocation3 + $0x3a0] sm:$0xff]  ;;  %v4758_v7 = vpack.c.bf16 %v210_v62, %v202_v61  ;;  %v203_v8 = vld [vmem:[#allocation3 + $0x3b0] sm:$0xff]  ;;  %v4790_v11 = vpack.c.bf16 %v212_v3, %v204_v2  ;;  %v780_v12 = vld [vmem:[#allocation5 + $0x8] sm:$0xff] }
  0x76   :  { %445 = vmatmul.mubr.f32.gmra.mrb[4].mxu1 %v6434_v9  ;;  %4741 = vmatpush1.bf16.msra.mxu0 %v4740_v10  ;;  %v209_v6 = vld [vmem:[#allocation3 + $0x3e0] sm:$0xff]  ;;  %v211_v10 = vld [vmem:[#allocation3 + $0x3f0] sm:$0xff]  ;;  %v6479_v14 = vld [vmem:[%s7773_s0 + $0x38] sm:$0xff] }
  0x77   :  { %4773 = vmatpush1.bf16.msra.mxu1 %v4772_v13  ;;  %337 = vmatprep.mubr.f32.mxu0 %v7782_v0  ;;  %v784_v13 = vld [vmem:[#allocation5 + $0x28] sm:$0xff]  ;;  %v4760_v15 = vpack.c.bf16 %v209_v6, %v201_v5  ;;  %v786_v17 = vld [vmem:[#allocation5 + $0x38] sm:$0xff]  ;;  %v4792_v18 = vpack.c.bf16 %v211_v10, %v203_v8  ;;  %v783_v20 = vld [vmem:[#allocation5 + $0x20] sm:$0xff] }
  0x78   :  { %450 = vmatprep.mubr.f32.mxu1 %v7782_v0  ;;  %4743 = vmatprep.subr.bf16.mxu0 %v4742_v16  ;;  %v782_v16 = vld [vmem:[#allocation5 + $0x18] sm:$0xff]  ;;  %v6483_v21 = vpack.c.bf16 %v784_v13, %v780_v12  ;;  %v785_v24 = vld [vmem:[#allocation5 + $0x30] sm:$0xff]  ;;  %v792_v27 = vld [vmem:[#allocation5 + $0x68] sm:$0xff] }
  0x79   :  { %338 = vmatmul.mubr.f32.gmra.mrb[6].mxu0 %v6443_v22  ;;  %4775 = vmatprep.subr.bf16.mxu1 %v4774_v19  ;;  %v779_v19 = vld [vmem:[#allocation5] sm:$0xff]  ;;  %v6486_v25 = vpack.c.bf16 %v786_v17, %v782_v16  ;;  %v794_v30 = vld [vmem:[#allocation5 + $0x78] sm:$0xff]  ;;  %v793_v37 = vld [vmem:[#allocation5 + $0x70] sm:$0xff] }
  0x7a   :  { %451 = vmatmul.mubr.f32.gmra.mrb[6].mxu1 %v6443_v22  ;;  %4745 = vmatpush1.bf16.msra.mxu0 %v4744_v23  ;;  %v781_v23 = vld [vmem:[#allocation5 + $0x10] sm:$0xff]  ;;  %v6489_v28 = vpack.c.bf16 %v783_v20, %v779_v19  ;;  %v791_v33 = vld [vmem:[#allocation5 + $0x60] sm:$0xff]  ;;  %v800_v40 = vld [vmem:[#allocation5 + $0xa8] sm:$0xff] }
  0x7b   :  { %4777 = vmatpush1.bf16.msra.mxu1 %v4776_v26  ;;  %343 = vmatprep.mubr.f32.mxu0 %v7782_v0  ;;  %v788_v26 = vld [vmem:[#allocation5 + $0x48] sm:$0xff]  ;;  %v6492_v31 = vpack.c.bf16 %v785_v24, %v781_v23  ;;  %v802_v43 = vld [vmem:[#allocation5 + $0xb8] sm:$0xff]  ;;  %v799_v47 = vld [vmem:[#allocation5 + $0xa0] sm:$0xff] }
  0x7c   :  { %456 = vmatprep.mubr.f32.mxu1 %v7782_v0  ;;  %4747 = vmatprep.subr.bf16.mxu0 %v4746_v29  ;;  %v790_v29 = vld [vmem:[#allocation5 + $0x58] sm:$0xff]  ;;  %v6496_v34 = vpack.c.bf16 %v792_v27, %v788_v26  ;;  %v804_v52 = vld [vmem:[#allocation5 + $0xc8] sm:$0xff]  ;;  %v803_v58 = vld [vmem:[#allocation5 + $0xc0] sm:$0xff] }
  0x7d   :  { %344 = vmatmul.mubr.f32.gmra.mrb[8].mxu0 %v6452_v35  ;;  %4779 = vmatprep.subr.bf16.mxu1 %v4778_v32  ;;  %v787_v32 = vld [vmem:[#allocation5 + $0x40] sm:$0xff]  ;;  %v6500_v38 = vpack.c.bf16 %v794_v30, %v790_v29  ;;  %v806_v55 = vld [vmem:[#allocation5 + $0xd8] sm:$0xff]  ;;  %v809_v62 = vld [vmem:[#allocation5 + $0xf0] sm:$0xff] }
  0x7e   :  { %457 = vmatmul.mubr.f32.gmra.mrb[8].mxu1 %v6452_v35  ;;  %4749 = vmatpush1.bf16.msra.mxu0 %v4748_v36  ;;  %v789_v36 = vld [vmem:[#allocation5 + $0x50] sm:$0xff]  ;;  %v6504_v41 = vpack.c.bf16 %v791_v33, %v787_v32  ;;  %v812_v2 = vld [vmem:[#allocation5 + $0x108] sm:$0xff]  ;;  %v814_v5 = vld [vmem:[#allocation5 + $0x118] sm:$0xff] }
  0x7f   :  { %4781 = vmatpush1.bf16.msra.mxu1 %v4780_v39  ;;  %349 = vmatprep.mubr.f32.mxu0 %v7782_v0  ;;  %v796_v39 = vld [vmem:[#allocation5 + $0x88] sm:$0xff]  ;;  %v6508_v44 = vpack.c.bf16 %v793_v37, %v789_v36  ;;  %v818_v6 = vld [vmem:[#allocation5 + $0x138] sm:$0xff]  ;;  %v811_v8 = vld [vmem:[#allocation5 + $0x100] sm:$0xff] }
  0x80   :  { %462 = vmatprep.mubr.f32.mxu1 %v7782_v0  ;;  %4751 = vmatprep.subr.bf16.mxu0 %v4750_v42  ;;  %v798_v42 = vld [vmem:[#allocation5 + $0x98] sm:$0xff]  ;;  %v6512_v48 = vpack.c.bf16 %v800_v40, %v796_v39  ;;  %v816_v3 = vld [vmem:[#allocation5 + $0x128] sm:$0xff]  ;;  %v815_v10 = vld [vmem:[#allocation5 + $0x120] sm:$0xff]  ;;  %v6548_v13 = vpack.c.bf16 %v818_v6, %v814_v5 }
  0x81   :  { %350 = vmatmul.mubr.f32.gmra.mrb[10].mxu0 %v6461_v49  ;;  %4783 = vmatprep.subr.bf16.mxu1 %v4782_v45  ;;  %v795_v45 = vld [vmem:[#allocation5 + $0x80] sm:$0xff]  ;;  %v6516_v51 = vpack.c.bf16 %v802_v43, %v798_v42  ;;  %v817_v12 = vld [vmem:[#allocation5 + $0x130] sm:$0xff]  ;;  %v824_v16 = vld [vmem:[#allocation5 + $0x168] sm:$0xff]  ;;  %v6552_v17 = vpack.c.bf16 %v815_v10, %v811_v8 }
  0x82   :  { %463 = vmatmul.mubr.f32.gmra.mrb[10].mxu1 %v6461_v49  ;;  %4753 = vmatpush1.bf16.msra.mxu0 %v4752_v50  ;;  %v801_v50 = vld [vmem:[#allocation5 + $0xb0] sm:$0xff]  ;;  %v6520_v54 = vpack.c.bf16 %v799_v47, %v795_v45  ;;  %v826_v19 = vld [vmem:[#allocation5 + $0x178] sm:$0xff]  ;;  %v819_v23 = vld [vmem:[#allocation5 + $0x140] sm:$0xff] }
  0x83   :  { %4785 = vmatpush1.bf16.msra.mxu1 %v4784_v53  ;;  %355 = vmatprep.mubr.f32.mxu0 %v7782_v0  ;;  %v808_v53 = vld [vmem:[#allocation5 + $0xe8] sm:$0xff]  ;;  %v823_v24 = vld [vmem:[#allocation5 + $0x160] sm:$0xff]  ;;  %v825_v27 = vld [vmem:[#allocation5 + $0x170] sm:$0xff] }
  0x84   :  { %468 = vmatprep.mubr.f32.mxu1 %v7782_v0  ;;  %4755 = vmatprep.subr.bf16.mxu0 %v4754_v56  ;;  %v810_v56 = vld [vmem:[#allocation5 + $0xf8] sm:$0xff]  ;;  %v6528_v61 = vpack.c.bf16 %v808_v53, %v804_v52  ;;  %v828_v30 = vld [vmem:[#allocation5 + $0x188] sm:$0xff]  ;;  %v6568_v33 = vpack.c.bf16 %v823_v24, %v819_v23  ;;  %v827_v40 = vld [vmem:[#allocation5 + $0x180] sm:$0xff] }
  0x85   :  { %356 = vmatmul.mubr.f32.gmra.mrb[12].mxu0 %v6470_v63  ;;  %4787 = vmatprep.subr.bf16.mxu1 %v4786_v60  ;;  %v807_v60 = vld [vmem:[#allocation5 + $0xe0] sm:$0xff]  ;;  %v832_v32 = vld [vmem:[#allocation5 + $0x1a8] sm:$0xff]  ;;  %v830_v36 = vld [vmem:[#allocation5 + $0x198] sm:$0xff] }
  0x86   :  { %469 = vmatmul.mubr.f32.gmra.mrb[12].mxu1 %v6470_v63  ;;  %4757 = vmatpush1.bf16.msra.mxu0 %v4756_v1  ;;  %v6532_v1 = vpack.c.bf16 %v810_v56, %v806_v55  ;;  %v834_v37 = vld [vmem:[#allocation5 + $0x1b8] sm:$0xff]  ;;  %v831_v42 = vld [vmem:[#allocation5 + $0x1a0] sm:$0xff]  ;;  %v6576_v43 = vpack.c.bf16 %v832_v32, %v828_v30  ;;  %v833_v45 = vld [vmem:[#allocation5 + $0x1b0] sm:$0xff] }
  0x87   :  { %4789 = vmatpush1.bf16.msra.mxu1 %v4788_v4  ;;  %361 = vmatprep.mubr.f32.mxu0 %v7782_v0  ;;  %v6536_v4 = vpack.c.bf16 %v807_v60, %v803_v58  ;;  %v6580_v47 = vpack.c.bf16 %v834_v37, %v830_v36  ;;  %v6584_v52 = vpack.c.bf16 %v831_v42, %v827_v40  ;;  %v838_v53 = vld [vmem:[#allocation5 + $0x1d8] sm:$0xff]  ;;  %v835_v58 = vld [vmem:[#allocation5 + $0x1c0] sm:$0xff]  ;;  %v994_v5 = vld [vmem:[#allocation7 + $0x28] sm:$0xff] }
  0x88   :  { %474 = vmatprep.mubr.f32.mxu1 %v7782_v0  ;;  %4759 = vmatprep.subr.bf16.mxu0 %v4758_v7  ;;  %v842_v55 = vld [vmem:[#allocation5 + $0x1f8] sm:$0xff]  ;;  %v839_v60 = vld [vmem:[#allocation5 + $0x1e0] sm:$0xff]  ;;  %v1002_v23 = vld [vmem:[#allocation7 + $0x68] sm:$0xff] }
  0x89   :  { %362 = vmatmul.mubr.f32.gmra.mrb[14].mxu0 %v6479_v14  ;;  %4791 = vmatprep.subr.bf16.mxu1 %v4790_v11  ;;  %v6544_v11 = vpack.c.bf16 %v816_v3, %v812_v2  ;;  %v6596_v2 = vpack.c.bf16 %v842_v55, %v838_v53  ;;  %v990_v3 = vld [vmem:[#allocation7 + $0x8] sm:$0xff]  ;;  %v6600_v6 = vpack.c.bf16 %v839_v60, %v835_v58  ;;  %v992_v8 = vld [vmem:[#allocation7 + $0x18] sm:$0xff]  ;;  %v997_v37 = vld [vmem:[#allocation7 + $0x40] sm:$0xff] }
  0x8a   :  { %475 = vmatmul.mubr.f32.gmra.mrb[14].mxu1 %v6479_v14  ;;  %4761 = vmatpush1.bf16.msra.mxu0 %v4760_v15  ;;  %v820_v15 = vld [vmem:[#allocation5 + $0x148] sm:$0xff]  ;;  %v996_v10 = vld [vmem:[#allocation7 + $0x38] sm:$0xff]  ;;  %v1001_v40 = vld [vmem:[#allocation7 + $0x60] sm:$0xff] }
  0x8b   :  { %4793 = vmatpush1.bf16.msra.mxu1 %v4792_v18  ;;  %545 = vmatprep.mubr.f32.mxu0 %v7782_v0  ;;  %v822_v18 = vld [vmem:[#allocation5 + $0x158] sm:$0xff]  ;;  %v6560_v26 = vpack.c.bf16 %v824_v16, %v820_v15  ;;  %v993_v15 = vld [vmem:[#allocation7 + $0x20] sm:$0xff]  ;;  %v991_v16 = vld [vmem:[#allocation7 + $0x10] sm:$0xff]  ;;  %v6612_v24 = vpack.c.bf16 %v996_v10, %v992_v8  ;;  %v6632_v55 = vpack.c.bf16 %v1001_v40, %v997_v37 }
  0x8c   :  { %658 = vmatprep.mubr.f32.mxu1 %v7782_v0  ;;  %4795 = vmatprep.subr.bf16.mxu0 %v6483_v21  ;;  %v6564_v29 = vpack.c.bf16 %v826_v19, %v822_v18  ;;  %v995_v18 = vld [vmem:[#allocation7 + $0x30] sm:$0xff]  ;;  %v998_v19 = vld [vmem:[#allocation7 + $0x48] sm:$0xff]  ;;  %v1012_v53 = vld [vmem:[#allocation7 + $0xb8] sm:$0xff] }
  0x8d   :  { %546 = vmatmul.mubr.f32.vlgmr.msra.gmra.mrb[16].mxu0 %v6418_v46  ;;  %4827 = vmatprep.subr.bf16.mxu1 %v6486_v25  ;;  %v6620_v32 = vpack.c.bf16 %v995_v18, %v991_v16  ;;  %v6622_v36 = vpack.c.bf16 %v1002_v23, %v998_v19  ;;  %v999_v42 = vld [vmem:[#allocation7 + $0x50] sm:$0xff]  ;;  %v1014_v10 = vld [vmem:[#allocation7 + $0xc8] sm:$0xff]  ;;  %v1020_v16 = vld [vmem:[#allocation7 + $0xf8] sm:$0xff] }
  0x8e   :  { %659 = vmatmul.mubr.f32.vlgmr.msra.gmra.mrb[16].mxu1 %v6418_v46  ;;  %4797 = vmatpush1.bf16.msra.mxu0 %v6489_v28  ;;  %v797_v46 = vld [vmem:[#allocation5 + $0x90] sm:$0xff] }
  0x8f   :  { %4829 = vmatpush1.bf16.msra.mxu1 %v6492_v31  ;;  %551 = vmatprep.mubr.f32.mxu0 %v7782_v0  ;;  %v6524_v57 = vpack.c.bf16 %v801_v50, %v797_v46  ;;  %v836_v46 = vld [vmem:[#allocation5 + $0x1c8] sm:$0xff]  ;;  %v1011_v8 = vld [vmem:[#allocation7 + $0xb0] sm:$0xff] }
  0x90   :  { %664 = vmatprep.mubr.f32.mxu1 %v7782_v0  ;;  %4799 = vmatprep.subr.bf16.mxu0 %v6496_v34  ;;  %v840_v50 = vld [vmem:[#allocation5 + $0x1e8] sm:$0xff]  ;;  %v1015_v37 = vld [vmem:[#allocation7 + $0xd0] sm:$0xff] }
  0x91   :  { %552 = vmatmul.mubr.f32.gmra.mrb[18].mxu0 %v6425_v59  ;;  %4831 = vmatprep.subr.bf16.mxu1 %v6500_v38 }
  0x92   :  { %665 = vmatmul.mubr.f32.gmra.mrb[18].mxu1 %v6425_v59  ;;  %4801 = vmatpush1.bf16.msra.mxu0 %v6504_v41  ;;  %v805_v59 = vld [vmem:[#allocation5 + $0xd0] sm:$0xff] }
  0x93   :  { %4833 = vmatpush1.bf16.msra.mxu1 %v6508_v44  ;;  %557 = vmatprep.mubr.f32.mxu0 %v7782_v0  ;;  %v6540_v7 = vpack.c.bf16 %v809_v62, %v805_v59  ;;  %v6592_v59 = vpack.c.bf16 %v840_v50, %v836_v46  ;;  %v841_v62 = vld [vmem:[#allocation5 + $0x1f0] sm:$0xff]  ;;  %v1010_v46 = vld [vmem:[#allocation7 + $0xa8] sm:$0xff]  ;;  %v1008_v50 = vld [vmem:[#allocation7 + $0x98] sm:$0xff] }
  0x94   :  { %670 = vmatprep.mubr.f32.mxu1 %v7782_v0  ;;  %4803 = vmatprep.subr.bf16.mxu0 %v6512_v48 }
  0x95   :  { %558 = vmatmul.mubr.f32.gmra.mrb[20].mxu0 %v6434_v9  ;;  %4835 = vmatprep.subr.bf16.mxu1 %v6516_v51 }
  0x96   :  { %671 = vmatmul.mubr.f32.gmra.mrb[20].mxu1 %v6434_v9  ;;  %4805 = vmatpush1.bf16.msra.mxu0 %v6520_v54  ;;  %v813_v9 = vld [vmem:[#allocation5 + $0x110] sm:$0xff] }
  0x97   :  { %4837 = vmatpush1.bf16.msra.mxu1 %v6524_v57  ;;  %563 = vmatprep.mubr.f32.mxu0 %v7782_v0  ;;  %v6556_v20 = vpack.c.bf16 %v817_v12, %v813_v9  ;;  %v989_v12 = vld [vmem:[#allocation7] sm:$0xff] }
  0x98   :  { %676 = vmatprep.mubr.f32.mxu1 %v7782_v0  ;;  %4807 = vmatprep.subr.bf16.mxu0 %v6528_v61  ;;  %v6616_v30 = vpack.c.bf16 %v993_v15, %v989_v12  ;;  %v1018_v12 = vld [vmem:[#allocation7 + $0xe8] sm:$0xff]  ;;  %v1016_v15 = vld [vmem:[#allocation7 + $0xd8] sm:$0xff] }
  0x99   :  { %564 = vmatmul.mubr.f32.gmra.mrb[22].mxu0 %v6443_v22  ;;  %4839 = vmatprep.subr.bf16.mxu1 %v6532_v1  ;;  %v6652_v23 = vpack.c.bf16 %v1018_v12, %v1014_v10  ;;  %v6655_v40 = vpack.c.bf16 %v1020_v16, %v1016_v15  ;;  %v1023_v10 = vld [vmem:[#allocation7 + $0x110] sm:$0xff]  ;;  %v1030_v16 = vld [vmem:[#allocation7 + $0x148] sm:$0xff] }
  0x9a   :  { %677 = vmatmul.mubr.f32.gmra.mrb[22].mxu1 %v6443_v22  ;;  %4809 = vmatpush1.bf16.msra.mxu0 %v6536_v4  ;;  %v821_v22 = vld [vmem:[#allocation5 + $0x150] sm:$0xff] }
  0x9b   :  { %4841 = vmatpush1.bf16.msra.mxu1 %v6540_v7  ;;  %569 = vmatprep.mubr.f32.mxu0 %v7782_v0  ;;  %v6572_v39 = vpack.c.bf16 %v825_v27, %v821_v22  ;;  %v1000_v22 = vld [vmem:[#allocation7 + $0x58] sm:$0xff]  ;;  %7865 = vst [vmem:[#allocation14_spill] sm:$0xff] %v6652_v23  ;;  %7866 = vst [vmem:[#allocation15_spill] sm:$0xff] %v6655_v40  ;;  %v1027_v15 = vld [vmem:[#allocation7 + $0x130] sm:$0xff] }
  0x9c   :  { %682 = vmatprep.mubr.f32.mxu1 %v7782_v0  ;;  %4811 = vmatprep.subr.bf16.mxu0 %v6544_v11  ;;  %v1004_v27 = vld [vmem:[#allocation7 + $0x78] sm:$0xff] }
  0x9d   :  { %570 = vmatmul.mubr.f32.gmra.mrb[24].mxu0 %v6452_v35  ;;  %4843 = vmatprep.subr.bf16.mxu1 %v6548_v13 }
  0x9e   :  { %683 = vmatmul.mubr.f32.gmra.mrb[24].mxu1 %v6452_v35  ;;  %4813 = vmatpush1.bf16.msra.mxu0 %v6552_v17  ;;  %v829_v35 = vld [vmem:[#allocation5 + $0x190] sm:$0xff] }
  0x9f   :  { %4845 = vmatpush1.bf16.msra.mxu1 %v6556_v20  ;;  %575 = vmatprep.mubr.f32.mxu0 %v7782_v0  ;;  %v6588_v56 = vpack.c.bf16 %v833_v45, %v829_v35  ;;  %v1003_v35 = vld [vmem:[#allocation7 + $0x70] sm:$0xff]  ;;  %v1006_v45 = vld [vmem:[#allocation7 + $0x88] sm:$0xff] }
  0xa0   :  { %688 = vmatprep.mubr.f32.mxu1 %v7782_v0  ;;  %4815 = vmatprep.subr.bf16.mxu0 %v6560_v26  ;;  %v6636_v58 = vpack.c.bf16 %v1003_v35, %v999_v42  ;;  %v6638_v60 = vpack.c.bf16 %v1010_v46, %v1006_v45  ;;  %v1019_v42 = vld [vmem:[#allocation7 + $0xf0] sm:$0xff]  ;;  %v1022_v35 = vld [vmem:[#allocation7 + $0x108] sm:$0xff]  ;;  %v1024_v46 = vld [vmem:[#allocation7 + $0x118] sm:$0xff] }
  0xa1   :  { %576 = vmatmul.mubr.f32.gmra.mrb[26].mxu0 %v6461_v49  ;;  %4847 = vmatprep.subr.bf16.mxu1 %v6564_v29  ;;  %v1026_v45 = vld [vmem:[#allocation7 + $0x128] sm:$0xff] }
  0xa2   :  { %689 = vmatmul.mubr.f32.gmra.mrb[26].mxu1 %v6461_v49  ;;  %4817 = vmatpush1.bf16.msra.mxu0 %v6568_v33  ;;  %v837_v49 = vld [vmem:[#allocation5 + $0x1d0] sm:$0xff] }
  0xa3   :  { %4849 = vmatpush1.bf16.msra.mxu1 %v6572_v39  ;;  %581 = vmatprep.mubr.f32.mxu0 %v7782_v0  ;;  %v6604_v9 = vpack.c.bf16 %v841_v62, %v837_v49  ;;  %v1005_v49 = vld [vmem:[#allocation7 + $0x80] sm:$0xff] }
  0xa4   :  { %694 = vmatprep.mubr.f32.mxu1 %v7782_v0  ;;  %4819 = vmatprep.subr.bf16.mxu0 %v6576_v43  ;;  %v1009_v62 = vld [vmem:[#allocation7 + $0xa0] sm:$0xff] }
  0xa5   :  { %582 = vmatmul.mubr.f32.gmra.mrb[28].mxu0 %v6470_v63  ;;  %4851 = vmatprep.subr.bf16.mxu1 %v6580_v47  ;;  %v6646_v18 = vpack.c.bf16 %v1009_v62, %v1005_v49  ;;  %v6662_v49 = vpack.c.bf16 %v1019_v42, %v1015_v37  ;;  %v6664_v62 = vpack.c.bf16 %v1026_v45, %v1022_v35  ;;  %v1029_v35 = vld [vmem:[#allocation7 + $0x140] sm:$0xff] }
  0xa6   :  { %695 = vmatmul.mubr.f32.gmra.mrb[28].mxu1 %v6470_v63  ;;  %4821 = vmatpush1.bf16.msra.mxu0 %v6584_v52  ;;  %v6608_v63 = vpack.c.bf16 %v994_v5, %v990_v3  ;;  %v1007_v3 = vld [vmem:[#allocation7 + $0x90] sm:$0xff]  ;;  %v6641_v5 = vpack.c.bf16 %v1012_v53, %v1008_v50  ;;  %v1028_v50 = vld [vmem:[#allocation7 + $0x138] sm:$0xff]  ;;  %v6674_v37 = vpack.c.bf16 %v1027_v15, %v1023_v10  ;;  %v1033_v45 = vld [vmem:[#allocation7 + $0x160] sm:$0xff] }
  0xa7   :  { %4853 = vmatpush1.bf16.msra.mxu1 %v6588_v56  ;;  %587 = vmatprep.mubr.f32.mxu0 %v7782_v0  ;;  %v6650_v19 = vpack.c.bf16 %v1011_v8, %v1007_v3  ;;  %7868 = vst [vmem:[#allocation17_spill] sm:$0xff] %v6662_v49  ;;  %7869 = vst [vmem:[#allocation18_spill] sm:$0xff] %v6664_v62  ;;  %v1021_v3 = vld [vmem:[#allocation7 + $0x100] sm:$0xff]  ;;  %v6667_v12 = vpack.c.bf16 %v1028_v50, %v1024_v46  ;;  %v1031_v46 = vld [vmem:[#allocation7 + $0x150] sm:$0xff] }
  0xa8   :  { %700 = vmatprep.mubr.f32.mxu1 %v7782_v0  ;;  %4823 = vmatprep.subr.bf16.mxu0 %v6592_v59  ;;  %v1025_v8 = vld [vmem:[#allocation7 + $0x120] sm:$0xff]  ;;  %7872 = vst [vmem:[#allocation21_spill] sm:$0xff] %v6674_v37 }
  0xa9   :  { %588 = vmatmul.mubr.f32.gmra.mrb[30].mxu0 %v6479_v14  ;;  %4855 = vmatprep.subr.bf16.mxu1 %v6596_v2  ;;  %7864 = vst [vmem:[#allocation13_spill] sm:$0xff] %v6650_v19  ;;  %7870 = vst [vmem:[#allocation19_spill] sm:$0xff] %v6667_v12  ;;  %v1037_v15 = vld [vmem:[#allocation7 + $0x180] sm:$0xff] }
  0xaa   :  { %701 = vmatmul.mubr.f32.gmra.mrb[30].mxu1 %v6479_v14  ;;  %4825 = vmatpush1.bf16.msra.mxu0 %v6600_v6  ;;  %v6626_v14 = vpack.c.bf16 %v1004_v27, %v1000_v22  ;;  %v1013_v22 = vld [vmem:[#allocation7 + $0xc0] sm:$0xff] }
  0xab   :  { %4857 = vmatpush1.bf16.msra.mxu1 %v6604_v9  ;;  %907 = vmatprep.mubr.f32.mxu0 %v7782_v0  ;;  %v1017_v27 = vld [vmem:[#allocation7 + $0xe0] sm:$0xff] }
  0xac   :  { %978 = vmatprep.mubr.f32.mxu1 %v7782_v0  ;;  %4859 = vmatprep.subr.bf16.mxu0 %v6608_v63  ;;  %v6658_v53 = vpack.c.bf16 %v1017_v27, %v1013_v22  ;;  %v1032_v22 = vld [vmem:[#allocation7 + $0x158] sm:$0xff] }
  0xad   :  { %908 = vmatmul.mubr.f32.vlgmr.msra.gmra.mrb[0].mxu0 %v7782_v0  ;;  %4891 = vmatprep.subr.bf16.mxu1 %v6612_v24  ;;  %v1036_v27 = vld [vmem:[#allocation7 + $0x178] sm:$0xff] }
  0xae   :  { %979 = vmatmul.mubr.f32.vlgmr.msra.gmra.mrb[0].mxu1 %v7782_v0  ;;  %4861 = vmatpush1.bf16.msra.mxu0 %v6616_v30  ;;  %7867 = vst [vmem:[#allocation16_spill] sm:$0xff] %v6658_v53  ;;  %v6679_v50 = vpack.c.bf16 %v1036_v27, %v1032_v22  ;;  %v1039_v22 = vld [vmem:[#allocation7 + $0x190] sm:$0xff] }
  0xaf   :  { %4893 = vmatpush1.bf16.msra.mxu1 %v6620_v32  ;;  %4863 = vmatprep.subr.bf16.mxu0 %v6622_v36 }
  0xb0   :  { %4895 = vmatprep.subr.bf16.mxu1 %v6626_v14  ;;  %1117 = vmatprep.mubr.f32.mxu0 %v7782_v0  ;;  %7873 = vst [vmem:[#allocation22_spill] sm:$0xff] %v6679_v50 }
  0xb1   :  { %1188 = vmatprep.mubr.f32.mxu1 %v7782_v0  ;;  %v1034_v0 = vld [vmem:[#allocation7 + $0x168] sm:$0xff] }
  0xb2   :  { %4865 = vmatpush1.bf16.msra.mxu0 %v6632_v55  ;;  %v6676_v42 = vpack.c.bf16 %v1034_v0, %v1030_v16  ;;  %v1041_v16 = vld [vmem:[#allocation7 + $0x1a0] sm:$0xff] }
  0xb3   :  { %4897 = vmatpush1.bf16.msra.mxu1 %v6636_v58  ;;  %4867 = vmatprep.subr.bf16.mxu0 %v6638_v60 }
  0xb4   :  { %4899 = vmatprep.subr.bf16.mxu1 %v6641_v5 }
  0xb6   :  { %4869 = vmatpush1.bf16.msra.mxu0 %v6646_v18 }
  0xb7   :  { %4901 = vmatpush1.bf16.msra.mxu1 %v6650_v19  ;;  %4871 = vmatprep.subr.bf16.mxu0 %v6652_v23  ;;  %v6670_v19 = vpack.c.bf16 %v1025_v8, %v1021_v3  ;;  %v1038_v23 = vld [vmem:[#allocation7 + $0x188] sm:$0xff]  ;;  %v1040_v3 = vld [vmem:[#allocation7 + $0x198] sm:$0xff] }
  0xb8   :  { %4903 = vmatprep.subr.bf16.mxu1 %v6655_v40  ;;  %v1035_v40 = vld [vmem:[#allocation7 + $0x170] sm:$0xff]  ;;  %v1044_v8 = vld [vmem:[#allocation7 + $0x1b8] sm:$0xff] }
  0xb9   :  { %7871 = vst [vmem:[#allocation20_spill] sm:$0xff] %v6670_v19  ;;  %v6686_v0 = vpack.c.bf16 %v1035_v40, %v1031_v46  ;;  %v6691_v27 = vpack.c.bf16 %v1044_v8, %v1040_v3  ;;  %v1049_v46 = vld [vmem:[#allocation7 + $0x1e0] sm:$0xff]  ;;  %v1047_v8 = vld [vmem:[#allocation7 + $0x1d0] sm:$0xff] }
  0xba   :  { %4873 = vmatpush1.bf16.msra.mxu0 %v6658_v53  ;;  %v1042_v53 = vld [vmem:[#allocation7 + $0x1a8] sm:$0xff] }
  0xbb   :  { %4905 = vmatpush1.bf16.msra.mxu1 %v6662_v49  ;;  %4875 = vmatprep.subr.bf16.mxu0 %v6664_v62  ;;  %v6682_v49 = vpack.c.bf16 %v1033_v45, %v1029_v35  ;;  %v6688_v10 = vpack.c.bf16 %v1042_v53, %v1038_v23  ;;  %v1046_v62 = vld [vmem:[#allocation7 + $0x1c8] sm:$0xff]  ;;  %v1048_v35 = vld [vmem:[#allocation7 + $0x1d8] sm:$0xff]  ;;  %v1045_v53 = vld [vmem:[#allocation7 + $0x1c0] sm:$0xff] }
  0xbc   :  { %4907 = vmatprep.subr.bf16.mxu1 %v6667_v12  ;;  %v1043_v12 = vld [vmem:[#allocation7 + $0x1b0] sm:$0xff]  ;;  %v1052_v45 = vld [vmem:[#allocation7 + $0x1f8] sm:$0xff] }
  0xbd   :  { %v6698_v23 = vpack.c.bf16 %v1043_v12, %v1039_v22  ;;  %v6703_v3 = vpack.c.bf16 %v1052_v45, %v1048_v35 }
  0xbe   :  { %4877 = vmatpush1.bf16.msra.mxu0 %v6670_v19  ;;  %v1050_v19 = vld [vmem:[#allocation7 + $0x1e8] sm:$0xff] }
  0xbf   :  { %4909 = vmatpush1.bf16.msra.mxu1 %v6674_v37  ;;  %4879 = vmatprep.subr.bf16.mxu0 %v6676_v42  ;;  %v6694_v37 = vpack.c.bf16 %v1041_v16, %v1037_v15  ;;  %v6700_v40 = vpack.c.bf16 %v1050_v19, %v1046_v62  ;;  %v6706_v15 = vpack.c.bf16 %v1049_v46, %v1045_v53  ;;  %v7874_v19 = vmov 0.0  }
  0xc0   :  { %4911 = vmatprep.subr.bf16.mxu1 %v6679_v50  ;;  %v1051_v50 = vld [vmem:[#allocation7 + $0x1f0] sm:$0xff] }
  0xc1   :  { %v6710_v12 = vpack.c.bf16 %v1051_v50, %v1047_v8 }
  0xc2   :  { %4881 = vmatpush1.bf16.msra.mxu0 %v6682_v49 }
  0xc3   :  { %4913 = vmatpush1.bf16.msra.mxu1 %v6686_v0  ;;  %4883 = vmatprep.subr.bf16.mxu0 %v6688_v10 }
  0xc4   :  { %4915 = vmatprep.subr.bf16.mxu1 %v6691_v27 }
  0xc6   :  { %4885 = vmatpush1.bf16.msra.mxu0 %v6694_v37 }
  0xc7   :  { %4917 = vmatpush1.bf16.msra.mxu1 %v6698_v23  ;;  %4887 = vmatprep.subr.bf16.mxu0 %v6700_v40 }
  0xc8   :  { %4919 = vmatprep.subr.bf16.mxu1 %v6703_v3 }
  0xca   :  { %4889 = vmatpush1.bf16.msra.mxu0 %v6706_v15 }
  0xcb   :  { %4921 = vmatpush1.bf16.msra.mxu1 %v6710_v12  ;;  %4923 = vmatprep.subr.bf16.mxu0 %v6483_v21  ;;  %v215_v21 = vlaneseq }
  0xcc   :  { %4955 = vmatprep.subr.bf16.mxu1 %v6486_v25 }
  0xcd   :  { %1118 = vmatmul.mubr.f32.vlgmr.msra.gmra.mrb[30].mxu0 %v7874_v19  ;;  %v216_v25 = vshrl.u32 %v215_v21, 7 }
  0xce   :  { %1189 = vmatmul.mubr.f32.vlgmr.msra.gmra.mrb[30].mxu1 %v7874_v19  ;;  %4925 = vmatpush1.bf16.msra.mxu0 %v6489_v28 }
  0xcf   :  { %4957 = vmatpush1.bf16.msra.mxu1 %v6492_v31  ;;  %4927 = vmatprep.subr.bf16.mxu0 %v6496_v34  ;;  %v217_v28 = vsub.s32 0, %v216_v25  ;;  %v213_v31 = vld [vmem:[#allocation8] sm:$0xff]  ;;  %v221_v34 = vsub.s32 1, %v216_v25  ;;  %v245_v45 = vsub.s32 7, %v216_v25 }
  0xd0   :  { %4959 = vmatprep.subr.bf16.mxu1 %v6500_v38  ;;  %1385 = vmatprep.mubr.f32.mxu0 %v7874_v19 }
  0xd1   :  { %1456 = vmatprep.mubr.f32.mxu1 %v7874_v19  ;;  %v6753_v38 = vrot.slane %v213_v31, %v217_v28 }
  0xd2   :  { %4929 = vmatpush1.bf16.msra.mxu0 %v6504_v41  ;;  %v6755_v41 = vrot.slane %v213_v31, %v221_v34 }
  0xd3   :  { %4961 = vmatpush1.bf16.msra.mxu1 %v6508_v44  ;;  %4931 = vmatprep.subr.bf16.mxu0 %v6512_v48  ;;  %7875 = vst [vmem:[#allocation23_spill] sm:$0xff] %v6753_v38  ;;  %v229_v48 = vsub.s32 3, %v216_v25 }
  0xd4   :  { %4963 = vmatprep.subr.bf16.mxu1 %v6516_v51  ;;  %7876 = vst [vmem:[#allocation24_spill] sm:$0xff] %v6755_v41 }
  0xd6   :  { %4933 = vmatpush1.bf16.msra.mxu0 %v6520_v54 }
  0xd7   :  { %4965 = vmatpush1.bf16.msra.mxu1 %v6524_v57  ;;  %4935 = vmatprep.subr.bf16.mxu0 %v6528_v61 }
  0xd8   :  { %4967 = vmatprep.subr.bf16.mxu1 %v6532_v1 }
  0xda   :  { %4937 = vmatpush1.bf16.msra.mxu0 %v6536_v4 }
  0xdb   :  { %4969 = vmatpush1.bf16.msra.mxu1 %v6540_v7  ;;  %4939 = vmatprep.subr.bf16.mxu0 %v6544_v11  ;;  %v6759_v11 = vrot.slane %v213_v31, %v229_v48  ;;  %v6774_v48 = vrot.slane %v213_v31, %v245_v45  ;;  %v1746_v45 = vld [vmem:[#allocation5 + $0x58] sm:$0xff] }
  0xdc   :  { %4971 = vmatprep.subr.bf16.mxu1 %v6548_v13  ;;  %v225_v13 = vsub.s32 2, %v216_v25 }
  0xdd   :  { %7877 = vst [vmem:[#allocation25_spill] sm:$0xff] %v6759_v11  ;;  %7881 = vst [vmem:[#allocation29_spill] sm:$0xff] %v6774_v48 }
  0xde   :  { %4941 = vmatpush1.bf16.msra.mxu0 %v6552_v17 }
  0xdf   :  { %4973 = vmatpush1.bf16.msra.mxu1 %v6556_v20  ;;  %4943 = vmatprep.subr.bf16.mxu0 %v6560_v26  ;;  %v6762_v20 = vrot.slane %v213_v31, %v225_v13 }
  0xe0   :  { %4975 = vmatprep.subr.bf16.mxu1 %v6564_v29 }
  0xe1   :  { %7878 = vst [vmem:[#allocation26_spill] sm:$0xff] %v6762_v20 }
  0xe2   :  { %4945 = vmatpush1.bf16.msra.mxu0 %v6568_v33 }
  0xe3   :  { %4977 = vmatpush1.bf16.msra.mxu1 %v6572_v39  ;;  %4947 = vmatprep.subr.bf16.mxu0 %v6576_v43 }
  0xe4   :  { %4979 = vmatprep.subr.bf16.mxu1 %v6580_v47 }
  0xe6   :  { %4949 = vmatpush1.bf16.msra.mxu0 %v6584_v52  ;;  %v233_v52 = vsub.s32 4, %v216_v25 }
  0xe7   :  { %4981 = vmatpush1.bf16.msra.mxu1 %v6588_v56  ;;  %4951 = vmatprep.subr.bf16.mxu0 %v6592_v59  ;;  %v237_v59 = vsub.s32 5, %v216_v25 }
  0xe8   :  { %4983 = vmatprep.subr.bf16.mxu1 %v6596_v2  ;;  %v6765_v62 = vrot.slane %v213_v31, %v233_v52 }
  0xe9   :  { %v6767_v16 = vrot.slane %v213_v31, %v237_v59  ;;  %v7890_v59 = vld [vmem:[#allocation21_spill] sm:$0xff] }
  0xea   :  { %4953 = vmatpush1.bf16.msra.mxu0 %v6600_v6  ;;  %7879 = vst [vmem:[#allocation27_spill] sm:$0xff] %v6765_v62 }
  0xeb   :  { %4985 = vmatpush1.bf16.msra.mxu1 %v6604_v9  ;;  %4987 = vmatprep.subr.bf16.mxu0 %v6608_v63  ;;  %7880 = vst [vmem:[#allocation28_spill] sm:$0xff] %v6767_v16 }
  0xec   :  { %5019 = vmatprep.subr.bf16.mxu1 %v6612_v24 }
 0x180   :  { %v909_v44 = vpop.f32.mrb[0].mxu0 }
 0x181   :  { %v5818_v51 = vadd.f32 %v909_v44, %v6753_v38  ;;  %v980_v54 = vpop.f32.mrb[0].mxu1  ;;  %v911_v57 = vpop.f32.mrb[1].mxu0 }
 0x182   :  { %v5819_v61 = vadd.f32 %v911_v57, %v6755_v41  ;;  %v982_v1 = vpop.f32.mrb[1].mxu1  ;;  %v5834_v29 = vadd.f32 %v980_v54, %v6762_v20 }
 0x183   :  { %v4618_v4 = vmul.f32 -1.442695, %v5818_v51  ;;  %v5835_v17 = vadd.f32 %v982_v1, %v6759_v11  ;;  %v241_v51 = vsub.s32 6, %v216_v25 }
 0x184   :  { %v4619_v7 = vmul.f32 -1.442695, %v5819_v61 }
 0x185   :  { %5955 = vpow2.f32 %v4618_v4  ;;  %v4620_v26 = vmul.f32 -1.442695, %v5835_v17  ;;  %v6777_v57 = vrot.slane %v213_v31, %v241_v51  ;;  %v1749_v51 = vld [vmem:[#allocation5 + $0x70] sm:$0xff] }
 0x186   :  { %5957 = vpow2.f32 %v4619_v7 }
 0x187   :  { %5959 = vpow2.f32 %v4620_v26 }
 0x188   :  { %5961 = vtanh.f32 %v5834_v29 }
 0x18f   :  { %v5956_v33 = vpop.eup %5955 }
 0x190   :  { %v5958_v39 = vpop.eup %5957  ;;  %v1202_v43 = vadd.f32 1.0, %v5956_v33 }
 0x191   :  { %v1208_v47 = vadd.f32 1.0, %v5958_v39  ;;  %v5960_v56 = vpop.eup %5959  ;;  %v7885_v39 = vld [vmem:[#allocation16_spill] sm:$0xff] }
 0x192   :  { %5963 = vrcp.f32 %v1202_v43  ;;  %v5962_v2 = vpop.eup %5961  ;;  %v1215_v24 = vadd.f32 1.0, %v5960_v56  ;;  %v7889_v56 = vld [vmem:[#allocation20_spill] sm:$0xff] }
 0x193   :  { %5965 = vrcp.f32 %v1208_v47  ;;  %v7887_v47 = vld [vmem:[#allocation18_spill] sm:$0xff] }
 0x194   :  { %5967 = vrcp.f32 %v1215_v24 }
 0x19c   :  { %v5964_v6 = vpop.eup %5963 }
 0x19d   :  { %v5966_v9 = vpop.eup %5965  ;;  %v1219_v63 = vmul.f32 %v5964_v6, %v5962_v2  ;;  %v7891_v2 = vld [vmem:[#allocation22_spill] sm:$0xff] }
 0x19e   :  { %v1218_v50 = vmul.f32 0.0, %v5966_v9  ;;  %v5968_v61 = vpop.eup %5967  ;;  %v1737_v9 = vld [vmem:[#allocation5 + $0x10] sm:$0xff] }
 0x1a0   :  { %v6769_v22 = vadd.f32 %v1219_v63, %v1218_v50  ;;  %v1119_v35 = vpop.f32.mrb[30].mxu0  ;;  %v1741_v63 = vld [vmem:[#allocation5 + $0x30] sm:$0xff]  ;;  %v1744_v50 = vld [vmem:[#allocation5 + $0x48] sm:$0xff] }
 0x1a1   :  { %v5864_v53 = vadd.f32 %v1119_v35, %v6765_v62  ;;  %v1190_v46 = vpop.f32.mrb[30].mxu1  ;;  %v1121_v8 = vpop.f32.mrb[31].mxu0  ;;  %v6830_v24 = vpack.c.bf16 %v1741_v63, %v1737_v9  ;;  %v1748_v35 = vld [vmem:[#allocation5 + $0x68] sm:$0xff] }
 0x1a2   :  { %5969 = vtanh.f32 %v6769_v22  ;;  %v5865_v21 = vadd.f32 %v1121_v8, %v6767_v16  ;;  %v1192_v28 = vpop.f32.mrb[31].mxu1  ;;  %v5880_v7 = vadd.f32 %v1190_v46, %v6777_v57  ;;  %v1750_v46 = vld [vmem:[#allocation5 + $0x78] sm:$0xff]  ;;  %v1743_v8 = vld [vmem:[#allocation5 + $0x40] sm:$0xff]  ;;  %v1776_v63 = vld [vmem:[#allocation5 + $0x148] sm:$0xff] }
 0x1a3   :  { %v4621_v34 = vmul.f32 -1.442695, %v5864_v53  ;;  %v5881_v54 = vadd.f32 %v1192_v28, %v6774_v48  ;;  %v6835_v53 = vpack.c.bf16 %v1748_v35, %v1744_v50  ;;  %v6837_v28 = vpack.c.bf16 %v1750_v46, %v1746_v45  ;;  %v1780_v50 = vld [vmem:[#allocation5 + $0x168] sm:$0xff]  ;;  %v1778_v35 = vld [vmem:[#allocation5 + $0x158] sm:$0xff] }
 0x1a4   :  { %v4622_v44 = vmul.f32 -1.442695, %v5865_v21  ;;  %v1747_v21 = vld [vmem:[#allocation5 + $0x60] sm:$0xff]  ;;  %v6883_v45 = vpack.c.bf16 %v1780_v50, %v1776_v63  ;;  %v1782_v46 = vld [vmem:[#allocation5 + $0x178] sm:$0xff]  ;;  %v1793_v63 = vld [vmem:[#allocation5 + $0x1d0] sm:$0xff] }
 0x1a5   :  { %5971 = vpow2.f32 %v4621_v34  ;;  %v4623_v4 = vmul.f32 -1.442695, %v5881_v54  ;;  %v6839_v34 = vpack.c.bf16 %v1747_v21, %v1743_v8  ;;  %v1775_v8 = vld [vmem:[#allocation5 + $0x140] sm:$0xff]  ;;  %v1797_v50 = vld [vmem:[#allocation5 + $0x1f0] sm:$0xff] }
 0x1a6   :  { %5973 = vpow2.f32 %v4622_v44  ;;  %v1745_v44 = vld [vmem:[#allocation5 + $0x50] sm:$0xff]  ;;  %v1779_v21 = vld [vmem:[#allocation5 + $0x160] sm:$0xff] }
 0x1a7   :  { %5975 = vpow2.f32 %v4623_v4  ;;  %v6842_v54 = vpack.c.bf16 %v1749_v51, %v1745_v44  ;;  %v1754_v4 = vld [vmem:[#allocation5 + $0x98] sm:$0xff]  ;;  %v6885_v44 = vpack.c.bf16 %v1782_v46, %v1778_v35  ;;  %v6887_v51 = vpack.c.bf16 %v1779_v21, %v1775_v8  ;;  %v1946_v46 = vld [vmem:[#allocation7 + $0x8] sm:$0xff] }
 0x1a8   :  { %5977 = vtanh.f32 %v5880_v7  ;;  %v6914_v35 = vpack.c.bf16 %v1797_v50, %v1793_v63  ;;  %v1950_v8 = vld [vmem:[#allocation7 + $0x28] sm:$0xff]  ;;  %v1948_v21 = vld [vmem:[#allocation7 + $0x18] sm:$0xff] }
 0x1ac   :  { %v5970_v1 = vpop.eup %5969 }
 0x1ad   :  { %v1222_v13 = vmul.f32 %v5970_v1, %v5968_v61  ;;  %v1752_v61 = vld [vmem:[#allocation5 + $0x88] sm:$0xff] }
 0x1ae   :  { %v1756_v1 = vld [vmem:[#allocation5 + $0xa8] sm:$0xff] }
 0x1af   :  { %v5972_v17 = vpop.eup %5971  ;;  %1247 = vst [vmem:[%s7778_s5] sm:$0xff] %v1222_v13  ;;  %1386 = vmatmul.mubr.f32.vlgmr.msra.gmra.mrb[2].mxu0 %v1222_v13  ;;  %1457 = vmatmul.mubr.f32.vlgmr.msra.gmra.mrb[2].mxu1 %v1222_v13  ;;  %v6847_v7 = vpack.c.bf16 %v1756_v1, %v1752_v61  ;;  %v1758_v13 = vld [vmem:[#allocation5 + $0xb8] sm:$0xff]  ;;  %v1777_v61 = vld [vmem:[#allocation5 + $0x150] sm:$0xff] }
 0x1b0   :  { %v5974_v26 = vpop.eup %5973  ;;  %v1226_v25 = vadd.f32 1.0, %v5972_v17  ;;  %4989 = vmatpush1.bf16.msra.mxu0 %v6616_v30  ;;  %5021 = vmatpush1.bf16.msra.mxu1 %v6620_v32  ;;  %v7882_v30 = vld [vmem:[#allocation13_spill] sm:$0xff]  ;;  %v7883_v32 = vld [vmem:[#allocation14_spill] sm:$0xff]  ;;  %v1751_v17 = vld [vmem:[#allocation5 + $0x80] sm:$0xff] }
 0x1b1   :  { %v1232_v31 = vadd.f32 1.0, %v5974_v26  ;;  %4991 = vmatprep.subr.bf16.mxu0 %v6622_v36  ;;  %5023 = vmatprep.subr.bf16.mxu1 %v6626_v14  ;;  %v7884_v36 = vld [vmem:[#allocation15_spill] sm:$0xff]  ;;  %v5976_v14 = vpop.eup %5975  ;;  %v1755_v26 = vld [vmem:[#allocation5 + $0xa0] sm:$0xff]  ;;  %v1781_v1 = vld [vmem:[#allocation5 + $0x170] sm:$0xff] }
 0x1b2   :  { %5979 = vrcp.f32 %v1226_v25  ;;  %1595 = vmatprep.mubr.f32.mxu0 %v7874_v19  ;;  %1666 = vmatprep.mubr.f32.mxu1 %v7874_v19  ;;  %v5978_v29 = vpop.eup %5977  ;;  %v6849_v25 = vpack.c.bf16 %v1758_v13, %v1754_v4  ;;  %v6890_v4 = vpack.c.bf16 %v1781_v1, %v1777_v61  ;;  %v1784_v13 = vld [vmem:[#allocation5 + $0x188] sm:$0xff]  ;;  %v6919_v61 = vpack.c.bf16 %v1950_v8, %v1946_v46  ;;  %v1952_v1 = vld [vmem:[#allocation7 + $0x38] sm:$0xff] }
 0x1b3   :  { %5981 = vrcp.f32 %v1232_v31  ;;  %v6851_v31 = vpack.c.bf16 %v1755_v26, %v1751_v17  ;;  %v1788_v17 = vld [vmem:[#allocation5 + $0x1a8] sm:$0xff]  ;;  %v1786_v26 = vld [vmem:[#allocation5 + $0x198] sm:$0xff] }
 0x1b4   :  { %4993 = vmatpush1.bf16.msra.mxu0 %v6632_v55  ;;  %5025 = vmatpush1.bf16.msra.mxu1 %v6636_v58  ;;  %v7886_v55 = vld [vmem:[#allocation17_spill] sm:$0xff] }
 0x1b5   :  { %4995 = vmatprep.subr.bf16.mxu0 %v6638_v60  ;;  %5027 = vmatprep.subr.bf16.mxu1 %v6641_v5  ;;  %v1239_v60 = vadd.f32 1.0, %v5976_v14  ;;  %v7888_v5 = vld [vmem:[#allocation19_spill] sm:$0xff]  ;;  %v1760_v14 = vld [vmem:[#allocation5 + $0xc8] sm:$0xff] }
 0x1b7   :  { %5983 = vrcp.f32 %v1239_v60 }
 0x1b8   :  { %4997 = vmatpush1.bf16.msra.mxu0 %v6646_v18  ;;  %5029 = vmatpush1.bf16.msra.mxu1 %v7882_v30  ;;  %v1753_v30 = vld [vmem:[#allocation5 + $0x90] sm:$0xff] }
 0x1b9   :  { %4999 = vmatprep.subr.bf16.mxu0 %v7883_v32  ;;  %5031 = vmatprep.subr.bf16.mxu1 %v7884_v36  ;;  %v1757_v32 = vld [vmem:[#allocation5 + $0xb0] sm:$0xff] }
 0x1ba   :  { %v6854_v36 = vpack.c.bf16 %v1757_v32, %v1753_v30  ;;  %v6895_v30 = vpack.c.bf16 %v1788_v17, %v1784_v13  ;;  %v1790_v32 = vld [vmem:[#allocation5 + $0x1b8] sm:$0xff]  ;;  %v6921_v13 = vpack.c.bf16 %v1952_v1, %v1948_v21 }
 0x1bc   :  { %v5980_v33 = vpop.eup %5979  ;;  %5001 = vmatpush1.bf16.msra.mxu0 %v7885_v39  ;;  %5033 = vmatpush1.bf16.msra.mxu1 %v7886_v55  ;;  %v1766_v55 = vld [vmem:[#allocation5 + $0xf8] sm:$0xff] }
 0x1bd   :  { %v5982_v58 = vpop.eup %5981  ;;  %v1243_v43 = vmul.f32 %v5980_v33, %v5978_v29  ;;  %5003 = vmatprep.subr.bf16.mxu0 %v7887_v47  ;;  %5035 = vmatprep.subr.bf16.mxu1 %v7888_v5  ;;  %v1764_v29 = vld [vmem:[#allocation5 + $0xe8] sm:$0xff]  ;;  %v1762_v33 = vld [vmem:[#allocation5 + $0xd8] sm:$0xff]  ;;  %v1761_v5 = vld [vmem:[#allocation5 + $0xd0] sm:$0xff] }
 0x1be   :  { %v1242_v18 = vmul.f32 0.0, %v5982_v58  ;;  %v6859_v39 = vpack.c.bf16 %v1764_v29, %v1760_v14  ;;  %v1759_v58 = vld [vmem:[#allocation5 + $0xc0] sm:$0xff]  ;;  %v6861_v60 = vpack.c.bf16 %v1766_v55, %v1762_v33  ;;  %v6897_v33 = vpack.c.bf16 %v1790_v32, %v1786_v26 }
 0x1bf   :  { %v1783_v14 = vld [vmem:[#allocation5 + $0x180] sm:$0xff] }
 0x1c0   :  { %v6801_v52 = vadd.f32 %v1243_v43, %v1242_v18  ;;  %5005 = vmatpush1.bf16.msra.mxu0 %v7889_v56  ;;  %5037 = vmatpush1.bf16.msra.mxu1 %v7890_v59  ;;  %v1763_v43 = vld [vmem:[#allocation5 + $0xe0] sm:$0xff]  ;;  %v1765_v18 = vld [vmem:[#allocation5 + $0xf0] sm:$0xff]  ;;  %v1768_v59 = vld [vmem:[#allocation5 + $0x108] sm:$0xff] }
 0x1c1   :  { %5007 = vmatprep.subr.bf16.mxu0 %v6676_v42  ;;  %5039 = vmatprep.subr.bf16.mxu1 %v7891_v2  ;;  %v5984_v42 = vpop.eup %5983  ;;  %v6863_v47 = vpack.c.bf16 %v1763_v43, %v1759_v58  ;;  %v6866_v56 = vpack.c.bf16 %v1765_v18, %v1761_v5  ;;  %v1772_v2 = vld [vmem:[#allocation5 + $0x128] sm:$0xff]  ;;  %v1787_v29 = vld [vmem:[#allocation5 + $0x1a0] sm:$0xff]  ;;  %v1785_v58 = vld [vmem:[#allocation5 + $0x190] sm:$0xff] }
 0x1c2   :  { %5985 = vtanh.f32 %v6801_v52  ;;  %v6899_v55 = vpack.c.bf16 %v1787_v29, %v1783_v14  ;;  %v1789_v43 = vld [vmem:[#allocation5 + $0x1b0] sm:$0xff]  ;;  %v1792_v18 = vld [vmem:[#allocation5 + $0x1c8] sm:$0xff] }
 0x1c3   :  { %v6902_v5 = vpack.c.bf16 %v1789_v43, %v1785_v58 }
 0x1c4   :  { %5009 = vmatpush1.bf16.msra.mxu0 %v6682_v49  ;;  %5041 = vmatpush1.bf16.msra.mxu1 %v6686_v0  ;;  %v1740_v0 = vld [vmem:[#allocation5 + $0x28] sm:$0xff] }
 0x1c5   :  { %5011 = vmatprep.subr.bf16.mxu0 %v6688_v10  ;;  %5043 = vmatprep.subr.bf16.mxu1 %v6691_v27  ;;  %v1738_v10 = vld [vmem:[#allocation5 + $0x18] sm:$0xff] }
 0x1c8   :  { %5013 = vmatpush1.bf16.msra.mxu0 %v6694_v37  ;;  %5045 = vmatpush1.bf16.msra.mxu1 %v6698_v23  ;;  %v1736_v37 = vld [vmem:[#allocation5 + $0x8] sm:$0xff]  ;;  %v1742_v23 = vld [vmem:[#allocation5 + $0x38] sm:$0xff] }
 0x1c9   :  { %5015 = vmatprep.subr.bf16.mxu0 %v6700_v40  ;;  %5047 = vmatprep.subr.bf16.mxu1 %v6703_v3  ;;  %v6823_v27 = vpack.c.bf16 %v1740_v0, %v1736_v37  ;;  %v1735_v40 = vld [vmem:[#allocation5] sm:$0xff] }
 0x1ca   :  { %v1739_v3 = vld [vmem:[#allocation5 + $0x20] sm:$0xff] }
 0x1cb   :  { %v1767_v37 = vld [vmem:[#allocation5 + $0x100] sm:$0xff] }
 0x1cc   :  { %v5986_v6 = vpop.eup %5985  ;;  %5017 = vmatpush1.bf16.msra.mxu0 %v6706_v15  ;;  %5049 = vmatpush1.bf16.msra.mxu1 %v6710_v12  ;;  %v6825_v15 = vpack.c.bf16 %v1742_v23, %v1738_v10  ;;  %v6827_v12 = vpack.c.bf16 %v1739_v3, %v1735_v40  ;;  %v1771_v0 = vld [vmem:[#allocation5 + $0x120] sm:$0xff]  ;;  %v1769_v40 = vld [vmem:[#allocation5 + $0x110] sm:$0xff] }
 0x1cd   :  { %v1246_v49 = vmul.f32 %v5986_v6, %v5984_v42  ;;  %5051 = vmatprep.subr.bf16.mxu0 %v6823_v27  ;;  %v1770_v42 = vld [vmem:[#allocation5 + $0x118] sm:$0xff]  ;;  %v6871_v6 = vpack.c.bf16 %v1772_v2, %v1768_v59  ;;  %v6875_v23 = vpack.c.bf16 %v1771_v0, %v1767_v37  ;;  %v1773_v3 = vld [vmem:[#allocation5 + $0x130] sm:$0xff]  ;;  %v1796_v59 = vld [vmem:[#allocation5 + $0x1e8] sm:$0xff] }
 0x1ce   :  { %5083 = vmatprep.subr.bf16.mxu1 %v6825_v15  ;;  %v6878_v9 = vpack.c.bf16 %v1773_v3, %v1769_v40  ;;  %v1794_v2 = vld [vmem:[#allocation5 + $0x1d8] sm:$0xff]  ;;  %v1791_v37 = vld [vmem:[#allocation5 + $0x1c0] sm:$0xff] }
 0x1cf   :  { %1248 = vst [vmem:[%s7779_s6 + $0x38] sm:$0xff] %v1246_v49  ;;  %1596 = vmatmul.mubr.f32.vlgmr.msra.gmra.mrb[28].mxu0 %v1246_v49  ;;  %1667 = vmatmul.mubr.f32.vlgmr.msra.gmra.mrb[28].mxu1 %v1246_v49  ;;  %v1774_v49 = vld [vmem:[#allocation5 + $0x138] sm:$0xff]  ;;  %v1795_v0 = vld [vmem:[#allocation5 + $0x1e0] sm:$0xff] }
 0x1d0   :  { %1863 = vmatprep.mubr.f32.mxu0 %v7874_v19  ;;  %1934 = vmatprep.mubr.f32.mxu1 %v7874_v19  ;;  %v6873_v10 = vpack.c.bf16 %v1774_v49, %v1770_v42  ;;  %v6907_v42 = vpack.c.bf16 %v1796_v59, %v1792_v18  ;;  %v1798_v49 = vld [vmem:[#allocation5 + $0x1f8] sm:$0xff]  ;;  %v6911_v3 = vpack.c.bf16 %v1795_v0, %v1791_v37 }
 0x1d1   :  { %5053 = vmatpush1.bf16.msra.mxu0 %v6827_v12  ;;  %5085 = vmatpush1.bf16.msra.mxu1 %v6830_v24  ;;  %v6909_v40 = vpack.c.bf16 %v1798_v49, %v1794_v2 }
 0x1d2   :  { %5055 = vmatprep.subr.bf16.mxu0 %v6835_v53  ;;  %5087 = vmatprep.subr.bf16.mxu1 %v6837_v28 }
 0x1d5   :  { %5057 = vmatpush1.bf16.msra.mxu0 %v6839_v34  ;;  %5089 = vmatpush1.bf16.msra.mxu1 %v6842_v54 }
 0x1d6   :  { %5059 = vmatprep.subr.bf16.mxu0 %v6847_v7  ;;  %5091 = vmatprep.subr.bf16.mxu1 %v6849_v25 }
 0x1d9   :  { %5061 = vmatpush1.bf16.msra.mxu0 %v6851_v31  ;;  %5093 = vmatpush1.bf16.msra.mxu1 %v6854_v36 }
 0x1da   :  { %5063 = vmatprep.subr.bf16.mxu0 %v6859_v39  ;;  %5095 = vmatprep.subr.bf16.mxu1 %v6861_v60 }
 0x1dd   :  { %5065 = vmatpush1.bf16.msra.mxu0 %v6863_v47  ;;  %5097 = vmatpush1.bf16.msra.mxu1 %v6866_v56 }
 0x1de   :  { %5067 = vmatprep.subr.bf16.mxu0 %v6871_v6  ;;  %5099 = vmatprep.subr.bf16.mxu1 %v6873_v10 }
 0x1e1   :  { %5069 = vmatpush1.bf16.msra.mxu0 %v6875_v23  ;;  %5101 = vmatpush1.bf16.msra.mxu1 %v6878_v9 }
 0x1e2   :  { %5071 = vmatprep.subr.bf16.mxu0 %v6883_v45  ;;  %5103 = vmatprep.subr.bf16.mxu1 %v6885_v44 }
 0x1e5   :  { %5073 = vmatpush1.bf16.msra.mxu0 %v6887_v51  ;;  %5105 = vmatpush1.bf16.msra.mxu1 %v6890_v4 }
 0x1e6   :  { %5075 = vmatprep.subr.bf16.mxu0 %v6895_v30  ;;  %5107 = vmatprep.subr.bf16.mxu1 %v6897_v33 }
 0x1e9   :  { %5077 = vmatpush1.bf16.msra.mxu0 %v6899_v55  ;;  %5109 = vmatpush1.bf16.msra.mxu1 %v6902_v5 }
 0x1ea   :  { %5079 = vmatprep.subr.bf16.mxu0 %v6907_v42  ;;  %5111 = vmatprep.subr.bf16.mxu1 %v6909_v40 }
 0x1ed   :  { %5081 = vmatpush1.bf16.msra.mxu0 %v6911_v3  ;;  %5113 = vmatpush1.bf16.msra.mxu1 %v6914_v35 }
 0x1ee   :  { %5115 = vmatprep.subr.bf16.mxu0 %v6919_v61  ;;  %5147 = vmatprep.subr.bf16.mxu1 %v6921_v13 }
 0x282   :  { %v1387_v17 = vpop.f32.mrb[2].mxu0  ;;  %v1458_v26 = vpop.f32.mrb[2].mxu1 }
 0x283   :  { %v5820_v32 = vadd.f32 %v1387_v17, %v6753_v38  ;;  %v1389_v14 = vpop.f32.mrb[3].mxu0  ;;  %v1460_v29 = vpop.f32.mrb[3].mxu1  ;;  %v5836_v49 = vadd.f32 %v1458_v26, %v6762_v20  ;;  %v1962_v20 = vld [vmem:[#allocation7 + $0x88] sm:$0xff]  ;;  %v1968_v38 = vld [vmem:[#allocation7 + $0xb8] sm:$0xff] }
 0x284   :  { %v5821_v58 = vadd.f32 %v1389_v14, %v6755_v41  ;;  %v5837_v59 = vadd.f32 %v1460_v29, %v6759_v11  ;;  %v1966_v11 = vld [vmem:[#allocation7 + $0xa8] sm:$0xff]  ;;  %v1964_v41 = vld [vmem:[#allocation7 + $0x98] sm:$0xff] }
 0x285   :  { %v4624_v43 = vmul.f32 -1.442695, %v5820_v32 }
 0x286   :  { %v4625_v18 = vmul.f32 -1.442695, %v5821_v58  ;;  %v4626_v2 = vmul.f32 -1.442695, %v5837_v59 }
 0x287   :  { %5987 = vpow2.f32 %v4624_v43 }
 0x288   :  { %5989 = vpow2.f32 %v4625_v18 }
 0x289   :  { %5991 = vpow2.f32 %v4626_v2 }
 0x28a   :  { %5993 = vtanh.f32 %v5836_v49 }
 0x291   :  { %v5988_v37 = vpop.eup %5987 }
 0x292   :  { %v5990_v0 = vpop.eup %5989  ;;  %v1680_v63 = vadd.f32 1.0, %v5988_v37 }
 0x293   :  { %v1686_v50 = vadd.f32 1.0, %v5990_v0  ;;  %v5992_v46 = vpop.eup %5991 }
 0x294   :  { %5995 = vrcp.f32 %v1680_v63  ;;  %v5994_v8 = vpop.eup %5993  ;;  %v1693_v32 = vadd.f32 1.0, %v5992_v46  ;;  %v1949_v63 = vld [vmem:[#allocation7 + $0x20] sm:$0xff]  ;;  %v1951_v46 = vld [vmem:[#allocation7 + $0x30] sm:$0xff] }
 0x295   :  { %5997 = vrcp.f32 %v1686_v50  ;;  %v1947_v50 = vld [vmem:[#allocation7 + $0x10] sm:$0xff] }
 0x296   :  { %5999 = vrcp.f32 %v1693_v32 }
 0x29e   :  { %v5996_v21 = vpop.eup %5995 }
 0x29f   :  { %v5998_v1 = vpop.eup %5997  ;;  %v1697_v17 = vmul.f32 %v5996_v21, %v5994_v8  ;;  %v1954_v8 = vld [vmem:[#allocation7 + $0x48] sm:$0xff] }
 0x2a0   :  { %v1696_v14 = vmul.f32 %v5998_v1, %v6769_v22  ;;  %v1945_v22 = vld [vmem:[#allocation7] sm:$0xff]  ;;  %v1958_v21 = vld [vmem:[#allocation7 + $0x68] sm:$0xff]  ;;  %v1956_v1 = vld [vmem:[#allocation7 + $0x58] sm:$0xff]  ;;  %v6000_v32 = vpop.eup %5999 }
 0x2a2   :  { %v6930_v29 = vadd.f32 %v1697_v17, %v1696_v14  ;;  %v1597_v58 = vpop.f32.mrb[28].mxu0  ;;  %v1668_v26 = vpop.f32.mrb[28].mxu1  ;;  %v1960_v17 = vld [vmem:[#allocation7 + $0x78] sm:$0xff] }
 0x2a3   :  { %v5862_v43 = vadd.f32 %v1597_v58, %v6765_v62  ;;  %v1599_v18 = vpop.f32.mrb[29].mxu0  ;;  %v1670_v59 = vpop.f32.mrb[29].mxu1  ;;  %v1955_v62 = vld [vmem:[#allocation7 + $0x50] sm:$0xff] }
 0x2a4   :  { %7892 = vst [vmem:[#allocation13_spill] sm:$0xff] %v6930_v29  ;;  %v5863_v2 = vadd.f32 %v1599_v18, %v6767_v16  ;;  %6001 = vtanh.f32 %v6930_v29  ;;  %v5879_v0 = vadd.f32 %v1670_v59, %v6774_v48  ;;  %v6936_v18 = vpack.c.bf16 %v1949_v63, %v1945_v22  ;;  %v1959_v29 = vld [vmem:[#allocation7 + $0x70] sm:$0xff] }
 0x2a5   :  { %v4627_v49 = vmul.f32 -1.442695, %v5862_v43  ;;  %v6938_v16 = vpack.c.bf16 %v1951_v46, %v1947_v50  ;;  %v1953_v43 = vld [vmem:[#allocation7 + $0x40] sm:$0xff]  ;;  %v6943_v48 = vpack.c.bf16 %v1960_v17, %v1956_v1  ;;  %v6952_v50 = vpack.c.bf16 %v1959_v29, %v1955_v62  ;;  %v1976_v62 = vld [vmem:[#allocation7 + $0xf8] sm:$0xff] }
 0x2a6   :  { %v4628_v37 = vmul.f32 -1.442695, %v5863_v2  ;;  %v4629_v58 = vmul.f32 -1.442695, %v5879_v0  ;;  %v1957_v2 = vld [vmem:[#allocation7 + $0x60] sm:$0xff]  ;;  %v6956_v1 = vpack.c.bf16 %v1966_v11, %v1962_v20  ;;  %v6958_v17 = vpack.c.bf16 %v1968_v38, %v1964_v41 }
 0x2a7   :  { %6003 = vpow2.f32 %v4627_v49  ;;  %7893 = vst [vmem:[#allocation14_spill] sm:$0xff] %v6938_v16  ;;  %v5878_v49 = vadd.f32 %v1668_v26, %v6777_v57  ;;  %7895 = vst [vmem:[#allocation16_spill] sm:$0xff] %v6943_v48  ;;  %v6950_v63 = vpack.c.bf16 %v1957_v2, %v1953_v43  ;;  %v1961_v46 = vld [vmem:[#allocation7 + $0x80] sm:$0xff]  ;;  %v1974_v43 = vld [vmem:[#allocation7 + $0xe8] sm:$0xff] }
 0x2a8   :  { %6005 = vpow2.f32 %v4628_v37  ;;  %v6941_v37 = vpack.c.bf16 %v1958_v21, %v1954_v8  ;;  %7897 = vst [vmem:[#allocation18_spill] sm:$0xff] %v6952_v50  ;;  %v1965_v8 = vld [vmem:[#allocation7 + $0xa0] sm:$0xff]  ;;  %7898 = vst [vmem:[#allocation19_spill] sm:$0xff] %v6956_v1  ;;  %v1972_v2 = vld [vmem:[#allocation7 + $0xd8] sm:$0xff] }
 0x2a9   :  { %6007 = vpow2.f32 %v4629_v58  ;;  %7896 = vst [vmem:[#allocation17_spill] sm:$0xff] %v6950_v63  ;;  %7899 = vst [vmem:[#allocation20_spill] sm:$0xff] %v6958_v17  ;;  %v1970_v58 = vld [vmem:[#allocation7 + $0xc8] sm:$0xff]  ;;  %v6964_v11 = vpack.c.bf16 %v1965_v8, %v1961_v46  ;;  %v1969_v41 = vld [vmem:[#allocation7 + $0xc0] sm:$0xff] }
 0x2aa   :  { %7894 = vst [vmem:[#allocation15_spill] sm:$0xff] %v6941_v37  ;;  %6009 = vtanh.f32 %v5878_v49  ;;  %v1973_v20 = vld [vmem:[#allocation7 + $0xe0] sm:$0xff]  ;;  %v6970_v29 = vpack.c.bf16 %v1974_v43, %v1970_v58  ;;  %v6972_v49 = vpack.c.bf16 %v1976_v62, %v1972_v2  ;;  %v1979_v2 = vld [vmem:[#allocation7 + $0x110] sm:$0xff] }
 0x2ab   :  { %7900 = vst [vmem:[#allocation21_spill] sm:$0xff] %v6964_v11  ;;  %v6976_v46 = vpack.c.bf16 %v1973_v20, %v1969_v41  ;;  %v1983_v62 = vld [vmem:[#allocation7 + $0x130] sm:$0xff]  ;;  %v1992_v41 = vld [vmem:[#allocation7 + $0x178] sm:$0xff] }
 0x2ac   :  { %7902 = vst [vmem:[#allocation30_spill] sm:$0xff] %v6970_v29  ;;  %7903 = vst [vmem:[#allocation31_spill] sm:$0xff] %v6972_v49 }
 0x2ad   :  { %7904 = vst [vmem:[#allocation32_spill] sm:$0xff] %v6976_v46 }
 0x2ae   :  { %v6002_v14 = vpop.eup %6001 }
 0x2af   :  { %v1700_v59 = vmul.f32 %v6002_v14, %v6000_v32  ;;  %v1963_v32 = vld [vmem:[#allocation7 + $0x90] sm:$0xff] }
 0x2b0   :  { %v1967_v14 = vld [vmem:[#allocation7 + $0xb0] sm:$0xff] }
 0x2b1   :  { %v6004_v0 = vpop.eup %6003  ;;  %1725 = vst [vmem:[%s7778_s5 + $0x8] sm:$0xff] %v1700_v59  ;;  %1864 = vmatmul.mubr.f32.vlgmr.msra.gmra.mrb[4].mxu0 %v1700_v59  ;;  %1935 = vmatmul.mubr.f32.vlgmr.msra.gmra.mrb[4].mxu1 %v1700_v59  ;;  %v6966_v38 = vpack.c.bf16 %v1967_v14, %v1963_v32  ;;  %v1971_v59 = vld [vmem:[#allocation7 + $0xd0] sm:$0xff]  ;;  %v1977_v32 = vld [vmem:[#allocation7 + $0x100] sm:$0xff] }
 0x2b2   :  { %v6006_v22 = vpop.eup %6005  ;;  %v1704_v26 = vadd.f32 1.0, %v6004_v0  ;;  %5117 = vmatpush1.bf16.msra.mxu0 %v6936_v18  ;;  %5149 = vmatpush1.bf16.msra.mxu1 %v6938_v16  ;;  %v1975_v0 = vld [vmem:[#allocation7 + $0xf0] sm:$0xff]  ;;  %v1981_v14 = vld [vmem:[#allocation7 + $0x120] sm:$0xff] }
 0x2b3   :  { %v1710_v21 = vadd.f32 1.0, %v6006_v22  ;;  %5119 = vmatprep.subr.bf16.mxu0 %v6941_v37  ;;  %5151 = vmatprep.subr.bf16.mxu1 %v6943_v48  ;;  %7901 = vst [vmem:[#allocation22_spill] sm:$0xff] %v6966_v38  ;;  %v1978_v22 = vld [vmem:[#allocation7 + $0x108] sm:$0xff]  ;;  %v6978_v8 = vpack.c.bf16 %v1975_v0, %v1971_v59  ;;  %v6988_v0 = vpack.c.bf16 %v1981_v14, %v1977_v32  ;;  %v1991_v37 = vld [vmem:[#allocation7 + $0x170] sm:$0xff] }
 0x2b4   :  { %6011 = vrcp.f32 %v1704_v26  ;;  %2073 = vmatprep.mubr.f32.mxu0 %v7874_v19  ;;  %2144 = vmatprep.mubr.f32.mxu1 %v7874_v19  ;;  %v1982_v26 = vld [vmem:[#allocation7 + $0x128] sm:$0xff] }
 0x2b5   :  { %6013 = vrcp.f32 %v1710_v21  ;;  %v1980_v21 = vld [vmem:[#allocation7 + $0x118] sm:$0xff]  ;;  %7905 = vst [vmem:[#allocation33_spill] sm:$0xff] %v6978_v8  ;;  %v6982_v58 = vpack.c.bf16 %v1982_v26, %v1978_v22  ;;  %v1985_v22 = vld [vmem:[#allocation7 + $0x140] sm:$0xff]  ;;  %v1998_v14 = vld [vmem:[#allocation7 + $0x1a8] sm:$0xff] }
 0x2b6   :  { %5121 = vmatpush1.bf16.msra.mxu0 %v6950_v63  ;;  %5153 = vmatpush1.bf16.msra.mxu1 %v6952_v50  ;;  %v1984_v50 = vld [vmem:[#allocation7 + $0x138] sm:$0xff] }
 0x2b7   :  { %5123 = vmatprep.subr.bf16.mxu0 %v6956_v1  ;;  %5155 = vmatprep.subr.bf16.mxu1 %v6958_v17  ;;  %v6984_v43 = vpack.c.bf16 %v1984_v50, %v1980_v21  ;;  %v1986_v17 = vld [vmem:[#allocation7 + $0x148] sm:$0xff]  ;;  %v1989_v50 = vld [vmem:[#allocation7 + $0x160] sm:$0xff] }
 0x2b8   :  { %v1990_v1 = vld [vmem:[#allocation7 + $0x168] sm:$0xff] }
 0x2b9   :  { %v6994_v63 = vpack.c.bf16 %v1990_v1, %v1986_v17  ;;  %v1993_v17 = vld [vmem:[#allocation7 + $0x180] sm:$0xff] }
 0x2ba   :  { %5125 = vmatpush1.bf16.msra.mxu0 %v6964_v11  ;;  %5157 = vmatpush1.bf16.msra.mxu1 %v6966_v38  ;;  %v6008_v11 = vpop.eup %6007  ;;  %v1988_v38 = vld [vmem:[#allocation7 + $0x158] sm:$0xff] }
 0x2bb   :  { %5127 = vmatprep.subr.bf16.mxu0 %v6970_v29  ;;  %5159 = vmatprep.subr.bf16.mxu1 %v6972_v49  ;;  %v6010_v20 = vpop.eup %6009  ;;  %v6990_v49 = vpack.c.bf16 %v1983_v62, %v1979_v2  ;;  %v1717_v29 = vadd.f32 1.0, %v6008_v11  ;;  %v6996_v48 = vpack.c.bf16 %v1992_v41, %v1988_v38  ;;  %v1996_v2 = vld [vmem:[#allocation7 + $0x198] sm:$0xff]  ;;  %v7003_v11 = vpack.c.bf16 %v1989_v50, %v1985_v22  ;;  %v1997_v38 = vld [vmem:[#allocation7 + $0x1a0] sm:$0xff] }
 0x2bc   :  { %v2000_v62 = vld [vmem:[#allocation7 + $0x1b8] sm:$0xff] }
 0x2bd   :  { %6015 = vrcp.f32 %v1717_v29  ;;  %v7011_v41 = vpack.c.bf16 %v2000_v62, %v1996_v2  ;;  %v2008_v22 = vld [vmem:[#allocation7 + $0x1f8] sm:$0xff]  ;;  %v2003_v2 = vld [vmem:[#allocation7 + $0x1d0] sm:$0xff] }
 0x2be   :  { %v6012_v59 = vpop.eup %6011  ;;  %5129 = vmatpush1.bf16.msra.mxu0 %v6976_v46  ;;  %5161 = vmatpush1.bf16.msra.mxu1 %v6978_v8  ;;  %v1987_v46 = vld [vmem:[#allocation7 + $0x150] sm:$0xff]  ;;  %v1994_v8 = vld [vmem:[#allocation7 + $0x188] sm:$0xff] }
 0x2bf   :  { %v6014_v26 = vpop.eup %6013  ;;  %v1721_v21 = vmul.f32 %v6012_v59, %v6010_v20  ;;  %5131 = vmatprep.subr.bf16.mxu0 %v6982_v58  ;;  %5163 = vmatprep.subr.bf16.mxu1 %v6984_v43  ;;  %v7005_v1 = vpack.c.bf16 %v1991_v37, %v1987_v46  ;;  %v1995_v20 = vld [vmem:[#allocation7 + $0x190] sm:$0xff]  ;;  %v7016_v37 = vpack.c.bf16 %v1997_v38, %v1993_v17  ;;  %v2001_v46 = vld [vmem:[#allocation7 + $0x1c0] sm:$0xff] }
 0x2c0   :  { %v1720_v32 = vmul.f32 %v6014_v26, %v6801_v52  ;;  %v7009_v52 = vpack.c.bf16 %v1998_v14, %v1994_v8  ;;  %v1999_v59 = vld [vmem:[#allocation7 + $0x1b0] sm:$0xff]  ;;  %v2002_v26 = vld [vmem:[#allocation7 + $0x1c8] sm:$0xff]  ;;  %v2005_v14 = vld [vmem:[#allocation7 + $0x1e0] sm:$0xff] }
 0x2c1   :  { %v7018_v29 = vpack.c.bf16 %v1999_v59, %v1995_v20  ;;  %v2007_v62 = vld [vmem:[#allocation7 + $0x1f0] sm:$0xff]  ;;  %v7028_v17 = vpack.c.bf16 %v2005_v14, %v2001_v46  ;;  %v7913_v14 = vld [vmem:[#allocation29_spill] sm:$0xff] }
 0x2c2   :  { %v6999_v16 = vadd.f32 %v1721_v21, %v1720_v32  ;;  %5133 = vmatpush1.bf16.msra.mxu0 %v6988_v0  ;;  %5165 = vmatpush1.bf16.msra.mxu1 %v6990_v49  ;;  %v2006_v21 = vld [vmem:[#allocation7 + $0x1e8] sm:$0xff]  ;;  %v2004_v32 = vld [vmem:[#allocation7 + $0x1d8] sm:$0xff]  ;;  %v7030_v38 = vpack.c.bf16 %v2007_v62, %v2003_v2 }
 0x2c3   :  { %5135 = vmatprep.subr.bf16.mxu0 %v6994_v63  ;;  %5167 = vmatprep.subr.bf16.mxu1 %v6996_v48  ;;  %v7022_v8 = vpack.c.bf16 %v2006_v21, %v2002_v26  ;;  %v7024_v50 = vpack.c.bf16 %v2008_v22, %v2004_v32  ;;  %v7912_v21 = vld [vmem:[#allocation28_spill] sm:$0xff] }
 0x2c4   :  { %6017 = vtanh.f32 %v6999_v16 }
 0x2c6   :  { %5137 = vmatpush1.bf16.msra.mxu0 %v7003_v11  ;;  %5169 = vmatpush1.bf16.msra.mxu1 %v7005_v1 }
 0x2c7   :  { %5139 = vmatprep.subr.bf16.mxu0 %v7009_v52  ;;  %5171 = vmatprep.subr.bf16.mxu1 %v7011_v41  ;;  %v6016_v20 = vpop.eup %6015 }
 0x2ca   :  { %5141 = vmatpush1.bf16.msra.mxu0 %v7016_v37  ;;  %5173 = vmatpush1.bf16.msra.mxu1 %v7018_v29 }
 0x2cb   :  { %5143 = vmatprep.subr.bf16.mxu0 %v7022_v8  ;;  %5175 = vmatprep.subr.bf16.mxu1 %v7024_v50 }
 0x2ce   :  { %v6018_v59 = vpop.eup %6017  ;;  %5145 = vmatpush1.bf16.msra.mxu0 %v7028_v17  ;;  %5177 = vmatpush1.bf16.msra.mxu1 %v7030_v38 }
 0x2cf   :  { %v1724_v26 = vmul.f32 %v6018_v59, %v6016_v20  ;;  %5179 = vmatprep.subr.bf16.mxu0 %v6823_v27  ;;  %5211 = vmatprep.subr.bf16.mxu1 %v6825_v15 }
 0x2d1   :  { %1726 = vst [vmem:[%s7779_s6 + $0x30] sm:$0xff] %v1724_v26  ;;  %2074 = vmatmul.mubr.f32.vlgmr.msra.gmra.mrb[26].mxu0 %v1724_v26  ;;  %2145 = vmatmul.mubr.f32.vlgmr.msra.gmra.mrb[26].mxu1 %v1724_v26 }
 0x2d2   :  { %5181 = vmatpush1.bf16.msra.mxu0 %v6827_v12  ;;  %5213 = vmatpush1.bf16.msra.mxu1 %v6830_v24  ;;  %v7906_v12 = vld [vmem:[#allocation23_spill] sm:$0xff] }
 0x2d3   :  { %5183 = vmatprep.subr.bf16.mxu0 %v6835_v53  ;;  %5215 = vmatprep.subr.bf16.mxu1 %v6837_v28 }
 0x2d4   :  { %2341 = vmatprep.mubr.f32.mxu0 %v7874_v19  ;;  %2412 = vmatprep.mubr.f32.mxu1 %v7874_v19 }
 0x2d6   :  { %5185 = vmatpush1.bf16.msra.mxu0 %v6839_v34  ;;  %5217 = vmatpush1.bf16.msra.mxu1 %v6842_v54  ;;  %v7907_v34 = vld [vmem:[#allocation24_spill] sm:$0xff] }
 0x2d7   :  { %5187 = vmatprep.subr.bf16.mxu0 %v6847_v7  ;;  %5219 = vmatprep.subr.bf16.mxu1 %v6849_v25 }
 0x2da   :  { %5189 = vmatpush1.bf16.msra.mxu0 %v6851_v31  ;;  %5221 = vmatpush1.bf16.msra.mxu1 %v6854_v36  ;;  %v7908_v31 = vld [vmem:[#allocation25_spill] sm:$0xff] }
 0x2db   :  { %5191 = vmatprep.subr.bf16.mxu0 %v6859_v39  ;;  %5223 = vmatprep.subr.bf16.mxu1 %v6861_v60  ;;  %v7909_v60 = vld [vmem:[#allocation26_spill] sm:$0xff] }
 0x2de   :  { %5193 = vmatpush1.bf16.msra.mxu0 %v6863_v47  ;;  %5225 = vmatpush1.bf16.msra.mxu1 %v6866_v56 }
 0x2df   :  { %5195 = vmatprep.subr.bf16.mxu0 %v6871_v6  ;;  %5227 = vmatprep.subr.bf16.mxu1 %v6873_v10 }
 0x2e2   :  { %5197 = vmatpush1.bf16.msra.mxu0 %v6875_v23  ;;  %5229 = vmatpush1.bf16.msra.mxu1 %v6878_v9 }
 0x2e3   :  { %5199 = vmatprep.subr.bf16.mxu0 %v6883_v45  ;;  %5231 = vmatprep.subr.bf16.mxu1 %v6885_v44 }
 0x2e6   :  { %5201 = vmatpush1.bf16.msra.mxu0 %v6887_v51  ;;  %5233 = vmatpush1.bf16.msra.mxu1 %v6890_v4 }
 0x2e7   :  { %5203 = vmatprep.subr.bf16.mxu0 %v6895_v30  ;;  %5235 = vmatprep.subr.bf16.mxu1 %v6897_v33  ;;  %v7910_v33 = vld [vmem:[#allocation13_spill] sm:$0xff] }
 0x2ea   :  { %5205 = vmatpush1.bf16.msra.mxu0 %v6899_v55  ;;  %5237 = vmatpush1.bf16.msra.mxu1 %v6902_v5 }
 0x2eb   :  { %5207 = vmatprep.subr.bf16.mxu0 %v6907_v42  ;;  %5239 = vmatprep.subr.bf16.mxu1 %v6909_v40 }
 0x2ee   :  { %5209 = vmatpush1.bf16.msra.mxu0 %v6911_v3  ;;  %5241 = vmatpush1.bf16.msra.mxu1 %v6914_v35  ;;  %v7911_v3 = vld [vmem:[#allocation27_spill] sm:$0xff] }
 0x2ef   :  { %5243 = vmatprep.subr.bf16.mxu0 %v6919_v61  ;;  %5275 = vmatprep.subr.bf16.mxu1 %v6921_v13 }
 0x384   :  { %v1865_v27 = vpop.f32.mrb[4].mxu0  ;;  %v1936_v15 = vpop.f32.mrb[4].mxu1 }
 0x385   :  { %v5822_v24 = vadd.f32 %v1865_v27, %v7906_v12  ;;  %v1867_v53 = vpop.f32.mrb[5].mxu0  ;;  %v1938_v28 = vpop.f32.mrb[5].mxu1  ;;  %v5838_v47 = vadd.f32 %v1936_v15, %v7909_v60 }
 0x386   :  { %v5823_v54 = vadd.f32 %v1867_v53, %v7907_v34  ;;  %v5839_v36 = vadd.f32 %v1938_v28, %v7908_v31  ;;  %v7914_v28 = vld [vmem:[#allocation14_spill] sm:$0xff] }
 0x387   :  { %v4630_v7 = vmul.f32 -1.442695, %v5822_v24 }
 0x388   :  { %v4631_v25 = vmul.f32 -1.442695, %v5823_v54  ;;  %v4632_v39 = vmul.f32 -1.442695, %v5839_v36  ;;  %v7917_v36 = vld [vmem:[#allocation17_spill] sm:$0xff] }
 0x389   :  { %6019 = vpow2.f32 %v4630_v7  ;;  %v7915_v7 = vld [vmem:[#allocation15_spill] sm:$0xff] }
 0x38a   :  { %6021 = vpow2.f32 %v4631_v25  ;;  %v7916_v25 = vld [vmem:[#allocation16_spill] sm:$0xff] }
 0x38b   :  { %6023 = vpow2.f32 %v4632_v39  ;;  %v7918_v39 = vld [vmem:[#allocation18_spill] sm:$0xff] }
 0x38c   :  { %6025 = vtanh.f32 %v5838_v47  ;;  %v7919_v47 = vld [vmem:[#allocation19_spill] sm:$0xff] }
 0x393   :  { %v6020_v56 = vpop.eup %6019 }
 0x394   :  { %v6022_v6 = vpop.eup %6021  ;;  %v2158_v10 = vadd.f32 1.0, %v6020_v56  ;;  %v7921_v56 = vld [vmem:[#allocation21_spill] sm:$0xff] }
 0x395   :  { %v2164_v23 = vadd.f32 1.0, %v6022_v6  ;;  %v6024_v9 = vpop.eup %6023  ;;  %v7922_v6 = vld [vmem:[#allocation22_spill] sm:$0xff] }
 0x396   :  { %6027 = vrcp.f32 %v2158_v10  ;;  %v6026_v45 = vpop.eup %6025  ;;  %v2171_v30 = vadd.f32 1.0, %v6024_v9  ;;  %v7923_v10 = vld [vmem:[#allocation30_spill] sm:$0xff] }
 0x397   :  { %6029 = vrcp.f32 %v2164_v23  ;;  %v7924_v23 = vld [vmem:[#allocation31_spill] sm:$0xff] }
 0x398   :  { %6031 = vrcp.f32 %v2171_v30 }
 0x3a0   :  { %v6028_v44 = vpop.eup %6027 }
 0x3a1   :  { %v6030_v51 = vpop.eup %6029  ;;  %v2175_v4 = vmul.f32 %v6028_v44, %v6026_v45 }
 0x3a2   :  { %v2174_v55 = vmul.f32 %v6030_v51, %v7910_v33  ;;  %v6032_v62 = vpop.eup %6031  ;;  %v7925_v51 = vld [vmem:[#allocation32_spill] sm:$0xff] }
 0x3a4   :  { %v7080_v5 = vadd.f32 %v2175_v4, %v2174_v55  ;;  %v2075_v42 = vpop.f32.mrb[26].mxu0  ;;  %v2146_v40 = vpop.f32.mrb[26].mxu1  ;;  %v7926_v4 = vld [vmem:[#allocation33_spill] sm:$0xff] }
 0x3a5   :  { %v5860_v35 = vadd.f32 %v2075_v42, %v7911_v3  ;;  %v2077_v61 = vpop.f32.mrb[27].mxu0  ;;  %v2148_v13 = vpop.f32.mrb[27].mxu1  ;;  %v5876_v26 = vadd.f32 %v2146_v40, %v6777_v57 }
 0x3a6   :  { %v5861_v32 = vadd.f32 %v2077_v61, %v7912_v21  ;;  %6033 = vtanh.f32 %v7080_v5  ;;  %v5877_v2 = vadd.f32 %v2148_v13, %v7913_v14  ;;  %v2706_v13 = vld [vmem:[#allocation5 + $0x78] sm:$0xff] }
 0x3a7   :  { %v4633_v22 = vmul.f32 -1.442695, %v5860_v35  ;;  %v2702_v35 = vld [vmem:[#allocation5 + $0x58] sm:$0xff] }
 0x3a8   :  { %v4634_v46 = vmul.f32 -1.442695, %v5861_v32  ;;  %v4635_v59 = vmul.f32 -1.442695, %v5877_v2  ;;  %v2699_v32 = vld [vmem:[#allocation5 + $0x40] sm:$0xff] }
 0x3a9   :  { %6035 = vpow2.f32 %v4633_v22  ;;  %v2703_v22 = vld [vmem:[#allocation5 + $0x60] sm:$0xff] }
 0x3aa   :  { %6037 = vpow2.f32 %v4634_v46  ;;  %v7145_v46 = vpack.c.bf16 %v2706_v13, %v2702_v35  ;;  %v7147_v2 = vpack.c.bf16 %v2703_v22, %v2699_v32  ;;  %v2738_v13 = vld [vmem:[#allocation5 + $0x178] sm:$0xff]  ;;  %v2731_v32 = vld [vmem:[#allocation5 + $0x140] sm:$0xff] }
 0x3ab   :  { %6039 = vpow2.f32 %v4635_v59  ;;  %v2735_v22 = vld [vmem:[#allocation5 + $0x160] sm:$0xff] }
 0x3ac   :  { %6041 = vtanh.f32 %v5876_v26  ;;  %v2708_v26 = vld [vmem:[#allocation5 + $0x88] sm:$0xff] }
 0x3b0   :  { %v6034_v20 = vpop.eup %6033 }
 0x3b1   :  { %v2178_v27 = vmul.f32 %v6034_v20, %v6032_v62  ;;  %v2701_v62 = vld [vmem:[#allocation5 + $0x50] sm:$0xff] }
 0x3b2   :  { %v2705_v20 = vld [vmem:[#allocation5 + $0x70] sm:$0xff] }
 0x3b3   :  { %v6036_v15 = vpop.eup %6035  ;;  %2203 = vst [vmem:[%s7778_s5 + $0x10] sm:$0xff] %v2178_v27  ;;  %2342 = vmatmul.mubr.f32.vlgmr.msra.gmra.mrb[6].mxu0 %v2178_v27  ;;  %2413 = vmatmul.mubr.f32.vlgmr.msra.gmra.mrb[6].mxu1 %v2178_v27  ;;  %v7150_v59 = vpack.c.bf16 %v2705_v20, %v2701_v62  ;;  %v2712_v27 = vld [vmem:[#allocation5 + $0xa8] sm:$0xff]  ;;  %v7195_v20 = vpack.c.bf16 %v2735_v22, %v2731_v32  ;;  %v2904_v22 = vld [vmem:[#allocation7 + $0x18] sm:$0xff] }
 0x3b4   :  { %v6038_v24 = vpop.eup %6037  ;;  %v2182_v53 = vadd.f32 1.0, %v6036_v15  ;;  %5245 = vmatpush1.bf16.msra.mxu0 %v6936_v18  ;;  %5277 = vmatpush1.bf16.msra.mxu1 %v7914_v28  ;;  %v7920_v18 = vld [vmem:[#allocation20_spill] sm:$0xff]  ;;  %v2710_v15 = vld [vmem:[#allocation5 + $0x98] sm:$0xff]  ;;  %v2906_v32 = vld [vmem:[#allocation7 + $0x28] sm:$0xff] }
 0x3b5   :  { %v2188_v54 = vadd.f32 1.0, %v6038_v24  ;;  %5247 = vmatprep.subr.bf16.mxu0 %v7915_v7  ;;  %5279 = vmatprep.subr.bf16.mxu1 %v7916_v25  ;;  %v6040_v9 = vpop.eup %6039  ;;  %v7155_v24 = vpack.c.bf16 %v2712_v27, %v2708_v26  ;;  %v2707_v28 = vld [vmem:[#allocation5 + $0x80] sm:$0xff]  ;;  %v2733_v26 = vld [vmem:[#allocation5 + $0x150] sm:$0xff] }
 0x3b6   :  { %6043 = vrcp.f32 %v2182_v53  ;;  %2551 = vmatprep.mubr.f32.mxu0 %v7874_v19  ;;  %2622 = vmatprep.mubr.f32.mxu1 %v7874_v19  ;;  %v6042_v45 = vpop.eup %6041  ;;  %v2195_v55 = vadd.f32 1.0, %v6040_v9  ;;  %v2714_v53 = vld [vmem:[#allocation5 + $0xb8] sm:$0xff]  ;;  %v2715_v9 = vld [vmem:[#allocation5 + $0xc0] sm:$0xff]  ;;  %v2737_v27 = vld [vmem:[#allocation5 + $0x170] sm:$0xff] }
 0x3b7   :  { %6045 = vrcp.f32 %v2188_v54  ;;  %v2711_v54 = vld [vmem:[#allocation5 + $0xa0] sm:$0xff]  ;;  %v7157_v7 = vpack.c.bf16 %v2714_v53, %v2710_v15  ;;  %v7198_v15 = vpack.c.bf16 %v2737_v27, %v2733_v26  ;;  %v2740_v53 = vld [vmem:[#allocation5 + $0x188] sm:$0xff]  ;;  %v2908_v27 = vld [vmem:[#allocation7 + $0x38] sm:$0xff] }
 0x3b8   :  { %5249 = vmatpush1.bf16.msra.mxu0 %v7917_v36  ;;  %5281 = vmatpush1.bf16.msra.mxu1 %v7918_v39  ;;  %6047 = vrcp.f32 %v2195_v55  ;;  %v7159_v25 = vpack.c.bf16 %v2711_v54, %v2707_v28  ;;  %v2709_v36 = vld [vmem:[#allocation5 + $0x90] sm:$0xff]  ;;  %v2724_v55 = vld [vmem:[#allocation5 + $0x108] sm:$0xff]  ;;  %v2742_v54 = vld [vmem:[#allocation5 + $0x198] sm:$0xff] }
 0x3b9   :  { %5251 = vmatprep.subr.bf16.mxu0 %v7919_v47  ;;  %5283 = vmatprep.subr.bf16.mxu1 %v7920_v18  ;;  %v2713_v39 = vld [vmem:[#allocation5 + $0xb0] sm:$0xff]  ;;  %v2716_v18 = vld [vmem:[#allocation5 + $0xc8] sm:$0xff] }
 0x3ba   :  { %v7162_v47 = vpack.c.bf16 %v2713_v39, %v2709_v36  ;;  %v2744_v28 = vld [vmem:[#allocation5 + $0x1a8] sm:$0xff]  ;;  %v2746_v39 = vld [vmem:[#allocation5 + $0x1b8] sm:$0xff] }
 0x3bb   :  { %v7203_v36 = vpack.c.bf16 %v2744_v28, %v2740_v53  ;;  %v7229_v53 = vpack.c.bf16 %v2908_v27, %v2904_v22 }
 0x3bc   :  { %5253 = vmatpush1.bf16.msra.mxu0 %v7921_v56  ;;  %5285 = vmatpush1.bf16.msra.mxu1 %v7922_v6  ;;  %v2720_v56 = vld [vmem:[#allocation5 + $0xe8] sm:$0xff]  ;;  %v2718_v6 = vld [vmem:[#allocation5 + $0xd8] sm:$0xff] }
 0x3bd   :  { %5255 = vmatprep.subr.bf16.mxu0 %v7923_v10  ;;  %5287 = vmatprep.subr.bf16.mxu1 %v7924_v23  ;;  %v7167_v10 = vpack.c.bf16 %v2720_v56, %v2716_v18  ;;  %v2722_v23 = vld [vmem:[#allocation5 + $0xf8] sm:$0xff]  ;;  %v2739_v18 = vld [vmem:[#allocation5 + $0x180] sm:$0xff] }
 0x3be   :  { %v2743_v56 = vld [vmem:[#allocation5 + $0x1a0] sm:$0xff] }
 0x3c0   :  { %v6044_v44 = vpop.eup %6043  ;;  %5257 = vmatpush1.bf16.msra.mxu0 %v7925_v51  ;;  %5289 = vmatpush1.bf16.msra.mxu1 %v7926_v4  ;;  %v2717_v4 = vld [vmem:[#allocation5 + $0xd0] sm:$0xff] }
 0x3c1   :  { %v6046_v30 = vpop.eup %6045  ;;  %v2199_v33 = vmul.f32 %v6044_v44, %v6042_v45  ;;  %5259 = vmatprep.subr.bf16.mxu0 %v6982_v58  ;;  %5291 = vmatprep.subr.bf16.mxu1 %v6984_v43  ;;  %v2696_v58 = vld [vmem:[#allocation5 + $0x28] sm:$0xff]  ;;  %v2694_v43 = vld [vmem:[#allocation5 + $0x18] sm:$0xff]  ;;  %v2719_v45 = vld [vmem:[#allocation5 + $0xe0] sm:$0xff]  ;;  %v7169_v44 = vpack.c.bf16 %v2722_v23, %v2718_v6  ;;  %v7205_v6 = vpack.c.bf16 %v2746_v39, %v2742_v54 }
 0x3c2   :  { %v2198_v42 = vmul.f32 %v6046_v30, %v6999_v16  ;;  %v6048_v16 = vpop.eup %6047  ;;  %v7171_v51 = vpack.c.bf16 %v2719_v45, %v2715_v9  ;;  %v2721_v30 = vld [vmem:[#allocation5 + $0xf0] sm:$0xff]  ;;  %v7207_v23 = vpack.c.bf16 %v2743_v56, %v2739_v18 }
 0x3c3   :  { %v2741_v9 = vld [vmem:[#allocation5 + $0x190] sm:$0xff] }
 0x3c4   :  { %v7109_v40 = vadd.f32 %v2199_v33, %v2198_v42  ;;  %5261 = vmatpush1.bf16.msra.mxu0 %v6988_v0  ;;  %5293 = vmatpush1.bf16.msra.mxu1 %v6990_v49  ;;  %v2692_v49 = vld [vmem:[#allocation5 + $0x8] sm:$0xff]  ;;  %v7174_v33 = vpack.c.bf16 %v2721_v30, %v2717_v4  ;;  %v2745_v45 = vld [vmem:[#allocation5 + $0x1b0] sm:$0xff] }
 0x3c5   :  { %5263 = vmatprep.subr.bf16.mxu0 %v6994_v63  ;;  %5295 = vmatprep.subr.bf16.mxu1 %v6996_v48  ;;  %v7131_v0 = vpack.c.bf16 %v2696_v58, %v2692_v49  ;;  %v2728_v42 = vld [vmem:[#allocation5 + $0x128] sm:$0xff]  ;;  %v2723_v49 = vld [vmem:[#allocation5 + $0x100] sm:$0xff]  ;;  %v7210_v4 = vpack.c.bf16 %v2745_v45, %v2741_v9 }
 0x3c6   :  { %6049 = vtanh.f32 %v7109_v40  ;;  %v2727_v58 = vld [vmem:[#allocation5 + $0x120] sm:$0xff]  ;;  %v2748_v30 = vld [vmem:[#allocation5 + $0x1c8] sm:$0xff] }
 0x3c8   :  { %5265 = vmatpush1.bf16.msra.mxu0 %v7003_v11  ;;  %5297 = vmatpush1.bf16.msra.mxu1 %v7005_v1  ;;  %v2698_v11 = vld [vmem:[#allocation5 + $0x38] sm:$0xff]  ;;  %v2691_v1 = vld [vmem:[#allocation5] sm:$0xff] }
 0x3c9   :  { %5267 = vmatprep.subr.bf16.mxu0 %v7009_v52  ;;  %5299 = vmatprep.subr.bf16.mxu1 %v7011_v41  ;;  %v2695_v52 = vld [vmem:[#allocation5 + $0x20] sm:$0xff]  ;;  %v7133_v41 = vpack.c.bf16 %v2698_v11, %v2694_v43  ;;  %v7183_v11 = vpack.c.bf16 %v2727_v58, %v2723_v49 }
 0x3ca   :  { %v2747_v49 = vld [vmem:[#allocation5 + $0x1c0] sm:$0xff] }
 0x3cb   :  { %v2751_v58 = vld [vmem:[#allocation5 + $0x1e0] sm:$0xff] }
 0x3cc   :  { %5269 = vmatpush1.bf16.msra.mxu0 %v7016_v37  ;;  %5301 = vmatpush1.bf16.msra.mxu1 %v7018_v29  ;;  %v7135_v37 = vpack.c.bf16 %v2695_v52, %v2691_v1  ;;  %v2693_v29 = vld [vmem:[#allocation5 + $0x10] sm:$0xff] }
 0x3cd   :  { %5271 = vmatprep.subr.bf16.mxu0 %v7022_v8  ;;  %5303 = vmatprep.subr.bf16.mxu1 %v7024_v50  ;;  %v2697_v8 = vld [vmem:[#allocation5 + $0x30] sm:$0xff] }
 0x3ce   :  { %v7138_v50 = vpack.c.bf16 %v2697_v8, %v2693_v29  ;;  %v2725_v1 = vld [vmem:[#allocation5 + $0x110] sm:$0xff]  ;;  %v2732_v8 = vld [vmem:[#allocation5 + $0x148] sm:$0xff] }
 0x3cf   :  { %v2729_v52 = vld [vmem:[#allocation5 + $0x130] sm:$0xff] }
 0x3d0   :  { %v6050_v48 = vpop.eup %6049  ;;  %5273 = vmatpush1.bf16.msra.mxu0 %v7028_v17  ;;  %5305 = vmatpush1.bf16.msra.mxu1 %v7030_v38  ;;  %v2700_v17 = vld [vmem:[#allocation5 + $0x48] sm:$0xff]  ;;  %v7186_v29 = vpack.c.bf16 %v2729_v52, %v2725_v1  ;;  %v7219_v52 = vpack.c.bf16 %v2751_v58, %v2747_v49 }
 0x3d1   :  { %v2202_v63 = vmul.f32 %v6050_v48, %v6048_v16  ;;  %5307 = vmatprep.subr.bf16.mxu0 %v7131_v0  ;;  %5339 = vmatprep.subr.bf16.mxu1 %v7133_v41  ;;  %v2704_v38 = vld [vmem:[#allocation5 + $0x68] sm:$0xff]  ;;  %v2726_v16 = vld [vmem:[#allocation5 + $0x118] sm:$0xff]  ;;  %v7179_v48 = vpack.c.bf16 %v2728_v42, %v2724_v55 }
 0x3d2   :  { %v7143_v61 = vpack.c.bf16 %v2704_v38, %v2700_v17  ;;  %v2736_v17 = vld [vmem:[#allocation5 + $0x168] sm:$0xff]  ;;  %v2734_v38 = vld [vmem:[#allocation5 + $0x158] sm:$0xff] }
 0x3d3   :  { %2204 = vst [vmem:[%s7779_s6 + $0x28] sm:$0xff] %v2202_v63  ;;  %2552 = vmatmul.mubr.f32.vlgmr.msra.gmra.mrb[24].mxu0 %v2202_v63  ;;  %2623 = vmatmul.mubr.f32.vlgmr.msra.gmra.mrb[24].mxu1 %v2202_v63  ;;  %v2730_v63 = vld [vmem:[#allocation5 + $0x138] sm:$0xff]  ;;  %v7191_v35 = vpack.c.bf16 %v2736_v17, %v2732_v8  ;;  %v7193_v62 = vpack.c.bf16 %v2738_v13, %v2734_v38  ;;  %v2752_v55 = vld [vmem:[#allocation5 + $0x1e8] sm:$0xff]  ;;  %v2749_v8 = vld [vmem:[#allocation5 + $0x1d0] sm:$0xff] }
 0x3d4   :  { %2819 = vmatprep.mubr.f32.mxu0 %v7874_v19  ;;  %2890 = vmatprep.mubr.f32.mxu1 %v7874_v19  ;;  %v7181_v43 = vpack.c.bf16 %v2730_v63, %v2726_v16  ;;  %v2750_v42 = vld [vmem:[#allocation5 + $0x1d8] sm:$0xff]  ;;  %v7215_v16 = vpack.c.bf16 %v2752_v55, %v2748_v30  ;;  %v2753_v17 = vld [vmem:[#allocation5 + $0x1f0] sm:$0xff]  ;;  %v2902_v13 = vld [vmem:[#allocation7 + $0x8] sm:$0xff] }
 0x3d5   :  { %5309 = vmatpush1.bf16.msra.mxu0 %v7135_v37  ;;  %5341 = vmatpush1.bf16.msra.mxu1 %v7138_v50  ;;  %v2754_v63 = vld [vmem:[#allocation5 + $0x1f8] sm:$0xff]  ;;  %v7222_v38 = vpack.c.bf16 %v2753_v17, %v2749_v8  ;;  %v7227_v26 = vpack.c.bf16 %v2906_v32, %v2902_v13 }
 0x3d6   :  { %5311 = vmatprep.subr.bf16.mxu0 %v7143_v61  ;;  %5343 = vmatprep.subr.bf16.mxu1 %v7145_v46  ;;  %v7217_v1 = vpack.c.bf16 %v2754_v63, %v2750_v42 }
 0x3d9   :  { %5313 = vmatpush1.bf16.msra.mxu0 %v7147_v2  ;;  %5345 = vmatpush1.bf16.msra.mxu1 %v7150_v59 }
 0x3da   :  { %5315 = vmatprep.subr.bf16.mxu0 %v7155_v24  ;;  %5347 = vmatprep.subr.bf16.mxu1 %v7157_v7 }
 0x3dd   :  { %5317 = vmatpush1.bf16.msra.mxu0 %v7159_v25  ;;  %5349 = vmatpush1.bf16.msra.mxu1 %v7162_v47 }
 0x3de   :  { %5319 = vmatprep.subr.bf16.mxu0 %v7167_v10  ;;  %5351 = vmatprep.subr.bf16.mxu1 %v7169_v44 }
 0x3e1   :  { %5321 = vmatpush1.bf16.msra.mxu0 %v7171_v51  ;;  %5353 = vmatpush1.bf16.msra.mxu1 %v7174_v33 }
 0x3e2   :  { %5323 = vmatprep.subr.bf16.mxu0 %v7179_v48  ;;  %5355 = vmatprep.subr.bf16.mxu1 %v7181_v43 }
 0x3e5   :  { %5325 = vmatpush1.bf16.msra.mxu0 %v7183_v11  ;;  %5357 = vmatpush1.bf16.msra.mxu1 %v7186_v29 }
 0x3e6   :  { %5327 = vmatprep.subr.bf16.mxu0 %v7191_v35  ;;  %5359 = vmatprep.subr.bf16.mxu1 %v7193_v62 }
 0x3e9   :  { %5329 = vmatpush1.bf16.msra.mxu0 %v7195_v20  ;;  %5361 = vmatpush1.bf16.msra.mxu1 %v7198_v15 }
 0x3ea   :  { %5331 = vmatprep.subr.bf16.mxu0 %v7203_v36  ;;  %5363 = vmatprep.subr.bf16.mxu1 %v7205_v6 }
 0x3ed   :  { %5333 = vmatpush1.bf16.msra.mxu0 %v7207_v23  ;;  %5365 = vmatpush1.bf16.msra.mxu1 %v7210_v4 }
 0x3ee   :  { %5335 = vmatprep.subr.bf16.mxu0 %v7215_v16  ;;  %5367 = vmatprep.subr.bf16.mxu1 %v7217_v1 }
 0x3f1   :  { %5337 = vmatpush1.bf16.msra.mxu0 %v7219_v52  ;;  %5369 = vmatpush1.bf16.msra.mxu1 %v7222_v38 }
 0x3f2   :  { %5371 = vmatprep.subr.bf16.mxu0 %v7227_v26  ;;  %5403 = vmatprep.subr.bf16.mxu1 %v7229_v53 }
 0x486   :  { %v2343_v28 = vpop.f32.mrb[6].mxu0  ;;  %v2414_v54 = vpop.f32.mrb[6].mxu1 }
 0x487   :  { %v5824_v39 = vadd.f32 %v2343_v28, %v7906_v12  ;;  %v2345_v18 = vpop.f32.mrb[7].mxu0  ;;  %v2416_v56 = vpop.f32.mrb[7].mxu1  ;;  %v5840_v63 = vadd.f32 %v2414_v54, %v7909_v60  ;;  %v2918_v60 = vld [vmem:[#allocation7 + $0x88] sm:$0xff]  ;;  %v2924_v12 = vld [vmem:[#allocation7 + $0xb8] sm:$0xff] }
 0x488   :  { %v5825_v9 = vadd.f32 %v2345_v18, %v7907_v34  ;;  %v5841_v55 = vadd.f32 %v2416_v56, %v7908_v31  ;;  %v2922_v31 = vld [vmem:[#allocation7 + $0xa8] sm:$0xff]  ;;  %v2920_v34 = vld [vmem:[#allocation7 + $0x98] sm:$0xff] }
 0x489   :  { %v4636_v45 = vmul.f32 -1.442695, %v5824_v39 }
 0x48a   :  { %v4637_v30 = vmul.f32 -1.442695, %v5825_v9  ;;  %v4638_v42 = vmul.f32 -1.442695, %v5841_v55 }
 0x48b   :  { %6051 = vpow2.f32 %v4636_v45 }
 0x48c   :  { %6053 = vpow2.f32 %v4637_v30 }
 0x48d   :  { %6055 = vpow2.f32 %v4638_v42 }
 0x48e   :  { %6057 = vtanh.f32 %v5840_v63 }
 0x495   :  { %v6052_v49 = vpop.eup %6051 }
 0x496   :  { %v6054_v58 = vpop.eup %6053  ;;  %v2636_v8 = vadd.f32 1.0, %v6052_v49 }
 0x497   :  { %v2642_v17 = vadd.f32 1.0, %v6054_v58  ;;  %v6056_v13 = vpop.eup %6055 }
 0x498   :  { %6059 = vrcp.f32 %v2636_v8  ;;  %v6058_v32 = vpop.eup %6057  ;;  %v2649_v39 = vadd.f32 1.0, %v6056_v13  ;;  %v2905_v8 = vld [vmem:[#allocation7 + $0x20] sm:$0xff]  ;;  %v2907_v13 = vld [vmem:[#allocation7 + $0x30] sm:$0xff] }
 0x499   :  { %6061 = vrcp.f32 %v2642_v17  ;;  %v2903_v17 = vld [vmem:[#allocation7 + $0x10] sm:$0xff] }
 0x49a   :  { %6063 = vrcp.f32 %v2649_v39 }
 0x4a2   :  { %v6060_v22 = vpop.eup %6059 }
 0x4a3   :  { %v6062_v27 = vpop.eup %6061  ;;  %v2653_v28 = vmul.f32 %v6060_v22, %v6058_v32  ;;  %v2910_v32 = vld [vmem:[#allocation7 + $0x48] sm:$0xff] }
 0x4a4   :  { %v2652_v18 = vmul.f32 %v6062_v27, %v7080_v5  ;;  %v2901_v5 = vld [vmem:[#allocation7] sm:$0xff]  ;;  %v2914_v22 = vld [vmem:[#allocation7 + $0x68] sm:$0xff]  ;;  %v2912_v27 = vld [vmem:[#allocation7 + $0x58] sm:$0xff]  ;;  %v6064_v39 = vpop.eup %6063 }
 0x4a6   :  { %v7238_v56 = vadd.f32 %v2653_v28, %v2652_v18  ;;  %v2553_v9 = vpop.f32.mrb[24].mxu0  ;;  %v2624_v54 = vpop.f32.mrb[24].mxu1  ;;  %v2916_v28 = vld [vmem:[#allocation7 + $0x78] sm:$0xff] }
 0x4a7   :  { %v5858_v45 = vadd.f32 %v2553_v9, %v7911_v3  ;;  %v2555_v30 = vpop.f32.mrb[25].mxu0  ;;  %v2626_v55 = vpop.f32.mrb[25].mxu1  ;;  %v2911_v3 = vld [vmem:[#allocation7 + $0x50] sm:$0xff] }
 0x4a8   :  { %7927 = vst [vmem:[#allocation13_spill] sm:$0xff] %v7238_v56  ;;  %v5859_v42 = vadd.f32 %v2555_v30, %v7912_v21  ;;  %6065 = vtanh.f32 %v7238_v56  ;;  %v5875_v58 = vadd.f32 %v2626_v55, %v7913_v14  ;;  %v7244_v30 = vpack.c.bf16 %v2905_v8, %v2901_v5  ;;  %v2915_v56 = vld [vmem:[#allocation7 + $0x70] sm:$0xff] }
 0x4a9   :  { %v4639_v63 = vmul.f32 -1.442695, %v5858_v45  ;;  %v7246_v21 = vpack.c.bf16 %v2907_v13, %v2903_v17  ;;  %v2909_v45 = vld [vmem:[#allocation7 + $0x40] sm:$0xff]  ;;  %v7251_v14 = vpack.c.bf16 %v2916_v28, %v2912_v27  ;;  %v7260_v17 = vpack.c.bf16 %v2915_v56, %v2911_v3  ;;  %v2932_v3 = vld [vmem:[#allocation7 + $0xf8] sm:$0xff] }
 0x4aa   :  { %v4640_v49 = vmul.f32 -1.442695, %v5859_v42  ;;  %v4641_v9 = vmul.f32 -1.442695, %v5875_v58  ;;  %v2913_v42 = vld [vmem:[#allocation7 + $0x60] sm:$0xff]  ;;  %v7264_v27 = vpack.c.bf16 %v2922_v31, %v2918_v60  ;;  %v7266_v28 = vpack.c.bf16 %v2924_v12, %v2920_v34 }
 0x4ab   :  { %6067 = vpow2.f32 %v4639_v63  ;;  %7928 = vst [vmem:[#allocation14_spill] sm:$0xff] %v7246_v21  ;;  %v5874_v63 = vadd.f32 %v2624_v54, %v6777_v57  ;;  %7930 = vst [vmem:[#allocation16_spill] sm:$0xff] %v7251_v14  ;;  %v7258_v8 = vpack.c.bf16 %v2913_v42, %v2909_v45  ;;  %v2917_v13 = vld [vmem:[#allocation7 + $0x80] sm:$0xff]  ;;  %v2930_v45 = vld [vmem:[#allocation7 + $0xe8] sm:$0xff] }
 0x4ac   :  { %6069 = vpow2.f32 %v4640_v49  ;;  %v7249_v49 = vpack.c.bf16 %v2914_v22, %v2910_v32  ;;  %7932 = vst [vmem:[#allocation18_spill] sm:$0xff] %v7260_v17  ;;  %v2921_v32 = vld [vmem:[#allocation7 + $0xa0] sm:$0xff]  ;;  %7933 = vst [vmem:[#allocation19_spill] sm:$0xff] %v7264_v27  ;;  %v2928_v42 = vld [vmem:[#allocation7 + $0xd8] sm:$0xff] }
 0x4ad   :  { %6071 = vpow2.f32 %v4641_v9  ;;  %7931 = vst [vmem:[#allocation17_spill] sm:$0xff] %v7258_v8  ;;  %7934 = vst [vmem:[#allocation20_spill] sm:$0xff] %v7266_v28  ;;  %v2926_v9 = vld [vmem:[#allocation7 + $0xc8] sm:$0xff]  ;;  %v7272_v31 = vpack.c.bf16 %v2921_v32, %v2917_v13  ;;  %v2925_v34 = vld [vmem:[#allocation7 + $0xc0] sm:$0xff] }
 0x4ae   :  { %7929 = vst [vmem:[#allocation15_spill] sm:$0xff] %v7249_v49  ;;  %6073 = vtanh.f32 %v5874_v63  ;;  %v2929_v60 = vld [vmem:[#allocation7 + $0xe0] sm:$0xff]  ;;  %v7278_v56 = vpack.c.bf16 %v2930_v45, %v2926_v9  ;;  %v7280_v63 = vpack.c.bf16 %v2932_v3, %v2928_v42  ;;  %v2935_v42 = vld [vmem:[#allocation7 + $0x110] sm:$0xff] }
 0x4af   :  { %7935 = vst [vmem:[#allocation21_spill] sm:$0xff] %v7272_v31  ;;  %v7284_v13 = vpack.c.bf16 %v2929_v60, %v2925_v34  ;;  %v2939_v3 = vld [vmem:[#allocation7 + $0x130] sm:$0xff]  ;;  %v2948_v34 = vld [vmem:[#allocation7 + $0x178] sm:$0xff] }
 0x4b0   :  { %7937 = vst [vmem:[#allocation30_spill] sm:$0xff] %v7278_v56  ;;  %7938 = vst [vmem:[#allocation31_spill] sm:$0xff] %v7280_v63 }
 0x4b1   :  { %7939 = vst [vmem:[#allocation32_spill] sm:$0xff] %v7284_v13 }
 0x4b2   :  { %v6066_v18 = vpop.eup %6065 }
 0x4b3   :  { %v2656_v55 = vmul.f32 %v6066_v18, %v6064_v39  ;;  %v2919_v39 = vld [vmem:[#allocation7 + $0x90] sm:$0xff] }
 0x4b4   :  { %v2923_v18 = vld [vmem:[#allocation7 + $0xb0] sm:$0xff] }
 0x4b5   :  { %v6068_v58 = vpop.eup %6067  ;;  %2681 = vst [vmem:[%s7778_s5 + $0x18] sm:$0xff] %v2656_v55  ;;  %2820 = vmatmul.mubr.f32.vlgmr.msra.gmra.mrb[8].mxu0 %v2656_v55  ;;  %2891 = vmatmul.mubr.f32.vlgmr.msra.gmra.mrb[8].mxu1 %v2656_v55  ;;  %v7274_v12 = vpack.c.bf16 %v2923_v18, %v2919_v39  ;;  %v2927_v55 = vld [vmem:[#allocation7 + $0xd0] sm:$0xff]  ;;  %v2933_v39 = vld [vmem:[#allocation7 + $0x100] sm:$0xff] }
 0x4b6   :  { %v6070_v5 = vpop.eup %6069  ;;  %v2660_v54 = vadd.f32 1.0, %v6068_v58  ;;  %5373 = vmatpush1.bf16.msra.mxu0 %v7244_v30  ;;  %5405 = vmatpush1.bf16.msra.mxu1 %v7246_v21  ;;  %v2931_v58 = vld [vmem:[#allocation7 + $0xf0] sm:$0xff]  ;;  %v2937_v18 = vld [vmem:[#allocation7 + $0x120] sm:$0xff] }
 0x4b7   :  { %v2666_v22 = vadd.f32 1.0, %v6070_v5  ;;  %5375 = vmatprep.subr.bf16.mxu0 %v7249_v49  ;;  %5407 = vmatprep.subr.bf16.mxu1 %v7251_v14  ;;  %7936 = vst [vmem:[#allocation22_spill] sm:$0xff] %v7274_v12  ;;  %v2934_v5 = vld [vmem:[#allocation7 + $0x108] sm:$0xff]  ;;  %v7286_v32 = vpack.c.bf16 %v2931_v58, %v2927_v55  ;;  %v7296_v58 = vpack.c.bf16 %v2937_v18, %v2933_v39  ;;  %v2947_v49 = vld [vmem:[#allocation7 + $0x170] sm:$0xff] }
 0x4b8   :  { %6075 = vrcp.f32 %v2660_v54  ;;  %3029 = vmatprep.mubr.f32.mxu0 %v7874_v19  ;;  %3100 = vmatprep.mubr.f32.mxu1 %v7874_v19  ;;  %v2938_v54 = vld [vmem:[#allocation7 + $0x128] sm:$0xff] }
 0x4b9   :  { %6077 = vrcp.f32 %v2666_v22  ;;  %v2936_v22 = vld [vmem:[#allocation7 + $0x118] sm:$0xff]  ;;  %7940 = vst [vmem:[#allocation33_spill] sm:$0xff] %v7286_v32  ;;  %v7290_v9 = vpack.c.bf16 %v2938_v54, %v2934_v5  ;;  %v2941_v5 = vld [vmem:[#allocation7 + $0x140] sm:$0xff]  ;;  %v2954_v18 = vld [vmem:[#allocation7 + $0x1a8] sm:$0xff] }
 0x4ba   :  { %5377 = vmatpush1.bf16.msra.mxu0 %v7258_v8  ;;  %5409 = vmatpush1.bf16.msra.mxu1 %v7260_v17  ;;  %v2940_v17 = vld [vmem:[#allocation7 + $0x138] sm:$0xff] }
 0x4bb   :  { %5379 = vmatprep.subr.bf16.mxu0 %v7264_v27  ;;  %5411 = vmatprep.subr.bf16.mxu1 %v7266_v28  ;;  %v7292_v45 = vpack.c.bf16 %v2940_v17, %v2936_v22  ;;  %v2942_v28 = vld [vmem:[#allocation7 + $0x148] sm:$0xff]  ;;  %v2945_v17 = vld [vmem:[#allocation7 + $0x160] sm:$0xff] }
 0x4bc   :  { %v2946_v27 = vld [vmem:[#allocation7 + $0x168] sm:$0xff] }
 0x4bd   :  { %v7302_v8 = vpack.c.bf16 %v2946_v27, %v2942_v28  ;;  %v2949_v28 = vld [vmem:[#allocation7 + $0x180] sm:$0xff] }
 0x4be   :  { %5381 = vmatpush1.bf16.msra.mxu0 %v7272_v31  ;;  %5413 = vmatpush1.bf16.msra.mxu1 %v7274_v12  ;;  %v6072_v31 = vpop.eup %6071  ;;  %v2944_v12 = vld [vmem:[#allocation7 + $0x158] sm:$0xff] }
 0x4bf   :  { %5383 = vmatprep.subr.bf16.mxu0 %v7278_v56  ;;  %5415 = vmatprep.subr.bf16.mxu1 %v7280_v63  ;;  %v6074_v60 = vpop.eup %6073  ;;  %v7298_v63 = vpack.c.bf16 %v2939_v3, %v2935_v42  ;;  %v2673_v56 = vadd.f32 1.0, %v6072_v31  ;;  %v7304_v14 = vpack.c.bf16 %v2948_v34, %v2944_v12  ;;  %v2952_v42 = vld [vmem:[#allocation7 + $0x198] sm:$0xff]  ;;  %v7311_v31 = vpack.c.bf16 %v2945_v17, %v2941_v5  ;;  %v2953_v12 = vld [vmem:[#allocation7 + $0x1a0] sm:$0xff] }
 0x4c0   :  { %v2956_v3 = vld [vmem:[#allocation7 + $0x1b8] sm:$0xff] }
 0x4c1   :  { %6079 = vrcp.f32 %v2673_v56  ;;  %v7319_v34 = vpack.c.bf16 %v2956_v3, %v2952_v42  ;;  %v2964_v5 = vld [vmem:[#allocation7 + $0x1f8] sm:$0xff]  ;;  %v2959_v42 = vld [vmem:[#allocation7 + $0x1d0] sm:$0xff] }
 0x4c2   :  { %v6076_v55 = vpop.eup %6075  ;;  %5385 = vmatpush1.bf16.msra.mxu0 %v7284_v13  ;;  %5417 = vmatpush1.bf16.msra.mxu1 %v7286_v32  ;;  %v2943_v13 = vld [vmem:[#allocation7 + $0x150] sm:$0xff]  ;;  %v2950_v32 = vld [vmem:[#allocation7 + $0x188] sm:$0xff] }
 0x4c3   :  { %v6078_v54 = vpop.eup %6077  ;;  %v2677_v22 = vmul.f32 %v6076_v55, %v6074_v60  ;;  %5387 = vmatprep.subr.bf16.mxu0 %v7290_v9  ;;  %5419 = vmatprep.subr.bf16.mxu1 %v7292_v45  ;;  %v7313_v27 = vpack.c.bf16 %v2947_v49, %v2943_v13  ;;  %v2951_v60 = vld [vmem:[#allocation7 + $0x190] sm:$0xff]  ;;  %v7324_v49 = vpack.c.bf16 %v2953_v12, %v2949_v28  ;;  %v2957_v13 = vld [vmem:[#allocation7 + $0x1c0] sm:$0xff] }
 0x4c4   :  { %v2676_v39 = vmul.f32 %v6078_v54, %v7109_v40  ;;  %v7317_v40 = vpack.c.bf16 %v2954_v18, %v2950_v32  ;;  %v2955_v55 = vld [vmem:[#allocation7 + $0x1b0] sm:$0xff]  ;;  %v2958_v54 = vld [vmem:[#allocation7 + $0x1c8] sm:$0xff]  ;;  %v2961_v18 = vld [vmem:[#allocation7 + $0x1e0] sm:$0xff] }
 0x4c5   :  { %v7326_v56 = vpack.c.bf16 %v2955_v55, %v2951_v60  ;;  %v2963_v3 = vld [vmem:[#allocation7 + $0x1f0] sm:$0xff]  ;;  %v7336_v28 = vpack.c.bf16 %v2961_v18, %v2957_v13  ;;  %v7948_v18 = vld [vmem:[#allocation29_spill] sm:$0xff] }
 0x4c6   :  { %v7307_v21 = vadd.f32 %v2677_v22, %v2676_v39  ;;  %5389 = vmatpush1.bf16.msra.mxu0 %v7296_v58  ;;  %5421 = vmatpush1.bf16.msra.mxu1 %v7298_v63  ;;  %v2962_v22 = vld [vmem:[#allocation7 + $0x1e8] sm:$0xff]  ;;  %v2960_v39 = vld [vmem:[#allocation7 + $0x1d8] sm:$0xff]  ;;  %v7338_v12 = vpack.c.bf16 %v2963_v3, %v2959_v42 }
 0x4c7   :  { %5391 = vmatprep.subr.bf16.mxu0 %v7302_v8  ;;  %5423 = vmatprep.subr.bf16.mxu1 %v7304_v14  ;;  %v7330_v32 = vpack.c.bf16 %v2962_v22, %v2958_v54  ;;  %v7332_v17 = vpack.c.bf16 %v2964_v5, %v2960_v39  ;;  %v7947_v22 = vld [vmem:[#allocation28_spill] sm:$0xff] }
 0x4c8   :  { %6081 = vtanh.f32 %v7307_v21 }
 0x4ca   :  { %5393 = vmatpush1.bf16.msra.mxu0 %v7311_v31  ;;  %5425 = vmatpush1.bf16.msra.mxu1 %v7313_v27 }
 0x4cb   :  { %5395 = vmatprep.subr.bf16.mxu0 %v7317_v40  ;;  %5427 = vmatprep.subr.bf16.mxu1 %v7319_v34  ;;  %v6080_v60 = vpop.eup %6079 }
 0x4ce   :  { %5397 = vmatpush1.bf16.msra.mxu0 %v7324_v49  ;;  %5429 = vmatpush1.bf16.msra.mxu1 %v7326_v56 }
 0x4cf   :  { %5399 = vmatprep.subr.bf16.mxu0 %v7330_v32  ;;  %5431 = vmatprep.subr.bf16.mxu1 %v7332_v17 }
 0x4d2   :  { %v6082_v55 = vpop.eup %6081  ;;  %5401 = vmatpush1.bf16.msra.mxu0 %v7336_v28  ;;  %5433 = vmatpush1.bf16.msra.mxu1 %v7338_v12 }
 0x4d3   :  { %v2680_v54 = vmul.f32 %v6082_v55, %v6080_v60  ;;  %5435 = vmatprep.subr.bf16.mxu0 %v7131_v0  ;;  %5467 = vmatprep.subr.bf16.mxu1 %v7133_v41 }
 0x4d5   :  { %2682 = vst [vmem:[%s7779_s6 + $0x20] sm:$0xff] %v2680_v54  ;;  %3030 = vmatmul.mubr.f32.vlgmr.msra.gmra.mrb[22].mxu0 %v2680_v54  ;;  %3101 = vmatmul.mubr.f32.vlgmr.msra.gmra.mrb[22].mxu1 %v2680_v54 }
 0x4d6   :  { %5437 = vmatpush1.bf16.msra.mxu0 %v7135_v37  ;;  %5469 = vmatpush1.bf16.msra.mxu1 %v7138_v50  ;;  %v7941_v37 = vld [vmem:[#allocation23_spill] sm:$0xff] }
 0x4d7   :  { %5439 = vmatprep.subr.bf16.mxu0 %v7143_v61  ;;  %5471 = vmatprep.subr.bf16.mxu1 %v7145_v46 }
 0x4d8   :  { %3297 = vmatprep.mubr.f32.mxu0 %v7874_v19  ;;  %3368 = vmatprep.mubr.f32.mxu1 %v7874_v19 }
 0x4da   :  { %5441 = vmatpush1.bf16.msra.mxu0 %v7147_v2  ;;  %5473 = vmatpush1.bf16.msra.mxu1 %v7150_v59  ;;  %v7942_v2 = vld [vmem:[#allocation24_spill] sm:$0xff] }
 0x4db   :  { %5443 = vmatprep.subr.bf16.mxu0 %v7155_v24  ;;  %5475 = vmatprep.subr.bf16.mxu1 %v7157_v7 }
 0x4de   :  { %5445 = vmatpush1.bf16.msra.mxu0 %v7159_v25  ;;  %5477 = vmatpush1.bf16.msra.mxu1 %v7162_v47  ;;  %v7943_v25 = vld [vmem:[#allocation25_spill] sm:$0xff] }
 0x4df   :  { %5447 = vmatprep.subr.bf16.mxu0 %v7167_v10  ;;  %5479 = vmatprep.subr.bf16.mxu1 %v7169_v44  ;;  %v7944_v44 = vld [vmem:[#allocation26_spill] sm:$0xff] }
 0x4e2   :  { %5449 = vmatpush1.bf16.msra.mxu0 %v7171_v51  ;;  %5481 = vmatpush1.bf16.msra.mxu1 %v7174_v33 }
 0x4e3   :  { %5451 = vmatprep.subr.bf16.mxu0 %v7179_v48  ;;  %5483 = vmatprep.subr.bf16.mxu1 %v7181_v43 }
 0x4e6   :  { %5453 = vmatpush1.bf16.msra.mxu0 %v7183_v11  ;;  %5485 = vmatpush1.bf16.msra.mxu1 %v7186_v29 }
 0x4e7   :  { %5455 = vmatprep.subr.bf16.mxu0 %v7191_v35  ;;  %5487 = vmatprep.subr.bf16.mxu1 %v7193_v62 }
 0x4ea   :  { %5457 = vmatpush1.bf16.msra.mxu0 %v7195_v20  ;;  %5489 = vmatpush1.bf16.msra.mxu1 %v7198_v15 }
 0x4eb   :  { %5459 = vmatprep.subr.bf16.mxu0 %v7203_v36  ;;  %5491 = vmatprep.subr.bf16.mxu1 %v7205_v6  ;;  %v7945_v6 = vld [vmem:[#allocation13_spill] sm:$0xff] }
 0x4ee   :  { %5461 = vmatpush1.bf16.msra.mxu0 %v7207_v23  ;;  %5493 = vmatpush1.bf16.msra.mxu1 %v7210_v4 }
 0x4ef   :  { %5463 = vmatprep.subr.bf16.mxu0 %v7215_v16  ;;  %5495 = vmatprep.subr.bf16.mxu1 %v7217_v1 }
 0x4f2   :  { %5465 = vmatpush1.bf16.msra.mxu0 %v7219_v52  ;;  %5497 = vmatpush1.bf16.msra.mxu1 %v7222_v38  ;;  %v7946_v52 = vld [vmem:[#allocation27_spill] sm:$0xff] }
 0x4f3   :  { %5499 = vmatprep.subr.bf16.mxu0 %v7227_v26  ;;  %5531 = vmatprep.subr.bf16.mxu1 %v7229_v53 }
 0x588   :  { %v2821_v0 = vpop.f32.mrb[8].mxu0  ;;  %v2892_v41 = vpop.f32.mrb[8].mxu1 }
 0x589   :  { %v5826_v50 = vadd.f32 %v2821_v0, %v7941_v37  ;;  %v2823_v61 = vpop.f32.mrb[9].mxu0  ;;  %v2894_v46 = vpop.f32.mrb[9].mxu1  ;;  %v5842_v51 = vadd.f32 %v2892_v41, %v7944_v44 }
 0x58a   :  { %v5827_v59 = vadd.f32 %v2823_v61, %v7942_v2  ;;  %v5843_v47 = vadd.f32 %v2894_v46, %v7943_v25  ;;  %v7949_v46 = vld [vmem:[#allocation14_spill] sm:$0xff] }
 0x58b   :  { %v4642_v24 = vmul.f32 -1.442695, %v5826_v50 }
 0x58c   :  { %v4643_v7 = vmul.f32 -1.442695, %v5827_v59  ;;  %v4644_v10 = vmul.f32 -1.442695, %v5843_v47  ;;  %v7952_v47 = vld [vmem:[#allocation17_spill] sm:$0xff] }
 0x58d   :  { %6083 = vpow2.f32 %v4642_v24  ;;  %v7950_v24 = vld [vmem:[#allocation15_spill] sm:$0xff] }
 0x58e   :  { %6085 = vpow2.f32 %v4643_v7  ;;  %v7951_v7 = vld [vmem:[#allocation16_spill] sm:$0xff] }
 0x58f   :  { %6087 = vpow2.f32 %v4644_v10  ;;  %v7953_v10 = vld [vmem:[#allocation18_spill] sm:$0xff] }
 0x590   :  { %6089 = vtanh.f32 %v5842_v51  ;;  %v7954_v51 = vld [vmem:[#allocation19_spill] sm:$0xff] }
 0x597   :  { %v6084_v33 = vpop.eup %6083 }
 0x598   :  { %v6086_v48 = vpop.eup %6085  ;;  %v3114_v43 = vadd.f32 1.0, %v6084_v33  ;;  %v7956_v33 = vld [vmem:[#allocation21_spill] sm:$0xff] }
 0x599   :  { %v3120_v11 = vadd.f32 1.0, %v6086_v48  ;;  %v6088_v29 = vpop.eup %6087  ;;  %v7957_v48 = vld [vmem:[#allocation22_spill] sm:$0xff] }
 0x59a   :  { %6091 = vrcp.f32 %v3114_v43  ;;  %v6090_v35 = vpop.eup %6089  ;;  %v3127_v36 = vadd.f32 1.0, %v6088_v29  ;;  %v7958_v43 = vld [vmem:[#allocation30_spill] sm:$0xff] }
 0x59b   :  { %6093 = vrcp.f32 %v3120_v11  ;;  %v7959_v11 = vld [vmem:[#allocation31_spill] sm:$0xff] }
 0x59c   :  { %6095 = vrcp.f32 %v3127_v36 }
 0x5a4   :  { %v6092_v62 = vpop.eup %6091 }
 0x5a5   :  { %v6094_v20 = vpop.eup %6093  ;;  %v3131_v15 = vmul.f32 %v6092_v62, %v6090_v35 }
 0x5a6   :  { %v3130_v23 = vmul.f32 %v6094_v20, %v7945_v6  ;;  %v6096_v3 = vpop.eup %6095  ;;  %v7960_v20 = vld [vmem:[#allocation32_spill] sm:$0xff] }
 0x5a8   :  { %v7388_v4 = vadd.f32 %v3131_v15, %v3130_v23  ;;  %v3031_v16 = vpop.f32.mrb[22].mxu0  ;;  %v3102_v1 = vpop.f32.mrb[22].mxu1  ;;  %v7961_v15 = vld [vmem:[#allocation33_spill] sm:$0xff] }
 0x5a9   :  { %v5856_v38 = vadd.f32 %v3031_v16, %v7946_v52  ;;  %v3033_v26 = vpop.f32.mrb[23].mxu0  ;;  %v3104_v53 = vpop.f32.mrb[23].mxu1  ;;  %v5872_v54 = vadd.f32 %v3102_v1, %v6777_v57 }
 0x5aa   :  { %v5857_v39 = vadd.f32 %v3033_v26, %v7947_v22  ;;  %6097 = vtanh.f32 %v7388_v4  ;;  %v5873_v42 = vadd.f32 %v3104_v53, %v7948_v18  ;;  %v3662_v53 = vld [vmem:[#allocation5 + $0x78] sm:$0xff] }
 0x5ab   :  { %v4645_v5 = vmul.f32 -1.442695, %v5856_v38  ;;  %v3658_v38 = vld [vmem:[#allocation5 + $0x58] sm:$0xff] }
 0x5ac   :  { %v4646_v13 = vmul.f32 -1.442695, %v5857_v39  ;;  %v4647_v55 = vmul.f32 -1.442695, %v5873_v42  ;;  %v3655_v39 = vld [vmem:[#allocation5 + $0x40] sm:$0xff] }
 0x5ad   :  { %6099 = vpow2.f32 %v4645_v5  ;;  %v3659_v5 = vld [vmem:[#allocation5 + $0x60] sm:$0xff] }
 0x5ae   :  { %6101 = vpow2.f32 %v4646_v13  ;;  %v7453_v13 = vpack.c.bf16 %v3662_v53, %v3658_v38  ;;  %v7455_v42 = vpack.c.bf16 %v3659_v5, %v3655_v39  ;;  %v3694_v53 = vld [vmem:[#allocation5 + $0x178] sm:$0xff]  ;;  %v3687_v39 = vld [vmem:[#allocation5 + $0x140] sm:$0xff] }
 0x5af   :  { %6103 = vpow2.f32 %v4647_v55  ;;  %v3691_v5 = vld [vmem:[#allocation5 + $0x160] sm:$0xff] }
 0x5b0   :  { %6105 = vtanh.f32 %v5872_v54  ;;  %v3664_v54 = vld [vmem:[#allocation5 + $0x88] sm:$0xff] }
 0x5b4   :  { %v6098_v60 = vpop.eup %6097 }
 0x5b5   :  { %v3134_v0 = vmul.f32 %v6098_v60, %v6096_v3  ;;  %v3657_v3 = vld [vmem:[#allocation5 + $0x50] sm:$0xff] }
 0x5b6   :  { %v3661_v60 = vld [vmem:[#allocation5 + $0x70] sm:$0xff] }
 0x5b7   :  { %v6100_v41 = vpop.eup %6099  ;;  %3159 = vst [vmem:[%s7778_s5 + $0x20] sm:$0xff] %v3134_v0  ;;  %3298 = vmatmul.mubr.f32.vlgmr.msra.gmra.mrb[10].mxu0 %v3134_v0  ;;  %3369 = vmatmul.mubr.f32.vlgmr.msra.gmra.mrb[10].mxu1 %v3134_v0  ;;  %v7458_v55 = vpack.c.bf16 %v3661_v60, %v3657_v3  ;;  %v3668_v0 = vld [vmem:[#allocation5 + $0xa8] sm:$0xff]  ;;  %v7503_v60 = vpack.c.bf16 %v3691_v5, %v3687_v39  ;;  %v3860_v5 = vld [vmem:[#allocation7 + $0x18] sm:$0xff] }
 0x5b8   :  { %v6102_v50 = vpop.eup %6101  ;;  %v3138_v61 = vadd.f32 1.0, %v6100_v41  ;;  %5501 = vmatpush1.bf16.msra.mxu0 %v7244_v30  ;;  %5533 = vmatpush1.bf16.msra.mxu1 %v7949_v46  ;;  %v7955_v30 = vld [vmem:[#allocation20_spill] sm:$0xff]  ;;  %v3666_v41 = vld [vmem:[#allocation5 + $0x98] sm:$0xff]  ;;  %v3862_v39 = vld [vmem:[#allocation7 + $0x28] sm:$0xff] }
 0x5b9   :  { %v3144_v59 = vadd.f32 1.0, %v6102_v50  ;;  %5503 = vmatprep.subr.bf16.mxu0 %v7950_v24  ;;  %5535 = vmatprep.subr.bf16.mxu1 %v7951_v7  ;;  %v6104_v29 = vpop.eup %6103  ;;  %v7463_v50 = vpack.c.bf16 %v3668_v0, %v3664_v54  ;;  %v3663_v46 = vld [vmem:[#allocation5 + $0x80] sm:$0xff]  ;;  %v3689_v54 = vld [vmem:[#allocation5 + $0x150] sm:$0xff] }
 0x5ba   :  { %6107 = vrcp.f32 %v3138_v61  ;;  %3507 = vmatprep.mubr.f32.mxu0 %v7874_v19  ;;  %3578 = vmatprep.mubr.f32.mxu1 %v7874_v19  ;;  %v6106_v35 = vpop.eup %6105  ;;  %v3151_v23 = vadd.f32 1.0, %v6104_v29  ;;  %v3670_v61 = vld [vmem:[#allocation5 + $0xb8] sm:$0xff]  ;;  %v3671_v29 = vld [vmem:[#allocation5 + $0xc0] sm:$0xff]  ;;  %v3693_v0 = vld [vmem:[#allocation5 + $0x170] sm:$0xff] }
 0x5bb   :  { %6109 = vrcp.f32 %v3144_v59  ;;  %v3667_v59 = vld [vmem:[#allocation5 + $0xa0] sm:$0xff]  ;;  %v7465_v24 = vpack.c.bf16 %v3670_v61, %v3666_v41  ;;  %v7506_v41 = vpack.c.bf16 %v3693_v0, %v3689_v54  ;;  %v3696_v61 = vld [vmem:[#allocation5 + $0x188] sm:$0xff]  ;;  %v3864_v0 = vld [vmem:[#allocation7 + $0x38] sm:$0xff] }
 0x5bc   :  { %5505 = vmatpush1.bf16.msra.mxu0 %v7952_v47  ;;  %5537 = vmatpush1.bf16.msra.mxu1 %v7953_v10  ;;  %6111 = vrcp.f32 %v3151_v23  ;;  %v7467_v7 = vpack.c.bf16 %v3667_v59, %v3663_v46  ;;  %v3665_v47 = vld [vmem:[#allocation5 + $0x90] sm:$0xff]  ;;  %v3680_v23 = vld [vmem:[#allocation5 + $0x108] sm:$0xff]  ;;  %v3698_v59 = vld [vmem:[#allocation5 + $0x198] sm:$0xff] }
 0x5bd   :  { %5507 = vmatprep.subr.bf16.mxu0 %v7954_v51  ;;  %5539 = vmatprep.subr.bf16.mxu1 %v7955_v30  ;;  %v3669_v10 = vld [vmem:[#allocation5 + $0xb0] sm:$0xff]  ;;  %v3672_v30 = vld [vmem:[#allocation5 + $0xc8] sm:$0xff] }
 0x5be   :  { %v7470_v51 = vpack.c.bf16 %v3669_v10, %v3665_v47  ;;  %v3700_v46 = vld [vmem:[#allocation5 + $0x1a8] sm:$0xff]  ;;  %v3702_v10 = vld [vmem:[#allocation5 + $0x1b8] sm:$0xff] }
 0x5bf   :  { %v7511_v47 = vpack.c.bf16 %v3700_v46, %v3696_v61  ;;  %v7537_v61 = vpack.c.bf16 %v3864_v0, %v3860_v5 }
 0x5c0   :  { %5509 = vmatpush1.bf16.msra.mxu0 %v7956_v33  ;;  %5541 = vmatpush1.bf16.msra.mxu1 %v7957_v48  ;;  %v3676_v33 = vld [vmem:[#allocation5 + $0xe8] sm:$0xff]  ;;  %v3674_v48 = vld [vmem:[#allocation5 + $0xd8] sm:$0xff] }
 0x5c1   :  { %5511 = vmatprep.subr.bf16.mxu0 %v7958_v43  ;;  %5543 = vmatprep.subr.bf16.mxu1 %v7959_v11  ;;  %v7475_v43 = vpack.c.bf16 %v3676_v33, %v3672_v30  ;;  %v3678_v11 = vld [vmem:[#allocation5 + $0xf8] sm:$0xff]  ;;  %v3695_v30 = vld [vmem:[#allocation5 + $0x180] sm:$0xff] }
 0x5c2   :  { %v3699_v33 = vld [vmem:[#allocation5 + $0x1a0] sm:$0xff] }
 0x5c4   :  { %v6108_v62 = vpop.eup %6107  ;;  %5513 = vmatpush1.bf16.msra.mxu0 %v7960_v20  ;;  %5545 = vmatpush1.bf16.msra.mxu1 %v7961_v15  ;;  %v3673_v15 = vld [vmem:[#allocation5 + $0xd0] sm:$0xff] }
 0x5c5   :  { %v6110_v36 = vpop.eup %6109  ;;  %v3155_v6 = vmul.f32 %v6108_v62, %v6106_v35  ;;  %5515 = vmatprep.subr.bf16.mxu0 %v7290_v9  ;;  %5547 = vmatprep.subr.bf16.mxu1 %v7292_v45  ;;  %v3652_v9 = vld [vmem:[#allocation5 + $0x28] sm:$0xff]  ;;  %v3650_v45 = vld [vmem:[#allocation5 + $0x18] sm:$0xff]  ;;  %v3675_v35 = vld [vmem:[#allocation5 + $0xe0] sm:$0xff]  ;;  %v7477_v62 = vpack.c.bf16 %v3678_v11, %v3674_v48  ;;  %v7513_v48 = vpack.c.bf16 %v3702_v10, %v3698_v59 }
 0x5c6   :  { %v3154_v16 = vmul.f32 %v6110_v36, %v7307_v21  ;;  %v6112_v21 = vpop.eup %6111  ;;  %v7479_v20 = vpack.c.bf16 %v3675_v35, %v3671_v29  ;;  %v3677_v36 = vld [vmem:[#allocation5 + $0xf0] sm:$0xff]  ;;  %v7515_v11 = vpack.c.bf16 %v3699_v33, %v3695_v30 }
 0x5c7   :  { %v3697_v29 = vld [vmem:[#allocation5 + $0x190] sm:$0xff] }
 0x5c8   :  { %v7417_v1 = vadd.f32 %v3155_v6, %v3154_v16  ;;  %5517 = vmatpush1.bf16.msra.mxu0 %v7296_v58  ;;  %5549 = vmatpush1.bf16.msra.mxu1 %v7298_v63  ;;  %v3648_v63 = vld [vmem:[#allocation5 + $0x8] sm:$0xff]  ;;  %v7482_v6 = vpack.c.bf16 %v3677_v36, %v3673_v15  ;;  %v3701_v35 = vld [vmem:[#allocation5 + $0x1b0] sm:$0xff] }
 0x5c9   :  { %5519 = vmatprep.subr.bf16.mxu0 %v7302_v8  ;;  %5551 = vmatprep.subr.bf16.mxu1 %v7304_v14  ;;  %v7439_v58 = vpack.c.bf16 %v3652_v9, %v3648_v63  ;;  %v3684_v16 = vld [vmem:[#allocation5 + $0x128] sm:$0xff]  ;;  %v3679_v63 = vld [vmem:[#allocation5 + $0x100] sm:$0xff]  ;;  %v7518_v15 = vpack.c.bf16 %v3701_v35, %v3697_v29 }
 0x5ca   :  { %6113 = vtanh.f32 %v7417_v1  ;;  %v3683_v9 = vld [vmem:[#allocation5 + $0x120] sm:$0xff]  ;;  %v3704_v36 = vld [vmem:[#allocation5 + $0x1c8] sm:$0xff] }
 0x5cc   :  { %5521 = vmatpush1.bf16.msra.mxu0 %v7311_v31  ;;  %5553 = vmatpush1.bf16.msra.mxu1 %v7313_v27  ;;  %v3654_v31 = vld [vmem:[#allocation5 + $0x38] sm:$0xff]  ;;  %v3647_v27 = vld [vmem:[#allocation5] sm:$0xff] }
 0x5cd   :  { %5523 = vmatprep.subr.bf16.mxu0 %v7317_v40  ;;  %5555 = vmatprep.subr.bf16.mxu1 %v7319_v34  ;;  %v3651_v40 = vld [vmem:[#allocation5 + $0x20] sm:$0xff]  ;;  %v7441_v34 = vpack.c.bf16 %v3654_v31, %v3650_v45  ;;  %v7491_v31 = vpack.c.bf16 %v3683_v9, %v3679_v63 }
 0x5ce   :  { %v3703_v63 = vld [vmem:[#allocation5 + $0x1c0] sm:$0xff] }
 0x5cf   :  { %v3707_v9 = vld [vmem:[#allocation5 + $0x1e0] sm:$0xff] }
 0x5d0   :  { %5525 = vmatpush1.bf16.msra.mxu0 %v7324_v49  ;;  %5557 = vmatpush1.bf16.msra.mxu1 %v7326_v56  ;;  %v7443_v49 = vpack.c.bf16 %v3651_v40, %v3647_v27  ;;  %v3649_v56 = vld [vmem:[#allocation5 + $0x10] sm:$0xff] }
 0x5d1   :  { %5527 = vmatprep.subr.bf16.mxu0 %v7330_v32  ;;  %5559 = vmatprep.subr.bf16.mxu1 %v7332_v17  ;;  %v3653_v32 = vld [vmem:[#allocation5 + $0x30] sm:$0xff] }
 0x5d2   :  { %v7446_v17 = vpack.c.bf16 %v3653_v32, %v3649_v56  ;;  %v3681_v27 = vld [vmem:[#allocation5 + $0x110] sm:$0xff]  ;;  %v3688_v32 = vld [vmem:[#allocation5 + $0x148] sm:$0xff] }
 0x5d3   :  { %v3685_v40 = vld [vmem:[#allocation5 + $0x130] sm:$0xff] }
 0x5d4   :  { %v6114_v14 = vpop.eup %6113  ;;  %5529 = vmatpush1.bf16.msra.mxu0 %v7336_v28  ;;  %5561 = vmatpush1.bf16.msra.mxu1 %v7338_v12  ;;  %v3656_v28 = vld [vmem:[#allocation5 + $0x48] sm:$0xff]  ;;  %v7494_v56 = vpack.c.bf16 %v3685_v40, %v3681_v27  ;;  %v7527_v40 = vpack.c.bf16 %v3707_v9, %v3703_v63 }
 0x5d5   :  { %v3158_v8 = vmul.f32 %v6114_v14, %v6112_v21  ;;  %5563 = vmatprep.subr.bf16.mxu0 %v7439_v58  ;;  %5595 = vmatprep.subr.bf16.mxu1 %v7441_v34  ;;  %v3660_v12 = vld [vmem:[#allocation5 + $0x68] sm:$0xff]  ;;  %v3682_v21 = vld [vmem:[#allocation5 + $0x118] sm:$0xff]  ;;  %v7487_v14 = vpack.c.bf16 %v3684_v16, %v3680_v23 }
 0x5d6   :  { %v7451_v26 = vpack.c.bf16 %v3660_v12, %v3656_v28  ;;  %v3692_v28 = vld [vmem:[#allocation5 + $0x168] sm:$0xff]  ;;  %v3690_v12 = vld [vmem:[#allocation5 + $0x158] sm:$0xff] }
 0x5d7   :  { %3160 = vst [vmem:[%s7779_s6 + $0x18] sm:$0xff] %v3158_v8  ;;  %3508 = vmatmul.mubr.f32.vlgmr.msra.gmra.mrb[20].mxu0 %v3158_v8  ;;  %3579 = vmatmul.mubr.f32.vlgmr.msra.gmra.mrb[20].mxu1 %v3158_v8  ;;  %v3686_v8 = vld [vmem:[#allocation5 + $0x138] sm:$0xff]  ;;  %v7499_v38 = vpack.c.bf16 %v3692_v28, %v3688_v32  ;;  %v7501_v3 = vpack.c.bf16 %v3694_v53, %v3690_v12  ;;  %v3708_v23 = vld [vmem:[#allocation5 + $0x1e8] sm:$0xff]  ;;  %v3705_v32 = vld [vmem:[#allocation5 + $0x1d0] sm:$0xff] }
 0x5d8   :  { %3775 = vmatprep.mubr.f32.mxu0 %v7874_v19  ;;  %3846 = vmatprep.mubr.f32.mxu1 %v7874_v19  ;;  %v7489_v45 = vpack.c.bf16 %v3686_v8, %v3682_v21  ;;  %v3706_v16 = vld [vmem:[#allocation5 + $0x1d8] sm:$0xff]  ;;  %v7523_v21 = vpack.c.bf16 %v3708_v23, %v3704_v36  ;;  %v3709_v28 = vld [vmem:[#allocation5 + $0x1f0] sm:$0xff]  ;;  %v3858_v53 = vld [vmem:[#allocation7 + $0x8] sm:$0xff] }
 0x5d9   :  { %5565 = vmatpush1.bf16.msra.mxu0 %v7443_v49  ;;  %5597 = vmatpush1.bf16.msra.mxu1 %v7446_v17  ;;  %v3710_v8 = vld [vmem:[#allocation5 + $0x1f8] sm:$0xff]  ;;  %v7530_v12 = vpack.c.bf16 %v3709_v28, %v3705_v32  ;;  %v7535_v54 = vpack.c.bf16 %v3862_v39, %v3858_v53 }
 0x5da   :  { %5567 = vmatprep.subr.bf16.mxu0 %v7451_v26  ;;  %5599 = vmatprep.subr.bf16.mxu1 %v7453_v13  ;;  %v7525_v27 = vpack.c.bf16 %v3710_v8, %v3706_v16 }
 0x5dd   :  { %5569 = vmatpush1.bf16.msra.mxu0 %v7455_v42  ;;  %5601 = vmatpush1.bf16.msra.mxu1 %v7458_v55 }
 0x5de   :  { %5571 = vmatprep.subr.bf16.mxu0 %v7463_v50  ;;  %5603 = vmatprep.subr.bf16.mxu1 %v7465_v24 }
 0x5e1   :  { %5573 = vmatpush1.bf16.msra.mxu0 %v7467_v7  ;;  %5605 = vmatpush1.bf16.msra.mxu1 %v7470_v51 }
 0x5e2   :  { %5575 = vmatprep.subr.bf16.mxu0 %v7475_v43  ;;  %5607 = vmatprep.subr.bf16.mxu1 %v7477_v62 }
 0x5e5   :  { %5577 = vmatpush1.bf16.msra.mxu0 %v7479_v20  ;;  %5609 = vmatpush1.bf16.msra.mxu1 %v7482_v6 }
 0x5e6   :  { %5579 = vmatprep.subr.bf16.mxu0 %v7487_v14  ;;  %5611 = vmatprep.subr.bf16.mxu1 %v7489_v45 }
 0x5e9   :  { %5581 = vmatpush1.bf16.msra.mxu0 %v7491_v31  ;;  %5613 = vmatpush1.bf16.msra.mxu1 %v7494_v56 }
 0x5ea   :  { %5583 = vmatprep.subr.bf16.mxu0 %v7499_v38  ;;  %5615 = vmatprep.subr.bf16.mxu1 %v7501_v3 }
 0x5ed   :  { %5585 = vmatpush1.bf16.msra.mxu0 %v7503_v60  ;;  %5617 = vmatpush1.bf16.msra.mxu1 %v7506_v41 }
 0x5ee   :  { %5587 = vmatprep.subr.bf16.mxu0 %v7511_v47  ;;  %5619 = vmatprep.subr.bf16.mxu1 %v7513_v48 }
 0x5f1   :  { %5589 = vmatpush1.bf16.msra.mxu0 %v7515_v11  ;;  %5621 = vmatpush1.bf16.msra.mxu1 %v7518_v15 }
 0x5f2   :  { %5591 = vmatprep.subr.bf16.mxu0 %v7523_v21  ;;  %5623 = vmatprep.subr.bf16.mxu1 %v7525_v27 }
 0x5f5   :  { %5593 = vmatpush1.bf16.msra.mxu0 %v7527_v40  ;;  %5625 = vmatpush1.bf16.msra.mxu1 %v7530_v12 }
 0x5f6   :  { %5627 = vmatprep.subr.bf16.mxu0 %v7535_v54  ;;  %5659 = vmatprep.subr.bf16.mxu1 %v7537_v61 }
 0x68a   :  { %v3299_v46 = vpop.f32.mrb[10].mxu0  ;;  %v3370_v59 = vpop.f32.mrb[10].mxu1 }
 0x68b   :  { %v5828_v10 = vadd.f32 %v3299_v46, %v7941_v37  ;;  %v3301_v30 = vpop.f32.mrb[11].mxu0  ;;  %v3372_v33 = vpop.f32.mrb[11].mxu1  ;;  %v5844_v8 = vadd.f32 %v3370_v59, %v7944_v44  ;;  %v3874_v44 = vld [vmem:[#allocation7 + $0x88] sm:$0xff]  ;;  %v3880_v37 = vld [vmem:[#allocation7 + $0xb8] sm:$0xff] }
 0x68c   :  { %v5829_v29 = vadd.f32 %v3301_v30, %v7942_v2  ;;  %v5845_v23 = vadd.f32 %v3372_v33, %v7943_v25  ;;  %v3878_v25 = vld [vmem:[#allocation7 + $0xa8] sm:$0xff]  ;;  %v3876_v2 = vld [vmem:[#allocation7 + $0x98] sm:$0xff] }
 0x68d   :  { %v4648_v35 = vmul.f32 -1.442695, %v5828_v10 }
 0x68e   :  { %v4649_v36 = vmul.f32 -1.442695, %v5829_v29  ;;  %v4650_v16 = vmul.f32 -1.442695, %v5845_v23 }
 0x68f   :  { %6115 = vpow2.f32 %v4648_v35 }
 0x690   :  { %6117 = vpow2.f32 %v4649_v36 }
 0x691   :  { %6119 = vpow2.f32 %v4650_v16 }
 0x692   :  { %6121 = vtanh.f32 %v5844_v8 }
 0x699   :  { %v6116_v63 = vpop.eup %6115 }
 0x69a   :  { %v6118_v9 = vpop.eup %6117  ;;  %v3592_v32 = vadd.f32 1.0, %v6116_v63 }
 0x69b   :  { %v3598_v28 = vadd.f32 1.0, %v6118_v9  ;;  %v6120_v53 = vpop.eup %6119 }
 0x69c   :  { %6123 = vrcp.f32 %v3592_v32  ;;  %v6122_v39 = vpop.eup %6121  ;;  %v3605_v10 = vadd.f32 1.0, %v6120_v53  ;;  %v3861_v32 = vld [vmem:[#allocation7 + $0x20] sm:$0xff]  ;;  %v3863_v53 = vld [vmem:[#allocation7 + $0x30] sm:$0xff] }
 0x69d   :  { %6125 = vrcp.f32 %v3598_v28  ;;  %v3859_v28 = vld [vmem:[#allocation7 + $0x10] sm:$0xff] }
 0x69e   :  { %6127 = vrcp.f32 %v3605_v10 }
 0x6a6   :  { %v6124_v5 = vpop.eup %6123 }
 0x6a7   :  { %v6126_v0 = vpop.eup %6125  ;;  %v3609_v46 = vmul.f32 %v6124_v5, %v6122_v39  ;;  %v3866_v39 = vld [vmem:[#allocation7 + $0x48] sm:$0xff] }
 0x6a8   :  { %v3608_v30 = vmul.f32 %v6126_v0, %v7388_v4  ;;  %v3857_v4 = vld [vmem:[#allocation7] sm:$0xff]  ;;  %v3870_v5 = vld [vmem:[#allocation7 + $0x68] sm:$0xff]  ;;  %v3868_v0 = vld [vmem:[#allocation7 + $0x58] sm:$0xff]  ;;  %v6128_v10 = vpop.eup %6127 }
 0x6aa   :  { %v7546_v33 = vadd.f32 %v3609_v46, %v3608_v30  ;;  %v3509_v29 = vpop.f32.mrb[20].mxu0  ;;  %v3580_v59 = vpop.f32.mrb[20].mxu1  ;;  %v3872_v46 = vld [vmem:[#allocation7 + $0x78] sm:$0xff] }
 0x6ab   :  { %v5854_v35 = vadd.f32 %v3509_v29, %v7946_v52  ;;  %v3511_v36 = vpop.f32.mrb[21].mxu0  ;;  %v3582_v23 = vpop.f32.mrb[21].mxu1  ;;  %v3867_v52 = vld [vmem:[#allocation7 + $0x50] sm:$0xff] }
 0x6ac   :  { %7962 = vst [vmem:[#allocation13_spill] sm:$0xff] %v7546_v33  ;;  %v5855_v16 = vadd.f32 %v3511_v36, %v7947_v22  ;;  %6129 = vtanh.f32 %v7546_v33  ;;  %v5871_v9 = vadd.f32 %v3582_v23, %v7948_v18  ;;  %v7552_v36 = vpack.c.bf16 %v3861_v32, %v3857_v4  ;;  %v3871_v33 = vld [vmem:[#allocation7 + $0x70] sm:$0xff] }
 0x6ad   :  { %v4651_v8 = vmul.f32 -1.442695, %v5854_v35  ;;  %v7554_v22 = vpack.c.bf16 %v3863_v53, %v3859_v28  ;;  %v3865_v35 = vld [vmem:[#allocation7 + $0x40] sm:$0xff]  ;;  %v7559_v18 = vpack.c.bf16 %v3872_v46, %v3868_v0  ;;  %v7568_v28 = vpack.c.bf16 %v3871_v33, %v3867_v52  ;;  %v3888_v52 = vld [vmem:[#allocation7 + $0xf8] sm:$0xff] }
 0x6ae   :  { %v4652_v63 = vmul.f32 -1.442695, %v5855_v16  ;;  %v4653_v29 = vmul.f32 -1.442695, %v5871_v9  ;;  %v3869_v16 = vld [vmem:[#allocation7 + $0x60] sm:$0xff]  ;;  %v7572_v0 = vpack.c.bf16 %v3878_v25, %v3874_v44  ;;  %v7574_v46 = vpack.c.bf16 %v3880_v37, %v3876_v2 }
 0x6af   :  { %6131 = vpow2.f32 %v4651_v8  ;;  %7963 = vst [vmem:[#allocation14_spill] sm:$0xff] %v7554_v22  ;;  %v5870_v8 = vadd.f32 %v3580_v59, %v6777_v57  ;;  %7965 = vst [vmem:[#allocation16_spill] sm:$0xff] %v7559_v18  ;;  %v7566_v32 = vpack.c.bf16 %v3869_v16, %v3865_v35  ;;  %v3873_v53 = vld [vmem:[#allocation7 + $0x80] sm:$0xff]  ;;  %v3886_v35 = vld [vmem:[#allocation7 + $0xe8] sm:$0xff] }
 0x6b0   :  { %6133 = vpow2.f32 %v4652_v63  ;;  %v7557_v63 = vpack.c.bf16 %v3870_v5, %v3866_v39  ;;  %7967 = vst [vmem:[#allocation18_spill] sm:$0xff] %v7568_v28  ;;  %v3877_v39 = vld [vmem:[#allocation7 + $0xa0] sm:$0xff]  ;;  %7968 = vst [vmem:[#allocation19_spill] sm:$0xff] %v7572_v0  ;;  %v3884_v16 = vld [vmem:[#allocation7 + $0xd8] sm:$0xff] }
 0x6b1   :  { %6135 = vpow2.f32 %v4653_v29  ;;  %7966 = vst [vmem:[#allocation17_spill] sm:$0xff] %v7566_v32  ;;  %7969 = vst [vmem:[#allocation20_spill] sm:$0xff] %v7574_v46  ;;  %v3882_v29 = vld [vmem:[#allocation7 + $0xc8] sm:$0xff]  ;;  %v7580_v25 = vpack.c.bf16 %v3877_v39, %v3873_v53  ;;  %v3881_v2 = vld [vmem:[#allocation7 + $0xc0] sm:$0xff] }
 0x6b2   :  { %7964 = vst [vmem:[#allocation15_spill] sm:$0xff] %v7557_v63  ;;  %6137 = vtanh.f32 %v5870_v8  ;;  %v3885_v44 = vld [vmem:[#allocation7 + $0xe0] sm:$0xff]  ;;  %v7586_v33 = vpack.c.bf16 %v3886_v35, %v3882_v29  ;;  %v7588_v8 = vpack.c.bf16 %v3888_v52, %v3884_v16  ;;  %v3891_v16 = vld [vmem:[#allocation7 + $0x110] sm:$0xff] }
 0x6b3   :  { %7970 = vst [vmem:[#allocation21_spill] sm:$0xff] %v7580_v25  ;;  %v7592_v53 = vpack.c.bf16 %v3885_v44, %v3881_v2  ;;  %v3895_v52 = vld [vmem:[#allocation7 + $0x130] sm:$0xff]  ;;  %v3904_v2 = vld [vmem:[#allocation7 + $0x178] sm:$0xff] }
 0x6b4   :  { %7972 = vst [vmem:[#allocation30_spill] sm:$0xff] %v7586_v33  ;;  %7973 = vst [vmem:[#allocation31_spill] sm:$0xff] %v7588_v8 }
 0x6b5   :  { %7974 = vst [vmem:[#allocation32_spill] sm:$0xff] %v7592_v53 }
 0x6b6   :  { %v6130_v30 = vpop.eup %6129 }
 0x6b7   :  { %v3612_v23 = vmul.f32 %v6130_v30, %v6128_v10  ;;  %v3875_v10 = vld [vmem:[#allocation7 + $0x90] sm:$0xff] }
 0x6b8   :  { %v3879_v30 = vld [vmem:[#allocation7 + $0xb0] sm:$0xff] }
 0x6b9   :  { %v6132_v9 = vpop.eup %6131  ;;  %3637 = vst [vmem:[%s7778_s5 + $0x28] sm:$0xff] %v3612_v23  ;;  %3776 = vmatmul.mubr.f32.vlgmr.msra.gmra.mrb[12].mxu0 %v3612_v23  ;;  %3847 = vmatmul.mubr.f32.vlgmr.msra.gmra.mrb[12].mxu1 %v3612_v23  ;;  %v7582_v37 = vpack.c.bf16 %v3879_v30, %v3875_v10  ;;  %v3883_v23 = vld [vmem:[#allocation7 + $0xd0] sm:$0xff]  ;;  %v3889_v10 = vld [vmem:[#allocation7 + $0x100] sm:$0xff] }
 0x6ba   :  { %v6134_v4 = vpop.eup %6133  ;;  %v3616_v59 = vadd.f32 1.0, %v6132_v9  ;;  %5629 = vmatpush1.bf16.msra.mxu0 %v7552_v36  ;;  %5661 = vmatpush1.bf16.msra.mxu1 %v7554_v22  ;;  %v3887_v9 = vld [vmem:[#allocation7 + $0xf0] sm:$0xff]  ;;  %v3893_v30 = vld [vmem:[#allocation7 + $0x120] sm:$0xff] }
 0x6bb   :  { %v3622_v5 = vadd.f32 1.0, %v6134_v4  ;;  %5631 = vmatprep.subr.bf16.mxu0 %v7557_v63  ;;  %5663 = vmatprep.subr.bf16.mxu1 %v7559_v18  ;;  %7971 = vst [vmem:[#allocation22_spill] sm:$0xff] %v7582_v37  ;;  %v3890_v4 = vld [vmem:[#allocation7 + $0x108] sm:$0xff]  ;;  %v7594_v39 = vpack.c.bf16 %v3887_v9, %v3883_v23  ;;  %v7604_v9 = vpack.c.bf16 %v3893_v30, %v3889_v10  ;;  %v3903_v63 = vld [vmem:[#allocation7 + $0x170] sm:$0xff] }
 0x6bc   :  { %6139 = vrcp.f32 %v3616_v59  ;;  %3985 = vmatprep.mubr.f32.mxu0 %v7874_v19  ;;  %4056 = vmatprep.mubr.f32.mxu1 %v7874_v19  ;;  %v3894_v59 = vld [vmem:[#allocation7 + $0x128] sm:$0xff] }
 0x6bd   :  { %6141 = vrcp.f32 %v3622_v5  ;;  %v3892_v5 = vld [vmem:[#allocation7 + $0x118] sm:$0xff]  ;;  %7975 = vst [vmem:[#allocation33_spill] sm:$0xff] %v7594_v39  ;;  %v7598_v29 = vpack.c.bf16 %v3894_v59, %v3890_v4  ;;  %v3897_v4 = vld [vmem:[#allocation7 + $0x140] sm:$0xff]  ;;  %v3910_v30 = vld [vmem:[#allocation7 + $0x1a8] sm:$0xff] }
 0x6be   :  { %5633 = vmatpush1.bf16.msra.mxu0 %v7566_v32  ;;  %5665 = vmatpush1.bf16.msra.mxu1 %v7568_v28  ;;  %v3896_v28 = vld [vmem:[#allocation7 + $0x138] sm:$0xff] }
 0x6bf   :  { %5635 = vmatprep.subr.bf16.mxu0 %v7572_v0  ;;  %5667 = vmatprep.subr.bf16.mxu1 %v7574_v46  ;;  %v7600_v35 = vpack.c.bf16 %v3896_v28, %v3892_v5  ;;  %v3898_v46 = vld [vmem:[#allocation7 + $0x148] sm:$0xff]  ;;  %v3901_v28 = vld [vmem:[#allocation7 + $0x160] sm:$0xff] }
 0x6c0   :  { %v3902_v0 = vld [vmem:[#allocation7 + $0x168] sm:$0xff] }
 0x6c1   :  { %v7610_v32 = vpack.c.bf16 %v3902_v0, %v3898_v46  ;;  %v3905_v46 = vld [vmem:[#allocation7 + $0x180] sm:$0xff] }
 0x6c2   :  { %5637 = vmatpush1.bf16.msra.mxu0 %v7580_v25  ;;  %5669 = vmatpush1.bf16.msra.mxu1 %v7582_v37  ;;  %v6136_v25 = vpop.eup %6135  ;;  %v3900_v37 = vld [vmem:[#allocation7 + $0x158] sm:$0xff] }
 0x6c3   :  { %5639 = vmatprep.subr.bf16.mxu0 %v7586_v33  ;;  %5671 = vmatprep.subr.bf16.mxu1 %v7588_v8  ;;  %v6138_v44 = vpop.eup %6137  ;;  %v7606_v8 = vpack.c.bf16 %v3895_v52, %v3891_v16  ;;  %v3629_v33 = vadd.f32 1.0, %v6136_v25  ;;  %v7612_v18 = vpack.c.bf16 %v3904_v2, %v3900_v37  ;;  %v3908_v16 = vld [vmem:[#allocation7 + $0x198] sm:$0xff]  ;;  %v7619_v25 = vpack.c.bf16 %v3901_v28, %v3897_v4  ;;  %v3909_v37 = vld [vmem:[#allocation7 + $0x1a0] sm:$0xff] }
 0x6c4   :  { %v3912_v52 = vld [vmem:[#allocation7 + $0x1b8] sm:$0xff] }
 0x6c5   :  { %6143 = vrcp.f32 %v3629_v33  ;;  %v7627_v2 = vpack.c.bf16 %v3912_v52, %v3908_v16  ;;  %v3920_v4 = vld [vmem:[#allocation7 + $0x1f8] sm:$0xff]  ;;  %v3915_v16 = vld [vmem:[#allocation7 + $0x1d0] sm:$0xff] }
 0x6c6   :  { %v6140_v23 = vpop.eup %6139  ;;  %5641 = vmatpush1.bf16.msra.mxu0 %v7592_v53  ;;  %5673 = vmatpush1.bf16.msra.mxu1 %v7594_v39  ;;  %v3899_v53 = vld [vmem:[#allocation7 + $0x150] sm:$0xff]  ;;  %v3906_v39 = vld [vmem:[#allocation7 + $0x188] sm:$0xff] }
 0x6c7   :  { %v6142_v59 = vpop.eup %6141  ;;  %v3633_v5 = vmul.f32 %v6140_v23, %v6138_v44  ;;  %5643 = vmatprep.subr.bf16.mxu0 %v7598_v29  ;;  %5675 = vmatprep.subr.bf16.mxu1 %v7600_v35  ;;  %v7621_v0 = vpack.c.bf16 %v3903_v63, %v3899_v53  ;;  %v3907_v44 = vld [vmem:[#allocation7 + $0x190] sm:$0xff]  ;;  %v7632_v63 = vpack.c.bf16 %v3909_v37, %v3905_v46  ;;  %v3913_v53 = vld [vmem:[#allocation7 + $0x1c0] sm:$0xff] }
 0x6c8   :  { %v3632_v10 = vmul.f32 %v6142_v59, %v7417_v1  ;;  %v7625_v1 = vpack.c.bf16 %v3910_v30, %v3906_v39  ;;  %v3911_v23 = vld [vmem:[#allocation7 + $0x1b0] sm:$0xff]  ;;  %v3914_v59 = vld [vmem:[#allocation7 + $0x1c8] sm:$0xff]  ;;  %v3917_v30 = vld [vmem:[#allocation7 + $0x1e0] sm:$0xff] }
 0x6c9   :  { %v7634_v33 = vpack.c.bf16 %v3911_v23, %v3907_v44  ;;  %v3919_v52 = vld [vmem:[#allocation7 + $0x1f0] sm:$0xff]  ;;  %v7644_v46 = vpack.c.bf16 %v3917_v30, %v3913_v53  ;;  %v7983_v30 = vld [vmem:[#allocation29_spill] sm:$0xff] }
 0x6ca   :  { %v7615_v22 = vadd.f32 %v3633_v5, %v3632_v10  ;;  %5645 = vmatpush1.bf16.msra.mxu0 %v7604_v9  ;;  %5677 = vmatpush1.bf16.msra.mxu1 %v7606_v8  ;;  %v3918_v5 = vld [vmem:[#allocation7 + $0x1e8] sm:$0xff]  ;;  %v3916_v10 = vld [vmem:[#allocation7 + $0x1d8] sm:$0xff]  ;;  %v7646_v37 = vpack.c.bf16 %v3919_v52, %v3915_v16 }
 0x6cb   :  { %5647 = vmatprep.subr.bf16.mxu0 %v7610_v32  ;;  %5679 = vmatprep.subr.bf16.mxu1 %v7612_v18  ;;  %v7638_v39 = vpack.c.bf16 %v3918_v5, %v3914_v59  ;;  %v7640_v28 = vpack.c.bf16 %v3920_v4, %v3916_v10  ;;  %v7982_v5 = vld [vmem:[#allocation28_spill] sm:$0xff] }
 0x6cc   :  { %6145 = vtanh.f32 %v7615_v22 }
 0x6ce   :  { %5649 = vmatpush1.bf16.msra.mxu0 %v7619_v25  ;;  %5681 = vmatpush1.bf16.msra.mxu1 %v7621_v0 }
 0x6cf   :  { %5651 = vmatprep.subr.bf16.mxu0 %v7625_v1  ;;  %5683 = vmatprep.subr.bf16.mxu1 %v7627_v2  ;;  %v6144_v44 = vpop.eup %6143 }
 0x6d2   :  { %5653 = vmatpush1.bf16.msra.mxu0 %v7632_v63  ;;  %5685 = vmatpush1.bf16.msra.mxu1 %v7634_v33 }
 0x6d3   :  { %5655 = vmatprep.subr.bf16.mxu0 %v7638_v39  ;;  %5687 = vmatprep.subr.bf16.mxu1 %v7640_v28 }
 0x6d6   :  { %v6146_v23 = vpop.eup %6145  ;;  %5657 = vmatpush1.bf16.msra.mxu0 %v7644_v46  ;;  %5689 = vmatpush1.bf16.msra.mxu1 %v7646_v37 }
 0x6d7   :  { %v3636_v59 = vmul.f32 %v6146_v23, %v6144_v44  ;;  %5691 = vmatprep.subr.bf16.mxu0 %v7439_v58  ;;  %5723 = vmatprep.subr.bf16.mxu1 %v7441_v34 }
 0x6d9   :  { %3638 = vst [vmem:[%s7779_s6 + $0x10] sm:$0xff] %v3636_v59  ;;  %3986 = vmatmul.mubr.f32.vlgmr.msra.gmra.mrb[18].mxu0 %v3636_v59  ;;  %4057 = vmatmul.mubr.f32.vlgmr.msra.gmra.mrb[18].mxu1 %v3636_v59 }
 0x6da   :  { %5693 = vmatpush1.bf16.msra.mxu0 %v7443_v49  ;;  %5725 = vmatpush1.bf16.msra.mxu1 %v7446_v17  ;;  %v7976_v49 = vld [vmem:[#allocation23_spill] sm:$0xff] }
 0x6db   :  { %5695 = vmatprep.subr.bf16.mxu0 %v7451_v26  ;;  %5727 = vmatprep.subr.bf16.mxu1 %v7453_v13 }
 0x6dc   :  { %4253 = vmatprep.mubr.f32.mxu0 %v7874_v19  ;;  %4324 = vmatprep.mubr.f32.mxu1 %v7874_v19 }
 0x6de   :  { %5697 = vmatpush1.bf16.msra.mxu0 %v7455_v42  ;;  %5729 = vmatpush1.bf16.msra.mxu1 %v7458_v55  ;;  %v7977_v42 = vld [vmem:[#allocation24_spill] sm:$0xff] }
 0x6df   :  { %5699 = vmatprep.subr.bf16.mxu0 %v7463_v50  ;;  %5731 = vmatprep.subr.bf16.mxu1 %v7465_v24 }
 0x6e2   :  { %5701 = vmatpush1.bf16.msra.mxu0 %v7467_v7  ;;  %5733 = vmatpush1.bf16.msra.mxu1 %v7470_v51  ;;  %v7978_v7 = vld [vmem:[#allocation25_spill] sm:$0xff] }
 0x6e3   :  { %5703 = vmatprep.subr.bf16.mxu0 %v7475_v43  ;;  %5735 = vmatprep.subr.bf16.mxu1 %v7477_v62  ;;  %v7979_v62 = vld [vmem:[#allocation26_spill] sm:$0xff] }
 0x6e6   :  { %5705 = vmatpush1.bf16.msra.mxu0 %v7479_v20  ;;  %5737 = vmatpush1.bf16.msra.mxu1 %v7482_v6 }
 0x6e7   :  { %5707 = vmatprep.subr.bf16.mxu0 %v7487_v14  ;;  %5739 = vmatprep.subr.bf16.mxu1 %v7489_v45 }
 0x6ea   :  { %5709 = vmatpush1.bf16.msra.mxu0 %v7491_v31  ;;  %5741 = vmatpush1.bf16.msra.mxu1 %v7494_v56 }
 0x6eb   :  { %5711 = vmatprep.subr.bf16.mxu0 %v7499_v38  ;;  %5743 = vmatprep.subr.bf16.mxu1 %v7501_v3 }
 0x6ee   :  { %5713 = vmatpush1.bf16.msra.mxu0 %v7503_v60  ;;  %5745 = vmatpush1.bf16.msra.mxu1 %v7506_v41 }
 0x6ef   :  { %5715 = vmatprep.subr.bf16.mxu0 %v7511_v47  ;;  %5747 = vmatprep.subr.bf16.mxu1 %v7513_v48  ;;  %v7980_v48 = vld [vmem:[#allocation13_spill] sm:$0xff] }
 0x6f2   :  { %5717 = vmatpush1.bf16.msra.mxu0 %v7515_v11  ;;  %5749 = vmatpush1.bf16.msra.mxu1 %v7518_v15 }
 0x6f3   :  { %5719 = vmatprep.subr.bf16.mxu0 %v7523_v21  ;;  %5751 = vmatprep.subr.bf16.mxu1 %v7525_v27 }
 0x6f6   :  { %5721 = vmatpush1.bf16.msra.mxu0 %v7527_v40  ;;  %5753 = vmatpush1.bf16.msra.mxu1 %v7530_v12  ;;  %v7981_v40 = vld [vmem:[#allocation27_spill] sm:$0xff] }
 0x6f7   :  { %5755 = vmatprep.subr.bf16.mxu0 %v7535_v54  ;;  %5787 = vmatprep.subr.bf16.mxu1 %v7537_v61 }
 0x78c   :  { %v3777_v58 = vpop.f32.mrb[12].mxu0  ;;  %v3848_v34 = vpop.f32.mrb[12].mxu1 }
 0x78d   :  { %v5830_v17 = vadd.f32 %v3777_v58, %v7976_v49  ;;  %v3779_v26 = vpop.f32.mrb[13].mxu0  ;;  %v3850_v13 = vpop.f32.mrb[13].mxu1  ;;  %v5846_v20 = vadd.f32 %v3848_v34, %v7979_v62 }
 0x78e   :  { %v5831_v55 = vadd.f32 %v3779_v26, %v7977_v42  ;;  %v5847_v51 = vadd.f32 %v3850_v13, %v7978_v7  ;;  %v7984_v13 = vld [vmem:[#allocation14_spill] sm:$0xff] }
 0x78f   :  { %v4654_v50 = vmul.f32 -1.442695, %v5830_v17 }
 0x790   :  { %v4655_v24 = vmul.f32 -1.442695, %v5831_v55  ;;  %v4656_v43 = vmul.f32 -1.442695, %v5847_v51  ;;  %v7987_v51 = vld [vmem:[#allocation17_spill] sm:$0xff] }
 0x791   :  { %6147 = vpow2.f32 %v4654_v50  ;;  %v7985_v50 = vld [vmem:[#allocation15_spill] sm:$0xff] }
 0x792   :  { %6149 = vpow2.f32 %v4655_v24  ;;  %v7986_v24 = vld [vmem:[#allocation16_spill] sm:$0xff] }
 0x793   :  { %6151 = vpow2.f32 %v4656_v43  ;;  %v7988_v43 = vld [vmem:[#allocation18_spill] sm:$0xff] }
 0x794   :  { %6153 = vtanh.f32 %v5846_v20  ;;  %v7989_v20 = vld [vmem:[#allocation19_spill] sm:$0xff] }
 0x79b   :  { %v6148_v6 = vpop.eup %6147 }
 0x79c   :  { %v6150_v14 = vpop.eup %6149  ;;  %v4070_v45 = vadd.f32 1.0, %v6148_v6  ;;  %v7991_v6 = vld [vmem:[#allocation21_spill] sm:$0xff] }
 0x79d   :  { %v4076_v31 = vadd.f32 1.0, %v6150_v14  ;;  %v6152_v56 = vpop.eup %6151  ;;  %v7992_v14 = vld [vmem:[#allocation22_spill] sm:$0xff] }
 0x79e   :  { %6155 = vrcp.f32 %v4070_v45  ;;  %v6154_v38 = vpop.eup %6153  ;;  %v4083_v47 = vadd.f32 1.0, %v6152_v56  ;;  %v7993_v45 = vld [vmem:[#allocation30_spill] sm:$0xff] }
 0x79f   :  { %6157 = vrcp.f32 %v4076_v31  ;;  %v7994_v31 = vld [vmem:[#allocation31_spill] sm:$0xff] }
 0x7a0   :  { %6159 = vrcp.f32 %v4083_v47 }
 0x7a8   :  { %v6156_v3 = vpop.eup %6155 }
 0x7a9   :  { %v6158_v60 = vpop.eup %6157  ;;  %v4087_v41 = vmul.f32 %v6156_v3, %v6154_v38  ;;  %v7995_v3 = vld [vmem:[#allocation32_spill] sm:$0xff] }
 0x7aa   :  { %v4086_v11 = vmul.f32 %v6158_v60, %v7980_v48  ;;  %v6160_v52 = vpop.eup %6159  ;;  %v7996_v60 = vld [vmem:[#allocation33_spill] sm:$0xff] }
 0x7ac   :  { %v7696_v15 = vadd.f32 %v4087_v41, %v4086_v11  ;;  %v3987_v21 = vpop.f32.mrb[18].mxu0  ;;  %v4058_v27 = vpop.f32.mrb[18].mxu1 }
 0x7ad   :  { %v5852_v12 = vadd.f32 %v3987_v21, %v7981_v40  ;;  %v3989_v54 = vpop.f32.mrb[19].mxu0  ;;  %v4060_v61 = vpop.f32.mrb[19].mxu1  ;;  %v5868_v59 = vadd.f32 %v4058_v27, %v6777_v57 }
 0x7ae   :  { %v5853_v10 = vadd.f32 %v3989_v54, %v7982_v5  ;;  %6161 = vtanh.f32 %v7696_v15  ;;  %v5869_v16 = vadd.f32 %v4060_v61, %v7983_v30 }
 0x7af   :  { %v4657_v4 = vmul.f32 -1.442695, %v5852_v12 }
 0x7b0   :  { %v4658_v53 = vmul.f32 -1.442695, %v5853_v10  ;;  %v4659_v23 = vmul.f32 -1.442695, %v5869_v16 }
 0x7b1   :  { %6163 = vpow2.f32 %v4657_v4 }
 0x7b2   :  { %6165 = vpow2.f32 %v4658_v53 }
 0x7b3   :  { %6167 = vpow2.f32 %v4659_v23 }
 0x7b4   :  { %6169 = vtanh.f32 %v5868_v59 }
 0x7b8   :  { %v6162_v44 = vpop.eup %6161 }
 0x7b9   :  { %v4090_v58 = vmul.f32 %v6162_v44, %v6160_v52 }
 0x7bb   :  { %v6164_v34 = vpop.eup %6163  ;;  %4115 = vst [vmem:[%s7778_s5 + $0x30] sm:$0xff] %v4090_v58  ;;  %4254 = vmatmul.mubr.f32.vlgmr.msra.gmra.mrb[14].mxu0 %v4090_v58  ;;  %4325 = vmatmul.mubr.f32.vlgmr.msra.gmra.mrb[14].mxu1 %v4090_v58 }
 0x7bc   :  { %v6166_v17 = vpop.eup %6165  ;;  %v4094_v26 = vadd.f32 1.0, %v6164_v34  ;;  %5757 = vmatpush1.bf16.msra.mxu0 %v7552_v36  ;;  %5789 = vmatpush1.bf16.msra.mxu1 %v7984_v13  ;;  %v7990_v36 = vld [vmem:[#allocation20_spill] sm:$0xff] }
 0x7bd   :  { %v4100_v55 = vadd.f32 1.0, %v6166_v17  ;;  %5759 = vmatprep.subr.bf16.mxu0 %v7985_v50  ;;  %5791 = vmatprep.subr.bf16.mxu1 %v7986_v24  ;;  %v6168_v56 = vpop.eup %6167 }
 0x7be   :  { %6171 = vrcp.f32 %v4094_v26  ;;  %4463 = vmatprep.mubr.f32.mxu0 %v7874_v19  ;;  %4534 = vmatprep.mubr.f32.mxu1 %v7874_v19  ;;  %v6170_v38 = vpop.eup %6169  ;;  %v4107_v48 = vadd.f32 1.0, %v6168_v56 }
 0x7bf   :  { %6173 = vrcp.f32 %v4100_v55 }
 0x7c0   :  { %5761 = vmatpush1.bf16.msra.mxu0 %v7987_v51  ;;  %5793 = vmatpush1.bf16.msra.mxu1 %v7988_v43  ;;  %6175 = vrcp.f32 %v4107_v48 }
 0x7c1   :  { %5763 = vmatprep.subr.bf16.mxu0 %v7989_v20  ;;  %5795 = vmatprep.subr.bf16.mxu1 %v7990_v36 }
 0x7c4   :  { %5765 = vmatpush1.bf16.msra.mxu0 %v7991_v6  ;;  %5797 = vmatpush1.bf16.msra.mxu1 %v7992_v14 }
 0x7c5   :  { %5767 = vmatprep.subr.bf16.mxu0 %v7993_v45  ;;  %5799 = vmatprep.subr.bf16.mxu1 %v7994_v31 }
 0x7c8   :  { %v6172_v19 = vpop.eup %6171  ;;  %5769 = vmatpush1.bf16.msra.mxu0 %v7995_v3  ;;  %5801 = vmatpush1.bf16.msra.mxu1 %v7996_v60 }
 0x7c9   :  { %v6174_v41 = vpop.eup %6173  ;;  %v4111_v47 = vmul.f32 %v6172_v19, %v6170_v38  ;;  %5771 = vmatprep.subr.bf16.mxu0 %v7598_v29  ;;  %5803 = vmatprep.subr.bf16.mxu1 %v7600_v35 }
 0x7ca   :  { %v4110_v11 = vmul.f32 %v6174_v41, %v7615_v22  ;;  %v6176_v22 = vpop.eup %6175 }
 0x7cc   :  { %v7725_v21 = vadd.f32 %v4111_v47, %v4110_v11  ;;  %5773 = vmatpush1.bf16.msra.mxu0 %v7604_v9  ;;  %5805 = vmatpush1.bf16.msra.mxu1 %v7606_v8 }
 0x7cd   :  { %5775 = vmatprep.subr.bf16.mxu0 %v7610_v32  ;;  %5807 = vmatprep.subr.bf16.mxu1 %v7612_v18 }
 0x7ce   :  { %6177 = vtanh.f32 %v7725_v21 }
 0x7d0   :  { %5777 = vmatpush1.bf16.msra.mxu0 %v7619_v25  ;;  %5809 = vmatpush1.bf16.msra.mxu1 %v7621_v0 }
 0x7d1   :  { %5779 = vmatprep.subr.bf16.mxu0 %v7625_v1  ;;  %5811 = vmatprep.subr.bf16.mxu1 %v7627_v2 }
 0x7d4   :  { %5781 = vmatpush1.bf16.msra.mxu0 %v7632_v63  ;;  %5813 = vmatpush1.bf16.msra.mxu1 %v7634_v33 }
 0x7d5   :  { %5783 = vmatprep.subr.bf16.mxu0 %v7638_v39  ;;  %5815 = vmatprep.subr.bf16.mxu1 %v7640_v28 }
 0x7d8   :  { %v6178_v18 = vpop.eup %6177  ;;  %5785 = vmatpush1.bf16.msra.mxu0 %v7644_v46  ;;  %5817 = vmatpush1.bf16.msra.mxu1 %v7646_v37 }
 0x7d9   :  { %v4114_v32 = vmul.f32 %v6178_v18, %v6176_v22 }
 0x7db   :  { %4116 = vst [vmem:[%s7779_s6 + $0x8] sm:$0xff] %v4114_v32  ;;  %4464 = vmatmul.mubr.f32.vlgmr.msra.gmra.mrb[16].mxu0 %v4114_v32  ;;  %4535 = vmatmul.mubr.f32.vlgmr.msra.gmra.mrb[16].mxu1 %v4114_v32 }
 0x88e   :  { %v4255_v8 = vpop.f32.mrb[14].mxu0  ;;  %v4326_v29 = vpop.f32.mrb[14].mxu1 }
 0x88f   :  { %v5832_v35 = vadd.f32 %v4255_v8, %v7976_v49  ;;  %v4257_v9 = vpop.f32.mrb[15].mxu0  ;;  %v4328_v25 = vpop.f32.mrb[15].mxu1  ;;  %v5848_v39 = vadd.f32 %v4326_v29, %v7979_v62 }
 0x890   :  { %v5833_v0 = vadd.f32 %v4257_v9, %v7977_v42  ;;  %v5849_v63 = vadd.f32 %v4328_v25, %v7978_v7 }
 0x891   :  { %v4660_v1 = vmul.f32 -1.442695, %v5832_v35 }
 0x892   :  { %v4661_v2 = vmul.f32 -1.442695, %v5833_v0  ;;  %v4662_v33 = vmul.f32 -1.442695, %v5849_v63 }
 0x893   :  { %6179 = vpow2.f32 %v4660_v1 }
 0x894   :  { %6181 = vpow2.f32 %v4661_v2 }
 0x895   :  { %6183 = vpow2.f32 %v4662_v33 }
 0x896   :  { %6185 = vtanh.f32 %v5848_v39 }
 0x89d   :  { %v6180_v28 = vpop.eup %6179 }
 0x89e   :  { %v6182_v46 = vpop.eup %6181  ;;  %v4548_v37 = vadd.f32 1.0, %v6180_v28 }
 0x89f   :  { %v4554_v27 = vadd.f32 1.0, %v6182_v46  ;;  %v6184_v49 = vpop.eup %6183 }
 0x8a0   :  { %6187 = vrcp.f32 %v4548_v37  ;;  %v6186_v12 = vpop.eup %6185  ;;  %v4561_v10 = vadd.f32 1.0, %v6184_v49 }
 0x8a1   :  { %6189 = vrcp.f32 %v4554_v27 }
 0x8a2   :  { %6191 = vrcp.f32 %v4561_v10 }
 0x8aa   :  { %v6188_v42 = vpop.eup %6187 }
 0x8ab   :  { %v6190_v54 = vpop.eup %6189  ;;  %v4565_v61 = vmul.f32 %v6188_v42, %v6186_v12 }
 0x8ac   :  { %v4564_v4 = vmul.f32 %v6190_v54, %v7696_v15  ;;  %v6192_v34 = vpop.eup %6191 }
 0x8ae   :  { %v4566_v7 = vadd.f32 %v4565_v61, %v4564_v4  ;;  %v4465_v53 = vpop.f32.mrb[16].mxu0  ;;  %v4536_v16 = vpop.f32.mrb[16].mxu1 }
 0x8af   :  { %v5850_v62 = vadd.f32 %v4465_v53, %v7981_v40  ;;  %v4467_v52 = vpop.f32.mrb[17].mxu0  ;;  %v4538_v44 = vpop.f32.mrb[17].mxu1  ;;  %v5866_v40 = vadd.f32 %v4536_v16, %v6777_v57 }
 0x8b0   :  { %6193 = vtanh.f32 %v4566_v7  ;;  %4597 = vst [vmem:[%s7781_s8] sm:$0xff] %v4566_v7  ;;  %v5851_v23 = vadd.f32 %v4467_v52, %v7982_v5  ;;  %v5867_v15 = vadd.f32 %v4538_v44, %v7983_v30 }
 0x8b1   :  { %v4663_v59 = vmul.f32 -1.442695, %v5850_v62 }
 0x8b2   :  { %v4664_v58 = vmul.f32 -1.442695, %v5851_v23  ;;  %v4665_v26 = vmul.f32 -1.442695, %v5867_v15 }
 0x8b3   :  { %6195 = vpow2.f32 %v4663_v59 }
 0x8b4   :  { %6197 = vpow2.f32 %v4664_v58 }
 0x8b5   :  { %6199 = vpow2.f32 %v4665_v26 }
 0x8b6   :  { %6201 = vtanh.f32 %v5866_v40 }
 0x8ba   :  { %v6194_v17 = vpop.eup %6193 }
 0x8bb   :  { %v4568_v13 = vmul.f32 %v6194_v17, %v6192_v34 }
 0x8bd   :  { %v6196_v55 = vpop.eup %6195  ;;  %4593 = vst [vmem:[%s7778_s5 + $0x38] sm:$0xff] %v4568_v13  ;;  %4595 = vst [vmem:[%s7780_s7] sm:$0xff] %v4568_v13 }
 0x8be   :  { %v6198_v5 = vpop.eup %6197  ;;  %v4572_v50 = vadd.f32 1.0, %v6196_v55 }
 0x8bf   :  { %v4578_v30 = vadd.f32 1.0, %v6198_v5  ;;  %v6200_v24 = vpop.eup %6199 }
 0x8c0   :  { %6203 = vrcp.f32 %v4572_v50  ;;  %v6202_v51 = vpop.eup %6201  ;;  %v4585_v36 = vadd.f32 1.0, %v6200_v24 }
 0x8c1   :  { %6205 = vrcp.f32 %v4578_v30 }
 0x8c2   :  { %6207 = vrcp.f32 %v4585_v36 }
 0x8ca   :  { %v6204_v43 = vpop.eup %6203 }
 0x8cb   :  { %v6206_v57 = vpop.eup %6205  ;;  %v4589_v20 = vmul.f32 %v6204_v43, %v6202_v51 }
 0x8cc   :  { %v4588_v6 = vmul.f32 %v6206_v57, %v7725_v21  ;;  %v6208_v45 = vpop.eup %6207 }
 0x8ce   :  { %v4590_v14 = vadd.f32 %v4589_v20, %v4588_v6 }
 0x8d0   :  { %6209 = vtanh.f32 %v4590_v14  ;;  %4598 = vst [vmem:[%s7781_s8 + $0x8] sm:$0xff] %v4590_v14 }
 0x8da   :  { %v6210_v31 = vpop.eup %6209 }
 0x8db   :  { %v4592_v56 = vmul.f32 %v6210_v31, %v6208_v45 }
 0x8dd   :  { %4594 = vst [vmem:[%s7779_s6] sm:$0xff] %v4592_v56  ;;  %4596 = vst [vmem:[%s7780_s7 + $0x8] sm:$0xff] %v4592_v56 }
 0x8de   :  { %4615 = vsyncpa [#allocation4], 1 }
 0x8df   :  { %4616 = vsyncpa [#allocation6], 1 }
 0x8e0   :  { %4617 = vsyncpa [#allocation9], 1 }

// kernel: _encoder_forward_impl.3
= control target key start
LH: loop header
LB: loop body
LE: loop exit
PB: predicated region body
PF: predicated region fallthrough
CT: control target
= control target key end

     0   :  { %14 = vsyncpa [#allocation6], 0  ;;  %s9428_s0 = inlined_call_operand.vmem [shape: f32[64,128], index: 0, kind: input, shape index: {}]   ;;  %s9429_s1 = inlined_call_operand.vmem [shape: f32[64,128], index: 1, kind: input, shape index: {}]   ;;  %s9430_s2 = inlined_call_operand.vmem [shape: f32[256,1024], index: 2, kind: input, shape index: {}]   ;;  %s9431_s3 = inlined_call_operand.hbm [shape: f32[128,512], index: 3, kind: input, shape index: {}]   ;;  %s9432_s4 = inlined_call_operand.hbm [shape: f32[128,512], index: 4, kind: input, shape index: {}]   ;;  %s9433_s5 = inlined_call_operand.vmem [shape: f32[1,1024], index: 5, kind: input, shape index: {}]   ;;  %s9434_s6 = inlined_call_operand.vmem [shape: f32[64,128], index: 6, kind: output, shape index: {0}]   ;;  %s9435_s7 = inlined_call_operand.vmem [shape: f32[8,256], index: 7, kind: output, shape index: {1}]   ;;  %s9436_s8 = inlined_call_operand.vmem [shape: f32[8,256], index: 8, kind: output, shape index: {2}]  }
   0x1   :  { %15 = vsyncpa [#allocation8], 0  ;;  %s7103_s27 = smov [#allocation5]   ;;  %s7055_s9 = scalar_lea.hbm %s9431_s3, 8192 }
   0x2   :  { %s27_s28 = sshll.u32 %s7103_s27, 4  ;;  %p7056_p0 = scmp.ne.s32.totalorder %s9431_s3, %s7055_s9  ;;  %s28_s28 = int_to_ptr.vmem [resolvable:$true] %s27_s28 }
   0x3   :  { %p7059_p1 = scmp.lt.u32.totalorder %s7055_s9, %s9431_s3 }
   0x5   :  { %p7061_p2 = pnand %p7059_p1, %p7056_p0 }
   0x7   :  { %7064 = shalt.err (!%p7061_p2)
}
   0x8   :  { %s7065_s14 = scalar_lea.vmem %s28_s28, 8192  ;;  %p7070_p4 = scmp.lt.s32.totalorder %s28_s28, %s28_s28 }
   0x9   :  { %p7066_p3 = scmp.ne.s32.totalorder %s28_s28, %s7065_s14  ;;  %p7071_p5 = scmp.lt.s32.totalorder %s7065_s14, %s7065_s14 }
   0xb   :  { %p7072_p6 = por %p7071_p5, %p7070_p4 }
   0xd   :  { %p7073_p7 = pnand %p7072_p6, %p7066_p3 }
   0xf   :  { %7076 = shalt.err (!%p7073_p7)
}
  0x10   :  { %s7104_s15 = smov 512   ;;  %s7105_s16 = smov 32  }
  0x11   :  { %33 = dma.hbm_to_vmem [thread:$0]  %s9431_s3, 8192, %s28_s28, [#allocation6], %s7104_s15, %s7104_s15, %s7105_s16  }
  0x12   :  { %s7106_s19 = smov [#allocation7]   ;;  %s7077_s23 = scalar_lea.hbm %s9432_s4, 8192 }
  0x13   :  { %s39_s20 = sshll.u32 %s7106_s19, 4  ;;  %p7078_p8 = scmp.ne.s32.totalorder %s9432_s4, %s7077_s23  ;;  %s40_s20 = int_to_ptr.vmem [resolvable:$true] %s39_s20 }
  0x14   :  { %p7081_p9 = scmp.lt.u32.totalorder %s7077_s23, %s9432_s4 }
  0x16   :  { %p7083_p10 = pnand %p7081_p9, %p7078_p8 }
  0x18   :  { %7086 = shalt.err (!%p7083_p10)
}
  0x19   :  { %s7087_s29 = scalar_lea.vmem %s40_s20, 8192  ;;  %p7092_p12 = scmp.lt.s32.totalorder %s40_s20, %s40_s20 }
  0x1a   :  { %p7088_p11 = scmp.ne.s32.totalorder %s40_s20, %s7087_s29  ;;  %p7093_p13 = scmp.lt.s32.totalorder %s7087_s29, %s7087_s29 }
  0x1c   :  { %p7094_p0 = por %p7093_p13, %p7092_p12 }
  0x1e   :  { %p7095_p1 = pnand %p7094_p0, %p7088_p11 }
  0x20   :  { %7098 = shalt.err (!%p7095_p1)
}
  0x21   :  { %45 = dma.hbm_to_vmem [thread:$0]  %s9432_s4, 8192, %s40_s20, [#allocation8], %s7104_s15, %s7104_s15, %s7105_s16  }
  0x22   :  { %7099 = dma.done.wait [#allocation6], 8192  }
  0x23   :  { %7100 = vsyncadd [#allocation6], 4294959104 }
  0x24   :  { %7101 = dma.done.wait [#allocation8], 8192  }
  0x25   :  { %7102 = vsyncadd [#allocation8], 4294959104  ;;  %v9437_v0 = vmov 0.0   ;;  %v63_v1 = vld [vmem:[%s9430_s2 + $0x8] sm:$0xff]  ;;  %v65_v3 = vld [vmem:[%s9430_s2 + $0x18] sm:$0xff] }
  0x26   :  { %296 = vmatprep.mubr.f32.mxu0 %v9437_v0  ;;  %409 = vmatprep.mubr.f32.mxu1 %v9437_v0  ;;  %v71_v2 = vld [vmem:[%s9430_s2 + $0x48] sm:$0xff]  ;;  %v73_v5 = vld [vmem:[%s9430_s2 + $0x58] sm:$0xff]  ;;  %v62_v6 = vld [vmem:[%s9430_s2] sm:$0xff] }
  0x27   :  { %v5322_v4 = vpack.c.bf16 %v71_v2, %v63_v1  ;;  %v70_v7 = vld [vmem:[%s9430_s2 + $0x40] sm:$0xff]  ;;  %v5354_v8 = vpack.c.bf16 %v73_v5, %v65_v3  ;;  %v64_v10 = vld [vmem:[%s9430_s2 + $0x10] sm:$0xff]  ;;  %v79_v12 = vld [vmem:[%s9430_s2 + $0x88] sm:$0xff] }
  0x28   :  { %v5324_v9 = vpack.c.bf16 %v70_v7, %v62_v6  ;;  %v72_v11 = vld [vmem:[%s9430_s2 + $0x50] sm:$0xff]  ;;  %v87_v14 = vld [vmem:[%s9430_s2 + $0xc8] sm:$0xff]  ;;  %v81_v15 = vld [vmem:[%s9430_s2 + $0x98] sm:$0xff] }
  0x29   :  { %5323 = vmatprep.subr.bf16.mxu0 %v5322_v4  ;;  %v5356_v13 = vpack.c.bf16 %v72_v11, %v64_v10  ;;  %v89_v16 = vld [vmem:[%s9430_s2 + $0xd8] sm:$0xff]  ;;  %5355 = vmatprep.subr.bf16.mxu1 %v5354_v8  ;;  %v5326_v17 = vpack.c.bf16 %v87_v14, %v79_v12  ;;  %v78_v19 = vld [vmem:[%s9430_s2 + $0x80] sm:$0xff]  ;;  %v80_v21 = vld [vmem:[%s9430_s2 + $0x90] sm:$0xff] }
  0x2a   :  { %5325 = vmatpush1.bf16.msra.mxu0 %v5324_v9  ;;  %v5358_v18 = vpack.c.bf16 %v89_v16, %v81_v15  ;;  %v86_v20 = vld [vmem:[%s9430_s2 + $0xc0] sm:$0xff]  ;;  %v88_v23 = vld [vmem:[%s9430_s2 + $0xd0] sm:$0xff]  ;;  %v95_v24 = vld [vmem:[%s9430_s2 + $0x108] sm:$0xff] }
  0x2b   :  { %5357 = vmatpush1.bf16.msra.mxu1 %v5356_v13  ;;  %v5328_v22 = vpack.c.bf16 %v86_v20, %v78_v19  ;;  %v103_v25 = vld [vmem:[%s9430_s2 + $0x148] sm:$0xff]  ;;  %5327 = vmatprep.subr.bf16.mxu0 %v5326_v17  ;;  %v5360_v26 = vpack.c.bf16 %v88_v23, %v80_v21  ;;  %v97_v28 = vld [vmem:[%s9430_s2 + $0x118] sm:$0xff]  ;;  %v94_v30 = vld [vmem:[%s9430_s2 + $0x100] sm:$0xff] }
  0x2c   :  { %5359 = vmatprep.subr.bf16.mxu1 %v5358_v18  ;;  %v5330_v27 = vpack.c.bf16 %v103_v25, %v95_v24  ;;  %v105_v29 = vld [vmem:[%s9430_s2 + $0x158] sm:$0xff]  ;;  %v102_v32 = vld [vmem:[%s9430_s2 + $0x140] sm:$0xff]  ;;  %v96_v33 = vld [vmem:[%s9430_s2 + $0x110] sm:$0xff] }
  0x2d   :  { %v5362_v31 = vpack.c.bf16 %v105_v29, %v97_v28  ;;  %v104_v34 = vld [vmem:[%s9430_s2 + $0x150] sm:$0xff]  ;;  %v5332_v35 = vpack.c.bf16 %v102_v32, %v94_v30  ;;  %v111_v36 = vld [vmem:[%s9430_s2 + $0x188] sm:$0xff]  ;;  %v113_v38 = vld [vmem:[%s9430_s2 + $0x198] sm:$0xff] }
  0x2e   :  { %5329 = vmatpush1.bf16.msra.mxu0 %v5328_v22  ;;  %v119_v37 = vld [vmem:[%s9430_s2 + $0x1c8] sm:$0xff]  ;;  %v5364_v39 = vpack.c.bf16 %v104_v34, %v96_v33  ;;  %v121_v41 = vld [vmem:[%s9430_s2 + $0x1d8] sm:$0xff]  ;;  %v110_v42 = vld [vmem:[%s9430_s2 + $0x180] sm:$0xff] }
  0x2f   :  { %5361 = vmatpush1.bf16.msra.mxu1 %v5360_v26  ;;  %5331 = vmatprep.subr.bf16.mxu0 %v5330_v27  ;;  %v5334_v40 = vpack.c.bf16 %v119_v37, %v111_v36  ;;  %v118_v43 = vld [vmem:[%s9430_s2 + $0x1c0] sm:$0xff]  ;;  %v5366_v44 = vpack.c.bf16 %v121_v41, %v113_v38  ;;  %v112_v45 = vld [vmem:[%s9430_s2 + $0x190] sm:$0xff]  ;;  %v127_v47 = vld [vmem:[%s9430_s2 + $0x208] sm:$0xff] }
  0x30   :  { %5363 = vmatprep.subr.bf16.mxu1 %v5362_v31  ;;  %v120_v46 = vld [vmem:[%s9430_s2 + $0x1d0] sm:$0xff]  ;;  %v135_v48 = vld [vmem:[%s9430_s2 + $0x248] sm:$0xff]  ;;  %v129_v49 = vld [vmem:[%s9430_s2 + $0x218] sm:$0xff]  ;;  %v5336_v51 = vpack.c.bf16 %v118_v43, %v110_v42 }
  0x31   :  { %v137_v50 = vld [vmem:[%s9430_s2 + $0x258] sm:$0xff]  ;;  %v5368_v52 = vpack.c.bf16 %v120_v46, %v112_v45  ;;  %v5338_v53 = vpack.c.bf16 %v135_v48, %v127_v47  ;;  %v126_v54 = vld [vmem:[%s9430_s2 + $0x200] sm:$0xff]  ;;  %v128_v56 = vld [vmem:[%s9430_s2 + $0x210] sm:$0xff] }
  0x32   :  { %5333 = vmatpush1.bf16.msra.mxu0 %v5332_v35  ;;  %v134_v55 = vld [vmem:[%s9430_s2 + $0x240] sm:$0xff]  ;;  %v5370_v57 = vpack.c.bf16 %v137_v50, %v129_v49  ;;  %v136_v58 = vld [vmem:[%s9430_s2 + $0x250] sm:$0xff]  ;;  %v143_v59 = vld [vmem:[%s9430_s2 + $0x288] sm:$0xff] }
  0x33   :  { %5365 = vmatpush1.bf16.msra.mxu1 %v5364_v39  ;;  %5335 = vmatprep.subr.bf16.mxu0 %v5334_v40  ;;  %v151_v60 = vld [vmem:[%s9430_s2 + $0x2c8] sm:$0xff]  ;;  %v145_v61 = vld [vmem:[%s9430_s2 + $0x298] sm:$0xff]  ;;  %v5340_v63 = vpack.c.bf16 %v134_v55, %v126_v54  ;;  %v5372_v1 = vpack.c.bf16 %v136_v58, %v128_v56  ;;  %v142_v3 = vld [vmem:[%s9430_s2 + $0x280] sm:$0xff] }
  0x34   :  { %5367 = vmatprep.subr.bf16.mxu1 %v5366_v44  ;;  %v153_v62 = vld [vmem:[%s9430_s2 + $0x2d8] sm:$0xff]  ;;  %v5342_v2 = vpack.c.bf16 %v151_v60, %v143_v59  ;;  %v150_v4 = vld [vmem:[%s9430_s2 + $0x2c0] sm:$0xff]  ;;  %v144_v5 = vld [vmem:[%s9430_s2 + $0x290] sm:$0xff] }
  0x35   :  { %v5374_v6 = vpack.c.bf16 %v153_v62, %v145_v61  ;;  %v152_v7 = vld [vmem:[%s9430_s2 + $0x2d0] sm:$0xff]  ;;  %v159_v8 = vld [vmem:[%s9430_s2 + $0x308] sm:$0xff]  ;;  %v161_v10 = vld [vmem:[%s9430_s2 + $0x318] sm:$0xff]  ;;  %v5344_v12 = vpack.c.bf16 %v150_v4, %v142_v3 }
  0x36   :  { %5337 = vmatpush1.bf16.msra.mxu0 %v5336_v51  ;;  %v167_v9 = vld [vmem:[%s9430_s2 + $0x348] sm:$0xff]  ;;  %v169_v11 = vld [vmem:[%s9430_s2 + $0x358] sm:$0xff]  ;;  %v5376_v13 = vpack.c.bf16 %v152_v7, %v144_v5  ;;  %v158_v15 = vld [vmem:[%s9430_s2 + $0x300] sm:$0xff] }
  0x37   :  { %5369 = vmatpush1.bf16.msra.mxu1 %v5368_v52  ;;  %5339 = vmatprep.subr.bf16.mxu0 %v5338_v53  ;;  %v5346_v14 = vpack.c.bf16 %v167_v9, %v159_v8  ;;  %v166_v16 = vld [vmem:[%s9430_s2 + $0x340] sm:$0xff]  ;;  %v160_v17 = vld [vmem:[%s9430_s2 + $0x310] sm:$0xff]  ;;  %v5378_v18 = vpack.c.bf16 %v169_v11, %v161_v10  ;;  %v175_v20 = vld [vmem:[%s9430_s2 + $0x388] sm:$0xff] }
  0x38   :  { %5371 = vmatprep.subr.bf16.mxu1 %v5370_v57  ;;  %v168_v19 = vld [vmem:[%s9430_s2 + $0x350] sm:$0xff]  ;;  %v183_v21 = vld [vmem:[%s9430_s2 + $0x3c8] sm:$0xff]  ;;  %v177_v22 = vld [vmem:[%s9430_s2 + $0x398] sm:$0xff]  ;;  %v5348_v24 = vpack.c.bf16 %v166_v16, %v158_v15 }
  0x39   :  { %v185_v23 = vld [vmem:[%s9430_s2 + $0x3d8] sm:$0xff]  ;;  %v5380_v25 = vpack.c.bf16 %v168_v19, %v160_v17  ;;  %v5350_v26 = vpack.c.bf16 %v183_v21, %v175_v20  ;;  %v174_v27 = vld [vmem:[%s9430_s2 + $0x380] sm:$0xff]  ;;  %v176_v29 = vld [vmem:[%s9430_s2 + $0x390] sm:$0xff] }
  0x3a   :  { %5341 = vmatpush1.bf16.msra.mxu0 %v5340_v63  ;;  %v182_v28 = vld [vmem:[%s9430_s2 + $0x3c0] sm:$0xff]  ;;  %v5382_v30 = vpack.c.bf16 %v185_v23, %v177_v22  ;;  %v184_v31 = vld [vmem:[%s9430_s2 + $0x3d0] sm:$0xff]  ;;  %v67_v32 = vld [vmem:[%s9430_s2 + $0x28] sm:$0xff] }
  0x3b   :  { %5373 = vmatpush1.bf16.msra.mxu1 %v5372_v1  ;;  %5343 = vmatprep.subr.bf16.mxu0 %v5342_v2  ;;  %v75_v33 = vld [vmem:[%s9430_s2 + $0x68] sm:$0xff]  ;;  %v69_v34 = vld [vmem:[%s9430_s2 + $0x38] sm:$0xff]  ;;  %v5352_v36 = vpack.c.bf16 %v182_v28, %v174_v27  ;;  %v5384_v37 = vpack.c.bf16 %v184_v31, %v176_v29  ;;  %v66_v39 = vld [vmem:[%s9430_s2 + $0x20] sm:$0xff] }
  0x3c   :  { %5375 = vmatprep.subr.bf16.mxu1 %v5374_v6  ;;  %v77_v35 = vld [vmem:[%s9430_s2 + $0x78] sm:$0xff]  ;;  %v5386_v38 = vpack.c.bf16 %v75_v33, %v67_v32  ;;  %v74_v40 = vld [vmem:[%s9430_s2 + $0x60] sm:$0xff]  ;;  %v68_v42 = vld [vmem:[%s9430_s2 + $0x30] sm:$0xff] }
  0x3d   :  { %v5418_v41 = vpack.c.bf16 %v77_v35, %v69_v34  ;;  %v76_v43 = vld [vmem:[%s9430_s2 + $0x70] sm:$0xff]  ;;  %v83_v44 = vld [vmem:[%s9430_s2 + $0xa8] sm:$0xff]  ;;  %v7404_v46 = vld [vmem:[%s9428_s0] sm:$0xff]  ;;  %v5388_v47 = vpack.c.bf16 %v74_v40, %v66_v39 }
  0x3e   :  { %5345 = vmatpush1.bf16.msra.mxu0 %v5344_v12  ;;  %v91_v45 = vld [vmem:[%s9430_s2 + $0xe8] sm:$0xff]  ;;  %v85_v48 = vld [vmem:[%s9430_s2 + $0xb8] sm:$0xff]  ;;  %v5420_v50 = vpack.c.bf16 %v76_v43, %v68_v42  ;;  %v82_v51 = vld [vmem:[%s9430_s2 + $0xa0] sm:$0xff] }
  0x3f   :  { %5377 = vmatpush1.bf16.msra.mxu1 %v5376_v13  ;;  %5347 = vmatprep.subr.bf16.mxu0 %v5346_v14  ;;  %v93_v49 = vld [vmem:[%s9430_s2 + $0xf8] sm:$0xff]  ;;  %v90_v52 = vld [vmem:[%s9430_s2 + $0xe0] sm:$0xff]  ;;  %v5390_v53 = vpack.c.bf16 %v91_v45, %v83_v44  ;;  %v84_v54 = vld [vmem:[%s9430_s2 + $0xb0] sm:$0xff] }
  0x40   :  { %5379 = vmatprep.subr.bf16.mxu1 %v5378_v18  ;;  %v92_v55 = vld [vmem:[%s9430_s2 + $0xf0] sm:$0xff]  ;;  %v5422_v56 = vpack.c.bf16 %v93_v49, %v85_v48  ;;  %v99_v57 = vld [vmem:[%s9430_s2 + $0x128] sm:$0xff]  ;;  %v5392_v60 = vpack.c.bf16 %v90_v52, %v82_v51  ;;  %v101_v61 = vld [vmem:[%s9430_s2 + $0x138] sm:$0xff] }
  0x41   :  { %v107_v58 = vld [vmem:[%s9430_s2 + $0x168] sm:$0xff]  ;;  %v109_v62 = vld [vmem:[%s9430_s2 + $0x178] sm:$0xff]  ;;  %v5424_v63 = vpack.c.bf16 %v92_v55, %v84_v54  ;;  %v98_v1 = vld [vmem:[%s9430_s2 + $0x120] sm:$0xff] }
  0x42   :  { %5349 = vmatpush1.bf16.msra.mxu0 %v5348_v24  ;;  %v7435_v59 = vld [vmem:[%s9428_s0 + $0x8] sm:$0xff]  ;;  %v106_v2 = vld [vmem:[%s9430_s2 + $0x160] sm:$0xff]  ;;  %v5394_v3 = vpack.c.bf16 %v107_v58, %v99_v57  ;;  %v100_v4 = vld [vmem:[%s9430_s2 + $0x130] sm:$0xff]  ;;  %v5426_v6 = vpack.c.bf16 %v109_v62, %v101_v61 }
  0x43   :  { %5381 = vmatpush1.bf16.msra.mxu1 %v5380_v25  ;;  %5351 = vmatprep.subr.bf16.mxu0 %v5350_v26  ;;  %v108_v5 = vld [vmem:[%s9430_s2 + $0x170] sm:$0xff]  ;;  %v115_v7 = vld [vmem:[%s9430_s2 + $0x1a8] sm:$0xff]  ;;  %v5396_v10 = vpack.c.bf16 %v106_v2, %v98_v1  ;;  %v117_v11 = vld [vmem:[%s9430_s2 + $0x1b8] sm:$0xff] }
  0x44   :  { %5383 = vmatprep.subr.bf16.mxu1 %v5382_v30  ;;  %v123_v8 = vld [vmem:[%s9430_s2 + $0x1e8] sm:$0xff]  ;;  %v7468_v9 = vld [vmem:[%s9428_s0 + $0x10] sm:$0xff]  ;;  %v125_v12 = vld [vmem:[%s9430_s2 + $0x1f8] sm:$0xff]  ;;  %v5428_v13 = vpack.c.bf16 %v108_v5, %v100_v4 }
  0x45   :  { %v114_v14 = vld [vmem:[%s9430_s2 + $0x1a0] sm:$0xff]  ;;  %v5398_v16 = vpack.c.bf16 %v123_v8, %v115_v7  ;;  %v116_v17 = vld [vmem:[%s9430_s2 + $0x1b0] sm:$0xff]  ;;  %v5430_v19 = vpack.c.bf16 %v125_v12, %v117_v11  ;;  %v131_v20 = vld [vmem:[%s9430_s2 + $0x228] sm:$0xff] }
  0x46   :  { %5353 = vmatpush1.bf16.msra.mxu0 %v5352_v36  ;;  %v122_v15 = vld [vmem:[%s9430_s2 + $0x1e0] sm:$0xff]  ;;  %v124_v18 = vld [vmem:[%s9430_s2 + $0x1f0] sm:$0xff]  ;;  %v139_v21 = vld [vmem:[%s9430_s2 + $0x268] sm:$0xff] }
  0x47   :  { %5385 = vmatpush1.bf16.msra.mxu1 %v5384_v37  ;;  %5387 = vmatprep.subr.bf16.mxu0 %v5386_v38  ;;  %v7501_v22 = vld [vmem:[%s9428_s0 + $0x18] sm:$0xff]  ;;  %v5400_v23 = vpack.c.bf16 %v122_v15, %v114_v14  ;;  %v5432_v26 = vpack.c.bf16 %v124_v18, %v116_v17  ;;  %v130_v27 = vld [vmem:[%s9430_s2 + $0x220] sm:$0xff]  ;;  %v5402_v29 = vpack.c.bf16 %v139_v21, %v131_v20  ;;  %v132_v30 = vld [vmem:[%s9430_s2 + $0x230] sm:$0xff] }
  0x48   :  { %5419 = vmatprep.subr.bf16.mxu1 %v5418_v41  ;;  %v133_v24 = vld [vmem:[%s9430_s2 + $0x238] sm:$0xff]  ;;  %v138_v28 = vld [vmem:[%s9430_s2 + $0x260] sm:$0xff]  ;;  %v140_v31 = vld [vmem:[%s9430_s2 + $0x270] sm:$0xff] }
  0x49   :  { %297 = vmatmul.mubr.f32.vlgmr.msra.gmra.mrb[0].mxu0 %v7404_v46  ;;  %v141_v25 = vld [vmem:[%s9430_s2 + $0x278] sm:$0xff]  ;;  %v147_v33 = vld [vmem:[%s9430_s2 + $0x2a8] sm:$0xff]  ;;  %v7534_v35 = vld [vmem:[%s9428_s0 + $0x20] sm:$0xff]  ;;  %v5404_v36 = vpack.c.bf16 %v138_v28, %v130_v27  ;;  %v5436_v39 = vpack.c.bf16 %v140_v31, %v132_v30 }
  0x4a   :  { %410 = vmatmul.mubr.f32.vlgmr.msra.gmra.mrb[0].mxu1 %v7404_v46  ;;  %5389 = vmatpush1.bf16.msra.mxu0 %v5388_v47  ;;  %v5434_v32 = vpack.c.bf16 %v141_v25, %v133_v24  ;;  %v155_v34 = vld [vmem:[%s9430_s2 + $0x2e8] sm:$0xff]  ;;  %v149_v37 = vld [vmem:[%s9430_s2 + $0x2b8] sm:$0xff]  ;;  %v146_v40 = vld [vmem:[%s9430_s2 + $0x2a0] sm:$0xff] }
  0x4b   :  { %5421 = vmatpush1.bf16.msra.mxu1 %v5420_v50  ;;  %302 = vmatprep.mubr.f32.mxu0 %v9437_v0  ;;  %v157_v38 = vld [vmem:[%s9430_s2 + $0x2f8] sm:$0xff]  ;;  %v154_v41 = vld [vmem:[%s9430_s2 + $0x2e0] sm:$0xff]  ;;  %v5406_v42 = vpack.c.bf16 %v155_v34, %v147_v33  ;;  %v148_v43 = vld [vmem:[%s9430_s2 + $0x2b0] sm:$0xff] }
  0x4c   :  { %415 = vmatprep.mubr.f32.mxu1 %v9437_v0  ;;  %5391 = vmatprep.subr.bf16.mxu0 %v5390_v53  ;;  %v156_v44 = vld [vmem:[%s9430_s2 + $0x2f0] sm:$0xff]  ;;  %v5438_v45 = vpack.c.bf16 %v157_v38, %v149_v37  ;;  %v163_v47 = vld [vmem:[%s9430_s2 + $0x328] sm:$0xff]  ;;  %v5408_v50 = vpack.c.bf16 %v154_v41, %v146_v40  ;;  %v165_v51 = vld [vmem:[%s9430_s2 + $0x338] sm:$0xff] }
  0x4d   :  { %303 = vmatmul.mubr.f32.gmra.mrb[2].mxu0 %v7435_v59  ;;  %5423 = vmatprep.subr.bf16.mxu1 %v5422_v56  ;;  %v171_v48 = vld [vmem:[%s9430_s2 + $0x368] sm:$0xff]  ;;  %v173_v52 = vld [vmem:[%s9430_s2 + $0x378] sm:$0xff]  ;;  %v5440_v53 = vpack.c.bf16 %v156_v44, %v148_v43  ;;  %v162_v54 = vld [vmem:[%s9430_s2 + $0x320] sm:$0xff] }
  0x4e   :  { %416 = vmatmul.mubr.f32.gmra.mrb[2].mxu1 %v7435_v59  ;;  %5393 = vmatpush1.bf16.msra.mxu0 %v5392_v60  ;;  %v7567_v49 = vld [vmem:[%s9428_s0 + $0x28] sm:$0xff]  ;;  %v170_v55 = vld [vmem:[%s9430_s2 + $0x360] sm:$0xff]  ;;  %v5410_v56 = vpack.c.bf16 %v171_v48, %v163_v47  ;;  %v164_v57 = vld [vmem:[%s9430_s2 + $0x330] sm:$0xff]  ;;  %v5442_v60 = vpack.c.bf16 %v173_v52, %v165_v51 }
  0x4f   :  { %5425 = vmatpush1.bf16.msra.mxu1 %v5424_v63  ;;  %308 = vmatprep.mubr.f32.mxu0 %v9437_v0  ;;  %v172_v58 = vld [vmem:[%s9430_s2 + $0x370] sm:$0xff]  ;;  %v179_v61 = vld [vmem:[%s9430_s2 + $0x3a8] sm:$0xff]  ;;  %v5412_v1 = vpack.c.bf16 %v170_v55, %v162_v54  ;;  %v181_v2 = vld [vmem:[%s9430_s2 + $0x3b8] sm:$0xff] }
  0x50   :  { %421 = vmatprep.mubr.f32.mxu1 %v9437_v0  ;;  %5395 = vmatprep.subr.bf16.mxu0 %v5394_v3  ;;  %v187_v62 = vld [vmem:[%s9430_s2 + $0x3e8] sm:$0xff]  ;;  %v7600_v63 = vld [vmem:[%s9428_s0 + $0x30] sm:$0xff]  ;;  %v189_v3 = vld [vmem:[%s9430_s2 + $0x3f8] sm:$0xff]  ;;  %v5444_v4 = vpack.c.bf16 %v172_v58, %v164_v57 }
  0x51   :  { %309 = vmatmul.mubr.f32.gmra.mrb[4].mxu0 %v7468_v9  ;;  %5427 = vmatprep.subr.bf16.mxu1 %v5426_v6  ;;  %v178_v5 = vld [vmem:[%s9430_s2 + $0x3a0] sm:$0xff]  ;;  %v5414_v7 = vpack.c.bf16 %v187_v62, %v179_v61  ;;  %v180_v8 = vld [vmem:[%s9430_s2 + $0x3b0] sm:$0xff]  ;;  %v5446_v11 = vpack.c.bf16 %v189_v3, %v181_v2  ;;  %v693_v12 = vld [vmem:[%s9430_s2 + $0x408] sm:$0xff] }
  0x52   :  { %422 = vmatmul.mubr.f32.gmra.mrb[4].mxu1 %v7468_v9  ;;  %5397 = vmatpush1.bf16.msra.mxu0 %v5396_v10  ;;  %v186_v6 = vld [vmem:[%s9430_s2 + $0x3e0] sm:$0xff]  ;;  %v188_v10 = vld [vmem:[%s9430_s2 + $0x3f0] sm:$0xff]  ;;  %v7633_v14 = vld [vmem:[%s9428_s0 + $0x38] sm:$0xff] }
  0x53   :  { %5429 = vmatpush1.bf16.msra.mxu1 %v5428_v13  ;;  %314 = vmatprep.mubr.f32.mxu0 %v9437_v0  ;;  %v701_v13 = vld [vmem:[%s9430_s2 + $0x448] sm:$0xff]  ;;  %v5416_v15 = vpack.c.bf16 %v186_v6, %v178_v5  ;;  %v703_v17 = vld [vmem:[%s9430_s2 + $0x458] sm:$0xff]  ;;  %v5448_v18 = vpack.c.bf16 %v188_v10, %v180_v8  ;;  %v700_v20 = vld [vmem:[%s9430_s2 + $0x440] sm:$0xff] }
  0x54   :  { %427 = vmatprep.mubr.f32.mxu1 %v9437_v0  ;;  %5399 = vmatprep.subr.bf16.mxu0 %v5398_v16  ;;  %v695_v16 = vld [vmem:[%s9430_s2 + $0x418] sm:$0xff]  ;;  %v5450_v21 = vpack.c.bf16 %v701_v13, %v693_v12  ;;  %v702_v24 = vld [vmem:[%s9430_s2 + $0x450] sm:$0xff]  ;;  %v717_v27 = vld [vmem:[%s9430_s2 + $0x4c8] sm:$0xff] }
  0x55   :  { %315 = vmatmul.mubr.f32.gmra.mrb[6].mxu0 %v7501_v22  ;;  %5431 = vmatprep.subr.bf16.mxu1 %v5430_v19  ;;  %v692_v19 = vld [vmem:[%s9430_s2 + $0x400] sm:$0xff]  ;;  %v5482_v25 = vpack.c.bf16 %v703_v17, %v695_v16  ;;  %v719_v30 = vld [vmem:[%s9430_s2 + $0x4d8] sm:$0xff]  ;;  %v718_v37 = vld [vmem:[%s9430_s2 + $0x4d0] sm:$0xff] }
  0x56   :  { %428 = vmatmul.mubr.f32.gmra.mrb[6].mxu1 %v7501_v22  ;;  %5401 = vmatpush1.bf16.msra.mxu0 %v5400_v23  ;;  %v694_v23 = vld [vmem:[%s9430_s2 + $0x410] sm:$0xff]  ;;  %v5452_v28 = vpack.c.bf16 %v700_v20, %v692_v19  ;;  %v716_v33 = vld [vmem:[%s9430_s2 + $0x4c0] sm:$0xff]  ;;  %v733_v40 = vld [vmem:[%s9430_s2 + $0x548] sm:$0xff] }
  0x57   :  { %5433 = vmatpush1.bf16.msra.mxu1 %v5432_v26  ;;  %320 = vmatprep.mubr.f32.mxu0 %v9437_v0  ;;  %v709_v26 = vld [vmem:[%s9430_s2 + $0x488] sm:$0xff]  ;;  %v5484_v31 = vpack.c.bf16 %v702_v24, %v694_v23  ;;  %v735_v43 = vld [vmem:[%s9430_s2 + $0x558] sm:$0xff]  ;;  %v726_v48 = vld [vmem:[%s9430_s2 + $0x510] sm:$0xff] }
  0x58   :  { %433 = vmatprep.mubr.f32.mxu1 %v9437_v0  ;;  %5403 = vmatprep.subr.bf16.mxu0 %v5402_v29  ;;  %v711_v29 = vld [vmem:[%s9430_s2 + $0x498] sm:$0xff]  ;;  %v5454_v34 = vpack.c.bf16 %v717_v27, %v709_v26  ;;  %v741_v52 = vld [vmem:[%s9430_s2 + $0x588] sm:$0xff]  ;;  %v740_v58 = vld [vmem:[%s9430_s2 + $0x580] sm:$0xff] }
  0x59   :  { %321 = vmatmul.mubr.f32.gmra.mrb[8].mxu0 %v7534_v35  ;;  %5435 = vmatprep.subr.bf16.mxu1 %v5434_v32  ;;  %v708_v32 = vld [vmem:[%s9430_s2 + $0x480] sm:$0xff]  ;;  %v5486_v38 = vpack.c.bf16 %v719_v30, %v711_v29  ;;  %v743_v55 = vld [vmem:[%s9430_s2 + $0x598] sm:$0xff]  ;;  %v742_v61 = vld [vmem:[%s9430_s2 + $0x590] sm:$0xff] }
  0x5a   :  { %434 = vmatmul.mubr.f32.gmra.mrb[8].mxu1 %v7534_v35  ;;  %5405 = vmatpush1.bf16.msra.mxu0 %v5404_v36  ;;  %v710_v36 = vld [vmem:[%s9430_s2 + $0x490] sm:$0xff]  ;;  %v5456_v41 = vpack.c.bf16 %v716_v33, %v708_v32  ;;  %v757_v2 = vld [vmem:[%s9430_s2 + $0x608] sm:$0xff]  ;;  %v759_v5 = vld [vmem:[%s9430_s2 + $0x618] sm:$0xff] }
  0x5b   :  { %5437 = vmatpush1.bf16.msra.mxu1 %v5436_v39  ;;  %326 = vmatprep.mubr.f32.mxu0 %v9437_v0  ;;  %v725_v39 = vld [vmem:[%s9430_s2 + $0x508] sm:$0xff]  ;;  %v5488_v44 = vpack.c.bf16 %v718_v37, %v710_v36  ;;  %v750_v62 = vld [vmem:[%s9430_s2 + $0x5d0] sm:$0xff]  ;;  %v767_v6 = vld [vmem:[%s9430_s2 + $0x658] sm:$0xff] }
  0x5c   :  { %439 = vmatprep.mubr.f32.mxu1 %v9437_v0  ;;  %5407 = vmatprep.subr.bf16.mxu0 %v5406_v42  ;;  %v727_v42 = vld [vmem:[%s9430_s2 + $0x518] sm:$0xff]  ;;  %v5458_v47 = vpack.c.bf16 %v733_v40, %v725_v39  ;;  %v765_v3 = vld [vmem:[%s9430_s2 + $0x648] sm:$0xff]  ;;  %v756_v8 = vld [vmem:[%s9430_s2 + $0x600] sm:$0xff]  ;;  %v5498_v13 = vpack.c.bf16 %v767_v6, %v759_v5 }
  0x5d   :  { %327 = vmatmul.mubr.f32.gmra.mrb[10].mxu0 %v7567_v49  ;;  %5439 = vmatprep.subr.bf16.mxu1 %v5438_v45  ;;  %v724_v45 = vld [vmem:[%s9430_s2 + $0x500] sm:$0xff]  ;;  %v5490_v51 = vpack.c.bf16 %v735_v43, %v727_v42  ;;  %v5466_v10 = vpack.c.bf16 %v765_v3, %v757_v2  ;;  %v766_v12 = vld [vmem:[%s9430_s2 + $0x650] sm:$0xff]  ;;  %v781_v16 = vld [vmem:[%s9430_s2 + $0x6c8] sm:$0xff] }
  0x5e   :  { %440 = vmatmul.mubr.f32.gmra.mrb[10].mxu1 %v7567_v49  ;;  %5409 = vmatpush1.bf16.msra.mxu0 %v5408_v50  ;;  %v734_v50 = vld [vmem:[%s9430_s2 + $0x550] sm:$0xff]  ;;  %v783_v19 = vld [vmem:[%s9430_s2 + $0x6d8] sm:$0xff]  ;;  %v789_v27 = vld [vmem:[%s9430_s2 + $0x708] sm:$0xff] }
  0x5f   :  { %5441 = vmatpush1.bf16.msra.mxu1 %v5440_v53  ;;  %332 = vmatprep.mubr.f32.mxu0 %v9437_v0  ;;  %v749_v53 = vld [vmem:[%s9430_s2 + $0x5c8] sm:$0xff]  ;;  %v5492_v57 = vpack.c.bf16 %v734_v50, %v726_v48  ;;  %v774_v24 = vld [vmem:[%s9430_s2 + $0x690] sm:$0xff]  ;;  %v791_v30 = vld [vmem:[%s9430_s2 + $0x718] sm:$0xff] }
  0x60   :  { %445 = vmatprep.mubr.f32.mxu1 %v9437_v0  ;;  %5411 = vmatprep.subr.bf16.mxu0 %v5410_v56  ;;  %v751_v56 = vld [vmem:[%s9430_s2 + $0x5d8] sm:$0xff]  ;;  %v788_v33 = vld [vmem:[%s9430_s2 + $0x700] sm:$0xff]  ;;  %v790_v36 = vld [vmem:[%s9430_s2 + $0x710] sm:$0xff] }
  0x61   :  { %333 = vmatmul.mubr.f32.gmra.mrb[12].mxu0 %v7600_v63  ;;  %5443 = vmatprep.subr.bf16.mxu1 %v5442_v60  ;;  %v5462_v60 = vpack.c.bf16 %v749_v53, %v741_v52  ;;  %v798_v37 = vld [vmem:[%s9430_s2 + $0x750] sm:$0xff]  ;;  %v805_v39 = vld [vmem:[%s9430_s2 + $0x788] sm:$0xff]  ;;  %v807_v42 = vld [vmem:[%s9430_s2 + $0x798] sm:$0xff] }
  0x62   :  { %446 = vmatmul.mubr.f32.gmra.mrb[12].mxu1 %v7600_v63  ;;  %5413 = vmatpush1.bf16.msra.mxu0 %v5412_v1  ;;  %v5494_v1 = vpack.c.bf16 %v751_v56, %v743_v55  ;;  %v813_v40 = vld [vmem:[%s9430_s2 + $0x7c8] sm:$0xff]  ;;  %v815_v43 = vld [vmem:[%s9430_s2 + $0x7d8] sm:$0xff]  ;;  %v814_v48 = vld [vmem:[%s9430_s2 + $0x7d0] sm:$0xff] }
  0x63   :  { %5445 = vmatpush1.bf16.msra.mxu1 %v5444_v4  ;;  %338 = vmatprep.mubr.f32.mxu0 %v9437_v0  ;;  %v5510_v50 = vpack.c.bf16 %v815_v43, %v807_v42  ;;  %v705_v52 = vld [vmem:[%s9430_s2 + $0x468] sm:$0xff]  ;;  %v707_v55 = vld [vmem:[%s9430_s2 + $0x478] sm:$0xff]  ;;  %v7890_v2 = vld [vmem:[%s9429_s1] sm:$0xff] }
  0x64   :  { %451 = vmatprep.mubr.f32.mxu1 %v9437_v0  ;;  %5415 = vmatprep.subr.bf16.mxu0 %v5414_v7  ;;  %v5496_v7 = vpack.c.bf16 %v750_v62, %v742_v61  ;;  %v713_v62 = vld [vmem:[%s9430_s2 + $0x4a8] sm:$0xff]  ;;  %v723_v5 = vld [vmem:[%s9430_s2 + $0x4f8] sm:$0xff] }
  0x65   :  { %339 = vmatmul.mubr.f32.gmra.mrb[14].mxu0 %v7633_v14  ;;  %5447 = vmatprep.subr.bf16.mxu1 %v5446_v11  ;;  %v758_v11 = vld [vmem:[%s9430_s2 + $0x610] sm:$0xff]  ;;  %v763_v43 = vld [vmem:[%s9430_s2 + $0x638] sm:$0xff] }
  0x66   :  { %452 = vmatmul.mubr.f32.gmra.mrb[14].mxu1 %v7633_v14  ;;  %5417 = vmatpush1.bf16.msra.mxu0 %v5416_v15  ;;  %v773_v15 = vld [vmem:[%s9430_s2 + $0x688] sm:$0xff]  ;;  %v5500_v20 = vpack.c.bf16 %v766_v12, %v758_v11 }
  0x67   :  { %5449 = vmatpush1.bf16.msra.mxu1 %v5448_v18  ;;  %522 = vmatprep.mubr.f32.mxu0 %v9437_v0  ;;  %v775_v18 = vld [vmem:[%s9430_s2 + $0x698] sm:$0xff]  ;;  %v5470_v23 = vpack.c.bf16 %v781_v16, %v773_v15  ;;  %v729_v12 = vld [vmem:[%s9430_s2 + $0x528] sm:$0xff] }
  0x68   :  { %635 = vmatprep.mubr.f32.mxu1 %v9437_v0  ;;  %5451 = vmatprep.subr.bf16.mxu0 %v5450_v21  ;;  %v772_v21 = vld [vmem:[%s9430_s2 + $0x680] sm:$0xff]  ;;  %v5502_v26 = vpack.c.bf16 %v783_v19, %v775_v18  ;;  %v7923_v15 = vld [vmem:[%s9429_s1 + $0x8] sm:$0xff]  ;;  %v739_v18 = vld [vmem:[%s9430_s2 + $0x578] sm:$0xff] }
  0x69   :  { %523 = vmatmul.mubr.f32.vlgmr.msra.gmra.mrb[16].mxu0 %v7404_v46  ;;  %5483 = vmatprep.subr.bf16.mxu1 %v5482_v25  ;;  %v782_v25 = vld [vmem:[%s9430_s2 + $0x6d0] sm:$0xff] }
  0x6a   :  { %636 = vmatmul.mubr.f32.vlgmr.msra.gmra.mrb[16].mxu1 %v7404_v46  ;;  %5453 = vmatpush1.bf16.msra.mxu0 %v5452_v28  ;;  %v732_v46 = vld [vmem:[%s9430_s2 + $0x540] sm:$0xff]  ;;  %v797_v28 = vld [vmem:[%s9430_s2 + $0x748] sm:$0xff]  ;;  %v5504_v32 = vpack.c.bf16 %v782_v25, %v774_v24  ;;  %v738_v24 = vld [vmem:[%s9430_s2 + $0x570] sm:$0xff] }
  0x6b   :  { %5485 = vmatpush1.bf16.msra.mxu1 %v5484_v31  ;;  %528 = vmatprep.mubr.f32.mxu0 %v9437_v0  ;;  %v5460_v54 = vpack.c.bf16 %v732_v46, %v724_v45  ;;  %v799_v31 = vld [vmem:[%s9430_s2 + $0x758] sm:$0xff]  ;;  %v804_v45 = vld [vmem:[%s9430_s2 + $0x780] sm:$0xff]  ;;  %v5478_v46 = vpack.c.bf16 %v813_v40, %v805_v39  ;;  %v761_v39 = vld [vmem:[%s9430_s2 + $0x628] sm:$0xff] }
  0x6c   :  { %641 = vmatprep.mubr.f32.mxu1 %v9437_v0  ;;  %5455 = vmatprep.subr.bf16.mxu0 %v5454_v34  ;;  %v5474_v34 = vpack.c.bf16 %v797_v28, %v789_v27  ;;  %v753_v27 = vld [vmem:[%s9430_s2 + $0x5e8] sm:$0xff]  ;;  %v7956_v28 = vld [vmem:[%s9429_s1 + $0x10] sm:$0xff] }
  0x6d   :  { %529 = vmatmul.mubr.f32.gmra.mrb[18].mxu0 %v7435_v59  ;;  %5487 = vmatprep.subr.bf16.mxu1 %v5486_v38  ;;  %v5506_v38 = vpack.c.bf16 %v799_v31, %v791_v30  ;;  %v747_v30 = vld [vmem:[%s9430_s2 + $0x5b8] sm:$0xff]  ;;  %v769_v40 = vld [vmem:[%s9430_s2 + $0x668] sm:$0xff] }
  0x6e   :  { %642 = vmatmul.mubr.f32.gmra.mrb[18].mxu1 %v7435_v59  ;;  %5457 = vmatpush1.bf16.msra.mxu0 %v5456_v41  ;;  %v748_v59 = vld [vmem:[%s9430_s2 + $0x5c0] sm:$0xff]  ;;  %v755_v31 = vld [vmem:[%s9430_s2 + $0x5f8] sm:$0xff] }
  0x6f   :  { %5489 = vmatpush1.bf16.msra.mxu1 %v5488_v44  ;;  %534 = vmatprep.mubr.f32.mxu0 %v9437_v0  ;;  %v5464_v4 = vpack.c.bf16 %v748_v59, %v740_v58  ;;  %v5508_v44 = vpack.c.bf16 %v798_v37, %v790_v36  ;;  %v698_v59 = vld [vmem:[%s9430_s2 + $0x430] sm:$0xff] }
  0x70   :  { %647 = vmatprep.mubr.f32.mxu1 %v9437_v0  ;;  %5459 = vmatprep.subr.bf16.mxu0 %v5458_v47  ;;  %v806_v47 = vld [vmem:[%s9430_s2 + $0x790] sm:$0xff] }
  0x71   :  { %535 = vmatmul.mubr.f32.gmra.mrb[20].mxu0 %v7468_v9  ;;  %5491 = vmatprep.subr.bf16.mxu1 %v5490_v51  ;;  %v697_v51 = vld [vmem:[%s9430_s2 + $0x428] sm:$0xff]  ;;  %v5512_v56 = vpack.c.bf16 %v814_v48, %v806_v47  ;;  %v746_v36 = vld [vmem:[%s9430_s2 + $0x5b0] sm:$0xff]  ;;  %v5530_v47 = vpack.c.bf16 %v769_v40, %v761_v39  ;;  %v1412_v39 = vld [vmem:[#allocation5 + $0x20] sm:$0xff] }
  0x72   :  { %648 = vmatmul.mubr.f32.gmra.mrb[20].mxu1 %v7468_v9  ;;  %5461 = vmatpush1.bf16.msra.mxu0 %v5460_v54  ;;  %v764_v9 = vld [vmem:[%s9430_s2 + $0x640] sm:$0xff]  ;;  %v699_v54 = vld [vmem:[%s9430_s2 + $0x438] sm:$0xff]  ;;  %v5514_v58 = vpack.c.bf16 %v705_v52, %v697_v51  ;;  %v754_v37 = vld [vmem:[%s9430_s2 + $0x5f0] sm:$0xff] }
  0x73   :  { %5493 = vmatpush1.bf16.msra.mxu1 %v5492_v57  ;;  %540 = vmatprep.mubr.f32.mxu0 %v9437_v0  ;;  %v5468_v17 = vpack.c.bf16 %v764_v9, %v756_v8  ;;  %v696_v57 = vld [vmem:[%s9430_s2 + $0x420] sm:$0xff]  ;;  %v5546_v61 = vpack.c.bf16 %v707_v55, %v699_v54  ;;  %v714_v9 = vld [vmem:[%s9430_s2 + $0x4b0] sm:$0xff]  ;;  %v777_v52 = vld [vmem:[%s9430_s2 + $0x6a8] sm:$0xff] }
  0x74   :  { %653 = vmatprep.mubr.f32.mxu1 %v9437_v0  ;;  %5463 = vmatprep.subr.bf16.mxu0 %v5462_v60  ;;  %v706_v60 = vld [vmem:[%s9430_s2 + $0x470] sm:$0xff]  ;;  %v8022_v54 = vld [vmem:[%s9429_s1 + $0x20] sm:$0xff] }
  0x75   :  { %541 = vmatmul.mubr.f32.gmra.mrb[22].mxu0 %v7501_v22  ;;  %5495 = vmatprep.subr.bf16.mxu1 %v5494_v1  ;;  %v721_v1 = vld [vmem:[%s9430_s2 + $0x4e8] sm:$0xff]  ;;  %v5548_v6 = vpack.c.bf16 %v706_v60, %v698_v59  ;;  %v762_v48 = vld [vmem:[%s9430_s2 + $0x630] sm:$0xff]  ;;  %v784_v59 = vld [vmem:[%s9430_s2 + $0x6e0] sm:$0xff] }
  0x76   :  { %654 = vmatmul.mubr.f32.gmra.mrb[22].mxu1 %v7501_v22  ;;  %5465 = vmatpush1.bf16.msra.mxu0 %v5464_v4  ;;  %v780_v22 = vld [vmem:[%s9430_s2 + $0x6c0] sm:$0xff]  ;;  %v715_v4 = vld [vmem:[%s9430_s2 + $0x4b8] sm:$0xff]  ;;  %v5518_v8 = vpack.c.bf16 %v721_v1, %v713_v62  ;;  %v786_v62 = vld [vmem:[%s9430_s2 + $0x6f0] sm:$0xff] }
  0x77   :  { %5497 = vmatpush1.bf16.msra.mxu1 %v5496_v7  ;;  %546 = vmatprep.mubr.f32.mxu0 %v9437_v0  ;;  %v5472_v29 = vpack.c.bf16 %v780_v22, %v772_v21  ;;  %v720_v7 = vld [vmem:[%s9430_s2 + $0x4e0] sm:$0xff]  ;;  %v5550_v11 = vpack.c.bf16 %v723_v5, %v715_v4  ;;  %v801_v4 = vld [vmem:[%s9430_s2 + $0x768] sm:$0xff] }
  0x78   :  { %659 = vmatprep.mubr.f32.mxu1 %v9437_v0  ;;  %5467 = vmatprep.subr.bf16.mxu0 %v5466_v10  ;;  %v722_v10 = vld [vmem:[%s9430_s2 + $0x4f0] sm:$0xff]  ;;  %v736_v21 = vld [vmem:[%s9430_s2 + $0x560] sm:$0xff]  ;;  %v8055_v5 = vld [vmem:[%s9429_s1 + $0x28] sm:$0xff] }
  0x79   :  { %547 = vmatmul.mubr.f32.gmra.mrb[24].mxu0 %v7534_v35  ;;  %5499 = vmatprep.subr.bf16.mxu1 %v5498_v13  ;;  %v737_v13 = vld [vmem:[%s9430_s2 + $0x568] sm:$0xff]  ;;  %v5552_v19 = vpack.c.bf16 %v722_v10, %v714_v9  ;;  %v792_v9 = vld [vmem:[%s9430_s2 + $0x720] sm:$0xff] }
  0x7a   :  { %660 = vmatmul.mubr.f32.gmra.mrb[24].mxu1 %v7534_v35  ;;  %5469 = vmatpush1.bf16.msra.mxu0 %v5468_v17  ;;  %v796_v35 = vld [vmem:[%s9430_s2 + $0x740] sm:$0xff]  ;;  %v731_v17 = vld [vmem:[%s9430_s2 + $0x538] sm:$0xff]  ;;  %v5522_v22 = vpack.c.bf16 %v737_v13, %v729_v12  ;;  %v794_v12 = vld [vmem:[%s9430_s2 + $0x730] sm:$0xff] }
  0x7b   :  { %5501 = vmatpush1.bf16.msra.mxu1 %v5500_v20  ;;  %552 = vmatprep.mubr.f32.mxu0 %v9437_v0  ;;  %v5476_v41 = vpack.c.bf16 %v796_v35, %v788_v33  ;;  %v728_v20 = vld [vmem:[%s9430_s2 + $0x520] sm:$0xff]  ;;  %v5554_v25 = vpack.c.bf16 %v739_v18, %v731_v17  ;;  %v802_v13 = vld [vmem:[%s9430_s2 + $0x770] sm:$0xff]  ;;  %v809_v17 = vld [vmem:[%s9430_s2 + $0x7a8] sm:$0xff] }
  0x7c   :  { %665 = vmatprep.mubr.f32.mxu1 %v9437_v0  ;;  %5471 = vmatprep.subr.bf16.mxu0 %v5470_v23  ;;  %v730_v23 = vld [vmem:[%s9430_s2 + $0x530] sm:$0xff]  ;;  %v744_v33 = vld [vmem:[%s9430_s2 + $0x5a0] sm:$0xff]  ;;  %v817_v18 = vld [vmem:[%s9430_s2 + $0x7e8] sm:$0xff] }
  0x7d   :  { %553 = vmatmul.mubr.f32.gmra.mrb[26].mxu0 %v7567_v49  ;;  %5503 = vmatprep.subr.bf16.mxu1 %v5502_v26  ;;  %v745_v26 = vld [vmem:[%s9430_s2 + $0x5a8] sm:$0xff]  ;;  %v752_v35 = vld [vmem:[%s9430_s2 + $0x5e0] sm:$0xff] }
  0x7e   :  { %666 = vmatmul.mubr.f32.gmra.mrb[26].mxu1 %v7567_v49  ;;  %5473 = vmatpush1.bf16.msra.mxu0 %v5472_v29  ;;  %v812_v49 = vld [vmem:[%s9430_s2 + $0x7c0] sm:$0xff]  ;;  %v5524_v29 = vpack.c.bf16 %v736_v21, %v728_v20  ;;  %v5528_v42 = vpack.c.bf16 %v752_v35, %v744_v33  ;;  %v811_v21 = vld [vmem:[%s9430_s2 + $0x7b8] sm:$0xff] }
  0x7f   :  { %5505 = vmatpush1.bf16.msra.mxu1 %v5504_v32  ;;  %558 = vmatprep.mubr.f32.mxu0 %v9437_v0  ;;  %v5480_v53 = vpack.c.bf16 %v812_v49, %v804_v45  ;;  %v5556_v32 = vpack.c.bf16 %v738_v24, %v730_v23  ;;  %v5560_v45 = vpack.c.bf16 %v754_v37, %v746_v36  ;;  %v760_v49 = vld [vmem:[%s9430_s2 + $0x620] sm:$0xff]  ;;  %v8115_v33 = vld [vmem:[%s9429_s1 + $0x38] sm:$0xff] }
  0x80   :  { %671 = vmatprep.mubr.f32.mxu1 %v9437_v0  ;;  %5475 = vmatprep.subr.bf16.mxu0 %v5474_v34  ;;  %v5526_v34 = vpack.c.bf16 %v753_v27, %v745_v26  ;;  %v800_v10 = vld [vmem:[%s9430_s2 + $0x760] sm:$0xff]  ;;  %v5572_v23 = vpack.c.bf16 %v802_v13, %v794_v12  ;;  %v5542_v26 = vpack.c.bf16 %v817_v18, %v809_v17  ;;  %v810_v27 = vld [vmem:[%s9430_s2 + $0x7b0] sm:$0xff]  ;;  %v1415_v36 = vld [vmem:[#allocation5 + $0x38] sm:$0xff] }
  0x81   :  { %559 = vmatmul.mubr.f32.gmra.mrb[28].mxu0 %v7600_v63  ;;  %5507 = vmatprep.subr.bf16.mxu1 %v5506_v38  ;;  %v5558_v38 = vpack.c.bf16 %v755_v31, %v747_v30  ;;  %v5540_v20 = vpack.c.bf16 %v800_v10, %v792_v9  ;;  %v808_v24 = vld [vmem:[%s9430_s2 + $0x7a0] sm:$0xff]  ;;  %v1409_v31 = vld [vmem:[#allocation5 + $0x8] sm:$0xff]  ;;  %v1435_v10 = vld [vmem:[#allocation5 + $0xd8] sm:$0xff] }
  0x82   :  { %672 = vmatmul.mubr.f32.gmra.mrb[28].mxu1 %v7600_v63  ;;  %5477 = vmatpush1.bf16.msra.mxu0 %v5476_v41  ;;  %v704_v63 = vld [vmem:[%s9430_s2 + $0x460] sm:$0xff]  ;;  %v7989_v41 = vld [vmem:[%s9429_s1 + $0x18] sm:$0xff]  ;;  %v1438_v18 = vld [vmem:[#allocation5 + $0xf0] sm:$0xff] }
  0x83   :  { %5509 = vmatpush1.bf16.msra.mxu1 %v5508_v44  ;;  %564 = vmatprep.mubr.f32.mxu0 %v9437_v0  ;;  %v5516_v3 = vpack.c.bf16 %v704_v63, %v696_v57  ;;  %v771_v44 = vld [vmem:[%s9430_s2 + $0x678] sm:$0xff]  ;;  %v1432_v13 = vld [vmem:[#allocation5 + $0xc0] sm:$0xff] }
  0x84   :  { %677 = vmatprep.mubr.f32.mxu1 %v9437_v0  ;;  %5479 = vmatprep.subr.bf16.mxu0 %v5478_v46  ;;  %v768_v46 = vld [vmem:[%s9430_s2 + $0x660] sm:$0xff]  ;;  %v5562_v51 = vpack.c.bf16 %v771_v44, %v763_v43  ;;  %v787_v57 = vld [vmem:[%s9430_s2 + $0x6f8] sm:$0xff]  ;;  %v1414_v43 = vld [vmem:[#allocation5 + $0x30] sm:$0xff] }
  0x85   :  { %565 = vmatmul.mubr.f32.gmra.mrb[30].mxu0 %v7633_v14  ;;  %5511 = vmatprep.subr.bf16.mxu1 %v5510_v50  ;;  %v770_v50 = vld [vmem:[%s9430_s2 + $0x670] sm:$0xff]  ;;  %v5532_v55 = vpack.c.bf16 %v768_v46, %v760_v49  ;;  %v1421_v49 = vld [vmem:[#allocation5 + $0x68] sm:$0xff] }
  0x86   :  { %678 = vmatmul.mubr.f32.gmra.mrb[30].mxu1 %v7633_v14  ;;  %5481 = vmatpush1.bf16.msra.mxu0 %v5480_v53  ;;  %v712_v14 = vld [vmem:[%s9430_s2 + $0x4a0] sm:$0xff]  ;;  %v785_v53 = vld [vmem:[%s9430_s2 + $0x6e8] sm:$0xff]  ;;  %v5564_v63 = vpack.c.bf16 %v770_v50, %v762_v48  ;;  %v1423_v48 = vld [vmem:[#allocation5 + $0x78] sm:$0xff] }
  0x87   :  { %5513 = vmatpush1.bf16.msra.mxu1 %v5512_v56  ;;  %884 = vmatprep.mubr.f32.mxu0 %v9437_v0  ;;  %v5520_v16 = vpack.c.bf16 %v720_v7, %v712_v14  ;;  %v779_v56 = vld [vmem:[%s9430_s2 + $0x6b8] sm:$0xff]  ;;  %v5534_v60 = vpack.c.bf16 %v785_v53, %v777_v52  ;;  %v1420_v52 = vld [vmem:[#allocation5 + $0x60] sm:$0xff] }
  0x88   :  { %997 = vmatprep.mubr.f32.mxu1 %v9437_v0  ;;  %5515 = vmatprep.subr.bf16.mxu0 %v5514_v58  ;;  %v776_v58 = vld [vmem:[%s9430_s2 + $0x6a0] sm:$0xff]  ;;  %v5566_v1 = vpack.c.bf16 %v787_v57, %v779_v56  ;;  %v795_v14 = vld [vmem:[%s9430_s2 + $0x738] sm:$0xff]  ;;  %v1422_v56 = vld [vmem:[#allocation5 + $0x70] sm:$0xff] }
  0x89   :  { %885 = vmatmul.mubr.f32.vlgmr.msra.gmra.mrb[0].mxu0 %v7890_v2  ;;  %5547 = vmatprep.subr.bf16.mxu1 %v5546_v61  ;;  %v778_v61 = vld [vmem:[%s9430_s2 + $0x6b0] sm:$0xff]  ;;  %v803_v7 = vld [vmem:[%s9430_s2 + $0x778] sm:$0xff] }
  0x8a   :  { %998 = vmatmul.mubr.f32.vlgmr.msra.gmra.mrb[0].mxu1 %v7890_v2  ;;  %5517 = vmatpush1.bf16.msra.mxu0 %v5516_v3  ;;  %v793_v3 = vld [vmem:[%s9430_s2 + $0x728] sm:$0xff] }
  0x8b   :  { %5549 = vmatpush1.bf16.msra.mxu1 %v5548_v6  ;;  %890 = vmatprep.mubr.f32.mxu0 %v9437_v0  ;;  %v5536_v6 = vpack.c.bf16 %v784_v59, %v776_v58  ;;  %v1429_v58 = vld [vmem:[#allocation5 + $0xa8] sm:$0xff] }
  0x8c   :  { %1003 = vmatprep.mubr.f32.mxu1 %v9437_v0  ;;  %5519 = vmatprep.subr.bf16.mxu0 %v5518_v8  ;;  %v5568_v8 = vpack.c.bf16 %v786_v62, %v778_v61  ;;  %v1431_v61 = vld [vmem:[#allocation5 + $0xb8] sm:$0xff] }
  0x8d   :  { %891 = vmatmul.mubr.f32.gmra.mrb[2].mxu0 %v7923_v15  ;;  %5551 = vmatprep.subr.bf16.mxu1 %v5550_v11  ;;  %v5538_v11 = vpack.c.bf16 %v801_v4, %v793_v3  ;;  %v1428_v3 = vld [vmem:[#allocation5 + $0xa0] sm:$0xff] }
  0x8e   :  { %1004 = vmatmul.mubr.f32.gmra.mrb[2].mxu1 %v7923_v15  ;;  %5521 = vmatpush1.bf16.msra.mxu0 %v5520_v16  ;;  %v5570_v16 = vpack.c.bf16 %v803_v7, %v795_v14  ;;  %v1433_v7 = vld [vmem:[#allocation5 + $0xc8] sm:$0xff] }
  0x8f   :  { %5553 = vmatpush1.bf16.msra.mxu1 %v5552_v19  ;;  %896 = vmatprep.mubr.f32.mxu0 %v9437_v0  ;;  %v8088_v19 = vld [vmem:[%s9429_s1 + $0x30] sm:$0xff] }
  0x90   :  { %1009 = vmatprep.mubr.f32.mxu1 %v9437_v0  ;;  %5523 = vmatprep.subr.bf16.mxu0 %v5522_v22  ;;  %v819_v22 = vld [vmem:[%s9430_s2 + $0x7f8] sm:$0xff] }
  0x91   :  { %897 = vmatmul.mubr.f32.gmra.mrb[4].mxu0 %v7956_v28  ;;  %5555 = vmatprep.subr.bf16.mxu1 %v5554_v25  ;;  %v816_v25 = vld [vmem:[%s9430_s2 + $0x7e0] sm:$0xff]  ;;  %v5574_v30 = vpack.c.bf16 %v819_v22, %v811_v21  ;;  %v1441_v21 = vld [vmem:[#allocation5 + $0x108] sm:$0xff] }
  0x92   :  { %1010 = vmatmul.mubr.f32.gmra.mrb[4].mxu1 %v7956_v28  ;;  %5525 = vmatpush1.bf16.msra.mxu0 %v5524_v29  ;;  %v818_v29 = vld [vmem:[%s9430_s2 + $0x7f0] sm:$0xff]  ;;  %v5544_v35 = vpack.c.bf16 %v816_v25, %v808_v24  ;;  %v1445_v22 = vld [vmem:[#allocation5 + $0x128] sm:$0xff]  ;;  %v1443_v24 = vld [vmem:[#allocation5 + $0x118] sm:$0xff] }
  0x93   :  { %5557 = vmatpush1.bf16.msra.mxu1 %v5556_v32  ;;  %902 = vmatprep.mubr.f32.mxu0 %v9437_v0  ;;  %v1413_v32 = vld [vmem:[#allocation5 + $0x28] sm:$0xff]  ;;  %v5576_v37 = vpack.c.bf16 %v818_v29, %v810_v27  ;;  %v1447_v25 = vld [vmem:[#allocation5 + $0x138] sm:$0xff]  ;;  %v1440_v27 = vld [vmem:[#allocation5 + $0x100] sm:$0xff] }
  0x94   :  { %1015 = vmatprep.mubr.f32.mxu1 %v9437_v0  ;;  %5527 = vmatprep.subr.bf16.mxu0 %v5526_v34  ;;  %v1411_v34 = vld [vmem:[#allocation5 + $0x18] sm:$0xff]  ;;  %v8119_v40 = vpack.c.bf16 %v1413_v32, %v1409_v31  ;;  %v1444_v29 = vld [vmem:[#allocation5 + $0x120] sm:$0xff]  ;;  %v1446_v31 = vld [vmem:[#allocation5 + $0x130] sm:$0xff]  ;;  %v8184_v32 = vpack.c.bf16 %v1447_v25, %v1443_v24 }
  0x95   :  { %903 = vmatmul.mubr.f32.gmra.mrb[6].mxu0 %v7989_v41  ;;  %5559 = vmatprep.subr.bf16.mxu1 %v5558_v38  ;;  %v1408_v38 = vld [vmem:[#allocation5] sm:$0xff]  ;;  %v8122_v44 = vpack.c.bf16 %v1415_v36, %v1411_v34  ;;  %v1453_v34 = vld [vmem:[#allocation5 + $0x168] sm:$0xff]  ;;  %v8188_v36 = vpack.c.bf16 %v1444_v29, %v1440_v27  ;;  %v1621_v27 = vld [vmem:[#allocation7 + $0x18] sm:$0xff] }
  0x96   :  { %1016 = vmatmul.mubr.f32.gmra.mrb[6].mxu1 %v7989_v41  ;;  %5529 = vmatpush1.bf16.msra.mxu0 %v5528_v42  ;;  %v1410_v42 = vld [vmem:[#allocation5 + $0x10] sm:$0xff]  ;;  %v8125_v46 = vpack.c.bf16 %v1412_v39, %v1408_v38  ;;  %v1455_v38 = vld [vmem:[#allocation5 + $0x178] sm:$0xff]  ;;  %v1623_v24 = vld [vmem:[#allocation7 + $0x28] sm:$0xff] }
  0x97   :  { %5561 = vmatpush1.bf16.msra.mxu1 %v5560_v45  ;;  %908 = vmatprep.mubr.f32.mxu0 %v9437_v0  ;;  %v1417_v45 = vld [vmem:[#allocation5 + $0x48] sm:$0xff]  ;;  %v8128_v50 = vpack.c.bf16 %v1414_v43, %v1410_v42  ;;  %v1448_v42 = vld [vmem:[#allocation5 + $0x140] sm:$0xff]  ;;  %v1625_v29 = vld [vmem:[#allocation7 + $0x38] sm:$0xff] }
  0x98   :  { %1021 = vmatprep.mubr.f32.mxu1 %v9437_v0  ;;  %5531 = vmatprep.subr.bf16.mxu0 %v5530_v47  ;;  %v1419_v47 = vld [vmem:[#allocation5 + $0x58] sm:$0xff]  ;;  %v8132_v53 = vpack.c.bf16 %v1421_v49, %v1417_v45  ;;  %v1452_v43 = vld [vmem:[#allocation5 + $0x160] sm:$0xff]  ;;  %v1454_v49 = vld [vmem:[#allocation5 + $0x170] sm:$0xff] }
  0x99   :  { %909 = vmatmul.mubr.f32.gmra.mrb[8].mxu0 %v8022_v54  ;;  %5563 = vmatprep.subr.bf16.mxu1 %v5562_v51  ;;  %v1416_v51 = vld [vmem:[#allocation5 + $0x40] sm:$0xff]  ;;  %v8136_v57 = vpack.c.bf16 %v1423_v48, %v1419_v47  ;;  %v1457_v48 = vld [vmem:[#allocation5 + $0x188] sm:$0xff] }
  0x9a   :  { %1022 = vmatmul.mubr.f32.gmra.mrb[8].mxu1 %v8022_v54  ;;  %5533 = vmatpush1.bf16.msra.mxu0 %v5532_v55  ;;  %v1418_v55 = vld [vmem:[#allocation5 + $0x50] sm:$0xff]  ;;  %v8140_v59 = vpack.c.bf16 %v1420_v52, %v1416_v51  ;;  %v1461_v51 = vld [vmem:[#allocation5 + $0x1a8] sm:$0xff]  ;;  %v8204_v52 = vpack.c.bf16 %v1452_v43, %v1448_v42  ;;  %v8248_v43 = vpack.c.bf16 %v1625_v29, %v1621_v27 }
  0x9b   :  { %5565 = vmatpush1.bf16.msra.mxu1 %v5564_v63  ;;  %914 = vmatprep.mubr.f32.mxu0 %v9437_v0  ;;  %v1425_v63 = vld [vmem:[#allocation5 + $0x88] sm:$0xff]  ;;  %v8144_v62 = vpack.c.bf16 %v1422_v56, %v1418_v55  ;;  %v1459_v55 = vld [vmem:[#allocation5 + $0x198] sm:$0xff]  ;;  %v1640_v27 = vld [vmem:[#allocation7 + $0xb0] sm:$0xff] }
  0x9c   :  { %1027 = vmatprep.mubr.f32.mxu1 %v9437_v0  ;;  %5535 = vmatprep.subr.bf16.mxu0 %v5534_v60  ;;  %v1427_v60 = vld [vmem:[#allocation5 + $0x98] sm:$0xff]  ;;  %v8148_v4 = vpack.c.bf16 %v1429_v58, %v1425_v63  ;;  %v1456_v58 = vld [vmem:[#allocation5 + $0x180] sm:$0xff]  ;;  %v1631_v42 = vld [vmem:[#allocation7 + $0x68] sm:$0xff] }
  0x9d   :  { %915 = vmatmul.mubr.f32.gmra.mrb[10].mxu0 %v8055_v5  ;;  %5567 = vmatprep.subr.bf16.mxu1 %v5566_v1  ;;  %v1424_v1 = vld [vmem:[#allocation5 + $0x80] sm:$0xff]  ;;  %v8152_v14 = vpack.c.bf16 %v1431_v61, %v1427_v60  ;;  %v1463_v56 = vld [vmem:[#allocation5 + $0x1b8] sm:$0xff]  ;;  %v8212_v61 = vpack.c.bf16 %v1461_v51, %v1457_v48  ;;  %v1643_v29 = vld [vmem:[#allocation7 + $0xc8] sm:$0xff] }
  0x9e   :  { %1028 = vmatmul.mubr.f32.gmra.mrb[10].mxu1 %v8055_v5  ;;  %5537 = vmatpush1.bf16.msra.mxu0 %v5536_v6  ;;  %v1430_v6 = vld [vmem:[#allocation5 + $0xb0] sm:$0xff]  ;;  %v8156_v9 = vpack.c.bf16 %v1428_v3, %v1424_v1  ;;  %v1460_v60 = vld [vmem:[#allocation5 + $0x1a0] sm:$0xff]  ;;  %v8216_v3 = vpack.c.bf16 %v1463_v56, %v1459_v55 }
  0x9f   :  { %5569 = vmatpush1.bf16.msra.mxu1 %v5568_v8  ;;  %920 = vmatprep.mubr.f32.mxu0 %v9437_v0  ;;  %v1437_v8 = vld [vmem:[#allocation5 + $0xe8] sm:$0xff]  ;;  %v1462_v1 = vld [vmem:[#allocation5 + $0x1b0] sm:$0xff]  ;;  %v1626_v56 = vld [vmem:[#allocation7 + $0x40] sm:$0xff] }
  0xa0   :  { %1033 = vmatprep.mubr.f32.mxu1 %v9437_v0  ;;  %5539 = vmatprep.subr.bf16.mxu0 %v5538_v11  ;;  %v1439_v11 = vld [vmem:[#allocation5 + $0xf8] sm:$0xff]  ;;  %v8164_v17 = vpack.c.bf16 %v1437_v8, %v1433_v7  ;;  %v8220_v7 = vpack.c.bf16 %v1460_v60, %v1456_v58  ;;  %v1630_v58 = vld [vmem:[#allocation7 + $0x60] sm:$0xff]  ;;  %v1628_v60 = vld [vmem:[#allocation7 + $0x50] sm:$0xff] }
  0xa1   :  { %921 = vmatmul.mubr.f32.gmra.mrb[12].mxu0 %v8088_v19  ;;  %5571 = vmatprep.subr.bf16.mxu1 %v5570_v16  ;;  %v1436_v16 = vld [vmem:[#allocation5 + $0xe0] sm:$0xff]  ;;  %v1467_v8 = vld [vmem:[#allocation5 + $0x1d8] sm:$0xff] }
  0xa2   :  { %1034 = vmatmul.mubr.f32.gmra.mrb[12].mxu1 %v8088_v19  ;;  %5541 = vmatpush1.bf16.msra.mxu0 %v5540_v20  ;;  %v8168_v20 = vpack.c.bf16 %v1439_v11, %v1435_v10  ;;  %v1471_v10 = vld [vmem:[#allocation5 + $0x1f8] sm:$0xff] }
  0xa3   :  { %5573 = vmatpush1.bf16.msra.mxu1 %v5572_v23  ;;  %926 = vmatprep.mubr.f32.mxu0 %v9437_v0  ;;  %v8172_v23 = vpack.c.bf16 %v1436_v16, %v1432_v13  ;;  %v1464_v13 = vld [vmem:[#allocation5 + $0x1c0] sm:$0xff] }
  0xa4   :  { %1039 = vmatprep.mubr.f32.mxu1 %v9437_v0  ;;  %5543 = vmatprep.subr.bf16.mxu0 %v5542_v26  ;;  %v1468_v16 = vld [vmem:[#allocation5 + $0x1e0] sm:$0xff] }
  0xa5   :  { %927 = vmatmul.mubr.f32.gmra.mrb[14].mxu0 %v8115_v33  ;;  %5575 = vmatprep.subr.bf16.mxu1 %v5574_v30  ;;  %v8180_v30 = vpack.c.bf16 %v1445_v22, %v1441_v21  ;;  %v8232_v21 = vpack.c.bf16 %v1471_v10, %v1467_v8  ;;  %v1619_v22 = vld [vmem:[#allocation7 + $0x8] sm:$0xff]  ;;  %v8236_v25 = vpack.c.bf16 %v1468_v16, %v1464_v13  ;;  %v1641_v8 = vld [vmem:[#allocation7 + $0xb8] sm:$0xff] }
  0xa6   :  { %1040 = vmatmul.mubr.f32.gmra.mrb[14].mxu1 %v8115_v33  ;;  %5545 = vmatpush1.bf16.msra.mxu0 %v5544_v35  ;;  %v1449_v35 = vld [vmem:[#allocation5 + $0x148] sm:$0xff]  ;;  %v8268_v10 = vpack.c.bf16 %v1630_v58, %v1626_v56  ;;  %v1644_v56 = vld [vmem:[#allocation7 + $0xd0] sm:$0xff] }
  0xa7   :  { %5577 = vmatpush1.bf16.msra.mxu1 %v5576_v37  ;;  %1110 = vmatprep.mubr.f32.mxu0 %v9437_v0  ;;  %v1451_v37 = vld [vmem:[#allocation5 + $0x158] sm:$0xff]  ;;  %v8196_v45 = vpack.c.bf16 %v1453_v34, %v1449_v35  ;;  %v1622_v35 = vld [vmem:[#allocation7 + $0x20] sm:$0xff]  ;;  %v1620_v34 = vld [vmem:[#allocation7 + $0x10] sm:$0xff] }
  0xa8   :  { %1223 = vmatprep.mubr.f32.mxu1 %v9437_v0  ;;  %5579 = vmatprep.subr.bf16.mxu0 %v8119_v40  ;;  %v8200_v47 = vpack.c.bf16 %v1455_v38, %v1451_v37  ;;  %v1624_v37 = vld [vmem:[#allocation7 + $0x30] sm:$0xff]  ;;  %v1627_v38 = vld [vmem:[#allocation7 + $0x48] sm:$0xff] }
  0xa9   :  { %1111 = vmatmul.mubr.f32.vlgmr.msra.gmra.mrb[16].mxu0 %v7890_v2  ;;  %5611 = vmatprep.subr.bf16.mxu1 %v8122_v44  ;;  %v8256_v51 = vpack.c.bf16 %v1624_v37, %v1620_v34  ;;  %v8258_v55 = vpack.c.bf16 %v1631_v42, %v1627_v38  ;;  %v1649_v34 = vld [vmem:[#allocation7 + $0xf8] sm:$0xff] }
  0xaa   :  { %1224 = vmatmul.mubr.f32.vlgmr.msra.gmra.mrb[16].mxu1 %v7890_v2  ;;  %5581 = vmatpush1.bf16.msra.mxu0 %v8125_v46  ;;  %v1426_v2 = vld [vmem:[#allocation5 + $0x90] sm:$0xff] }
  0xab   :  { %5613 = vmatpush1.bf16.msra.mxu1 %v8128_v50  ;;  %1116 = vmatprep.mubr.f32.mxu0 %v9437_v0  ;;  %v8160_v12 = vpack.c.bf16 %v1430_v6, %v1426_v2  ;;  %v1465_v2 = vld [vmem:[#allocation5 + $0x1c8] sm:$0xff] }
  0xac   :  { %1229 = vmatprep.mubr.f32.mxu1 %v9437_v0  ;;  %5583 = vmatprep.subr.bf16.mxu0 %v8132_v53  ;;  %v1469_v6 = vld [vmem:[#allocation5 + $0x1e8] sm:$0xff] }
  0xad   :  { %1117 = vmatmul.mubr.f32.gmra.mrb[18].mxu0 %v7923_v15  ;;  %5615 = vmatprep.subr.bf16.mxu1 %v8136_v57 }
  0xae   :  { %1230 = vmatmul.mubr.f32.gmra.mrb[18].mxu1 %v7923_v15  ;;  %5585 = vmatpush1.bf16.msra.mxu0 %v8140_v59  ;;  %v1434_v15 = vld [vmem:[#allocation5 + $0xd0] sm:$0xff] }
  0xaf   :  { %5617 = vmatpush1.bf16.msra.mxu1 %v8144_v62  ;;  %1122 = vmatprep.mubr.f32.mxu0 %v9437_v0  ;;  %v8176_v26 = vpack.c.bf16 %v1438_v18, %v1434_v15  ;;  %v8228_v15 = vpack.c.bf16 %v1469_v6, %v1465_v2  ;;  %v1470_v18 = vld [vmem:[#allocation5 + $0x1f0] sm:$0xff]  ;;  %v1639_v2 = vld [vmem:[#allocation7 + $0xa8] sm:$0xff]  ;;  %v1637_v6 = vld [vmem:[#allocation7 + $0x98] sm:$0xff] }
  0xb0   :  { %1235 = vmatprep.mubr.f32.mxu1 %v9437_v0  ;;  %5587 = vmatprep.subr.bf16.mxu0 %v8148_v4 }
  0xb1   :  { %1123 = vmatmul.mubr.f32.gmra.mrb[20].mxu0 %v7956_v28  ;;  %5619 = vmatprep.subr.bf16.mxu1 %v8152_v14 }
  0xb2   :  { %1236 = vmatmul.mubr.f32.gmra.mrb[20].mxu1 %v7956_v28  ;;  %5589 = vmatpush1.bf16.msra.mxu0 %v8156_v9  ;;  %v1442_v28 = vld [vmem:[#allocation5 + $0x110] sm:$0xff] }
  0xb3   :  { %5621 = vmatpush1.bf16.msra.mxu1 %v8160_v12  ;;  %1128 = vmatprep.mubr.f32.mxu0 %v9437_v0  ;;  %v8192_v39 = vpack.c.bf16 %v1446_v31, %v1442_v28  ;;  %v1618_v31 = vld [vmem:[#allocation7] sm:$0xff] }
  0xb4   :  { %1241 = vmatprep.mubr.f32.mxu1 %v9437_v0  ;;  %5591 = vmatprep.subr.bf16.mxu0 %v8164_v17  ;;  %v8252_v48 = vpack.c.bf16 %v1622_v35, %v1618_v31  ;;  %v1647_v31 = vld [vmem:[#allocation7 + $0xe8] sm:$0xff]  ;;  %v1645_v35 = vld [vmem:[#allocation7 + $0xd8] sm:$0xff] }
  0xb5   :  { %1129 = vmatmul.mubr.f32.gmra.mrb[22].mxu0 %v7989_v41  ;;  %5623 = vmatprep.subr.bf16.mxu1 %v8168_v20  ;;  %v8288_v42 = vpack.c.bf16 %v1647_v31, %v1643_v29  ;;  %v8291_v58 = vpack.c.bf16 %v1649_v34, %v1645_v35  ;;  %v1652_v29 = vld [vmem:[#allocation7 + $0x110] sm:$0xff]  ;;  %v1659_v34 = vld [vmem:[#allocation7 + $0x148] sm:$0xff] }
  0xb6   :  { %1242 = vmatmul.mubr.f32.gmra.mrb[22].mxu1 %v7989_v41  ;;  %5593 = vmatpush1.bf16.msra.mxu0 %v8172_v23  ;;  %v1450_v41 = vld [vmem:[#allocation5 + $0x150] sm:$0xff] }
  0xb7   :  { %5625 = vmatpush1.bf16.msra.mxu1 %v8176_v26  ;;  %1134 = vmatprep.mubr.f32.mxu0 %v9437_v0  ;;  %v8208_v63 = vpack.c.bf16 %v1454_v49, %v1450_v41  ;;  %v1629_v41 = vld [vmem:[#allocation7 + $0x58] sm:$0xff]  ;;  %9527 = vst [vmem:[#allocation12_spill] sm:$0xff] %v8288_v42  ;;  %9528 = vst [vmem:[#allocation13_spill] sm:$0xff] %v8291_v58  ;;  %v1656_v35 = vld [vmem:[#allocation7 + $0x130] sm:$0xff] }
  0xb8   :  { %1247 = vmatprep.mubr.f32.mxu1 %v9437_v0  ;;  %5595 = vmatprep.subr.bf16.mxu0 %v8180_v30  ;;  %v1633_v49 = vld [vmem:[#allocation7 + $0x78] sm:$0xff] }
  0xb9   :  { %1135 = vmatmul.mubr.f32.gmra.mrb[24].mxu0 %v8022_v54  ;;  %5627 = vmatprep.subr.bf16.mxu1 %v8184_v32 }
  0xba   :  { %1248 = vmatmul.mubr.f32.gmra.mrb[24].mxu1 %v8022_v54  ;;  %5597 = vmatpush1.bf16.msra.mxu0 %v8188_v36  ;;  %v1458_v54 = vld [vmem:[#allocation5 + $0x190] sm:$0xff] }
  0xbb   :  { %5629 = vmatpush1.bf16.msra.mxu1 %v8192_v39  ;;  %1140 = vmatprep.mubr.f32.mxu0 %v9437_v0  ;;  %v8224_v11 = vpack.c.bf16 %v1462_v1, %v1458_v54  ;;  %v1632_v54 = vld [vmem:[#allocation7 + $0x70] sm:$0xff]  ;;  %v1635_v1 = vld [vmem:[#allocation7 + $0x88] sm:$0xff] }
  0xbc   :  { %1253 = vmatprep.mubr.f32.mxu1 %v9437_v0  ;;  %5599 = vmatprep.subr.bf16.mxu0 %v8196_v45  ;;  %v8272_v13 = vpack.c.bf16 %v1632_v54, %v1628_v60  ;;  %v8274_v16 = vpack.c.bf16 %v1639_v2, %v1635_v1  ;;  %v1648_v60 = vld [vmem:[#allocation7 + $0xf0] sm:$0xff]  ;;  %v1651_v54 = vld [vmem:[#allocation7 + $0x108] sm:$0xff]  ;;  %v1653_v2 = vld [vmem:[#allocation7 + $0x118] sm:$0xff] }
  0xbd   :  { %1141 = vmatmul.mubr.f32.gmra.mrb[26].mxu0 %v8055_v5  ;;  %5631 = vmatprep.subr.bf16.mxu1 %v8200_v47  ;;  %v1655_v1 = vld [vmem:[#allocation7 + $0x128] sm:$0xff] }
  0xbe   :  { %1254 = vmatmul.mubr.f32.gmra.mrb[26].mxu1 %v8055_v5  ;;  %5601 = vmatpush1.bf16.msra.mxu0 %v8204_v52  ;;  %v1466_v5 = vld [vmem:[#allocation5 + $0x1d0] sm:$0xff] }
  0xbf   :  { %5633 = vmatpush1.bf16.msra.mxu1 %v8208_v63  ;;  %1146 = vmatprep.mubr.f32.mxu0 %v9437_v0  ;;  %v8240_v28 = vpack.c.bf16 %v1470_v18, %v1466_v5  ;;  %v1634_v5 = vld [vmem:[#allocation7 + $0x80] sm:$0xff] }
  0xc0   :  { %1259 = vmatprep.mubr.f32.mxu1 %v9437_v0  ;;  %5603 = vmatprep.subr.bf16.mxu0 %v8212_v61  ;;  %v1638_v18 = vld [vmem:[#allocation7 + $0xa0] sm:$0xff] }
  0xc1   :  { %1147 = vmatmul.mubr.f32.gmra.mrb[28].mxu0 %v8088_v19  ;;  %5635 = vmatprep.subr.bf16.mxu1 %v8216_v3  ;;  %v8282_v37 = vpack.c.bf16 %v1638_v18, %v1634_v5  ;;  %v8298_v5 = vpack.c.bf16 %v1648_v60, %v1644_v56  ;;  %v8300_v18 = vpack.c.bf16 %v1655_v1, %v1651_v54  ;;  %v1658_v54 = vld [vmem:[#allocation7 + $0x140] sm:$0xff] }
  0xc2   :  { %1260 = vmatmul.mubr.f32.gmra.mrb[28].mxu1 %v8088_v19  ;;  %5605 = vmatpush1.bf16.msra.mxu0 %v8220_v7  ;;  %v8244_v19 = vpack.c.bf16 %v1623_v24, %v1619_v22  ;;  %v1636_v22 = vld [vmem:[#allocation7 + $0x90] sm:$0xff]  ;;  %v8277_v24 = vpack.c.bf16 %v1641_v8, %v1637_v6  ;;  %v1657_v6 = vld [vmem:[#allocation7 + $0x138] sm:$0xff]  ;;  %v8310_v56 = vpack.c.bf16 %v1656_v35, %v1652_v29  ;;  %v1662_v1 = vld [vmem:[#allocation7 + $0x160] sm:$0xff] }
  0xc3   :  { %5637 = vmatpush1.bf16.msra.mxu1 %v8224_v11  ;;  %1152 = vmatprep.mubr.f32.mxu0 %v9437_v0  ;;  %v8286_v38 = vpack.c.bf16 %v1640_v27, %v1636_v22  ;;  %9530 = vst [vmem:[#allocation15_spill] sm:$0xff] %v8298_v5  ;;  %9531 = vst [vmem:[#allocation16_spill] sm:$0xff] %v8300_v18  ;;  %v1650_v22 = vld [vmem:[#allocation7 + $0x100] sm:$0xff]  ;;  %v8303_v31 = vpack.c.bf16 %v1657_v6, %v1653_v2  ;;  %v1660_v2 = vld [vmem:[#allocation7 + $0x150] sm:$0xff] }
  0xc4   :  { %1265 = vmatprep.mubr.f32.mxu1 %v9437_v0  ;;  %5607 = vmatprep.subr.bf16.mxu0 %v8228_v15  ;;  %v1654_v27 = vld [vmem:[#allocation7 + $0x120] sm:$0xff]  ;;  %9534 = vst [vmem:[#allocation19_spill] sm:$0xff] %v8310_v56 }
  0xc5   :  { %1153 = vmatmul.mubr.f32.gmra.mrb[30].mxu0 %v8115_v33  ;;  %5639 = vmatprep.subr.bf16.mxu1 %v8232_v21  ;;  %9526 = vst [vmem:[#allocation11_spill] sm:$0xff] %v8286_v38  ;;  %9532 = vst [vmem:[#allocation17_spill] sm:$0xff] %v8303_v31  ;;  %v1666_v35 = vld [vmem:[#allocation7 + $0x180] sm:$0xff] }
  0xc6   :  { %1266 = vmatmul.mubr.f32.gmra.mrb[30].mxu1 %v8115_v33  ;;  %5609 = vmatpush1.bf16.msra.mxu0 %v8236_v25  ;;  %v8262_v33 = vpack.c.bf16 %v1633_v49, %v1629_v41  ;;  %v1642_v41 = vld [vmem:[#allocation7 + $0xc0] sm:$0xff] }
  0xc7   :  { %5641 = vmatpush1.bf16.msra.mxu1 %v8240_v28  ;;  %1536 = vmatprep.mubr.f32.mxu0 %v9437_v0  ;;  %v1646_v49 = vld [vmem:[#allocation7 + $0xe0] sm:$0xff] }
  0xc8   :  { %1607 = vmatprep.mubr.f32.mxu1 %v9437_v0  ;;  %5643 = vmatprep.subr.bf16.mxu0 %v8244_v19  ;;  %v8294_v8 = vpack.c.bf16 %v1646_v49, %v1642_v41  ;;  %v1661_v41 = vld [vmem:[#allocation7 + $0x158] sm:$0xff] }
  0xc9   :  { %1537 = vmatmul.mubr.f32.vlgmr.msra.gmra.mrb[0].mxu0 %v9437_v0  ;;  %5675 = vmatprep.subr.bf16.mxu1 %v8248_v43  ;;  %v1665_v49 = vld [vmem:[#allocation7 + $0x178] sm:$0xff] }
  0xca   :  { %1608 = vmatmul.mubr.f32.vlgmr.msra.gmra.mrb[0].mxu1 %v9437_v0  ;;  %5645 = vmatpush1.bf16.msra.mxu0 %v8252_v48  ;;  %9529 = vst [vmem:[#allocation14_spill] sm:$0xff] %v8294_v8  ;;  %v8315_v6 = vpack.c.bf16 %v1665_v49, %v1661_v41  ;;  %v1668_v41 = vld [vmem:[#allocation7 + $0x190] sm:$0xff] }
  0xcb   :  { %5677 = vmatpush1.bf16.msra.mxu1 %v8256_v51  ;;  %5647 = vmatprep.subr.bf16.mxu0 %v8258_v55 }
  0xcc   :  { %5679 = vmatprep.subr.bf16.mxu1 %v8262_v33  ;;  %1746 = vmatprep.mubr.f32.mxu0 %v9437_v0  ;;  %9535 = vst [vmem:[#allocation20_spill] sm:$0xff] %v8315_v6 }
  0xcd   :  { %1817 = vmatprep.mubr.f32.mxu1 %v9437_v0  ;;  %v1663_v0 = vld [vmem:[#allocation7 + $0x168] sm:$0xff] }
  0xce   :  { %5649 = vmatpush1.bf16.msra.mxu0 %v8268_v10  ;;  %v8312_v60 = vpack.c.bf16 %v1663_v0, %v1659_v34  ;;  %v1670_v34 = vld [vmem:[#allocation7 + $0x1a0] sm:$0xff] }
  0xcf   :  { %5681 = vmatpush1.bf16.msra.mxu1 %v8272_v13  ;;  %5651 = vmatprep.subr.bf16.mxu0 %v8274_v16 }
  0xd0   :  { %5683 = vmatprep.subr.bf16.mxu1 %v8277_v24 }
  0xd2   :  { %5653 = vmatpush1.bf16.msra.mxu0 %v8282_v37 }
  0xd3   :  { %5685 = vmatpush1.bf16.msra.mxu1 %v8286_v38  ;;  %5655 = vmatprep.subr.bf16.mxu0 %v8288_v42  ;;  %v8306_v38 = vpack.c.bf16 %v1654_v27, %v1650_v22  ;;  %v1667_v42 = vld [vmem:[#allocation7 + $0x188] sm:$0xff]  ;;  %v1669_v22 = vld [vmem:[#allocation7 + $0x198] sm:$0xff] }
  0xd4   :  { %5687 = vmatprep.subr.bf16.mxu1 %v8291_v58  ;;  %v1664_v58 = vld [vmem:[#allocation7 + $0x170] sm:$0xff]  ;;  %v1673_v27 = vld [vmem:[#allocation7 + $0x1b8] sm:$0xff] }
  0xd5   :  { %9533 = vst [vmem:[#allocation18_spill] sm:$0xff] %v8306_v38  ;;  %v8322_v0 = vpack.c.bf16 %v1664_v58, %v1660_v2  ;;  %v8327_v49 = vpack.c.bf16 %v1673_v27, %v1669_v22  ;;  %v1678_v2 = vld [vmem:[#allocation7 + $0x1e0] sm:$0xff]  ;;  %v1676_v27 = vld [vmem:[#allocation7 + $0x1d0] sm:$0xff] }
  0xd6   :  { %5657 = vmatpush1.bf16.msra.mxu0 %v8294_v8  ;;  %v1671_v8 = vld [vmem:[#allocation7 + $0x1a8] sm:$0xff] }
  0xd7   :  { %5689 = vmatpush1.bf16.msra.mxu1 %v8298_v5  ;;  %5659 = vmatprep.subr.bf16.mxu0 %v8300_v18  ;;  %v8318_v5 = vpack.c.bf16 %v1662_v1, %v1658_v54  ;;  %v8324_v29 = vpack.c.bf16 %v1671_v8, %v1667_v42  ;;  %v1675_v18 = vld [vmem:[#allocation7 + $0x1c8] sm:$0xff]  ;;  %v1677_v54 = vld [vmem:[#allocation7 + $0x1d8] sm:$0xff]  ;;  %v1674_v8 = vld [vmem:[#allocation7 + $0x1c0] sm:$0xff] }
  0xd8   :  { %5691 = vmatprep.subr.bf16.mxu1 %v8303_v31  ;;  %v1672_v31 = vld [vmem:[#allocation7 + $0x1b0] sm:$0xff]  ;;  %v1681_v1 = vld [vmem:[#allocation7 + $0x1f8] sm:$0xff] }
  0xd9   :  { %v8334_v42 = vpack.c.bf16 %v1672_v31, %v1668_v41  ;;  %v8339_v22 = vpack.c.bf16 %v1681_v1, %v1677_v54 }
  0xda   :  { %5661 = vmatpush1.bf16.msra.mxu0 %v8306_v38  ;;  %v1679_v38 = vld [vmem:[#allocation7 + $0x1e8] sm:$0xff] }
  0xdb   :  { %5693 = vmatpush1.bf16.msra.mxu1 %v8310_v56  ;;  %5663 = vmatprep.subr.bf16.mxu0 %v8312_v60  ;;  %v8330_v56 = vpack.c.bf16 %v1670_v34, %v1666_v35  ;;  %v8336_v58 = vpack.c.bf16 %v1679_v38, %v1675_v18  ;;  %v8342_v35 = vpack.c.bf16 %v1678_v2, %v1674_v8  ;;  %v9536_v38 = vmov 0.0  }
  0xdc   :  { %5695 = vmatprep.subr.bf16.mxu1 %v8315_v6  ;;  %v1680_v6 = vld [vmem:[#allocation7 + $0x1f0] sm:$0xff] }
  0xdd   :  { %v8346_v31 = vpack.c.bf16 %v1680_v6, %v1676_v27 }
  0xde   :  { %5665 = vmatpush1.bf16.msra.mxu0 %v8318_v5 }
  0xdf   :  { %5697 = vmatpush1.bf16.msra.mxu1 %v8322_v0  ;;  %5667 = vmatprep.subr.bf16.mxu0 %v8324_v29 }
  0xe0   :  { %5699 = vmatprep.subr.bf16.mxu1 %v8327_v49 }
  0xe2   :  { %5669 = vmatpush1.bf16.msra.mxu0 %v8330_v56 }
  0xe3   :  { %5701 = vmatpush1.bf16.msra.mxu1 %v8334_v42  ;;  %5671 = vmatprep.subr.bf16.mxu0 %v8336_v58 }
  0xe4   :  { %5703 = vmatprep.subr.bf16.mxu1 %v8339_v22 }
  0xe6   :  { %5673 = vmatpush1.bf16.msra.mxu0 %v8342_v35 }
  0xe7   :  { %5705 = vmatpush1.bf16.msra.mxu1 %v8346_v31  ;;  %5707 = vmatprep.subr.bf16.mxu0 %v8119_v40  ;;  %v192_v40 = vlaneseq }
  0xe8   :  { %5739 = vmatprep.subr.bf16.mxu1 %v8122_v44 }
  0xe9   :  { %1747 = vmatmul.mubr.f32.vlgmr.msra.gmra.mrb[30].mxu0 %v9536_v38  ;;  %v193_v44 = vshrl.u32 %v192_v40, 7 }
  0xea   :  { %1818 = vmatmul.mubr.f32.vlgmr.msra.gmra.mrb[30].mxu1 %v9536_v38  ;;  %5709 = vmatpush1.bf16.msra.mxu0 %v8125_v46 }
  0xeb   :  { %5741 = vmatpush1.bf16.msra.mxu1 %v8128_v50  ;;  %5711 = vmatprep.subr.bf16.mxu0 %v8132_v53  ;;  %v194_v46 = vsub.s32 0, %v193_v44  ;;  %v190_v50 = vld [vmem:[%s9433_s5] sm:$0xff]  ;;  %v198_v53 = vsub.s32 1, %v193_v44  ;;  %v222_v1 = vsub.s32 7, %v193_v44 }
  0xec   :  { %5743 = vmatprep.subr.bf16.mxu1 %v8136_v57  ;;  %2014 = vmatprep.mubr.f32.mxu0 %v9536_v38 }
  0xed   :  { %2085 = vmatprep.mubr.f32.mxu1 %v9536_v38  ;;  %v8392_v57 = vrot.slane %v190_v50, %v194_v46 }
  0xee   :  { %5713 = vmatpush1.bf16.msra.mxu0 %v8140_v59  ;;  %v8394_v59 = vrot.slane %v190_v50, %v198_v53 }
  0xef   :  { %5745 = vmatpush1.bf16.msra.mxu1 %v8144_v62  ;;  %5715 = vmatprep.subr.bf16.mxu0 %v8148_v4  ;;  %9537 = vst [vmem:[#allocation21_spill] sm:$0xff] %v8392_v57  ;;  %v206_v4 = vsub.s32 3, %v193_v44 }
  0xf0   :  { %5747 = vmatprep.subr.bf16.mxu1 %v8152_v14  ;;  %9538 = vst [vmem:[#allocation22_spill] sm:$0xff] %v8394_v59 }
  0xf2   :  { %5717 = vmatpush1.bf16.msra.mxu0 %v8156_v9 }
  0xf3   :  { %5749 = vmatpush1.bf16.msra.mxu1 %v8160_v12  ;;  %5719 = vmatprep.subr.bf16.mxu0 %v8164_v17 }
  0xf4   :  { %5751 = vmatprep.subr.bf16.mxu1 %v8168_v20 }
  0xf6   :  { %5721 = vmatpush1.bf16.msra.mxu0 %v8172_v23 }
  0xf7   :  { %5753 = vmatpush1.bf16.msra.mxu1 %v8176_v26  ;;  %5723 = vmatprep.subr.bf16.mxu0 %v8180_v30  ;;  %v8398_v30 = vrot.slane %v190_v50, %v206_v4  ;;  %v8413_v4 = vrot.slane %v190_v50, %v222_v1  ;;  %v2375_v1 = vld [vmem:[#allocation5 + $0x58] sm:$0xff] }
  0xf8   :  { %5755 = vmatprep.subr.bf16.mxu1 %v8184_v32  ;;  %v202_v32 = vsub.s32 2, %v193_v44 }
  0xf9   :  { %9539 = vst [vmem:[#allocation23_spill] sm:$0xff] %v8398_v30  ;;  %9543 = vst [vmem:[#allocation27_spill] sm:$0xff] %v8413_v4 }
  0xfa   :  { %5725 = vmatpush1.bf16.msra.mxu0 %v8188_v36 }
  0xfb   :  { %5757 = vmatpush1.bf16.msra.mxu1 %v8192_v39  ;;  %5727 = vmatprep.subr.bf16.mxu0 %v8196_v45  ;;  %v8401_v39 = vrot.slane %v190_v50, %v202_v32 }
  0xfc   :  { %5759 = vmatprep.subr.bf16.mxu1 %v8200_v47 }
  0xfd   :  { %9540 = vst [vmem:[#allocation24_spill] sm:$0xff] %v8401_v39 }
  0xfe   :  { %5729 = vmatpush1.bf16.msra.mxu0 %v8204_v52 }
  0xff   :  { %5761 = vmatpush1.bf16.msra.mxu1 %v8208_v63  ;;  %5731 = vmatprep.subr.bf16.mxu0 %v8212_v61 }
 0x100   :  { %5763 = vmatprep.subr.bf16.mxu1 %v8216_v3 }
 0x102   :  { %5733 = vmatpush1.bf16.msra.mxu0 %v8220_v7  ;;  %v210_v7 = vsub.s32 4, %v193_v44 }
 0x103   :  { %5765 = vmatpush1.bf16.msra.mxu1 %v8224_v11  ;;  %5735 = vmatprep.subr.bf16.mxu0 %v8228_v15  ;;  %v214_v15 = vsub.s32 5, %v193_v44 }
 0x104   :  { %5767 = vmatprep.subr.bf16.mxu1 %v8232_v21  ;;  %v8404_v18 = vrot.slane %v190_v50, %v210_v7 }
 0x105   :  { %v8406_v34 = vrot.slane %v190_v50, %v214_v15  ;;  %v9553_v15 = vld [vmem:[#allocation19_spill] sm:$0xff] }
 0x106   :  { %5737 = vmatpush1.bf16.msra.mxu0 %v8236_v25  ;;  %9541 = vst [vmem:[#allocation25_spill] sm:$0xff] %v8404_v18 }
 0x107   :  { %5769 = vmatpush1.bf16.msra.mxu1 %v8240_v28  ;;  %5771 = vmatprep.subr.bf16.mxu0 %v8244_v19  ;;  %9542 = vst [vmem:[#allocation26_spill] sm:$0xff] %v8406_v34 }
 0x108   :  { %5803 = vmatprep.subr.bf16.mxu1 %v8248_v43 }
 0x19c   :  { %v1538_v62 = vpop.f32.mrb[0].mxu0 }
 0x19d   :  { %v6602_v14 = vadd.f32 %v1538_v62, %v8392_v57  ;;  %v1609_v9 = vpop.f32.mrb[0].mxu1  ;;  %v1540_v12 = vpop.f32.mrb[1].mxu0 }
 0x19e   :  { %v6603_v17 = vadd.f32 %v1540_v12, %v8394_v59  ;;  %v1611_v20 = vpop.f32.mrb[1].mxu1  ;;  %v6618_v47 = vadd.f32 %v1609_v9, %v8401_v39 }
 0x19f   :  { %v5274_v23 = vmul.f32 -1.442695, %v6602_v14  ;;  %v6619_v36 = vadd.f32 %v1611_v20, %v8398_v30  ;;  %v218_v14 = vsub.s32 6, %v193_v44 }
 0x1a0   :  { %v5275_v26 = vmul.f32 -1.442695, %v6603_v17 }
 0x1a1   :  { %6799 = vpow2.f32 %v5274_v23  ;;  %v5276_v45 = vmul.f32 -1.442695, %v6619_v36  ;;  %v8416_v12 = vrot.slane %v190_v50, %v218_v14  ;;  %v2378_v14 = vld [vmem:[#allocation5 + $0x70] sm:$0xff] }
 0x1a2   :  { %6801 = vpow2.f32 %v5275_v26 }
 0x1a3   :  { %6803 = vpow2.f32 %v5276_v45 }
 0x1a4   :  { %6805 = vtanh.f32 %v6618_v47 }
 0x1ab   :  { %v6800_v52 = vpop.eup %6799 }
 0x1ac   :  { %v6802_v63 = vpop.eup %6801  ;;  %v1831_v61 = vadd.f32 1.0, %v6800_v52 }
 0x1ad   :  { %v1837_v3 = vadd.f32 1.0, %v6802_v63  ;;  %v6804_v11 = vpop.eup %6803  ;;  %v9548_v63 = vld [vmem:[#allocation14_spill] sm:$0xff] }
 0x1ae   :  { %6807 = vrcp.f32 %v1831_v61  ;;  %v6806_v21 = vpop.eup %6805  ;;  %v1844_v43 = vadd.f32 1.0, %v6804_v11  ;;  %v9552_v11 = vld [vmem:[#allocation18_spill] sm:$0xff] }
 0x1af   :  { %6809 = vrcp.f32 %v1837_v3  ;;  %v9550_v3 = vld [vmem:[#allocation16_spill] sm:$0xff] }
 0x1b0   :  { %6811 = vrcp.f32 %v1844_v43 }
 0x1b8   :  { %v6808_v25 = vpop.eup %6807 }
 0x1b9   :  { %v6810_v28 = vpop.eup %6809  ;;  %v1848_v19 = vmul.f32 %v6808_v25, %v6806_v21  ;;  %v9554_v21 = vld [vmem:[#allocation20_spill] sm:$0xff] }
 0x1ba   :  { %v1847_v6 = vmul.f32 0.0, %v6810_v28  ;;  %v6812_v17 = vpop.eup %6811  ;;  %v2366_v28 = vld [vmem:[#allocation5 + $0x10] sm:$0xff] }
 0x1bc   :  { %v8408_v41 = vadd.f32 %v1848_v19, %v1847_v6  ;;  %v1748_v54 = vpop.f32.mrb[30].mxu0  ;;  %v2370_v19 = vld [vmem:[#allocation5 + $0x30] sm:$0xff]  ;;  %v2373_v6 = vld [vmem:[#allocation5 + $0x48] sm:$0xff] }
 0x1bd   :  { %v6648_v8 = vadd.f32 %v1748_v54, %v8404_v18  ;;  %v1819_v2 = vpop.f32.mrb[30].mxu1  ;;  %v1750_v27 = vpop.f32.mrb[31].mxu0  ;;  %v8471_v43 = vpack.c.bf16 %v2370_v19, %v2366_v28  ;;  %v2377_v54 = vld [vmem:[#allocation5 + $0x68] sm:$0xff]  ;;  %v2398_v28 = vld [vmem:[#allocation5 + $0x110] sm:$0xff] }
 0x1be   :  { %6813 = vtanh.f32 %v8408_v41  ;;  %v6649_v40 = vadd.f32 %v1750_v27, %v8406_v34  ;;  %v1821_v46 = vpop.f32.mrb[31].mxu1  ;;  %v6664_v26 = vadd.f32 %v1819_v2, %v8416_v12  ;;  %v2379_v2 = vld [vmem:[#allocation5 + $0x78] sm:$0xff]  ;;  %v2372_v27 = vld [vmem:[#allocation5 + $0x40] sm:$0xff]  ;;  %v2402_v19 = vld [vmem:[#allocation5 + $0x130] sm:$0xff] }
 0x1bf   :  { %v5277_v53 = vmul.f32 -1.442695, %v6648_v8  ;;  %v6665_v9 = vadd.f32 %v1821_v46, %v8413_v4  ;;  %v8476_v8 = vpack.c.bf16 %v2377_v54, %v2373_v6  ;;  %v8478_v46 = vpack.c.bf16 %v2379_v2, %v2375_v1  ;;  %v2405_v54 = vld [vmem:[#allocation5 + $0x148] sm:$0xff]  ;;  %v2407_v2 = vld [vmem:[#allocation5 + $0x158] sm:$0xff] }
 0x1c0   :  { %v5278_v62 = vmul.f32 -1.442695, %v6649_v40  ;;  %v2376_v40 = vld [vmem:[#allocation5 + $0x60] sm:$0xff]  ;;  %v8519_v6 = vpack.c.bf16 %v2402_v19, %v2398_v28  ;;  %v2409_v1 = vld [vmem:[#allocation5 + $0x168] sm:$0xff] }
 0x1c1   :  { %6815 = vpow2.f32 %v5277_v53  ;;  %v5279_v23 = vmul.f32 -1.442695, %v6665_v9  ;;  %v8480_v53 = vpack.c.bf16 %v2376_v40, %v2372_v27  ;;  %v8524_v27 = vpack.c.bf16 %v2409_v1, %v2405_v54  ;;  %v2411_v40 = vld [vmem:[#allocation5 + $0x178] sm:$0xff]  ;;  %v2420_v28 = vld [vmem:[#allocation5 + $0x1c0] sm:$0xff] }
 0x1c2   :  { %6817 = vpow2.f32 %v5278_v62  ;;  %v2374_v62 = vld [vmem:[#allocation5 + $0x50] sm:$0xff]  ;;  %v2424_v19 = vld [vmem:[#allocation5 + $0x1e0] sm:$0xff] }
 0x1c3   :  { %6819 = vpow2.f32 %v5279_v23  ;;  %v8483_v9 = vpack.c.bf16 %v2378_v14, %v2374_v62  ;;  %v2383_v23 = vld [vmem:[#allocation5 + $0x98] sm:$0xff]  ;;  %v2404_v62 = vld [vmem:[#allocation5 + $0x140] sm:$0xff]  ;;  %v8552_v1 = vpack.c.bf16 %v2424_v19, %v2420_v28 }
 0x1c4   :  { %6821 = vtanh.f32 %v6664_v26  ;;  %v2408_v14 = vld [vmem:[#allocation5 + $0x160] sm:$0xff] }
 0x1c8   :  { %v6814_v20 = vpop.eup %6813 }
 0x1c9   :  { %v8419_v32 = vmul.f32 %v6814_v20, %v6812_v17  ;;  %v2381_v17 = vld [vmem:[#allocation5 + $0x88] sm:$0xff] }
 0x1ca   :  { %v2385_v20 = vld [vmem:[#allocation5 + $0xa8] sm:$0xff] }
 0x1cb   :  { %9544 = vst [vmem:[#allocation28_spill] sm:$0xff] %v8419_v32  ;;  %v6816_v36 = vpop.eup %6815  ;;  %2015 = vmatmul.mubr.f32.vlgmr.msra.gmra.mrb[2].mxu0 %v8419_v32  ;;  %2086 = vmatmul.mubr.f32.vlgmr.msra.gmra.mrb[2].mxu1 %v8419_v32  ;;  %v8488_v26 = vpack.c.bf16 %v2385_v20, %v2381_v17  ;;  %v8526_v17 = vpack.c.bf16 %v2411_v40, %v2407_v2  ;;  %v2422_v2 = vld [vmem:[#allocation5 + $0x1d0] sm:$0xff] }
 0x1cc   :  { %v6818_v45 = vpop.eup %6817  ;;  %v1855_v47 = vadd.f32 1.0, %v6816_v36  ;;  %5773 = vmatpush1.bf16.msra.mxu0 %v8252_v48  ;;  %5805 = vmatpush1.bf16.msra.mxu1 %v8256_v51  ;;  %v9545_v48 = vld [vmem:[#allocation11_spill] sm:$0xff]  ;;  %v9546_v51 = vld [vmem:[#allocation12_spill] sm:$0xff]  ;;  %v2387_v36 = vld [vmem:[#allocation5 + $0xb8] sm:$0xff]  ;;  %v8528_v20 = vpack.c.bf16 %v2408_v14, %v2404_v62 }
 0x1cd   :  { %v1861_v44 = vadd.f32 1.0, %v6818_v45  ;;  %5775 = vmatprep.subr.bf16.mxu0 %v8258_v55  ;;  %5807 = vmatprep.subr.bf16.mxu1 %v8262_v33  ;;  %v9547_v55 = vld [vmem:[#allocation13_spill] sm:$0xff]  ;;  %v6820_v33 = vpop.eup %6819  ;;  %v2380_v45 = vld [vmem:[#allocation5 + $0x80] sm:$0xff]  ;;  %v2575_v14 = vld [vmem:[#allocation7 + $0x8] sm:$0xff] }
 0x1ce   :  { %6823 = vrcp.f32 %v1855_v47  ;;  %2224 = vmatprep.mubr.f32.mxu0 %v9536_v38  ;;  %2295 = vmatprep.mubr.f32.mxu1 %v9536_v38  ;;  %v6822_v50 = vpop.eup %6821  ;;  %v2384_v47 = vld [vmem:[#allocation5 + $0xa0] sm:$0xff]  ;;  %v2426_v40 = vld [vmem:[#allocation5 + $0x1f0] sm:$0xff] }
 0x1cf   :  { %6825 = vrcp.f32 %v1861_v44  ;;  %v8490_v44 = vpack.c.bf16 %v2387_v36, %v2383_v23  ;;  %v2406_v23 = vld [vmem:[#allocation5 + $0x150] sm:$0xff]  ;;  %v8555_v62 = vpack.c.bf16 %v2426_v40, %v2422_v2 }
 0x1d0   :  { %5777 = vmatpush1.bf16.msra.mxu0 %v8268_v10  ;;  %5809 = vmatpush1.bf16.msra.mxu1 %v8272_v13  ;;  %v9549_v10 = vld [vmem:[#allocation15_spill] sm:$0xff]  ;;  %v2410_v36 = vld [vmem:[#allocation5 + $0x170] sm:$0xff] }
 0x1d1   :  { %5779 = vmatprep.subr.bf16.mxu0 %v8274_v16  ;;  %5811 = vmatprep.subr.bf16.mxu1 %v8277_v24  ;;  %v1868_v16 = vadd.f32 1.0, %v6820_v33  ;;  %v9551_v24 = vld [vmem:[#allocation17_spill] sm:$0xff] }
 0x1d3   :  { %6827 = vrcp.f32 %v1868_v16  ;;  %v2392_v16 = vld [vmem:[#allocation5 + $0xe0] sm:$0xff] }
 0x1d4   :  { %5781 = vmatpush1.bf16.msra.mxu0 %v8282_v37  ;;  %5813 = vmatpush1.bf16.msra.mxu1 %v9545_v48  ;;  %v8492_v48 = vpack.c.bf16 %v2384_v47, %v2380_v45  ;;  %v8531_v45 = vpack.c.bf16 %v2410_v36, %v2406_v23  ;;  %v2413_v47 = vld [vmem:[#allocation5 + $0x188] sm:$0xff]  ;;  %v2577_v36 = vld [vmem:[#allocation7 + $0x18] sm:$0xff] }
 0x1d5   :  { %5783 = vmatprep.subr.bf16.mxu0 %v9546_v51  ;;  %5815 = vmatprep.subr.bf16.mxu1 %v9547_v55  ;;  %v2382_v51 = vld [vmem:[#allocation5 + $0x90] sm:$0xff]  ;;  %v2579_v23 = vld [vmem:[#allocation7 + $0x28] sm:$0xff] }
 0x1d6   :  { %v2386_v55 = vld [vmem:[#allocation5 + $0xb0] sm:$0xff] }
 0x1d7   :  { %v8495_v33 = vpack.c.bf16 %v2386_v55, %v2382_v51  ;;  %v2417_v51 = vld [vmem:[#allocation5 + $0x1a8] sm:$0xff]  ;;  %v2415_v55 = vld [vmem:[#allocation5 + $0x198] sm:$0xff] }
 0x1d8   :  { %v6824_v52 = vpop.eup %6823  ;;  %5785 = vmatpush1.bf16.msra.mxu0 %v9548_v63  ;;  %5817 = vmatpush1.bf16.msra.mxu1 %v9549_v10  ;;  %v2391_v63 = vld [vmem:[#allocation5 + $0xd8] sm:$0xff] }
 0x1d9   :  { %v6826_v13 = vpop.eup %6825  ;;  %v1872_v61 = vmul.f32 %v6824_v52, %v6822_v50  ;;  %5787 = vmatprep.subr.bf16.mxu0 %v9550_v3  ;;  %5819 = vmatprep.subr.bf16.mxu1 %v9551_v24  ;;  %v2389_v50 = vld [vmem:[#allocation5 + $0xc8] sm:$0xff] }
 0x1da   :  { %v1871_v37 = vmul.f32 0.0, %v6826_v13  ;;  %v2393_v52 = vld [vmem:[#allocation5 + $0xe8] sm:$0xff]  ;;  %v2395_v13 = vld [vmem:[#allocation5 + $0xf8] sm:$0xff] }
 0x1db   :  { %v8500_v10 = vpack.c.bf16 %v2393_v52, %v2389_v50  ;;  %v8502_v3 = vpack.c.bf16 %v2395_v13, %v2391_v63  ;;  %v8536_v50 = vpack.c.bf16 %v2417_v51, %v2413_v47  ;;  %v2419_v52 = vld [vmem:[#allocation5 + $0x1b8] sm:$0xff]  ;;  %v2412_v63 = vld [vmem:[#allocation5 + $0x180] sm:$0xff]  ;;  %v8560_v47 = vpack.c.bf16 %v2579_v23, %v2575_v14 }
 0x1dc   :  { %v8441_v7 = vadd.f32 %v1872_v61, %v1871_v37  ;;  %5789 = vmatpush1.bf16.msra.mxu0 %v9552_v11  ;;  %5821 = vmatpush1.bf16.msra.mxu1 %v9553_v15  ;;  %v2388_v61 = vld [vmem:[#allocation5 + $0xc0] sm:$0xff]  ;;  %v2390_v37 = vld [vmem:[#allocation5 + $0xd0] sm:$0xff]  ;;  %v2581_v51 = vld [vmem:[#allocation7 + $0x38] sm:$0xff] }
 0x1dd   :  { %5791 = vmatprep.subr.bf16.mxu0 %v8312_v60  ;;  %5823 = vmatprep.subr.bf16.mxu1 %v9554_v21  ;;  %v6828_v60 = vpop.eup %6827  ;;  %v8504_v24 = vpack.c.bf16 %v2392_v16, %v2388_v61  ;;  %v2394_v11 = vld [vmem:[#allocation5 + $0xf0] sm:$0xff]  ;;  %v2397_v21 = vld [vmem:[#allocation5 + $0x108] sm:$0xff]  ;;  %v2416_v13 = vld [vmem:[#allocation5 + $0x1a0] sm:$0xff]  ;;  %v8538_v61 = vpack.c.bf16 %v2419_v52, %v2415_v55  ;;  %v8562_v55 = vpack.c.bf16 %v2581_v51, %v2577_v36 }
 0x1de   :  { %6829 = vtanh.f32 %v8441_v7  ;;  %v8507_v15 = vpack.c.bf16 %v2394_v11, %v2390_v37  ;;  %v8540_v16 = vpack.c.bf16 %v2416_v13, %v2412_v63  ;;  %v2414_v37 = vld [vmem:[#allocation5 + $0x190] sm:$0xff] }
 0x1df   :  { %v2418_v11 = vld [vmem:[#allocation5 + $0x1b0] sm:$0xff] }
 0x1e0   :  { %5793 = vmatpush1.bf16.msra.mxu0 %v8318_v5  ;;  %5825 = vmatpush1.bf16.msra.mxu1 %v8322_v0  ;;  %v2369_v0 = vld [vmem:[#allocation5 + $0x28] sm:$0xff] }
 0x1e1   :  { %5795 = vmatprep.subr.bf16.mxu0 %v8324_v29  ;;  %5827 = vmatprep.subr.bf16.mxu1 %v8327_v49  ;;  %v2367_v29 = vld [vmem:[#allocation5 + $0x18] sm:$0xff] }
 0x1e4   :  { %5797 = vmatpush1.bf16.msra.mxu0 %v8330_v56  ;;  %5829 = vmatpush1.bf16.msra.mxu1 %v8334_v42  ;;  %v2365_v56 = vld [vmem:[#allocation5 + $0x8] sm:$0xff]  ;;  %v2371_v42 = vld [vmem:[#allocation5 + $0x38] sm:$0xff] }
 0x1e5   :  { %5799 = vmatprep.subr.bf16.mxu0 %v8336_v58  ;;  %5831 = vmatprep.subr.bf16.mxu1 %v8339_v22  ;;  %v8464_v49 = vpack.c.bf16 %v2369_v0, %v2365_v56  ;;  %v2364_v58 = vld [vmem:[#allocation5] sm:$0xff]  ;;  %v2403_v0 = vld [vmem:[#allocation5 + $0x138] sm:$0xff] }
 0x1e6   :  { %v2368_v22 = vld [vmem:[#allocation5 + $0x20] sm:$0xff] }
 0x1e8   :  { %v6830_v25 = vpop.eup %6829  ;;  %5801 = vmatpush1.bf16.msra.mxu0 %v8342_v35  ;;  %5833 = vmatpush1.bf16.msra.mxu1 %v8346_v31  ;;  %v8466_v35 = vpack.c.bf16 %v2371_v42, %v2367_v29  ;;  %v8468_v31 = vpack.c.bf16 %v2368_v22, %v2364_v58  ;;  %v2396_v29 = vld [vmem:[#allocation5 + $0x100] sm:$0xff] }
 0x1e9   :  { %v8458_v5 = vmul.f32 %v6830_v25, %v6828_v60  ;;  %5835 = vmatprep.subr.bf16.mxu0 %v8464_v49  ;;  %v2401_v60 = vld [vmem:[#allocation5 + $0x128] sm:$0xff]  ;;  %v2399_v25 = vld [vmem:[#allocation5 + $0x118] sm:$0xff]  ;;  %v2400_v42 = vld [vmem:[#allocation5 + $0x120] sm:$0xff] }
 0x1ea   :  { %5867 = vmatprep.subr.bf16.mxu1 %v8466_v35  ;;  %v8512_v56 = vpack.c.bf16 %v2401_v60, %v2397_v21  ;;  %v8514_v58 = vpack.c.bf16 %v2403_v0, %v2399_v25  ;;  %v8516_v22 = vpack.c.bf16 %v2400_v42, %v2396_v29  ;;  %v8543_v21 = vpack.c.bf16 %v2418_v11, %v2414_v37  ;;  %v2421_v60 = vld [vmem:[#allocation5 + $0x1c8] sm:$0xff]  ;;  %v2423_v0 = vld [vmem:[#allocation5 + $0x1d8] sm:$0xff] }
 0x1eb   :  { %9555 = vst [vmem:[#allocation11_spill] sm:$0xff] %v8458_v5  ;;  %2225 = vmatmul.mubr.f32.vlgmr.msra.gmra.mrb[28].mxu0 %v8458_v5  ;;  %2296 = vmatmul.mubr.f32.vlgmr.msra.gmra.mrb[28].mxu1 %v8458_v5  ;;  %v2425_v25 = vld [vmem:[#allocation5 + $0x1e8] sm:$0xff]  ;;  %v2427_v42 = vld [vmem:[#allocation5 + $0x1f8] sm:$0xff] }
 0x1ec   :  { %2492 = vmatprep.mubr.f32.mxu0 %v9536_v38  ;;  %2563 = vmatprep.mubr.f32.mxu1 %v9536_v38  ;;  %v8548_v29 = vpack.c.bf16 %v2425_v25, %v2421_v60  ;;  %v8550_v54 = vpack.c.bf16 %v2427_v42, %v2423_v0 }
 0x1ed   :  { %5837 = vmatpush1.bf16.msra.mxu0 %v8468_v31  ;;  %5869 = vmatpush1.bf16.msra.mxu1 %v8471_v43 }
 0x1ee   :  { %5839 = vmatprep.subr.bf16.mxu0 %v8476_v8  ;;  %5871 = vmatprep.subr.bf16.mxu1 %v8478_v46 }
 0x1f1   :  { %5841 = vmatpush1.bf16.msra.mxu0 %v8480_v53  ;;  %5873 = vmatpush1.bf16.msra.mxu1 %v8483_v9 }
 0x1f2   :  { %5843 = vmatprep.subr.bf16.mxu0 %v8488_v26  ;;  %5875 = vmatprep.subr.bf16.mxu1 %v8490_v44 }
 0x1f5   :  { %5845 = vmatpush1.bf16.msra.mxu0 %v8492_v48  ;;  %5877 = vmatpush1.bf16.msra.mxu1 %v8495_v33 }
 0x1f6   :  { %5847 = vmatprep.subr.bf16.mxu0 %v8500_v10  ;;  %5879 = vmatprep.subr.bf16.mxu1 %v8502_v3 }
 0x1f9   :  { %5849 = vmatpush1.bf16.msra.mxu0 %v8504_v24  ;;  %5881 = vmatpush1.bf16.msra.mxu1 %v8507_v15 }
 0x1fa   :  { %5851 = vmatprep.subr.bf16.mxu0 %v8512_v56  ;;  %5883 = vmatprep.subr.bf16.mxu1 %v8514_v58 }
 0x1fd   :  { %5853 = vmatpush1.bf16.msra.mxu0 %v8516_v22  ;;  %5885 = vmatpush1.bf16.msra.mxu1 %v8519_v6 }
 0x1fe   :  { %5855 = vmatprep.subr.bf16.mxu0 %v8524_v27  ;;  %5887 = vmatprep.subr.bf16.mxu1 %v8526_v17 }
 0x201   :  { %5857 = vmatpush1.bf16.msra.mxu0 %v8528_v20  ;;  %5889 = vmatpush1.bf16.msra.mxu1 %v8531_v45 }
 0x202   :  { %5859 = vmatprep.subr.bf16.mxu0 %v8536_v50  ;;  %5891 = vmatprep.subr.bf16.mxu1 %v8538_v61 }
 0x205   :  { %5861 = vmatpush1.bf16.msra.mxu0 %v8540_v16  ;;  %5893 = vmatpush1.bf16.msra.mxu1 %v8543_v21 }
 0x206   :  { %5863 = vmatprep.subr.bf16.mxu0 %v8548_v29  ;;  %5895 = vmatprep.subr.bf16.mxu1 %v8550_v54 }
 0x209   :  { %5865 = vmatpush1.bf16.msra.mxu0 %v8552_v1  ;;  %5897 = vmatpush1.bf16.msra.mxu1 %v8555_v62 }
 0x20a   :  { %5899 = vmatprep.subr.bf16.mxu0 %v8560_v47  ;;  %5931 = vmatprep.subr.bf16.mxu1 %v8562_v55 }
 0x29e   :  { %v2016_v52 = vpop.f32.mrb[2].mxu0  ;;  %v2087_v63 = vpop.f32.mrb[2].mxu1 }
 0x29f   :  { %v6604_v13 = vadd.f32 %v2016_v52, %v8392_v57  ;;  %v2018_v37 = vpop.f32.mrb[3].mxu0  ;;  %v2089_v11 = vpop.f32.mrb[3].mxu1  ;;  %v6620_v19 = vadd.f32 %v2087_v63, %v8401_v39  ;;  %v2591_v39 = vld [vmem:[#allocation7 + $0x88] sm:$0xff] }
 0x2a0   :  { %v6605_v60 = vadd.f32 %v2018_v37, %v8394_v59  ;;  %v6621_v42 = vadd.f32 %v2089_v11, %v8398_v30  ;;  %v2595_v30 = vld [vmem:[#allocation7 + $0xa8] sm:$0xff]  ;;  %v2593_v59 = vld [vmem:[#allocation7 + $0x98] sm:$0xff] }
 0x2a1   :  { %v5280_v25 = vmul.f32 -1.442695, %v6604_v13 }
 0x2a2   :  { %v5281_v0 = vmul.f32 -1.442695, %v6605_v60  ;;  %v5282_v28 = vmul.f32 -1.442695, %v6621_v42 }
 0x2a3   :  { %6831 = vpow2.f32 %v5280_v25 }
 0x2a4   :  { %6833 = vpow2.f32 %v5281_v0 }
 0x2a5   :  { %6835 = vpow2.f32 %v5282_v28 }
 0x2a6   :  { %6837 = vtanh.f32 %v6620_v19 }
 0x2ad   :  { %v6832_v2 = vpop.eup %6831 }
 0x2ae   :  { %v6834_v40 = vpop.eup %6833  ;;  %v2309_v14 = vadd.f32 1.0, %v6832_v2 }
 0x2af   :  { %v2315_v23 = vadd.f32 1.0, %v6834_v40  ;;  %v6836_v36 = vpop.eup %6835 }
 0x2b0   :  { %6839 = vrcp.f32 %v2309_v14  ;;  %v6838_v51 = vpop.eup %6837  ;;  %v2322_v60 = vadd.f32 1.0, %v6836_v36  ;;  %v2578_v36 = vld [vmem:[#allocation7 + $0x20] sm:$0xff] }
 0x2b1   :  { %6841 = vrcp.f32 %v2315_v23 }
 0x2b2   :  { %6843 = vrcp.f32 %v2322_v60  ;;  %v2585_v60 = vld [vmem:[#allocation7 + $0x58] sm:$0xff] }
 0x2ba   :  { %v6840_v52 = vpop.eup %6839 }
 0x2bb   :  { %v6842_v13 = vpop.eup %6841  ;;  %v2326_v37 = vmul.f32 %v6840_v52, %v6838_v51  ;;  %v2576_v51 = vld [vmem:[#allocation7 + $0x10] sm:$0xff] }
 0x2bc   :  { %v2325_v25 = vmul.f32 %v6842_v13, %v8408_v41  ;;  %v2574_v41 = vld [vmem:[#allocation7] sm:$0xff]  ;;  %v2580_v52 = vld [vmem:[#allocation7 + $0x30] sm:$0xff]  ;;  %v2583_v13 = vld [vmem:[#allocation7 + $0x48] sm:$0xff] }
 0x2be   :  { %v8571_v11 = vadd.f32 %v2326_v37, %v2325_v25  ;;  %v2226_v0 = vpop.f32.mrb[28].mxu0  ;;  %v2297_v63 = vpop.f32.mrb[28].mxu1  ;;  %v2587_v37 = vld [vmem:[#allocation7 + $0x68] sm:$0xff]  ;;  %v2589_v25 = vld [vmem:[#allocation7 + $0x78] sm:$0xff] }
 0x2bf   :  { %v6646_v42 = vadd.f32 %v2226_v0, %v8404_v18  ;;  %v2228_v28 = vpop.f32.mrb[29].mxu0  ;;  %v2299_v19 = vpop.f32.mrb[29].mxu1  ;;  %v2584_v18 = vld [vmem:[#allocation7 + $0x50] sm:$0xff] }
 0x2c0   :  { %9556 = vst [vmem:[#allocation12_spill] sm:$0xff] %v8571_v11  ;;  %v6647_v2 = vadd.f32 %v2228_v28, %v8406_v34  ;;  %6845 = vtanh.f32 %v8571_v11  ;;  %v6663_v23 = vadd.f32 %v2299_v19, %v8413_v4  ;;  %v6844_v0 = vpop.eup %6843  ;;  %v8577_v28 = vpack.c.bf16 %v2578_v36, %v2574_v41  ;;  %v2588_v11 = vld [vmem:[#allocation7 + $0x70] sm:$0xff] }
 0x2c1   :  { %v5283_v40 = vmul.f32 -1.442695, %v6646_v42  ;;  %v8579_v34 = vpack.c.bf16 %v2580_v52, %v2576_v51  ;;  %v2582_v42 = vld [vmem:[#allocation7 + $0x40] sm:$0xff]  ;;  %v8586_v4 = vpack.c.bf16 %v2589_v25, %v2585_v60  ;;  %v8598_v60 = vpack.c.bf16 %v2595_v30, %v2591_v39 }
 0x2c2   :  { %v5284_v14 = vmul.f32 -1.442695, %v6647_v2  ;;  %v5285_v5 = vmul.f32 -1.442695, %v6663_v23  ;;  %9557 = vst [vmem:[#allocation13_spill] sm:$0xff] %v8577_v28  ;;  %v2586_v2 = vld [vmem:[#allocation7 + $0x60] sm:$0xff] }
 0x2c3   :  { %6847 = vpow2.f32 %v5283_v40  ;;  %9558 = vst [vmem:[#allocation14_spill] sm:$0xff] %v8579_v34  ;;  %v6662_v40 = vadd.f32 %v2297_v63, %v8416_v12  ;;  %9561 = vst [vmem:[#allocation17_spill] sm:$0xff] %v8586_v4  ;;  %v2597_v23 = vld [vmem:[#allocation7 + $0xb8] sm:$0xff]  ;;  %v8594_v63 = vpack.c.bf16 %v2588_v11, %v2584_v18  ;;  %v2590_v52 = vld [vmem:[#allocation7 + $0x80] sm:$0xff] }
 0x2c4   :  { %6849 = vpow2.f32 %v5284_v14  ;;  %v8584_v14 = vpack.c.bf16 %v2587_v37, %v2583_v13  ;;  %v2594_v13 = vld [vmem:[#allocation7 + $0xa0] sm:$0xff]  ;;  %9564 = vst [vmem:[#allocation20_spill] sm:$0xff] %v8598_v60  ;;  %v8600_v25 = vpack.c.bf16 %v2597_v23, %v2593_v59  ;;  %v2605_v18 = vld [vmem:[#allocation7 + $0xf8] sm:$0xff] }
 0x2c5   :  { %6851 = vpow2.f32 %v5285_v5  ;;  %9563 = vst [vmem:[#allocation19_spill] sm:$0xff] %v8594_v63  ;;  %v2592_v5 = vld [vmem:[#allocation7 + $0x90] sm:$0xff]  ;;  %v8606_v30 = vpack.c.bf16 %v2594_v13, %v2590_v52  ;;  %v2598_v39 = vld [vmem:[#allocation7 + $0xc0] sm:$0xff] }
 0x2c6   :  { %9560 = vst [vmem:[#allocation16_spill] sm:$0xff] %v8584_v14  ;;  %6853 = vtanh.f32 %v6662_v40  ;;  %9565 = vst [vmem:[#allocation29_spill] sm:$0xff] %v8600_v25  ;;  %v2602_v11 = vld [vmem:[#allocation7 + $0xe0] sm:$0xff] }
 0x2c7   :  { %9566 = vst [vmem:[#allocation30_spill] sm:$0xff] %v8606_v30  ;;  %v8618_v52 = vpack.c.bf16 %v2602_v11, %v2598_v39  ;;  %v2621_v39 = vld [vmem:[#allocation7 + $0x178] sm:$0xff] }
 0x2c9   :  { %9570 = vst [vmem:[#allocation34_spill] sm:$0xff] %v8618_v52 }
 0x2ca   :  { %v6846_v32 = vpop.eup %6845 }
 0x2cb   :  { %v8582_v19 = vmul.f32 %v6846_v32, %v6844_v0  ;;  %v8592_v32 = vpack.c.bf16 %v2586_v2, %v2582_v42  ;;  %v2596_v0 = vld [vmem:[#allocation7 + $0xb0] sm:$0xff]  ;;  %v2603_v42 = vld [vmem:[#allocation7 + $0xe8] sm:$0xff]  ;;  %v2601_v2 = vld [vmem:[#allocation7 + $0xd8] sm:$0xff] }
 0x2cc   :  { %v8608_v59 = vpack.c.bf16 %v2596_v0, %v2592_v5  ;;  %v8614_v23 = vpack.c.bf16 %v2605_v18, %v2601_v2  ;;  %v2606_v5 = vld [vmem:[#allocation7 + $0x100] sm:$0xff]  ;;  %v2608_v2 = vld [vmem:[#allocation7 + $0x110] sm:$0xff] }
 0x2cd   :  { %9559 = vst [vmem:[#allocation15_spill] sm:$0xff] %v8582_v19  ;;  %v6848_v41 = vpop.eup %6847  ;;  %2493 = vmatmul.mubr.f32.vlgmr.msra.gmra.mrb[4].mxu0 %v8582_v19  ;;  %2564 = vmatmul.mubr.f32.vlgmr.msra.gmra.mrb[4].mxu1 %v8582_v19  ;;  %9562 = vst [vmem:[#allocation18_spill] sm:$0xff] %v8592_v32  ;;  %v2611_v19 = vld [vmem:[#allocation7 + $0x128] sm:$0xff]  ;;  %v2610_v0 = vld [vmem:[#allocation7 + $0x120] sm:$0xff] }
 0x2ce   :  { %v6850_v36 = vpop.eup %6849  ;;  %v2333_v51 = vadd.f32 1.0, %v6848_v41  ;;  %5901 = vmatpush1.bf16.msra.mxu0 %v8577_v28  ;;  %5933 = vmatpush1.bf16.msra.mxu1 %v8579_v34  ;;  %v2599_v41 = vld [vmem:[#allocation7 + $0xc8] sm:$0xff]  ;;  %9567 = vst [vmem:[#allocation31_spill] sm:$0xff] %v8608_v59  ;;  %9569 = vst [vmem:[#allocation33_spill] sm:$0xff] %v8614_v23  ;;  %v2612_v18 = vld [vmem:[#allocation7 + $0x130] sm:$0xff] }
 0x2cf   :  { %v2339_v37 = vadd.f32 1.0, %v6850_v36  ;;  %5903 = vmatprep.subr.bf16.mxu0 %v8584_v14  ;;  %5935 = vmatprep.subr.bf16.mxu1 %v8586_v4  ;;  %v8612_v40 = vpack.c.bf16 %v2603_v42, %v2599_v41  ;;  %v2600_v36 = vld [vmem:[#allocation7 + $0xd0] sm:$0xff] }
 0x2d0   :  { %6855 = vrcp.f32 %v2333_v51  ;;  %2702 = vmatprep.mubr.f32.mxu0 %v9536_v38  ;;  %2773 = vmatprep.mubr.f32.mxu1 %v9536_v38  ;;  %v2604_v51 = vld [vmem:[#allocation7 + $0xf0] sm:$0xff] }
 0x2d1   :  { %6857 = vrcp.f32 %v2339_v37  ;;  %9568 = vst [vmem:[#allocation32_spill] sm:$0xff] %v8612_v40  ;;  %v2607_v37 = vld [vmem:[#allocation7 + $0x108] sm:$0xff]  ;;  %v8620_v13 = vpack.c.bf16 %v2604_v51, %v2600_v36  ;;  %v8630_v51 = vpack.c.bf16 %v2610_v0, %v2606_v5  ;;  %v2620_v34 = vld [vmem:[#allocation7 + $0x170] sm:$0xff] }
 0x2d2   :  { %5905 = vmatpush1.bf16.msra.mxu0 %v8592_v32  ;;  %5937 = vmatpush1.bf16.msra.mxu1 %v8594_v63  ;;  %v2609_v32 = vld [vmem:[#allocation7 + $0x118] sm:$0xff]  ;;  %v8624_v41 = vpack.c.bf16 %v2611_v19, %v2607_v37  ;;  %v2614_v19 = vld [vmem:[#allocation7 + $0x140] sm:$0xff]  ;;  %v2627_v0 = vld [vmem:[#allocation7 + $0x1a8] sm:$0xff] }
 0x2d3   :  { %5907 = vmatprep.subr.bf16.mxu0 %v8598_v60  ;;  %5939 = vmatprep.subr.bf16.mxu1 %v8600_v25  ;;  %v2613_v63 = vld [vmem:[#allocation7 + $0x138] sm:$0xff]  ;;  %9571 = vst [vmem:[#allocation35_spill] sm:$0xff] %v8620_v13  ;;  %v2615_v25 = vld [vmem:[#allocation7 + $0x148] sm:$0xff] }
 0x2d4   :  { %v8626_v42 = vpack.c.bf16 %v2613_v63, %v2609_v32  ;;  %v2619_v60 = vld [vmem:[#allocation7 + $0x168] sm:$0xff]  ;;  %v2618_v32 = vld [vmem:[#allocation7 + $0x160] sm:$0xff] }
 0x2d5   :  { %v8636_v4 = vpack.c.bf16 %v2619_v60, %v2615_v25  ;;  %v2622_v25 = vld [vmem:[#allocation7 + $0x180] sm:$0xff] }
 0x2d6   :  { %5909 = vmatpush1.bf16.msra.mxu0 %v8606_v30  ;;  %5941 = vmatpush1.bf16.msra.mxu1 %v8608_v59  ;;  %v6852_v30 = vpop.eup %6851  ;;  %v2617_v59 = vld [vmem:[#allocation7 + $0x158] sm:$0xff] }
 0x2d7   :  { %5911 = vmatprep.subr.bf16.mxu0 %v8612_v40  ;;  %5943 = vmatprep.subr.bf16.mxu1 %v8614_v23  ;;  %v6854_v11 = vpop.eup %6853  ;;  %v8632_v23 = vpack.c.bf16 %v2612_v18, %v2608_v2  ;;  %v2346_v40 = vadd.f32 1.0, %v6852_v30  ;;  %v8638_v14 = vpack.c.bf16 %v2621_v39, %v2617_v59  ;;  %v2625_v2 = vld [vmem:[#allocation7 + $0x198] sm:$0xff]  ;;  %v8645_v30 = vpack.c.bf16 %v2618_v32, %v2614_v19  ;;  %v2626_v59 = vld [vmem:[#allocation7 + $0x1a0] sm:$0xff] }
 0x2d8   :  { %v2629_v18 = vld [vmem:[#allocation7 + $0x1b8] sm:$0xff] }
 0x2d9   :  { %6859 = vrcp.f32 %v2346_v40  ;;  %v8653_v39 = vpack.c.bf16 %v2629_v18, %v2625_v2  ;;  %v2637_v19 = vld [vmem:[#allocation7 + $0x1f8] sm:$0xff]  ;;  %v2632_v2 = vld [vmem:[#allocation7 + $0x1d0] sm:$0xff] }
 0x2da   :  { %v6856_v36 = vpop.eup %6855  ;;  %5913 = vmatpush1.bf16.msra.mxu0 %v8618_v52  ;;  %5945 = vmatpush1.bf16.msra.mxu1 %v8620_v13  ;;  %v2616_v52 = vld [vmem:[#allocation7 + $0x150] sm:$0xff]  ;;  %v2623_v13 = vld [vmem:[#allocation7 + $0x188] sm:$0xff] }
 0x2db   :  { %v6858_v63 = vpop.eup %6857  ;;  %v2350_v37 = vmul.f32 %v6856_v36, %v6854_v11  ;;  %5915 = vmatprep.subr.bf16.mxu0 %v8624_v41  ;;  %5947 = vmatprep.subr.bf16.mxu1 %v8626_v42  ;;  %v8647_v60 = vpack.c.bf16 %v2620_v34, %v2616_v52  ;;  %v2624_v11 = vld [vmem:[#allocation7 + $0x190] sm:$0xff]  ;;  %v8658_v34 = vpack.c.bf16 %v2626_v59, %v2622_v25  ;;  %v2630_v52 = vld [vmem:[#allocation7 + $0x1c0] sm:$0xff] }
 0x2dc   :  { %v2349_v5 = vmul.f32 %v6858_v63, %v8441_v7  ;;  %v8651_v7 = vpack.c.bf16 %v2627_v0, %v2623_v13  ;;  %v2628_v36 = vld [vmem:[#allocation7 + $0x1b0] sm:$0xff]  ;;  %v2631_v63 = vld [vmem:[#allocation7 + $0x1c8] sm:$0xff]  ;;  %v2634_v0 = vld [vmem:[#allocation7 + $0x1e0] sm:$0xff] }
 0x2dd   :  { %v8660_v40 = vpack.c.bf16 %v2628_v36, %v2624_v11  ;;  %v2636_v18 = vld [vmem:[#allocation7 + $0x1f0] sm:$0xff]  ;;  %v8670_v25 = vpack.c.bf16 %v2634_v0, %v2630_v52  ;;  %v9579_v52 = vld [vmem:[#allocation27_spill] sm:$0xff] }
 0x2de   :  { %v8641_v28 = vadd.f32 %v2350_v37, %v2349_v5  ;;  %5917 = vmatpush1.bf16.msra.mxu0 %v8630_v51  ;;  %5949 = vmatpush1.bf16.msra.mxu1 %v8632_v23  ;;  %v2635_v37 = vld [vmem:[#allocation7 + $0x1e8] sm:$0xff]  ;;  %v2633_v5 = vld [vmem:[#allocation7 + $0x1d8] sm:$0xff]  ;;  %v8672_v59 = vpack.c.bf16 %v2636_v18, %v2632_v2 }
 0x2df   :  { %5919 = vmatprep.subr.bf16.mxu0 %v8636_v4  ;;  %5951 = vmatprep.subr.bf16.mxu1 %v8638_v14  ;;  %v8664_v13 = vpack.c.bf16 %v2635_v37, %v2631_v63  ;;  %v8666_v32 = vpack.c.bf16 %v2637_v19, %v2633_v5 }
 0x2e0   :  { %6861 = vtanh.f32 %v8641_v28 }
 0x2e2   :  { %5921 = vmatpush1.bf16.msra.mxu0 %v8645_v30  ;;  %5953 = vmatpush1.bf16.msra.mxu1 %v8647_v60 }
 0x2e3   :  { %5923 = vmatprep.subr.bf16.mxu0 %v8651_v7  ;;  %5955 = vmatprep.subr.bf16.mxu1 %v8653_v39  ;;  %v6860_v11 = vpop.eup %6859 }
 0x2e6   :  { %5925 = vmatpush1.bf16.msra.mxu0 %v8658_v34  ;;  %5957 = vmatpush1.bf16.msra.mxu1 %v8660_v40 }
 0x2e7   :  { %5927 = vmatprep.subr.bf16.mxu0 %v8664_v13  ;;  %5959 = vmatprep.subr.bf16.mxu1 %v8666_v32 }
 0x2ea   :  { %v6862_v36 = vpop.eup %6861  ;;  %5929 = vmatpush1.bf16.msra.mxu0 %v8670_v25  ;;  %5961 = vmatpush1.bf16.msra.mxu1 %v8672_v59 }
 0x2eb   :  { %v8678_v63 = vmul.f32 %v6862_v36, %v6860_v11  ;;  %5963 = vmatprep.subr.bf16.mxu0 %v8464_v49  ;;  %5995 = vmatprep.subr.bf16.mxu1 %v8466_v35 }
 0x2ed   :  { %9572 = vst [vmem:[#allocation36_spill] sm:$0xff] %v8678_v63  ;;  %2703 = vmatmul.mubr.f32.vlgmr.msra.gmra.mrb[26].mxu0 %v8678_v63  ;;  %2774 = vmatmul.mubr.f32.vlgmr.msra.gmra.mrb[26].mxu1 %v8678_v63 }
 0x2ee   :  { %5965 = vmatpush1.bf16.msra.mxu0 %v8468_v31  ;;  %5997 = vmatpush1.bf16.msra.mxu1 %v8471_v43 }
 0x2ef   :  { %5967 = vmatprep.subr.bf16.mxu0 %v8476_v8  ;;  %5999 = vmatprep.subr.bf16.mxu1 %v8478_v46  ;;  %v9573_v46 = vld [vmem:[#allocation22_spill] sm:$0xff] }
 0x2f0   :  { %2970 = vmatprep.mubr.f32.mxu0 %v9536_v38  ;;  %3041 = vmatprep.mubr.f32.mxu1 %v9536_v38 }
 0x2f2   :  { %5969 = vmatpush1.bf16.msra.mxu0 %v8480_v53  ;;  %6001 = vmatpush1.bf16.msra.mxu1 %v8483_v9 }
 0x2f3   :  { %5971 = vmatprep.subr.bf16.mxu0 %v8488_v26  ;;  %6003 = vmatprep.subr.bf16.mxu1 %v8490_v44  ;;  %v9574_v44 = vld [vmem:[#allocation23_spill] sm:$0xff] }
 0x2f6   :  { %5973 = vmatpush1.bf16.msra.mxu0 %v8492_v48  ;;  %6005 = vmatpush1.bf16.msra.mxu1 %v8495_v33 }
 0x2f7   :  { %5975 = vmatprep.subr.bf16.mxu0 %v8500_v10  ;;  %6007 = vmatprep.subr.bf16.mxu1 %v8502_v3  ;;  %v9575_v10 = vld [vmem:[#allocation24_spill] sm:$0xff] }
 0x2fa   :  { %5977 = vmatpush1.bf16.msra.mxu0 %v8504_v24  ;;  %6009 = vmatpush1.bf16.msra.mxu1 %v8507_v15 }
 0x2fb   :  { %5979 = vmatprep.subr.bf16.mxu0 %v8512_v56  ;;  %6011 = vmatprep.subr.bf16.mxu1 %v8514_v58 }
 0x2fe   :  { %5981 = vmatpush1.bf16.msra.mxu0 %v8516_v22  ;;  %6013 = vmatpush1.bf16.msra.mxu1 %v8519_v6 }
 0x2ff   :  { %5983 = vmatprep.subr.bf16.mxu0 %v8524_v27  ;;  %6015 = vmatprep.subr.bf16.mxu1 %v8526_v17 }
 0x302   :  { %5985 = vmatpush1.bf16.msra.mxu0 %v8528_v20  ;;  %6017 = vmatpush1.bf16.msra.mxu1 %v8531_v45 }
 0x303   :  { %5987 = vmatprep.subr.bf16.mxu0 %v8536_v50  ;;  %6019 = vmatprep.subr.bf16.mxu1 %v8538_v61  ;;  %v9576_v50 = vld [vmem:[#allocation12_spill] sm:$0xff] }
 0x306   :  { %5989 = vmatpush1.bf16.msra.mxu0 %v8540_v16  ;;  %6021 = vmatpush1.bf16.msra.mxu1 %v8543_v21 }
 0x307   :  { %5991 = vmatprep.subr.bf16.mxu0 %v8548_v29  ;;  %6023 = vmatprep.subr.bf16.mxu1 %v8550_v54  ;;  %v9577_v54 = vld [vmem:[#allocation25_spill] sm:$0xff] }
 0x30a   :  { %5993 = vmatpush1.bf16.msra.mxu0 %v8552_v1  ;;  %6025 = vmatpush1.bf16.msra.mxu1 %v8555_v62 }
 0x30b   :  { %6027 = vmatprep.subr.bf16.mxu0 %v8560_v47  ;;  %6059 = vmatprep.subr.bf16.mxu1 %v8562_v55  ;;  %v9578_v55 = vld [vmem:[#allocation26_spill] sm:$0xff] }
 0x3a0   :  { %v2494_v49 = vpop.f32.mrb[4].mxu0  ;;  %v2565_v35 = vpop.f32.mrb[4].mxu1 }
 0x3a1   :  { %v6606_v31 = vadd.f32 %v2494_v49, %v8392_v57  ;;  %v2496_v43 = vpop.f32.mrb[5].mxu0  ;;  %v2567_v8 = vpop.f32.mrb[5].mxu1  ;;  %v6622_v3 = vadd.f32 %v2565_v35, %v9575_v10 }
 0x3a2   :  { %v6607_v53 = vadd.f32 %v2496_v43, %v9573_v46  ;;  %v6623_v48 = vadd.f32 %v2567_v8, %v9574_v44  ;;  %v9581_v8 = vld [vmem:[#allocation13_spill] sm:$0xff] }
 0x3a3   :  { %v5286_v9 = vmul.f32 -1.442695, %v6606_v31 }
 0x3a4   :  { %v5287_v26 = vmul.f32 -1.442695, %v6607_v53  ;;  %v5288_v33 = vmul.f32 -1.442695, %v6623_v48  ;;  %v9582_v53 = vld [vmem:[#allocation14_spill] sm:$0xff]  ;;  %v9584_v48 = vld [vmem:[#allocation17_spill] sm:$0xff] }
 0x3a5   :  { %6863 = vpow2.f32 %v5286_v9 }
 0x3a6   :  { %6865 = vpow2.f32 %v5287_v26  ;;  %v9583_v26 = vld [vmem:[#allocation16_spill] sm:$0xff] }
 0x3a7   :  { %6867 = vpow2.f32 %v5288_v33  ;;  %v9585_v33 = vld [vmem:[#allocation18_spill] sm:$0xff] }
 0x3a8   :  { %6869 = vtanh.f32 %v6622_v3  ;;  %v9586_v3 = vld [vmem:[#allocation19_spill] sm:$0xff] }
 0x3af   :  { %v6864_v24 = vpop.eup %6863 }
 0x3b0   :  { %v6866_v15 = vpop.eup %6865  ;;  %v2787_v56 = vadd.f32 1.0, %v6864_v24  ;;  %v9587_v24 = vld [vmem:[#allocation20_spill] sm:$0xff] }
 0x3b1   :  { %v2793_v58 = vadd.f32 1.0, %v6866_v15  ;;  %v6868_v22 = vpop.eup %6867  ;;  %v9588_v15 = vld [vmem:[#allocation29_spill] sm:$0xff] }
 0x3b2   :  { %6871 = vrcp.f32 %v2787_v56  ;;  %v6870_v6 = vpop.eup %6869  ;;  %v2800_v45 = vadd.f32 1.0, %v6868_v22  ;;  %v9589_v56 = vld [vmem:[#allocation30_spill] sm:$0xff]  ;;  %v9591_v22 = vld [vmem:[#allocation32_spill] sm:$0xff] }
 0x3b3   :  { %6873 = vrcp.f32 %v2793_v58  ;;  %v9590_v58 = vld [vmem:[#allocation31_spill] sm:$0xff] }
 0x3b4   :  { %6875 = vrcp.f32 %v2800_v45  ;;  %v9593_v45 = vld [vmem:[#allocation34_spill] sm:$0xff] }
 0x3bc   :  { %v6872_v27 = vpop.eup %6871 }
 0x3bd   :  { %v6874_v17 = vpop.eup %6873  ;;  %v2804_v20 = vmul.f32 %v6872_v27, %v6870_v6  ;;  %v9592_v6 = vld [vmem:[#allocation33_spill] sm:$0xff] }
 0x3be   :  { %v2803_v61 = vmul.f32 %v6874_v17, %v9576_v50  ;;  %v6876_v2 = vpop.eup %6875  ;;  %v9594_v50 = vld [vmem:[#allocation35_spill] sm:$0xff] }
 0x3c0   :  { %v8723_v16 = vadd.f32 %v2804_v20, %v2803_v61  ;;  %v2704_v21 = vpop.f32.mrb[26].mxu0  ;;  %v2775_v29 = vpop.f32.mrb[26].mxu1 }
 0x3c1   :  { %v6644_v1 = vadd.f32 %v2704_v21, %v9577_v54  ;;  %v2706_v62 = vpop.f32.mrb[27].mxu0  ;;  %v2777_v47 = vpop.f32.mrb[27].mxu1  ;;  %v6660_v36 = vadd.f32 %v2775_v29, %v8416_v12 }
 0x3c2   :  { %v6645_v37 = vadd.f32 %v2706_v62, %v9578_v55  ;;  %6877 = vtanh.f32 %v8723_v16  ;;  %v6661_v0 = vadd.f32 %v2777_v47, %v9579_v52  ;;  %v3331_v47 = vld [vmem:[#allocation5 + $0x58] sm:$0xff] }
 0x3c3   :  { %v5289_v5 = vmul.f32 -1.442695, %v6644_v1 }
 0x3c4   :  { %v5290_v19 = vmul.f32 -1.442695, %v6645_v37  ;;  %v5291_v11 = vmul.f32 -1.442695, %v6661_v0  ;;  %v3332_v0 = vld [vmem:[#allocation5 + $0x60] sm:$0xff] }
 0x3c5   :  { %6879 = vpow2.f32 %v5289_v5  ;;  %v3335_v5 = vld [vmem:[#allocation5 + $0x78] sm:$0xff] }
 0x3c6   :  { %6881 = vpow2.f32 %v5290_v19  ;;  %v3328_v19 = vld [vmem:[#allocation5 + $0x40] sm:$0xff] }
 0x3c7   :  { %6883 = vpow2.f32 %v5291_v11  ;;  %v3330_v11 = vld [vmem:[#allocation5 + $0x50] sm:$0xff] }
 0x3c8   :  { %6885 = vtanh.f32 %v6660_v36  ;;  %v3334_v36 = vld [vmem:[#allocation5 + $0x70] sm:$0xff] }
 0x3cc   :  { %v6878_v18 = vpop.eup %6877 }
 0x3cd   :  { %v8730_v49 = vmul.f32 %v6878_v18, %v6876_v2  ;;  %v8790_v2 = vpack.c.bf16 %v3335_v5, %v3331_v47  ;;  %v8792_v18 = vpack.c.bf16 %v3332_v0, %v3328_v19  ;;  %v3361_v47 = vld [vmem:[#allocation5 + $0x148] sm:$0xff]  ;;  %v3363_v19 = vld [vmem:[#allocation5 + $0x158] sm:$0xff] }
 0x3ce   :  { %v3365_v5 = vld [vmem:[#allocation5 + $0x168] sm:$0xff] }
 0x3cf   :  { %9580 = vst [vmem:[#allocation12_spill] sm:$0xff] %v8730_v49  ;;  %v6880_v35 = vpop.eup %6879  ;;  %2971 = vmatmul.mubr.f32.vlgmr.msra.gmra.mrb[6].mxu0 %v8730_v49  ;;  %3042 = vmatmul.mubr.f32.vlgmr.msra.gmra.mrb[6].mxu1 %v8730_v49  ;;  %v8836_v0 = vpack.c.bf16 %v3365_v5, %v3361_v47  ;;  %v3380_v47 = vld [vmem:[#allocation5 + $0x1e0] sm:$0xff] }
 0x3d0   :  { %v6882_v31 = vpop.eup %6881  ;;  %v2811_v43 = vadd.f32 1.0, %v6880_v35  ;;  %6029 = vmatpush1.bf16.msra.mxu0 %v9581_v8  ;;  %6061 = vmatpush1.bf16.msra.mxu1 %v9582_v53  ;;  %v8795_v35 = vpack.c.bf16 %v3334_v36, %v3330_v11  ;;  %v3339_v8 = vld [vmem:[#allocation5 + $0x98] sm:$0xff]  ;;  %v3360_v36 = vld [vmem:[#allocation5 + $0x140] sm:$0xff] }
 0x3d1   :  { %v2817_v9 = vadd.f32 1.0, %v6882_v31  ;;  %6031 = vmatprep.subr.bf16.mxu0 %v9583_v26  ;;  %6063 = vmatprep.subr.bf16.mxu1 %v9584_v48  ;;  %v6884_v27 = vpop.eup %6883  ;;  %v3337_v31 = vld [vmem:[#allocation5 + $0x88] sm:$0xff]  ;;  %v3336_v26 = vld [vmem:[#allocation5 + $0x80] sm:$0xff]  ;;  %v3367_v11 = vld [vmem:[#allocation5 + $0x178] sm:$0xff] }
 0x3d2   :  { %6887 = vrcp.f32 %v2811_v43  ;;  %3180 = vmatprep.mubr.f32.mxu0 %v9536_v38  ;;  %3251 = vmatprep.mubr.f32.mxu1 %v9536_v38  ;;  %v6886_v17 = vpop.eup %6885  ;;  %v2824_v29 = vadd.f32 1.0, %v6884_v27  ;;  %v3341_v43 = vld [vmem:[#allocation5 + $0xa8] sm:$0xff]  ;;  %v3340_v48 = vld [vmem:[#allocation5 + $0xa0] sm:$0xff] }
 0x3d3   :  { %6889 = vrcp.f32 %v2817_v9  ;;  %v8800_v53 = vpack.c.bf16 %v3341_v43, %v3337_v31  ;;  %v3343_v9 = vld [vmem:[#allocation5 + $0xb8] sm:$0xff]  ;;  %v3364_v31 = vld [vmem:[#allocation5 + $0x160] sm:$0xff]  ;;  %v8838_v43 = vpack.c.bf16 %v3367_v11, %v3363_v19  ;;  %v3378_v11 = vld [vmem:[#allocation5 + $0x1d0] sm:$0xff] }
 0x3d4   :  { %6033 = vmatpush1.bf16.msra.mxu0 %v9585_v33  ;;  %6065 = vmatpush1.bf16.msra.mxu1 %v9586_v3  ;;  %6891 = vrcp.f32 %v2824_v29  ;;  %v8802_v33 = vpack.c.bf16 %v3343_v9, %v3339_v8  ;;  %v8804_v3 = vpack.c.bf16 %v3340_v48, %v3336_v26  ;;  %v3350_v29 = vld [vmem:[#allocation5 + $0xf0] sm:$0xff]  ;;  %v8840_v8 = vpack.c.bf16 %v3364_v31, %v3360_v36 }
 0x3d5   :  { %6035 = vmatprep.subr.bf16.mxu0 %v9587_v24  ;;  %6067 = vmatprep.subr.bf16.mxu1 %v9588_v15  ;;  %v3338_v24 = vld [vmem:[#allocation5 + $0x90] sm:$0xff] }
 0x3d6   :  { %v3342_v15 = vld [vmem:[#allocation5 + $0xb0] sm:$0xff] }
 0x3d7   :  { %v3362_v9 = vld [vmem:[#allocation5 + $0x150] sm:$0xff] }
 0x3d8   :  { %6037 = vmatpush1.bf16.msra.mxu0 %v9589_v56  ;;  %6069 = vmatpush1.bf16.msra.mxu1 %v9590_v58  ;;  %v8807_v56 = vpack.c.bf16 %v3342_v15, %v3338_v24  ;;  %v3345_v58 = vld [vmem:[#allocation5 + $0xc8] sm:$0xff]  ;;  %v3366_v26 = vld [vmem:[#allocation5 + $0x170] sm:$0xff] }
 0x3d9   :  { %6039 = vmatprep.subr.bf16.mxu0 %v9591_v22  ;;  %6071 = vmatprep.subr.bf16.mxu1 %v9592_v6  ;;  %v3349_v22 = vld [vmem:[#allocation5 + $0xe8] sm:$0xff]  ;;  %v3347_v6 = vld [vmem:[#allocation5 + $0xd8] sm:$0xff]  ;;  %v8843_v48 = vpack.c.bf16 %v3366_v26, %v3362_v9  ;;  %v3382_v36 = vld [vmem:[#allocation5 + $0x1f0] sm:$0xff] }
 0x3da   :  { %v8812_v27 = vpack.c.bf16 %v3349_v22, %v3345_v58  ;;  %v3369_v24 = vld [vmem:[#allocation5 + $0x188] sm:$0xff]  ;;  %v3371_v58 = vld [vmem:[#allocation5 + $0x198] sm:$0xff]  ;;  %v8867_v31 = vpack.c.bf16 %v3382_v36, %v3378_v11 }
 0x3db   :  { %v3373_v15 = vld [vmem:[#allocation5 + $0x1a8] sm:$0xff] }
 0x3dc   :  { %v6888_v20 = vpop.eup %6887  ;;  %6041 = vmatpush1.bf16.msra.mxu0 %v9593_v45  ;;  %6073 = vmatpush1.bf16.msra.mxu1 %v9594_v50  ;;  %v3348_v45 = vld [vmem:[#allocation5 + $0xe0] sm:$0xff]  ;;  %v8848_v22 = vpack.c.bf16 %v3373_v15, %v3369_v24  ;;  %v3531_v9 = vld [vmem:[#allocation7 + $0x8] sm:$0xff]  ;;  %v3533_v24 = vld [vmem:[#allocation7 + $0x18] sm:$0xff] }
 0x3dd   :  { %v6890_v61 = vpop.eup %6889  ;;  %v2828_v21 = vmul.f32 %v6888_v20, %v6886_v17  ;;  %6043 = vmatprep.subr.bf16.mxu0 %v8624_v41  ;;  %6075 = vmatprep.subr.bf16.mxu1 %v8626_v42  ;;  %v3325_v41 = vld [vmem:[#allocation5 + $0x28] sm:$0xff]  ;;  %v3323_v42 = vld [vmem:[#allocation5 + $0x18] sm:$0xff]  ;;  %v3344_v20 = vld [vmem:[#allocation5 + $0xc0] sm:$0xff] }
 0x3de   :  { %v2827_v1 = vmul.f32 %v6890_v61, %v8641_v28  ;;  %v3351_v17 = vld [vmem:[#allocation5 + $0xf8] sm:$0xff]  ;;  %v8816_v61 = vpack.c.bf16 %v3348_v45, %v3344_v20  ;;  %v3372_v20 = vld [vmem:[#allocation5 + $0x1a0] sm:$0xff]  ;;  %v3535_v26 = vld [vmem:[#allocation7 + $0x28] sm:$0xff] }
 0x3df   :  { %v8814_v50 = vpack.c.bf16 %v3351_v17, %v3347_v6  ;;  %v3375_v6 = vld [vmem:[#allocation5 + $0x1b8] sm:$0xff]  ;;  %v3368_v17 = vld [vmem:[#allocation5 + $0x180] sm:$0xff]  ;;  %v8872_v15 = vpack.c.bf16 %v3535_v26, %v3531_v9 }
 0x3e0   :  { %v8753_v62 = vadd.f32 %v2828_v21, %v2827_v1  ;;  %6045 = vmatpush1.bf16.msra.mxu0 %v8630_v51  ;;  %6077 = vmatpush1.bf16.msra.mxu1 %v8632_v23  ;;  %v3321_v23 = vld [vmem:[#allocation5 + $0x8] sm:$0xff]  ;;  %v3346_v21 = vld [vmem:[#allocation5 + $0xd0] sm:$0xff]  ;;  %v8850_v45 = vpack.c.bf16 %v3375_v6, %v3371_v58  ;;  %v3537_v58 = vld [vmem:[#allocation7 + $0x38] sm:$0xff] }
 0x3e1   :  { %6047 = vmatprep.subr.bf16.mxu0 %v8636_v4  ;;  %6079 = vmatprep.subr.bf16.mxu1 %v8638_v14  ;;  %v6892_v4 = vpop.eup %6891  ;;  %v8776_v51 = vpack.c.bf16 %v3325_v41, %v3321_v23  ;;  %v8819_v1 = vpack.c.bf16 %v3350_v29, %v3346_v21  ;;  %v3355_v23 = vld [vmem:[#allocation5 + $0x118] sm:$0xff]  ;;  %v8852_v21 = vpack.c.bf16 %v3372_v20, %v3368_v17  ;;  %v3370_v29 = vld [vmem:[#allocation5 + $0x190] sm:$0xff] }
 0x3e2   :  { %6893 = vtanh.f32 %v8753_v62  ;;  %v8874_v6 = vpack.c.bf16 %v3537_v58, %v3533_v24 }
 0x3e4   :  { %6049 = vmatpush1.bf16.msra.mxu0 %v8645_v30  ;;  %6081 = vmatpush1.bf16.msra.mxu1 %v8647_v60  ;;  %v3327_v30 = vld [vmem:[#allocation5 + $0x38] sm:$0xff]  ;;  %v3320_v60 = vld [vmem:[#allocation5] sm:$0xff] }
 0x3e5   :  { %6051 = vmatprep.subr.bf16.mxu0 %v8651_v7  ;;  %6083 = vmatprep.subr.bf16.mxu1 %v8653_v39  ;;  %v3324_v7 = vld [vmem:[#allocation5 + $0x20] sm:$0xff]  ;;  %v8778_v39 = vpack.c.bf16 %v3327_v30, %v3323_v42  ;;  %v3359_v42 = vld [vmem:[#allocation5 + $0x138] sm:$0xff] }
 0x3e6   :  { %v3352_v30 = vld [vmem:[#allocation5 + $0x100] sm:$0xff] }
 0x3e8   :  { %6053 = vmatpush1.bf16.msra.mxu0 %v8658_v34  ;;  %6085 = vmatpush1.bf16.msra.mxu1 %v8660_v40  ;;  %v8780_v34 = vpack.c.bf16 %v3324_v7, %v3320_v60  ;;  %v3322_v40 = vld [vmem:[#allocation5 + $0x10] sm:$0xff]  ;;  %v3356_v60 = vld [vmem:[#allocation5 + $0x120] sm:$0xff]  ;;  %v8826_v7 = vpack.c.bf16 %v3359_v42, %v3355_v23  ;;  %v3377_v23 = vld [vmem:[#allocation5 + $0x1c8] sm:$0xff] }
 0x3e9   :  { %6055 = vmatprep.subr.bf16.mxu0 %v8664_v13  ;;  %6087 = vmatprep.subr.bf16.mxu1 %v8666_v32  ;;  %v3326_v13 = vld [vmem:[#allocation5 + $0x30] sm:$0xff]  ;;  %v3381_v42 = vld [vmem:[#allocation5 + $0x1e8] sm:$0xff] }
 0x3ea   :  { %v8783_v32 = vpack.c.bf16 %v3326_v13, %v3322_v40  ;;  %v8828_v40 = vpack.c.bf16 %v3356_v60, %v3352_v30  ;;  %v3354_v13 = vld [vmem:[#allocation5 + $0x110] sm:$0xff]  ;;  %v3379_v30 = vld [vmem:[#allocation5 + $0x1d8] sm:$0xff]  ;;  %v8860_v60 = vpack.c.bf16 %v3381_v42, %v3377_v23 }
 0x3ec   :  { %v6894_v28 = vpop.eup %6893  ;;  %6057 = vmatpush1.bf16.msra.mxu0 %v8670_v25  ;;  %6089 = vmatpush1.bf16.msra.mxu1 %v8672_v59  ;;  %v3329_v25 = vld [vmem:[#allocation5 + $0x48] sm:$0xff] }
 0x3ed   :  { %v8770_v14 = vmul.f32 %v6894_v28, %v6892_v4  ;;  %6091 = vmatprep.subr.bf16.mxu0 %v8776_v51  ;;  %6123 = vmatprep.subr.bf16.mxu1 %v8778_v39  ;;  %v3333_v59 = vld [vmem:[#allocation5 + $0x68] sm:$0xff] }
 0x3ee   :  { %v8788_v37 = vpack.c.bf16 %v3333_v59, %v3329_v25  ;;  %v3353_v4 = vld [vmem:[#allocation5 + $0x108] sm:$0xff]  ;;  %v3358_v25 = vld [vmem:[#allocation5 + $0x130] sm:$0xff] }
 0x3ef   :  { %9595 = vst [vmem:[#allocation13_spill] sm:$0xff] %v8770_v14  ;;  %3181 = vmatmul.mubr.f32.vlgmr.msra.gmra.mrb[24].mxu0 %v8770_v14  ;;  %3252 = vmatmul.mubr.f32.vlgmr.msra.gmra.mrb[24].mxu1 %v8770_v14  ;;  %v3357_v28 = vld [vmem:[#allocation5 + $0x128] sm:$0xff]  ;;  %v8831_v59 = vpack.c.bf16 %v3358_v25, %v3354_v13  ;;  %v3383_v13 = vld [vmem:[#allocation5 + $0x1f8] sm:$0xff]  ;;  %v3376_v25 = vld [vmem:[#allocation5 + $0x1c0] sm:$0xff] }
 0x3f0   :  { %3448 = vmatprep.mubr.f32.mxu0 %v9536_v38  ;;  %3519 = vmatprep.mubr.f32.mxu1 %v9536_v38  ;;  %v8824_v41 = vpack.c.bf16 %v3357_v28, %v3353_v4  ;;  %v3374_v4 = vld [vmem:[#allocation5 + $0x1b0] sm:$0xff]  ;;  %v8862_v5 = vpack.c.bf16 %v3383_v13, %v3379_v30  ;;  %v8864_v19 = vpack.c.bf16 %v3380_v47, %v3376_v25 }
 0x3f1   :  { %6093 = vmatpush1.bf16.msra.mxu0 %v8780_v34  ;;  %6125 = vmatpush1.bf16.msra.mxu1 %v8783_v32  ;;  %v8855_v28 = vpack.c.bf16 %v3374_v4, %v3370_v29 }
 0x3f2   :  { %6095 = vmatprep.subr.bf16.mxu0 %v8788_v37  ;;  %6127 = vmatprep.subr.bf16.mxu1 %v8790_v2 }
 0x3f5   :  { %6097 = vmatpush1.bf16.msra.mxu0 %v8792_v18  ;;  %6129 = vmatpush1.bf16.msra.mxu1 %v8795_v35 }
 0x3f6   :  { %6099 = vmatprep.subr.bf16.mxu0 %v8800_v53  ;;  %6131 = vmatprep.subr.bf16.mxu1 %v8802_v33 }
 0x3f9   :  { %6101 = vmatpush1.bf16.msra.mxu0 %v8804_v3  ;;  %6133 = vmatpush1.bf16.msra.mxu1 %v8807_v56 }
 0x3fa   :  { %6103 = vmatprep.subr.bf16.mxu0 %v8812_v27  ;;  %6135 = vmatprep.subr.bf16.mxu1 %v8814_v50 }
 0x3fd   :  { %6105 = vmatpush1.bf16.msra.mxu0 %v8816_v61  ;;  %6137 = vmatpush1.bf16.msra.mxu1 %v8819_v1 }
 0x3fe   :  { %6107 = vmatprep.subr.bf16.mxu0 %v8824_v41  ;;  %6139 = vmatprep.subr.bf16.mxu1 %v8826_v7 }
 0x401   :  { %6109 = vmatpush1.bf16.msra.mxu0 %v8828_v40  ;;  %6141 = vmatpush1.bf16.msra.mxu1 %v8831_v59 }
 0x402   :  { %6111 = vmatprep.subr.bf16.mxu0 %v8836_v0  ;;  %6143 = vmatprep.subr.bf16.mxu1 %v8838_v43 }
 0x405   :  { %6113 = vmatpush1.bf16.msra.mxu0 %v8840_v8  ;;  %6145 = vmatpush1.bf16.msra.mxu1 %v8843_v48 }
 0x406   :  { %6115 = vmatprep.subr.bf16.mxu0 %v8848_v22  ;;  %6147 = vmatprep.subr.bf16.mxu1 %v8850_v45 }
 0x409   :  { %6117 = vmatpush1.bf16.msra.mxu0 %v8852_v21  ;;  %6149 = vmatpush1.bf16.msra.mxu1 %v8855_v28 }
 0x40a   :  { %6119 = vmatprep.subr.bf16.mxu0 %v8860_v60  ;;  %6151 = vmatprep.subr.bf16.mxu1 %v8862_v5 }
 0x40d   :  { %6121 = vmatpush1.bf16.msra.mxu0 %v8864_v19  ;;  %6153 = vmatpush1.bf16.msra.mxu1 %v8867_v31 }
 0x40e   :  { %6155 = vmatprep.subr.bf16.mxu0 %v8872_v15  ;;  %6187 = vmatprep.subr.bf16.mxu1 %v8874_v6 }
 0x4a2   :  { %v2972_v17 = vpop.f32.mrb[6].mxu0  ;;  %v3043_v20 = vpop.f32.mrb[6].mxu1 }
 0x4a3   :  { %v6608_v29 = vadd.f32 %v2972_v17, %v8392_v57  ;;  %v2974_v4 = vpop.f32.mrb[7].mxu0  ;;  %v3045_v23 = vpop.f32.mrb[7].mxu1  ;;  %v6624_v11 = vadd.f32 %v3043_v20, %v9575_v10  ;;  %v3547_v10 = vld [vmem:[#allocation7 + $0x88] sm:$0xff] }
 0x4a4   :  { %v6609_v42 = vadd.f32 %v2974_v4, %v9573_v46  ;;  %v6625_v25 = vadd.f32 %v3045_v23, %v9574_v44  ;;  %v3551_v44 = vld [vmem:[#allocation7 + $0xa8] sm:$0xff]  ;;  %v3549_v46 = vld [vmem:[#allocation7 + $0x98] sm:$0xff] }
 0x4a5   :  { %v5292_v30 = vmul.f32 -1.442695, %v6608_v29 }
 0x4a6   :  { %v5293_v13 = vmul.f32 -1.442695, %v6609_v42  ;;  %v5294_v47 = vmul.f32 -1.442695, %v6625_v25 }
 0x4a7   :  { %6895 = vpow2.f32 %v5292_v30 }
 0x4a8   :  { %6897 = vpow2.f32 %v5293_v13 }
 0x4a9   :  { %6899 = vpow2.f32 %v5294_v47 }
 0x4aa   :  { %6901 = vtanh.f32 %v6624_v11 }
 0x4b1   :  { %v6896_v36 = vpop.eup %6895 }
 0x4b2   :  { %v6898_v9 = vpop.eup %6897  ;;  %v3265_v26 = vadd.f32 1.0, %v6896_v36 }
 0x4b3   :  { %v3271_v24 = vadd.f32 1.0, %v6898_v9  ;;  %v6900_v58 = vpop.eup %6899 }
 0x4b4   :  { %6903 = vrcp.f32 %v3265_v26  ;;  %v6902_v17 = vpop.eup %6901  ;;  %v3278_v30 = vadd.f32 1.0, %v6900_v58 }
 0x4b5   :  { %6905 = vrcp.f32 %v3271_v24 }
 0x4b6   :  { %6907 = vrcp.f32 %v3278_v30  ;;  %v3543_v30 = vld [vmem:[#allocation7 + $0x68] sm:$0xff] }
 0x4be   :  { %v6904_v4 = vpop.eup %6903 }
 0x4bf   :  { %v6906_v29 = vpop.eup %6905  ;;  %v3282_v42 = vmul.f32 %v6904_v4, %v6902_v17  ;;  %v3534_v17 = vld [vmem:[#allocation7 + $0x20] sm:$0xff]  ;;  %v3532_v4 = vld [vmem:[#allocation7 + $0x10] sm:$0xff] }
 0x4c0   :  { %v3281_v13 = vmul.f32 %v6906_v29, %v8723_v16  ;;  %v3530_v16 = vld [vmem:[#allocation7] sm:$0xff]  ;;  %v3536_v29 = vld [vmem:[#allocation7 + $0x30] sm:$0xff]  ;;  %v6908_v63 = vpop.eup %6907 }
 0x4c2   :  { %v8883_v23 = vadd.f32 %v3282_v42, %v3281_v13  ;;  %v3182_v25 = vpop.f32.mrb[24].mxu0  ;;  %v3253_v20 = vpop.f32.mrb[24].mxu1  ;;  %v3539_v42 = vld [vmem:[#allocation7 + $0x48] sm:$0xff]  ;;  %v3541_v13 = vld [vmem:[#allocation7 + $0x58] sm:$0xff] }
 0x4c3   :  { %v6642_v36 = vadd.f32 %v3182_v25, %v9577_v54  ;;  %v3184_v47 = vpop.f32.mrb[25].mxu0  ;;  %v3255_v11 = vpop.f32.mrb[25].mxu1  ;;  %v3545_v25 = vld [vmem:[#allocation7 + $0x78] sm:$0xff]  ;;  %v3540_v54 = vld [vmem:[#allocation7 + $0x50] sm:$0xff] }
 0x4c4   :  { %9596 = vst [vmem:[#allocation14_spill] sm:$0xff] %v8883_v23  ;;  %v6643_v9 = vadd.f32 %v3184_v47, %v9578_v55  ;;  %6909 = vtanh.f32 %v8883_v23  ;;  %v6659_v58 = vadd.f32 %v3255_v11, %v9579_v52  ;;  %v8889_v47 = vpack.c.bf16 %v3534_v17, %v3530_v16  ;;  %v3544_v23 = vld [vmem:[#allocation7 + $0x70] sm:$0xff] }
 0x4c5   :  { %v5295_v26 = vmul.f32 -1.442695, %v6642_v36  ;;  %v8891_v55 = vpack.c.bf16 %v3536_v29, %v3532_v4  ;;  %v3538_v36 = vld [vmem:[#allocation7 + $0x40] sm:$0xff]  ;;  %v8898_v52 = vpack.c.bf16 %v3545_v25, %v3541_v13  ;;  %v3552_v25 = vld [vmem:[#allocation7 + $0xb0] sm:$0xff] }
 0x4c6   :  { %v5296_v24 = vmul.f32 -1.442695, %v6643_v9  ;;  %v5297_v14 = vmul.f32 -1.442695, %v6659_v58  ;;  %9597 = vst [vmem:[#allocation16_spill] sm:$0xff] %v8889_v47  ;;  %v3542_v9 = vld [vmem:[#allocation7 + $0x60] sm:$0xff] }
 0x4c7   :  { %6911 = vpow2.f32 %v5295_v26  ;;  %9598 = vst [vmem:[#allocation17_spill] sm:$0xff] %v8891_v55  ;;  %v6658_v26 = vadd.f32 %v3253_v20, %v8416_v12  ;;  %9601 = vst [vmem:[#allocation20_spill] sm:$0xff] %v8898_v52  ;;  %v3553_v58 = vld [vmem:[#allocation7 + $0xb8] sm:$0xff]  ;;  %v3546_v20 = vld [vmem:[#allocation7 + $0x80] sm:$0xff] }
 0x4c8   :  { %6913 = vpow2.f32 %v5296_v24  ;;  %v8896_v24 = vpack.c.bf16 %v3543_v30, %v3539_v42  ;;  %v3550_v29 = vld [vmem:[#allocation7 + $0xa0] sm:$0xff]  ;;  %v8910_v30 = vpack.c.bf16 %v3551_v44, %v3547_v10  ;;  %v8912_v13 = vpack.c.bf16 %v3553_v58, %v3549_v46 }
 0x4c9   :  { %6915 = vpow2.f32 %v5297_v14  ;;  %v3548_v14 = vld [vmem:[#allocation7 + $0x90] sm:$0xff]  ;;  %v8918_v44 = vpack.c.bf16 %v3550_v29, %v3546_v20  ;;  %v3554_v10 = vld [vmem:[#allocation7 + $0xc0] sm:$0xff] }
 0x4ca   :  { %9600 = vst [vmem:[#allocation19_spill] sm:$0xff] %v8896_v24  ;;  %6917 = vtanh.f32 %v6658_v26  ;;  %9604 = vst [vmem:[#allocation31_spill] sm:$0xff] %v8910_v30  ;;  %v8920_v46 = vpack.c.bf16 %v3552_v25, %v3548_v14  ;;  %v3562_v14 = vld [vmem:[#allocation7 + $0x100] sm:$0xff] }
 0x4cb   :  { %9605 = vst [vmem:[#allocation32_spill] sm:$0xff] %v8912_v13  ;;  %9606 = vst [vmem:[#allocation33_spill] sm:$0xff] %v8918_v44  ;;  %v3566_v25 = vld [vmem:[#allocation7 + $0x120] sm:$0xff] }
 0x4cc   :  { %9607 = vst [vmem:[#allocation34_spill] sm:$0xff] %v8920_v46 }
 0x4ce   :  { %v6910_v49 = vpop.eup %6909 }
 0x4cf   :  { %v8894_v11 = vmul.f32 %v6910_v49, %v6908_v63  ;;  %v8904_v63 = vpack.c.bf16 %v3542_v9, %v3538_v36  ;;  %v8906_v49 = vpack.c.bf16 %v3544_v23, %v3540_v54  ;;  %v3559_v36 = vld [vmem:[#allocation7 + $0xe8] sm:$0xff]  ;;  %v3557_v9 = vld [vmem:[#allocation7 + $0xd8] sm:$0xff]  ;;  %v3558_v23 = vld [vmem:[#allocation7 + $0xe0] sm:$0xff] }
 0x4d0   :  { %v3561_v54 = vld [vmem:[#allocation7 + $0xf8] sm:$0xff]  ;;  %v8930_v20 = vpack.c.bf16 %v3558_v23, %v3554_v10 }
 0x4d1   :  { %9599 = vst [vmem:[#allocation18_spill] sm:$0xff] %v8894_v11  ;;  %v6912_v16 = vpop.eup %6911  ;;  %3449 = vmatmul.mubr.f32.vlgmr.msra.gmra.mrb[8].mxu0 %v8894_v11  ;;  %3520 = vmatmul.mubr.f32.vlgmr.msra.gmra.mrb[8].mxu1 %v8894_v11  ;;  %9602 = vst [vmem:[#allocation29_spill] sm:$0xff] %v8904_v63  ;;  %v8926_v58 = vpack.c.bf16 %v3561_v54, %v3557_v9  ;;  %v3567_v11 = vld [vmem:[#allocation7 + $0x128] sm:$0xff]  ;;  %v3564_v9 = vld [vmem:[#allocation7 + $0x110] sm:$0xff] }
 0x4d2   :  { %v6914_v17 = vpop.eup %6913  ;;  %v3289_v4 = vadd.f32 1.0, %v6912_v16  ;;  %6157 = vmatpush1.bf16.msra.mxu0 %v8889_v47  ;;  %6189 = vmatpush1.bf16.msra.mxu1 %v8891_v55  ;;  %9603 = vst [vmem:[#allocation30_spill] sm:$0xff] %v8906_v49  ;;  %v3555_v16 = vld [vmem:[#allocation7 + $0xc8] sm:$0xff]  ;;  %9610 = vst [vmem:[#allocation38_spill] sm:$0xff] %v8930_v20  ;;  %v3568_v54 = vld [vmem:[#allocation7 + $0x130] sm:$0xff] }
 0x4d3   :  { %v3295_v42 = vadd.f32 1.0, %v6914_v17  ;;  %6159 = vmatprep.subr.bf16.mxu0 %v8896_v24  ;;  %6191 = vmatprep.subr.bf16.mxu1 %v8898_v52  ;;  %v8924_v26 = vpack.c.bf16 %v3559_v36, %v3555_v16  ;;  %9609 = vst [vmem:[#allocation37_spill] sm:$0xff] %v8926_v58  ;;  %v3556_v17 = vld [vmem:[#allocation7 + $0xd0] sm:$0xff]  ;;  %v3577_v10 = vld [vmem:[#allocation7 + $0x178] sm:$0xff] }
 0x4d4   :  { %6919 = vrcp.f32 %v3289_v4  ;;  %3658 = vmatprep.mubr.f32.mxu0 %v9536_v38  ;;  %3729 = vmatprep.mubr.f32.mxu1 %v9536_v38  ;;  %v3560_v4 = vld [vmem:[#allocation7 + $0xf0] sm:$0xff] }
 0x4d5   :  { %6921 = vrcp.f32 %v3295_v42  ;;  %9608 = vst [vmem:[#allocation35_spill] sm:$0xff] %v8924_v26  ;;  %v3563_v42 = vld [vmem:[#allocation7 + $0x108] sm:$0xff]  ;;  %v8932_v29 = vpack.c.bf16 %v3560_v4, %v3556_v17  ;;  %v8942_v4 = vpack.c.bf16 %v3566_v25, %v3562_v14  ;;  %v3576_v55 = vld [vmem:[#allocation7 + $0x170] sm:$0xff] }
 0x4d6   :  { %6161 = vmatpush1.bf16.msra.mxu0 %v8904_v63  ;;  %6193 = vmatpush1.bf16.msra.mxu1 %v8906_v49  ;;  %v3565_v63 = vld [vmem:[#allocation7 + $0x118] sm:$0xff]  ;;  %v8936_v16 = vpack.c.bf16 %v3567_v11, %v3563_v42  ;;  %v3570_v11 = vld [vmem:[#allocation7 + $0x140] sm:$0xff]  ;;  %v3583_v25 = vld [vmem:[#allocation7 + $0x1a8] sm:$0xff] }
 0x4d7   :  { %6163 = vmatprep.subr.bf16.mxu0 %v8910_v30  ;;  %6195 = vmatprep.subr.bf16.mxu1 %v8912_v13  ;;  %v3569_v49 = vld [vmem:[#allocation7 + $0x138] sm:$0xff]  ;;  %9611 = vst [vmem:[#allocation39_spill] sm:$0xff] %v8932_v29  ;;  %v3571_v13 = vld [vmem:[#allocation7 + $0x148] sm:$0xff] }
 0x4d8   :  { %v8938_v36 = vpack.c.bf16 %v3569_v49, %v3565_v63  ;;  %v3575_v30 = vld [vmem:[#allocation7 + $0x168] sm:$0xff]  ;;  %v3574_v63 = vld [vmem:[#allocation7 + $0x160] sm:$0xff] }
 0x4d9   :  { %v8948_v52 = vpack.c.bf16 %v3575_v30, %v3571_v13  ;;  %v3578_v13 = vld [vmem:[#allocation7 + $0x180] sm:$0xff] }
 0x4da   :  { %6165 = vmatpush1.bf16.msra.mxu0 %v8918_v44  ;;  %6197 = vmatpush1.bf16.msra.mxu1 %v8920_v46  ;;  %v6916_v44 = vpop.eup %6915  ;;  %v3573_v46 = vld [vmem:[#allocation7 + $0x158] sm:$0xff] }
 0x4db   :  { %6167 = vmatprep.subr.bf16.mxu0 %v8924_v26  ;;  %6199 = vmatprep.subr.bf16.mxu1 %v8926_v58  ;;  %v6918_v23 = vpop.eup %6917  ;;  %v8944_v58 = vpack.c.bf16 %v3568_v54, %v3564_v9  ;;  %v3302_v26 = vadd.f32 1.0, %v6916_v44  ;;  %v8950_v24 = vpack.c.bf16 %v3577_v10, %v3573_v46  ;;  %v3581_v9 = vld [vmem:[#allocation7 + $0x198] sm:$0xff]  ;;  %v8957_v44 = vpack.c.bf16 %v3574_v63, %v3570_v11  ;;  %v3582_v46 = vld [vmem:[#allocation7 + $0x1a0] sm:$0xff] }
 0x4dc   :  { %v3585_v54 = vld [vmem:[#allocation7 + $0x1b8] sm:$0xff] }
 0x4dd   :  { %6923 = vrcp.f32 %v3302_v26  ;;  %v8965_v10 = vpack.c.bf16 %v3585_v54, %v3581_v9  ;;  %v3593_v11 = vld [vmem:[#allocation7 + $0x1f8] sm:$0xff]  ;;  %v3588_v9 = vld [vmem:[#allocation7 + $0x1d0] sm:$0xff] }
 0x4de   :  { %v6920_v17 = vpop.eup %6919  ;;  %6169 = vmatpush1.bf16.msra.mxu0 %v8930_v20  ;;  %6201 = vmatpush1.bf16.msra.mxu1 %v8932_v29  ;;  %v3572_v20 = vld [vmem:[#allocation7 + $0x150] sm:$0xff]  ;;  %v3579_v29 = vld [vmem:[#allocation7 + $0x188] sm:$0xff] }
 0x4df   :  { %v6922_v49 = vpop.eup %6921  ;;  %v3306_v42 = vmul.f32 %v6920_v17, %v6918_v23  ;;  %6171 = vmatprep.subr.bf16.mxu0 %v8936_v16  ;;  %6203 = vmatprep.subr.bf16.mxu1 %v8938_v36  ;;  %v8959_v30 = vpack.c.bf16 %v3576_v55, %v3572_v20  ;;  %v3580_v23 = vld [vmem:[#allocation7 + $0x190] sm:$0xff]  ;;  %v8970_v55 = vpack.c.bf16 %v3582_v46, %v3578_v13  ;;  %v3586_v20 = vld [vmem:[#allocation7 + $0x1c0] sm:$0xff] }
 0x4e0   :  { %v3305_v14 = vmul.f32 %v6922_v49, %v8753_v62  ;;  %v8963_v62 = vpack.c.bf16 %v3583_v25, %v3579_v29  ;;  %v3584_v17 = vld [vmem:[#allocation7 + $0x1b0] sm:$0xff]  ;;  %v3587_v49 = vld [vmem:[#allocation7 + $0x1c8] sm:$0xff]  ;;  %v3590_v25 = vld [vmem:[#allocation7 + $0x1e0] sm:$0xff] }
 0x4e1   :  { %v8972_v26 = vpack.c.bf16 %v3584_v17, %v3580_v23  ;;  %v3592_v54 = vld [vmem:[#allocation7 + $0x1f0] sm:$0xff]  ;;  %v8982_v13 = vpack.c.bf16 %v3590_v25, %v3586_v20  ;;  %v9618_v20 = vld [vmem:[#allocation27_spill] sm:$0xff] }
 0x4e2   :  { %v8953_v47 = vadd.f32 %v3306_v42, %v3305_v14  ;;  %6173 = vmatpush1.bf16.msra.mxu0 %v8942_v4  ;;  %6205 = vmatpush1.bf16.msra.mxu1 %v8944_v58  ;;  %v3591_v42 = vld [vmem:[#allocation7 + $0x1e8] sm:$0xff]  ;;  %v3589_v14 = vld [vmem:[#allocation7 + $0x1d8] sm:$0xff]  ;;  %v8984_v46 = vpack.c.bf16 %v3592_v54, %v3588_v9 }
 0x4e3   :  { %6175 = vmatprep.subr.bf16.mxu0 %v8948_v52  ;;  %6207 = vmatprep.subr.bf16.mxu1 %v8950_v24  ;;  %v8976_v29 = vpack.c.bf16 %v3591_v42, %v3587_v49  ;;  %v8978_v63 = vpack.c.bf16 %v3593_v11, %v3589_v14 }
 0x4e4   :  { %6925 = vtanh.f32 %v8953_v47 }
 0x4e6   :  { %6177 = vmatpush1.bf16.msra.mxu0 %v8957_v44  ;;  %6209 = vmatpush1.bf16.msra.mxu1 %v8959_v30 }
 0x4e7   :  { %6179 = vmatprep.subr.bf16.mxu0 %v8963_v62  ;;  %6211 = vmatprep.subr.bf16.mxu1 %v8965_v10  ;;  %v6924_v23 = vpop.eup %6923 }
 0x4ea   :  { %6181 = vmatpush1.bf16.msra.mxu0 %v8970_v55  ;;  %6213 = vmatpush1.bf16.msra.mxu1 %v8972_v26 }
 0x4eb   :  { %6183 = vmatprep.subr.bf16.mxu0 %v8976_v29  ;;  %6215 = vmatprep.subr.bf16.mxu1 %v8978_v63 }
 0x4ee   :  { %v6926_v17 = vpop.eup %6925  ;;  %6185 = vmatpush1.bf16.msra.mxu0 %v8982_v13  ;;  %6217 = vmatpush1.bf16.msra.mxu1 %v8984_v46 }
 0x4ef   :  { %v8990_v49 = vmul.f32 %v6926_v17, %v6924_v23  ;;  %6219 = vmatprep.subr.bf16.mxu0 %v8776_v51  ;;  %6251 = vmatprep.subr.bf16.mxu1 %v8778_v39 }
 0x4f1   :  { %3659 = vmatmul.mubr.f32.vlgmr.msra.gmra.mrb[22].mxu0 %v8990_v49  ;;  %3730 = vmatmul.mubr.f32.vlgmr.msra.gmra.mrb[22].mxu1 %v8990_v49 }
 0x4f2   :  { %6221 = vmatpush1.bf16.msra.mxu0 %v8780_v34  ;;  %6253 = vmatpush1.bf16.msra.mxu1 %v8783_v32 }
 0x4f3   :  { %6223 = vmatprep.subr.bf16.mxu0 %v8788_v37  ;;  %6255 = vmatprep.subr.bf16.mxu1 %v8790_v2  ;;  %v9612_v2 = vld [vmem:[#allocation22_spill] sm:$0xff] }
 0x4f4   :  { %3926 = vmatprep.mubr.f32.mxu0 %v9536_v38  ;;  %3997 = vmatprep.mubr.f32.mxu1 %v9536_v38 }
 0x4f6   :  { %6225 = vmatpush1.bf16.msra.mxu0 %v8792_v18  ;;  %6257 = vmatpush1.bf16.msra.mxu1 %v8795_v35 }
 0x4f7   :  { %6227 = vmatprep.subr.bf16.mxu0 %v8800_v53  ;;  %6259 = vmatprep.subr.bf16.mxu1 %v8802_v33  ;;  %v9613_v33 = vld [vmem:[#allocation23_spill] sm:$0xff] }
 0x4fa   :  { %6229 = vmatpush1.bf16.msra.mxu0 %v8804_v3  ;;  %6261 = vmatpush1.bf16.msra.mxu1 %v8807_v56 }
 0x4fb   :  { %6231 = vmatprep.subr.bf16.mxu0 %v8812_v27  ;;  %6263 = vmatprep.subr.bf16.mxu1 %v8814_v50  ;;  %v9614_v27 = vld [vmem:[#allocation24_spill] sm:$0xff] }
 0x4fe   :  { %6233 = vmatpush1.bf16.msra.mxu0 %v8816_v61  ;;  %6265 = vmatpush1.bf16.msra.mxu1 %v8819_v1 }
 0x4ff   :  { %6235 = vmatprep.subr.bf16.mxu0 %v8824_v41  ;;  %6267 = vmatprep.subr.bf16.mxu1 %v8826_v7 }
 0x502   :  { %6237 = vmatpush1.bf16.msra.mxu0 %v8828_v40  ;;  %6269 = vmatpush1.bf16.msra.mxu1 %v8831_v59 }
 0x503   :  { %6239 = vmatprep.subr.bf16.mxu0 %v8836_v0  ;;  %6271 = vmatprep.subr.bf16.mxu1 %v8838_v43 }
 0x506   :  { %6241 = vmatpush1.bf16.msra.mxu0 %v8840_v8  ;;  %6273 = vmatpush1.bf16.msra.mxu1 %v8843_v48 }
 0x507   :  { %6243 = vmatprep.subr.bf16.mxu0 %v8848_v22  ;;  %6275 = vmatprep.subr.bf16.mxu1 %v8850_v45  ;;  %v9615_v22 = vld [vmem:[#allocation14_spill] sm:$0xff] }
 0x50a   :  { %6245 = vmatpush1.bf16.msra.mxu0 %v8852_v21  ;;  %6277 = vmatpush1.bf16.msra.mxu1 %v8855_v28 }
 0x50b   :  { %6247 = vmatprep.subr.bf16.mxu0 %v8860_v60  ;;  %6279 = vmatprep.subr.bf16.mxu1 %v8862_v5  ;;  %v9616_v5 = vld [vmem:[#allocation25_spill] sm:$0xff] }
 0x50e   :  { %6249 = vmatpush1.bf16.msra.mxu0 %v8864_v19  ;;  %6281 = vmatpush1.bf16.msra.mxu1 %v8867_v31 }
 0x50f   :  { %6283 = vmatprep.subr.bf16.mxu0 %v8872_v15  ;;  %6315 = vmatprep.subr.bf16.mxu1 %v8874_v6  ;;  %v9617_v6 = vld [vmem:[#allocation26_spill] sm:$0xff] }
 0x5a4   :  { %v3450_v51 = vpop.f32.mrb[8].mxu0  ;;  %v3521_v39 = vpop.f32.mrb[8].mxu1 }
 0x5a5   :  { %v6610_v34 = vadd.f32 %v3450_v51, %v8392_v57  ;;  %v3452_v32 = vpop.f32.mrb[9].mxu0  ;;  %v3523_v37 = vpop.f32.mrb[9].mxu1  ;;  %v6626_v50 = vadd.f32 %v3521_v39, %v9614_v27 }
 0x5a6   :  { %v6611_v18 = vadd.f32 %v3452_v32, %v9612_v2  ;;  %v6627_v3 = vadd.f32 %v3523_v37, %v9613_v33 }
 0x5a7   :  { %v5298_v35 = vmul.f32 -1.442695, %v6610_v34 }
 0x5a8   :  { %v5299_v53 = vmul.f32 -1.442695, %v6611_v18  ;;  %v5300_v56 = vmul.f32 -1.442695, %v6627_v3  ;;  %v9619_v18 = vld [vmem:[#allocation16_spill] sm:$0xff]  ;;  %v9621_v3 = vld [vmem:[#allocation19_spill] sm:$0xff] }
 0x5a9   :  { %6927 = vpow2.f32 %v5298_v35  ;;  %v9620_v35 = vld [vmem:[#allocation17_spill] sm:$0xff] }
 0x5aa   :  { %6929 = vpow2.f32 %v5299_v53 }
 0x5ab   :  { %6931 = vpow2.f32 %v5300_v56  ;;  %v9622_v56 = vld [vmem:[#allocation20_spill] sm:$0xff] }
 0x5ac   :  { %6933 = vtanh.f32 %v6626_v50  ;;  %v9624_v50 = vld [vmem:[#allocation30_spill] sm:$0xff] }
 0x5b3   :  { %v6928_v61 = vpop.eup %6927 }
 0x5b4   :  { %v6930_v1 = vpop.eup %6929  ;;  %v3743_v41 = vadd.f32 1.0, %v6928_v61  ;;  %v9625_v61 = vld [vmem:[#allocation31_spill] sm:$0xff] }
 0x5b5   :  { %v3749_v7 = vadd.f32 1.0, %v6930_v1  ;;  %v6932_v40 = vpop.eup %6931  ;;  %v9626_v1 = vld [vmem:[#allocation32_spill] sm:$0xff] }
 0x5b6   :  { %6935 = vrcp.f32 %v3743_v41  ;;  %v6934_v59 = vpop.eup %6933  ;;  %v3756_v48 = vadd.f32 1.0, %v6932_v40  ;;  %v9627_v41 = vld [vmem:[#allocation33_spill] sm:$0xff]  ;;  %v9629_v40 = vld [vmem:[#allocation35_spill] sm:$0xff] }
 0x5b7   :  { %6937 = vrcp.f32 %v3749_v7  ;;  %v9628_v7 = vld [vmem:[#allocation34_spill] sm:$0xff] }
 0x5b8   :  { %6939 = vrcp.f32 %v3756_v48  ;;  %v9631_v48 = vld [vmem:[#allocation38_spill] sm:$0xff] }
 0x5c0   :  { %v6936_v0 = vpop.eup %6935 }
 0x5c1   :  { %v6938_v43 = vpop.eup %6937  ;;  %v3760_v8 = vmul.f32 %v6936_v0, %v6934_v59  ;;  %v9630_v59 = vld [vmem:[#allocation37_spill] sm:$0xff] }
 0x5c2   :  { %v3759_v45 = vmul.f32 %v6938_v43, %v9615_v22  ;;  %v6940_v9 = vpop.eup %6939  ;;  %v9632_v22 = vld [vmem:[#allocation39_spill] sm:$0xff] }
 0x5c4   :  { %v9035_v21 = vadd.f32 %v3760_v8, %v3759_v45  ;;  %v3660_v28 = vpop.f32.mrb[22].mxu0  ;;  %v3731_v60 = vpop.f32.mrb[22].mxu1 }
 0x5c5   :  { %v6640_v19 = vadd.f32 %v3660_v28, %v9616_v5  ;;  %v3662_v31 = vpop.f32.mrb[23].mxu0  ;;  %v3733_v15 = vpop.f32.mrb[23].mxu1  ;;  %v6656_v17 = vadd.f32 %v3731_v60, %v8416_v12 }
 0x5c6   :  { %v6641_v42 = vadd.f32 %v3662_v31, %v9617_v6  ;;  %6941 = vtanh.f32 %v9035_v21  ;;  %v6657_v25 = vadd.f32 %v3733_v15, %v9618_v20  ;;  %v4285_v15 = vld [vmem:[#allocation5 + $0x48] sm:$0xff] }
 0x5c7   :  { %v5301_v14 = vmul.f32 -1.442695, %v6640_v19 }
 0x5c8   :  { %v5302_v11 = vmul.f32 -1.442695, %v6641_v42  ;;  %v5303_v23 = vmul.f32 -1.442695, %v6657_v25  ;;  %v4289_v42 = vld [vmem:[#allocation5 + $0x68] sm:$0xff]  ;;  %v4291_v25 = vld [vmem:[#allocation5 + $0x78] sm:$0xff] }
 0x5c9   :  { %6943 = vpow2.f32 %v5301_v14  ;;  %v4287_v14 = vld [vmem:[#allocation5 + $0x58] sm:$0xff] }
 0x5ca   :  { %6945 = vpow2.f32 %v5302_v11  ;;  %v9100_v11 = vpack.c.bf16 %v4289_v42, %v4285_v15  ;;  %v4321_v15 = vld [vmem:[#allocation5 + $0x168] sm:$0xff]  ;;  %v4319_v42 = vld [vmem:[#allocation5 + $0x158] sm:$0xff] }
 0x5cb   :  { %6947 = vpow2.f32 %v5303_v23  ;;  %v9102_v23 = vpack.c.bf16 %v4291_v25, %v4287_v14  ;;  %v4323_v25 = vld [vmem:[#allocation5 + $0x178] sm:$0xff] }
 0x5cc   :  { %6949 = vtanh.f32 %v6656_v17 }
 0x5d0   :  { %v6942_v54 = vpop.eup %6941 }
 0x5d1   :  { %v3763_v51 = vmul.f32 %v6942_v54, %v6940_v9  ;;  %v4284_v9 = vld [vmem:[#allocation5 + $0x40] sm:$0xff] }
 0x5d2   :  { %v4288_v54 = vld [vmem:[#allocation5 + $0x60] sm:$0xff] }
 0x5d3   :  { %v6944_v39 = vpop.eup %6943  ;;  %3927 = vmatmul.mubr.f32.vlgmr.msra.gmra.mrb[10].mxu0 %v3763_v51  ;;  %v5248_v34 = vadd.f32 %v3763_v51, %v8990_v49  ;;  %3998 = vmatmul.mubr.f32.vlgmr.msra.gmra.mrb[10].mxu1 %v3763_v51  ;;  %v9623_v49 = vld [vmem:[#allocation29_spill] sm:$0xff]  ;;  %v9104_v17 = vpack.c.bf16 %v4288_v54, %v4284_v9  ;;  %v4316_v9 = vld [vmem:[#allocation5 + $0x140] sm:$0xff] }
 0x5d4   :  { %v6946_v32 = vpop.eup %6945  ;;  %v3767_v37 = vadd.f32 1.0, %v6944_v39  ;;  %6285 = vmatpush1.bf16.msra.mxu0 %v9619_v18  ;;  %6317 = vmatpush1.bf16.msra.mxu1 %v9620_v35  ;;  %v4286_v51 = vld [vmem:[#allocation5 + $0x50] sm:$0xff]  ;;  %v4295_v18 = vld [vmem:[#allocation5 + $0x98] sm:$0xff]  ;;  %v4320_v54 = vld [vmem:[#allocation5 + $0x160] sm:$0xff] }
 0x5d5   :  { %v3773_v53 = vadd.f32 1.0, %v6946_v32  ;;  %5256 = vst [vmem:[%s9434_s6 + $0x20] sm:$0xff] %v5248_v34  ;;  %6287 = vmatprep.subr.bf16.mxu0 %v9621_v3  ;;  %6319 = vmatprep.subr.bf16.mxu1 %v9622_v56  ;;  %v6948_v0 = vpop.eup %6947  ;;  %v4290_v39 = vld [vmem:[#allocation5 + $0x70] sm:$0xff]  ;;  %v4293_v32 = vld [vmem:[#allocation5 + $0x88] sm:$0xff]  ;;  %v4292_v3 = vld [vmem:[#allocation5 + $0x80] sm:$0xff] }
 0x5d6   :  { %6951 = vrcp.f32 %v3767_v37  ;;  %4136 = vmatprep.mubr.f32.mxu0 %v9536_v38  ;;  %4207 = vmatprep.mubr.f32.mxu1 %v9536_v38  ;;  %v6950_v43 = vpop.eup %6949  ;;  %v3780_v60 = vadd.f32 1.0, %v6948_v0  ;;  %v9107_v34 = vpack.c.bf16 %v4290_v39, %v4286_v51  ;;  %v4297_v37 = vld [vmem:[#allocation5 + $0xa8] sm:$0xff]  ;;  %v4296_v56 = vld [vmem:[#allocation5 + $0xa0] sm:$0xff]  ;;  %v9150_v51 = vpack.c.bf16 %v4323_v25, %v4319_v42 }
 0x5d7   :  { %6953 = vrcp.f32 %v3773_v53  ;;  %v9112_v35 = vpack.c.bf16 %v4297_v37, %v4293_v32  ;;  %v4299_v53 = vld [vmem:[#allocation5 + $0xb8] sm:$0xff]  ;;  %v9152_v39 = vpack.c.bf16 %v4320_v54, %v4316_v9  ;;  %v4318_v32 = vld [vmem:[#allocation5 + $0x150] sm:$0xff]  ;;  %v4487_v25 = vld [vmem:[#allocation7 + $0x8] sm:$0xff] }
 0x5d8   :  { %6289 = vmatpush1.bf16.msra.mxu0 %v9623_v49  ;;  %6321 = vmatpush1.bf16.msra.mxu1 %v9624_v50  ;;  %6955 = vrcp.f32 %v3780_v60  ;;  %v9114_v49 = vpack.c.bf16 %v4299_v53, %v4295_v18  ;;  %v9116_v50 = vpack.c.bf16 %v4296_v56, %v4292_v3  ;;  %v4306_v60 = vld [vmem:[#allocation5 + $0xf0] sm:$0xff]  ;;  %v4325_v53 = vld [vmem:[#allocation5 + $0x188] sm:$0xff]  ;;  %v4327_v56 = vld [vmem:[#allocation5 + $0x198] sm:$0xff] }
 0x5d9   :  { %6291 = vmatprep.subr.bf16.mxu0 %v9625_v61  ;;  %6323 = vmatprep.subr.bf16.mxu1 %v9626_v1  ;;  %v4294_v61 = vld [vmem:[#allocation5 + $0x90] sm:$0xff]  ;;  %v4329_v3 = vld [vmem:[#allocation5 + $0x1a8] sm:$0xff]  ;;  %v4489_v54 = vld [vmem:[#allocation7 + $0x18] sm:$0xff] }
 0x5da   :  { %v4298_v1 = vld [vmem:[#allocation5 + $0xb0] sm:$0xff]  ;;  %v4491_v9 = vld [vmem:[#allocation7 + $0x28] sm:$0xff] }
 0x5db   :  { %v4322_v37 = vld [vmem:[#allocation5 + $0x170] sm:$0xff] }
 0x5dc   :  { %6293 = vmatpush1.bf16.msra.mxu0 %v9627_v41  ;;  %6325 = vmatpush1.bf16.msra.mxu1 %v9628_v7  ;;  %v9119_v41 = vpack.c.bf16 %v4298_v1, %v4294_v61  ;;  %v4301_v7 = vld [vmem:[#allocation5 + $0xc8] sm:$0xff]  ;;  %v9155_v18 = vpack.c.bf16 %v4322_v37, %v4318_v32  ;;  %v9160_v61 = vpack.c.bf16 %v4329_v3, %v4325_v53  ;;  %v4331_v1 = vld [vmem:[#allocation5 + $0x1b8] sm:$0xff] }
 0x5dd   :  { %6295 = vmatprep.subr.bf16.mxu0 %v9629_v40  ;;  %6327 = vmatprep.subr.bf16.mxu1 %v9630_v59  ;;  %v4305_v40 = vld [vmem:[#allocation5 + $0xe8] sm:$0xff]  ;;  %v4303_v59 = vld [vmem:[#allocation5 + $0xd8] sm:$0xff]  ;;  %v9184_v32 = vpack.c.bf16 %v4491_v9, %v4487_v25 }
 0x5de   :  { %v9124_v0 = vpack.c.bf16 %v4305_v40, %v4301_v7  ;;  %v4324_v7 = vld [vmem:[#allocation5 + $0x180] sm:$0xff]  ;;  %v4493_v37 = vld [vmem:[#allocation7 + $0x38] sm:$0xff] }
 0x5df   :  { %v4328_v40 = vld [vmem:[#allocation5 + $0x1a0] sm:$0xff]  ;;  %v9186_v53 = vpack.c.bf16 %v4493_v37, %v4489_v54 }
 0x5e0   :  { %v6952_v8 = vpop.eup %6951  ;;  %6297 = vmatpush1.bf16.msra.mxu0 %v9631_v48  ;;  %6329 = vmatpush1.bf16.msra.mxu1 %v9632_v22  ;;  %v4304_v48 = vld [vmem:[#allocation5 + $0xe0] sm:$0xff] }
 0x5e1   :  { %v6954_v45 = vpop.eup %6953  ;;  %v3784_v28 = vmul.f32 %v6952_v8, %v6950_v43  ;;  %6299 = vmatprep.subr.bf16.mxu0 %v8936_v16  ;;  %6331 = vmatprep.subr.bf16.mxu1 %v8938_v36  ;;  %v4277_v36 = vld [vmem:[#allocation5 + $0x8] sm:$0xff]  ;;  %v4307_v43 = vld [vmem:[#allocation5 + $0xf8] sm:$0xff]  ;;  %v4300_v8 = vld [vmem:[#allocation5 + $0xc0] sm:$0xff] }
 0x5e2   :  { %v3783_v19 = vmul.f32 %v6954_v45, %v8953_v47  ;;  %v9126_v22 = vpack.c.bf16 %v4307_v43, %v4303_v59  ;;  %v9128_v45 = vpack.c.bf16 %v4304_v48, %v4300_v8  ;;  %v9162_v59 = vpack.c.bf16 %v4331_v1, %v4327_v56  ;;  %v4326_v8 = vld [vmem:[#allocation5 + $0x190] sm:$0xff] }
 0x5e3   :  { %v9164_v43 = vpack.c.bf16 %v4328_v40, %v4324_v7  ;;  %v4330_v48 = vld [vmem:[#allocation5 + $0x1b0] sm:$0xff] }
 0x5e4   :  { %v9065_v31 = vadd.f32 %v3784_v28, %v3783_v19  ;;  %6301 = vmatpush1.bf16.msra.mxu0 %v8942_v4  ;;  %6333 = vmatpush1.bf16.msra.mxu1 %v8944_v58  ;;  %v9633_v58 = vld [vmem:[#allocation18_spill] sm:$0xff]  ;;  %v4281_v4 = vld [vmem:[#allocation5 + $0x28] sm:$0xff]  ;;  %v4302_v28 = vld [vmem:[#allocation5 + $0xd0] sm:$0xff] }
 0x5e5   :  { %6303 = vmatprep.subr.bf16.mxu0 %v8948_v52  ;;  %6335 = vmatprep.subr.bf16.mxu1 %v8950_v24  ;;  %v6956_v52 = vpop.eup %6955  ;;  %v9131_v19 = vpack.c.bf16 %v4306_v60, %v4302_v28  ;;  %v9167_v28 = vpack.c.bf16 %v4330_v48, %v4326_v8  ;;  %v4333_v60 = vld [vmem:[#allocation5 + $0x1c8] sm:$0xff] }
 0x5e6   :  { %6957 = vtanh.f32 %v9065_v31 }
 0x5e8   :  { %6305 = vmatpush1.bf16.msra.mxu0 %v8957_v44  ;;  %6337 = vmatpush1.bf16.msra.mxu1 %v8959_v30  ;;  %v4279_v44 = vld [vmem:[#allocation5 + $0x18] sm:$0xff]  ;;  %v9088_v30 = vpack.c.bf16 %v4281_v4, %v4277_v36  ;;  %v4308_v36 = vld [vmem:[#allocation5 + $0x100] sm:$0xff] }
 0x5e9   :  { %6307 = vmatprep.subr.bf16.mxu0 %v8963_v62  ;;  %6339 = vmatprep.subr.bf16.mxu1 %v8965_v10  ;;  %v4283_v62 = vld [vmem:[#allocation5 + $0x38] sm:$0xff]  ;;  %v4276_v10 = vld [vmem:[#allocation5] sm:$0xff] }
 0x5ea   :  { %v4312_v4 = vld [vmem:[#allocation5 + $0x120] sm:$0xff] }
 0x5ec   :  { %6309 = vmatpush1.bf16.msra.mxu0 %v8970_v55  ;;  %6341 = vmatpush1.bf16.msra.mxu1 %v8972_v26  ;;  %v4280_v55 = vld [vmem:[#allocation5 + $0x20] sm:$0xff]  ;;  %v9090_v26 = vpack.c.bf16 %v4283_v62, %v4279_v44  ;;  %v9140_v62 = vpack.c.bf16 %v4312_v4, %v4308_v36 }
 0x5ed   :  { %6311 = vmatprep.subr.bf16.mxu0 %v8976_v29  ;;  %6343 = vmatprep.subr.bf16.mxu1 %v8978_v63  ;;  %v9092_v29 = vpack.c.bf16 %v4280_v55, %v4276_v10  ;;  %v4278_v63 = vld [vmem:[#allocation5 + $0x10] sm:$0xff]  ;;  %v4332_v36 = vld [vmem:[#allocation5 + $0x1c0] sm:$0xff] }
 0x5ee   :  { %v4310_v10 = vld [vmem:[#allocation5 + $0x110] sm:$0xff]  ;;  %v4336_v4 = vld [vmem:[#allocation5 + $0x1e0] sm:$0xff] }
 0x5ef   :  { %v4314_v55 = vld [vmem:[#allocation5 + $0x130] sm:$0xff] }
 0x5f0   :  { %v6958_v47 = vpop.eup %6957  ;;  %6313 = vmatpush1.bf16.msra.mxu0 %v8982_v13  ;;  %6345 = vmatpush1.bf16.msra.mxu1 %v8984_v46  ;;  %v4282_v13 = vld [vmem:[#allocation5 + $0x30] sm:$0xff] }
 0x5f1   :  { %v3787_v24 = vmul.f32 %v6958_v47, %v6956_v52  ;;  %6347 = vmatprep.subr.bf16.mxu0 %v9088_v30  ;;  %v9095_v46 = vpack.c.bf16 %v4282_v13, %v4278_v63  ;;  %6379 = vmatprep.subr.bf16.mxu1 %v9090_v26  ;;  %v4309_v52 = vld [vmem:[#allocation5 + $0x108] sm:$0xff]  ;;  %v9143_v63 = vpack.c.bf16 %v4314_v55, %v4310_v10 }
 0x5f2   :  { %v4313_v47 = vld [vmem:[#allocation5 + $0x128] sm:$0xff]  ;;  %v9176_v55 = vpack.c.bf16 %v4336_v4, %v4332_v36 }
 0x5f3   :  { %4137 = vmatmul.mubr.f32.vlgmr.msra.gmra.mrb[20].mxu0 %v3787_v24  ;;  %v5247_v16 = vadd.f32 %v3787_v24, %v9633_v58  ;;  %4208 = vmatmul.mubr.f32.vlgmr.msra.gmra.mrb[20].mxu1 %v3787_v24  ;;  %v4311_v24 = vld [vmem:[#allocation5 + $0x118] sm:$0xff]  ;;  %v9136_v58 = vpack.c.bf16 %v4313_v47, %v4309_v52  ;;  %v4317_v13 = vld [vmem:[#allocation5 + $0x148] sm:$0xff] }
 0x5f4   :  { %4404 = vmatprep.mubr.f32.mxu0 %v9536_v38  ;;  %4475 = vmatprep.mubr.f32.mxu1 %v9536_v38  ;;  %v9148_v14 = vpack.c.bf16 %v4321_v15, %v4317_v13  ;;  %v4337_v52 = vld [vmem:[#allocation5 + $0x1e8] sm:$0xff]  ;;  %v4335_v47 = vld [vmem:[#allocation5 + $0x1d8] sm:$0xff]  ;;  %v4334_v13 = vld [vmem:[#allocation5 + $0x1d0] sm:$0xff] }
 0x5f5   :  { %5255 = vst [vmem:[%s9434_s6 + $0x18] sm:$0xff] %v5247_v16  ;;  %6349 = vmatpush1.bf16.msra.mxu0 %v9092_v29  ;;  %6381 = vmatpush1.bf16.msra.mxu1 %v9095_v46  ;;  %v4315_v16 = vld [vmem:[#allocation5 + $0x138] sm:$0xff]  ;;  %v4338_v15 = vld [vmem:[#allocation5 + $0x1f0] sm:$0xff] }
 0x5f6   :  { %6351 = vmatprep.subr.bf16.mxu0 %v9100_v11  ;;  %6383 = vmatprep.subr.bf16.mxu1 %v9102_v23  ;;  %v9138_v44 = vpack.c.bf16 %v4315_v16, %v4311_v24  ;;  %v9172_v24 = vpack.c.bf16 %v4337_v52, %v4333_v60  ;;  %v4339_v16 = vld [vmem:[#allocation5 + $0x1f8] sm:$0xff]  ;;  %v9179_v42 = vpack.c.bf16 %v4338_v15, %v4334_v13 }
 0x5f7   :  { %v9174_v10 = vpack.c.bf16 %v4339_v16, %v4335_v47 }
 0x5f9   :  { %6353 = vmatpush1.bf16.msra.mxu0 %v9104_v17  ;;  %6385 = vmatpush1.bf16.msra.mxu1 %v9107_v34 }
 0x5fa   :  { %6355 = vmatprep.subr.bf16.mxu0 %v9112_v35  ;;  %6387 = vmatprep.subr.bf16.mxu1 %v9114_v49 }
 0x5fd   :  { %6357 = vmatpush1.bf16.msra.mxu0 %v9116_v50  ;;  %6389 = vmatpush1.bf16.msra.mxu1 %v9119_v41 }
 0x5fe   :  { %6359 = vmatprep.subr.bf16.mxu0 %v9124_v0  ;;  %6391 = vmatprep.subr.bf16.mxu1 %v9126_v22 }
 0x601   :  { %6361 = vmatpush1.bf16.msra.mxu0 %v9128_v45  ;;  %6393 = vmatpush1.bf16.msra.mxu1 %v9131_v19 }
 0x602   :  { %6363 = vmatprep.subr.bf16.mxu0 %v9136_v58  ;;  %6395 = vmatprep.subr.bf16.mxu1 %v9138_v44 }
 0x605   :  { %6365 = vmatpush1.bf16.msra.mxu0 %v9140_v62  ;;  %6397 = vmatpush1.bf16.msra.mxu1 %v9143_v63 }
 0x606   :  { %6367 = vmatprep.subr.bf16.mxu0 %v9148_v14  ;;  %6399 = vmatprep.subr.bf16.mxu1 %v9150_v51 }
 0x609   :  { %6369 = vmatpush1.bf16.msra.mxu0 %v9152_v39  ;;  %6401 = vmatpush1.bf16.msra.mxu1 %v9155_v18 }
 0x60a   :  { %6371 = vmatprep.subr.bf16.mxu0 %v9160_v61  ;;  %6403 = vmatprep.subr.bf16.mxu1 %v9162_v59 }
 0x60d   :  { %6373 = vmatpush1.bf16.msra.mxu0 %v9164_v43  ;;  %6405 = vmatpush1.bf16.msra.mxu1 %v9167_v28 }
 0x60e   :  { %6375 = vmatprep.subr.bf16.mxu0 %v9172_v24  ;;  %6407 = vmatprep.subr.bf16.mxu1 %v9174_v10 }
 0x611   :  { %6377 = vmatpush1.bf16.msra.mxu0 %v9176_v55  ;;  %6409 = vmatpush1.bf16.msra.mxu1 %v9179_v42 }
 0x612   :  { %6411 = vmatprep.subr.bf16.mxu0 %v9184_v32  ;;  %6443 = vmatprep.subr.bf16.mxu1 %v9186_v53 }
 0x6a6   :  { %v3928_v3 = vpop.f32.mrb[10].mxu0  ;;  %v3999_v56 = vpop.f32.mrb[10].mxu1 }
 0x6a7   :  { %v6612_v1 = vadd.f32 %v3928_v3, %v8392_v57  ;;  %v3930_v7 = vpop.f32.mrb[11].mxu0  ;;  %v4001_v40 = vpop.f32.mrb[11].mxu1  ;;  %v6628_v16 = vadd.f32 %v3999_v56, %v9614_v27  ;;  %v4503_v27 = vld [vmem:[#allocation7 + $0x88] sm:$0xff]  ;;  %v4509_v57 = vld [vmem:[#allocation7 + $0xb8] sm:$0xff] }
 0x6a8   :  { %v6613_v8 = vadd.f32 %v3930_v7, %v9612_v2  ;;  %v6629_v52 = vadd.f32 %v4001_v40, %v9613_v33  ;;  %v4507_v33 = vld [vmem:[#allocation7 + $0xa8] sm:$0xff]  ;;  %v4505_v2 = vld [vmem:[#allocation7 + $0x98] sm:$0xff] }
 0x6a9   :  { %v5304_v48 = vmul.f32 -1.442695, %v6612_v1 }
 0x6aa   :  { %v5305_v60 = vmul.f32 -1.442695, %v6613_v8  ;;  %v5306_v47 = vmul.f32 -1.442695, %v6629_v52 }
 0x6ab   :  { %6959 = vpow2.f32 %v5304_v48 }
 0x6ac   :  { %6961 = vpow2.f32 %v5305_v60 }
 0x6ad   :  { %6963 = vpow2.f32 %v5306_v47 }
 0x6ae   :  { %6965 = vtanh.f32 %v6628_v16 }
 0x6b5   :  { %v6960_v36 = vpop.eup %6959 }
 0x6b6   :  { %v6962_v4 = vpop.eup %6961  ;;  %v4221_v13 = vadd.f32 1.0, %v6960_v36 }
 0x6b7   :  { %v4227_v15 = vadd.f32 1.0, %v6962_v4  ;;  %v6964_v25 = vpop.eup %6963 }
 0x6b8   :  { %6967 = vrcp.f32 %v4221_v13  ;;  %v6966_v9 = vpop.eup %6965  ;;  %v4234_v1 = vadd.f32 1.0, %v6964_v25  ;;  %v4490_v13 = vld [vmem:[#allocation7 + $0x20] sm:$0xff]  ;;  %v4492_v25 = vld [vmem:[#allocation7 + $0x30] sm:$0xff] }
 0x6b9   :  { %6969 = vrcp.f32 %v4227_v15  ;;  %v4488_v15 = vld [vmem:[#allocation7 + $0x10] sm:$0xff] }
 0x6ba   :  { %6971 = vrcp.f32 %v4234_v1 }
 0x6c2   :  { %v6968_v54 = vpop.eup %6967 }
 0x6c3   :  { %v6970_v37 = vpop.eup %6969  ;;  %v4238_v3 = vmul.f32 %v6968_v54, %v6966_v9  ;;  %v4495_v9 = vld [vmem:[#allocation7 + $0x48] sm:$0xff] }
 0x6c4   :  { %v4237_v7 = vmul.f32 %v6970_v37, %v9035_v21  ;;  %v4486_v21 = vld [vmem:[#allocation7] sm:$0xff]  ;;  %v4499_v54 = vld [vmem:[#allocation7 + $0x68] sm:$0xff]  ;;  %v4497_v37 = vld [vmem:[#allocation7 + $0x58] sm:$0xff]  ;;  %v6972_v1 = vpop.eup %6971 }
 0x6c6   :  { %v9195_v40 = vadd.f32 %v4238_v3, %v4237_v7  ;;  %v4138_v8 = vpop.f32.mrb[20].mxu0  ;;  %v4209_v56 = vpop.f32.mrb[20].mxu1  ;;  %v4501_v3 = vld [vmem:[#allocation7 + $0x78] sm:$0xff] }
 0x6c7   :  { %v6638_v48 = vadd.f32 %v4138_v8, %v9616_v5  ;;  %v4140_v60 = vpop.f32.mrb[21].mxu0  ;;  %v4211_v52 = vpop.f32.mrb[21].mxu1  ;;  %v4496_v5 = vld [vmem:[#allocation7 + $0x50] sm:$0xff] }
 0x6c8   :  { %9634 = vst [vmem:[#allocation14_spill] sm:$0xff] %v9195_v40  ;;  %v6639_v47 = vadd.f32 %v4140_v60, %v9617_v6  ;;  %6973 = vtanh.f32 %v9195_v40  ;;  %v6655_v4 = vadd.f32 %v4211_v52, %v9618_v20  ;;  %v9201_v60 = vpack.c.bf16 %v4490_v13, %v4486_v21  ;;  %v4500_v40 = vld [vmem:[#allocation7 + $0x70] sm:$0xff] }
 0x6c9   :  { %v5307_v16 = vmul.f32 -1.442695, %v6638_v48  ;;  %v9203_v6 = vpack.c.bf16 %v4492_v25, %v4488_v15  ;;  %v4494_v48 = vld [vmem:[#allocation7 + $0x40] sm:$0xff]  ;;  %v9208_v20 = vpack.c.bf16 %v4501_v3, %v4497_v37  ;;  %v9638_v21 = vld [vmem:[#allocation13_spill] sm:$0xff] }
 0x6ca   :  { %v5308_v36 = vmul.f32 -1.442695, %v6639_v47  ;;  %v5309_v8 = vmul.f32 -1.442695, %v6655_v4  ;;  %v4498_v47 = vld [vmem:[#allocation7 + $0x60] sm:$0xff] }
 0x6cb   :  { %6975 = vpow2.f32 %v5307_v16  ;;  %9635 = vst [vmem:[#allocation16_spill] sm:$0xff] %v9203_v6  ;;  %v6654_v16 = vadd.f32 %v4209_v56, %v8416_v12  ;;  %9637 = vst [vmem:[#allocation19_spill] sm:$0xff] %v9208_v20  ;;  %v9213_v56 = vpack.c.bf16 %v4498_v47, %v4494_v48  ;;  %v4506_v37 = vld [vmem:[#allocation7 + $0xa0] sm:$0xff]  ;;  %v4508_v48 = vld [vmem:[#allocation7 + $0xb0] sm:$0xff] }
 0x6cc   :  { %6977 = vpow2.f32 %v5308_v36  ;;  %v9206_v36 = vpack.c.bf16 %v4499_v54, %v4495_v9  ;;  %v9215_v9 = vpack.c.bf16 %v4500_v40, %v4496_v5  ;;  %v4502_v54 = vld [vmem:[#allocation7 + $0x80] sm:$0xff]  ;;  %v4511_v5 = vld [vmem:[#allocation7 + $0xc8] sm:$0xff]  ;;  %v4513_v47 = vld [vmem:[#allocation7 + $0xd8] sm:$0xff] }
 0x6cd   :  { %6979 = vpow2.f32 %v5309_v8  ;;  %9639 = vst [vmem:[#allocation20_spill] sm:$0xff] %v9213_v56  ;;  %v4504_v8 = vld [vmem:[#allocation7 + $0x90] sm:$0xff]  ;;  %v4515_v40 = vld [vmem:[#allocation7 + $0xe8] sm:$0xff] }
 0x6ce   :  { %9636 = vst [vmem:[#allocation17_spill] sm:$0xff] %v9206_v36  ;;  %9640 = vst [vmem:[#allocation29_spill] sm:$0xff] %v9215_v9  ;;  %6981 = vtanh.f32 %v6654_v16  ;;  %v4517_v16 = vld [vmem:[#allocation7 + $0xf8] sm:$0xff] }
 0x6d2   :  { %v6974_v7 = vpop.eup %6973 }
 0x6d3   :  { %v4241_v52 = vmul.f32 %v6974_v7, %v6972_v1  ;;  %v9222_v1 = vpack.c.bf16 %v4507_v33, %v4503_v27  ;;  %v9224_v7 = vpack.c.bf16 %v4509_v57, %v4505_v2  ;;  %v9230_v33 = vpack.c.bf16 %v4506_v37, %v4502_v54  ;;  %v4510_v2 = vld [vmem:[#allocation7 + $0xc0] sm:$0xff] }
 0x6d4   :  { %v9232_v57 = vpack.c.bf16 %v4508_v48, %v4504_v8  ;;  %v4514_v27 = vld [vmem:[#allocation7 + $0xe0] sm:$0xff] }
 0x6d5   :  { %v6976_v4 = vpop.eup %6975  ;;  %4405 = vmatmul.mubr.f32.vlgmr.msra.gmra.mrb[12].mxu0 %v4241_v52  ;;  %v5249_v13 = vadd.f32 %v4241_v52, %v9638_v21  ;;  %4476 = vmatmul.mubr.f32.vlgmr.msra.gmra.mrb[12].mxu1 %v4241_v52  ;;  %9641 = vst [vmem:[#allocation30_spill] sm:$0xff] %v9222_v1  ;;  %9642 = vst [vmem:[#allocation31_spill] sm:$0xff] %v9224_v7  ;;  %v9236_v52 = vpack.c.bf16 %v4515_v40, %v4511_v5  ;;  %v4512_v21 = vld [vmem:[#allocation7 + $0xd0] sm:$0xff]  ;;  %v4518_v8 = vld [vmem:[#allocation7 + $0x100] sm:$0xff] }
 0x6d6   :  { %v6978_v15 = vpop.eup %6977  ;;  %v4245_v25 = vadd.f32 1.0, %v6976_v4  ;;  %6413 = vmatpush1.bf16.msra.mxu0 %v9201_v60  ;;  %6445 = vmatpush1.bf16.msra.mxu1 %v9203_v6  ;;  %9643 = vst [vmem:[#allocation32_spill] sm:$0xff] %v9230_v33  ;;  %9644 = vst [vmem:[#allocation33_spill] sm:$0xff] %v9232_v57  ;;  %v9238_v4 = vpack.c.bf16 %v4517_v16, %v4513_v47  ;;  %v9242_v54 = vpack.c.bf16 %v4514_v27, %v4510_v2  ;;  %v4522_v48 = vld [vmem:[#allocation7 + $0x120] sm:$0xff]  ;;  %v4520_v47 = vld [vmem:[#allocation7 + $0x110] sm:$0xff] }
 0x6d7   :  { %v4251_v3 = vadd.f32 1.0, %v6978_v15  ;;  %5257 = vst [vmem:[%s9434_s6 + $0x28] sm:$0xff] %v5249_v13  ;;  %6415 = vmatprep.subr.bf16.mxu0 %v9206_v36  ;;  %6447 = vmatprep.subr.bf16.mxu1 %v9208_v20  ;;  %9645 = vst [vmem:[#allocation34_spill] sm:$0xff] %v9236_v52  ;;  %v4516_v13 = vld [vmem:[#allocation7 + $0xf0] sm:$0xff]  ;;  %v4519_v15 = vld [vmem:[#allocation7 + $0x108] sm:$0xff] }
 0x6d8   :  { %6983 = vrcp.f32 %v4245_v25  ;;  %4614 = vmatprep.mubr.f32.mxu0 %v9536_v38  ;;  %4685 = vmatprep.mubr.f32.mxu1 %v9536_v38  ;;  %9646 = vst [vmem:[#allocation35_spill] sm:$0xff] %v9238_v4  ;;  %v4523_v25 = vld [vmem:[#allocation7 + $0x128] sm:$0xff]  ;;  %9647 = vst [vmem:[#allocation37_spill] sm:$0xff] %v9242_v54  ;;  %v9244_v37 = vpack.c.bf16 %v4516_v13, %v4512_v21  ;;  %v4524_v16 = vld [vmem:[#allocation7 + $0x130] sm:$0xff]  ;;  %v9254_v13 = vpack.c.bf16 %v4522_v48, %v4518_v8 }
 0x6d9   :  { %6985 = vrcp.f32 %v4251_v3  ;;  %v4521_v3 = vld [vmem:[#allocation7 + $0x118] sm:$0xff]  ;;  %v9248_v5 = vpack.c.bf16 %v4523_v25, %v4519_v15  ;;  %v4526_v15 = vld [vmem:[#allocation7 + $0x140] sm:$0xff]  ;;  %v4532_v36 = vld [vmem:[#allocation7 + $0x170] sm:$0xff] }
 0x6da   :  { %6417 = vmatpush1.bf16.msra.mxu0 %v9213_v56  ;;  %6449 = vmatpush1.bf16.msra.mxu1 %v9215_v9  ;;  %v4525_v9 = vld [vmem:[#allocation7 + $0x138] sm:$0xff]  ;;  %9648 = vst [vmem:[#allocation38_spill] sm:$0xff] %v9244_v37  ;;  %v4539_v48 = vld [vmem:[#allocation7 + $0x1a8] sm:$0xff] }
 0x6db   :  { %6419 = vmatprep.subr.bf16.mxu0 %v9222_v1  ;;  %6451 = vmatprep.subr.bf16.mxu1 %v9224_v7  ;;  %v9250_v40 = vpack.c.bf16 %v4525_v9, %v4521_v3  ;;  %v4527_v7 = vld [vmem:[#allocation7 + $0x148] sm:$0xff]  ;;  %v4533_v2 = vld [vmem:[#allocation7 + $0x178] sm:$0xff]  ;;  %v4530_v9 = vld [vmem:[#allocation7 + $0x160] sm:$0xff] }
 0x6dc   :  { %v4531_v1 = vld [vmem:[#allocation7 + $0x168] sm:$0xff] }
 0x6dd   :  { %v9260_v56 = vpack.c.bf16 %v4531_v1, %v4527_v7  ;;  %v4534_v7 = vld [vmem:[#allocation7 + $0x180] sm:$0xff] }
 0x6de   :  { %6421 = vmatpush1.bf16.msra.mxu0 %v9230_v33  ;;  %6453 = vmatpush1.bf16.msra.mxu1 %v9232_v57  ;;  %v6980_v33 = vpop.eup %6979  ;;  %v4529_v57 = vld [vmem:[#allocation7 + $0x158] sm:$0xff] }
 0x6df   :  { %6423 = vmatprep.subr.bf16.mxu0 %v9236_v52  ;;  %6455 = vmatprep.subr.bf16.mxu1 %v9238_v4  ;;  %v6982_v27 = vpop.eup %6981  ;;  %v9256_v4 = vpack.c.bf16 %v4524_v16, %v4520_v47  ;;  %v4258_v52 = vadd.f32 1.0, %v6980_v33  ;;  %v9262_v20 = vpack.c.bf16 %v4533_v2, %v4529_v57  ;;  %v4537_v47 = vld [vmem:[#allocation7 + $0x198] sm:$0xff]  ;;  %v9269_v33 = vpack.c.bf16 %v4530_v9, %v4526_v15  ;;  %v4538_v57 = vld [vmem:[#allocation7 + $0x1a0] sm:$0xff] }
 0x6e0   :  { %v4541_v16 = vld [vmem:[#allocation7 + $0x1b8] sm:$0xff] }
 0x6e1   :  { %6987 = vrcp.f32 %v4258_v52  ;;  %v9277_v2 = vpack.c.bf16 %v4541_v16, %v4537_v47  ;;  %v4549_v15 = vld [vmem:[#allocation7 + $0x1f8] sm:$0xff]  ;;  %v4544_v47 = vld [vmem:[#allocation7 + $0x1d0] sm:$0xff] }
 0x6e2   :  { %v6984_v21 = vpop.eup %6983  ;;  %6425 = vmatpush1.bf16.msra.mxu0 %v9242_v54  ;;  %6457 = vmatpush1.bf16.msra.mxu1 %v9244_v37  ;;  %v4528_v54 = vld [vmem:[#allocation7 + $0x150] sm:$0xff]  ;;  %v4535_v37 = vld [vmem:[#allocation7 + $0x188] sm:$0xff] }
 0x6e3   :  { %v6986_v25 = vpop.eup %6985  ;;  %v4262_v3 = vmul.f32 %v6984_v21, %v6982_v27  ;;  %6427 = vmatprep.subr.bf16.mxu0 %v9248_v5  ;;  %6459 = vmatprep.subr.bf16.mxu1 %v9250_v40  ;;  %v9271_v1 = vpack.c.bf16 %v4532_v36, %v4528_v54  ;;  %v4536_v27 = vld [vmem:[#allocation7 + $0x190] sm:$0xff]  ;;  %v9282_v36 = vpack.c.bf16 %v4538_v57, %v4534_v7  ;;  %v4542_v54 = vld [vmem:[#allocation7 + $0x1c0] sm:$0xff] }
 0x6e4   :  { %v4261_v8 = vmul.f32 %v6986_v25, %v9065_v31  ;;  %v9275_v31 = vpack.c.bf16 %v4539_v48, %v4535_v37  ;;  %v4540_v21 = vld [vmem:[#allocation7 + $0x1b0] sm:$0xff]  ;;  %v4543_v25 = vld [vmem:[#allocation7 + $0x1c8] sm:$0xff]  ;;  %v4546_v48 = vld [vmem:[#allocation7 + $0x1e0] sm:$0xff] }
 0x6e5   :  { %v9284_v52 = vpack.c.bf16 %v4540_v21, %v4536_v27  ;;  %v4548_v16 = vld [vmem:[#allocation7 + $0x1f0] sm:$0xff]  ;;  %v9294_v7 = vpack.c.bf16 %v4546_v48, %v4542_v54 }
 0x6e6   :  { %v9265_v6 = vadd.f32 %v4262_v3, %v4261_v8  ;;  %6429 = vmatpush1.bf16.msra.mxu0 %v9254_v13  ;;  %6461 = vmatpush1.bf16.msra.mxu1 %v9256_v4  ;;  %v4547_v3 = vld [vmem:[#allocation7 + $0x1e8] sm:$0xff]  ;;  %v4545_v8 = vld [vmem:[#allocation7 + $0x1d8] sm:$0xff]  ;;  %v9296_v57 = vpack.c.bf16 %v4548_v16, %v4544_v47  ;;  %v9657_v16 = vld [vmem:[#allocation27_spill] sm:$0xff] }
 0x6e7   :  { %6431 = vmatprep.subr.bf16.mxu0 %v9260_v56  ;;  %6463 = vmatprep.subr.bf16.mxu1 %v9262_v20  ;;  %v9288_v37 = vpack.c.bf16 %v4547_v3, %v4543_v25  ;;  %v9290_v9 = vpack.c.bf16 %v4549_v15, %v4545_v8  ;;  %v9649_v3 = vld [vmem:[#allocation12_spill] sm:$0xff]  ;;  %v9656_v15 = vld [vmem:[#allocation26_spill] sm:$0xff] }
 0x6e8   :  { %6989 = vtanh.f32 %v9265_v6 }
 0x6ea   :  { %6433 = vmatpush1.bf16.msra.mxu0 %v9269_v33  ;;  %6465 = vmatpush1.bf16.msra.mxu1 %v9271_v1 }
 0x6eb   :  { %6435 = vmatprep.subr.bf16.mxu0 %v9275_v31  ;;  %6467 = vmatprep.subr.bf16.mxu1 %v9277_v2  ;;  %v6988_v27 = vpop.eup %6987 }
 0x6ee   :  { %6437 = vmatpush1.bf16.msra.mxu0 %v9282_v36  ;;  %6469 = vmatpush1.bf16.msra.mxu1 %v9284_v52 }
 0x6ef   :  { %6439 = vmatprep.subr.bf16.mxu0 %v9288_v37  ;;  %6471 = vmatprep.subr.bf16.mxu1 %v9290_v9 }
 0x6f2   :  { %v6990_v21 = vpop.eup %6989  ;;  %6441 = vmatpush1.bf16.msra.mxu0 %v9294_v7  ;;  %6473 = vmatpush1.bf16.msra.mxu1 %v9296_v57 }
 0x6f3   :  { %v4265_v25 = vmul.f32 %v6990_v21, %v6988_v27  ;;  %6475 = vmatprep.subr.bf16.mxu0 %v9088_v30  ;;  %6507 = vmatprep.subr.bf16.mxu1 %v9090_v26 }
 0x6f5   :  { %4615 = vmatmul.mubr.f32.vlgmr.msra.gmra.mrb[18].mxu0 %v4265_v25  ;;  %v5246_v8 = vadd.f32 %v4265_v25, %v9649_v3  ;;  %4686 = vmatmul.mubr.f32.vlgmr.msra.gmra.mrb[18].mxu1 %v4265_v25 }
 0x6f6   :  { %6477 = vmatpush1.bf16.msra.mxu0 %v9092_v29  ;;  %6509 = vmatpush1.bf16.msra.mxu1 %v9095_v46  ;;  %v9650_v29 = vld [vmem:[#allocation21_spill] sm:$0xff] }
 0x6f7   :  { %5254 = vst [vmem:[%s9434_s6 + $0x10] sm:$0xff] %v5246_v8  ;;  %6479 = vmatprep.subr.bf16.mxu0 %v9100_v11  ;;  %6511 = vmatprep.subr.bf16.mxu1 %v9102_v23 }
 0x6f8   :  { %4882 = vmatprep.mubr.f32.mxu0 %v9536_v38  ;;  %4953 = vmatprep.mubr.f32.mxu1 %v9536_v38 }
 0x6fa   :  { %6481 = vmatpush1.bf16.msra.mxu0 %v9104_v17  ;;  %6513 = vmatpush1.bf16.msra.mxu1 %v9107_v34  ;;  %v9651_v17 = vld [vmem:[#allocation22_spill] sm:$0xff] }
 0x6fb   :  { %6483 = vmatprep.subr.bf16.mxu0 %v9112_v35  ;;  %6515 = vmatprep.subr.bf16.mxu1 %v9114_v49 }
 0x6fe   :  { %6485 = vmatpush1.bf16.msra.mxu0 %v9116_v50  ;;  %6517 = vmatpush1.bf16.msra.mxu1 %v9119_v41  ;;  %v9652_v50 = vld [vmem:[#allocation23_spill] sm:$0xff] }
 0x6ff   :  { %6487 = vmatprep.subr.bf16.mxu0 %v9124_v0  ;;  %6519 = vmatprep.subr.bf16.mxu1 %v9126_v22  ;;  %v9653_v22 = vld [vmem:[#allocation24_spill] sm:$0xff] }
 0x702   :  { %6489 = vmatpush1.bf16.msra.mxu0 %v9128_v45  ;;  %6521 = vmatpush1.bf16.msra.mxu1 %v9131_v19 }
 0x703   :  { %6491 = vmatprep.subr.bf16.mxu0 %v9136_v58  ;;  %6523 = vmatprep.subr.bf16.mxu1 %v9138_v44 }
 0x706   :  { %6493 = vmatpush1.bf16.msra.mxu0 %v9140_v62  ;;  %6525 = vmatpush1.bf16.msra.mxu1 %v9143_v63 }
 0x707   :  { %6495 = vmatprep.subr.bf16.mxu0 %v9148_v14  ;;  %6527 = vmatprep.subr.bf16.mxu1 %v9150_v51 }
 0x70a   :  { %6497 = vmatpush1.bf16.msra.mxu0 %v9152_v39  ;;  %6529 = vmatpush1.bf16.msra.mxu1 %v9155_v18 }
 0x70b   :  { %6499 = vmatprep.subr.bf16.mxu0 %v9160_v61  ;;  %6531 = vmatprep.subr.bf16.mxu1 %v9162_v59  ;;  %v9654_v59 = vld [vmem:[#allocation14_spill] sm:$0xff] }
 0x70e   :  { %6501 = vmatpush1.bf16.msra.mxu0 %v9164_v43  ;;  %6533 = vmatpush1.bf16.msra.mxu1 %v9167_v28 }
 0x70f   :  { %6503 = vmatprep.subr.bf16.mxu0 %v9172_v24  ;;  %6535 = vmatprep.subr.bf16.mxu1 %v9174_v10 }
 0x712   :  { %6505 = vmatpush1.bf16.msra.mxu0 %v9176_v55  ;;  %6537 = vmatpush1.bf16.msra.mxu1 %v9179_v42  ;;  %v9655_v55 = vld [vmem:[#allocation25_spill] sm:$0xff] }
 0x713   :  { %6539 = vmatprep.subr.bf16.mxu0 %v9184_v32  ;;  %6571 = vmatprep.subr.bf16.mxu1 %v9186_v53 }
 0x7a8   :  { %v4406_v30 = vpop.f32.mrb[12].mxu0  ;;  %v4477_v26 = vpop.f32.mrb[12].mxu1 }
 0x7a9   :  { %v6614_v46 = vadd.f32 %v4406_v30, %v9650_v29  ;;  %v4408_v11 = vpop.f32.mrb[13].mxu0  ;;  %v4479_v23 = vpop.f32.mrb[13].mxu1  ;;  %v6630_v45 = vadd.f32 %v4477_v26, %v9653_v22 }
 0x7aa   :  { %v6615_v34 = vadd.f32 %v4408_v11, %v9651_v17  ;;  %v6631_v41 = vadd.f32 %v4479_v23, %v9652_v50 }
 0x7ab   :  { %v5310_v35 = vmul.f32 -1.442695, %v6614_v46  ;;  %v9658_v46 = vld [vmem:[#allocation36_spill] sm:$0xff] }
 0x7ac   :  { %v5311_v49 = vmul.f32 -1.442695, %v6615_v34  ;;  %v5312_v0 = vmul.f32 -1.442695, %v6631_v41  ;;  %v9660_v41 = vld [vmem:[#allocation17_spill] sm:$0xff] }
 0x7ad   :  { %6991 = vpow2.f32 %v5310_v35  ;;  %v9659_v35 = vld [vmem:[#allocation16_spill] sm:$0xff] }
 0x7ae   :  { %6993 = vpow2.f32 %v5311_v49 }
 0x7af   :  { %6995 = vpow2.f32 %v5312_v0  ;;  %v9661_v0 = vld [vmem:[#allocation19_spill] sm:$0xff] }
 0x7b0   :  { %6997 = vtanh.f32 %v6630_v45  ;;  %v9662_v45 = vld [vmem:[#allocation20_spill] sm:$0xff] }
 0x7b7   :  { %v6992_v19 = vpop.eup %6991 }
 0x7b8   :  { %v6994_v58 = vpop.eup %6993  ;;  %v4699_v44 = vadd.f32 1.0, %v6992_v19  ;;  %v9664_v19 = vld [vmem:[#allocation30_spill] sm:$0xff] }
 0x7b9   :  { %v4705_v62 = vadd.f32 1.0, %v6994_v58  ;;  %v6996_v63 = vpop.eup %6995  ;;  %v9665_v58 = vld [vmem:[#allocation31_spill] sm:$0xff] }
 0x7ba   :  { %6999 = vrcp.f32 %v4699_v44  ;;  %v6998_v14 = vpop.eup %6997  ;;  %v4712_v61 = vadd.f32 1.0, %v6996_v63  ;;  %v9666_v44 = vld [vmem:[#allocation32_spill] sm:$0xff]  ;;  %v9668_v63 = vld [vmem:[#allocation34_spill] sm:$0xff] }
 0x7bb   :  { %7001 = vrcp.f32 %v4705_v62  ;;  %v9667_v62 = vld [vmem:[#allocation33_spill] sm:$0xff] }
 0x7bc   :  { %7003 = vrcp.f32 %v4712_v61  ;;  %v9671_v61 = vld [vmem:[#allocation38_spill] sm:$0xff] }
 0x7c4   :  { %v7000_v51 = vpop.eup %6999 }
 0x7c5   :  { %v7002_v39 = vpop.eup %7001  ;;  %v4716_v18 = vmul.f32 %v7000_v51, %v6998_v14  ;;  %v9669_v14 = vld [vmem:[#allocation35_spill] sm:$0xff] }
 0x7c6   :  { %v4715_v43 = vmul.f32 %v7002_v39, %v9654_v59  ;;  %v7004_v21 = vpop.eup %7003 }
 0x7c8   :  { %v9347_v28 = vadd.f32 %v4716_v18, %v4715_v43  ;;  %v4616_v24 = vpop.f32.mrb[18].mxu0  ;;  %v4687_v10 = vpop.f32.mrb[18].mxu1  ;;  %v9670_v18 = vld [vmem:[#allocation37_spill] sm:$0xff] }
 0x7c9   :  { %v6636_v42 = vadd.f32 %v4616_v24, %v9655_v55  ;;  %v4618_v32 = vpop.f32.mrb[19].mxu0  ;;  %v4689_v53 = vpop.f32.mrb[19].mxu1  ;;  %v6652_v8 = vadd.f32 %v4687_v10, %v8416_v12 }
 0x7ca   :  { %v6637_v54 = vadd.f32 %v4618_v32, %v9656_v15  ;;  %7005 = vtanh.f32 %v9347_v28  ;;  %v6653_v27 = vadd.f32 %v4689_v53, %v9657_v16 }
 0x7cb   :  { %v5313_v48 = vmul.f32 -1.442695, %v6636_v42 }
 0x7cc   :  { %v5314_v47 = vmul.f32 -1.442695, %v6637_v54  ;;  %v5315_v3 = vmul.f32 -1.442695, %v6653_v27 }
 0x7cd   :  { %7007 = vpow2.f32 %v5313_v48 }
 0x7ce   :  { %7009 = vpow2.f32 %v5314_v47 }
 0x7cf   :  { %7011 = vpow2.f32 %v5315_v3 }
 0x7d0   :  { %7013 = vtanh.f32 %v6652_v8 }
 0x7d4   :  { %v7006_v25 = vpop.eup %7005 }
 0x7d5   :  { %v4719_v30 = vmul.f32 %v7006_v25, %v7004_v21 }
 0x7d7   :  { %v7008_v26 = vpop.eup %7007  ;;  %4883 = vmatmul.mubr.f32.vlgmr.msra.gmra.mrb[14].mxu0 %v4719_v30  ;;  %v5250_v11 = vadd.f32 %v4719_v30, %v9658_v46  ;;  %4954 = vmatmul.mubr.f32.vlgmr.msra.gmra.mrb[14].mxu1 %v4719_v30 }
 0x7d8   :  { %v7010_v23 = vpop.eup %7009  ;;  %v4723_v34 = vadd.f32 1.0, %v7008_v26  ;;  %6541 = vmatpush1.bf16.msra.mxu0 %v9201_v60  ;;  %6573 = vmatpush1.bf16.msra.mxu1 %v9659_v35  ;;  %v9663_v60 = vld [vmem:[#allocation29_spill] sm:$0xff] }
 0x7d9   :  { %v4729_v49 = vadd.f32 1.0, %v7010_v23  ;;  %5258 = vst [vmem:[%s9434_s6 + $0x30] sm:$0xff] %v5250_v11  ;;  %6543 = vmatprep.subr.bf16.mxu0 %v9660_v41  ;;  %6575 = vmatprep.subr.bf16.mxu1 %v9661_v0  ;;  %v7012_v51 = vpop.eup %7011 }
 0x7da   :  { %7015 = vrcp.f32 %v4723_v34  ;;  %5092 = vmatprep.mubr.f32.mxu0 %v9536_v38  ;;  %5163 = vmatprep.mubr.f32.mxu1 %v9536_v38  ;;  %v7014_v39 = vpop.eup %7013  ;;  %v4736_v24 = vadd.f32 1.0, %v7012_v51 }
 0x7db   :  { %7017 = vrcp.f32 %v4729_v49 }
 0x7dc   :  { %6545 = vmatpush1.bf16.msra.mxu0 %v9662_v45  ;;  %6577 = vmatpush1.bf16.msra.mxu1 %v9663_v60  ;;  %7019 = vrcp.f32 %v4736_v24  ;;  %v9673_v45 = vld [vmem:[#allocation11_spill] sm:$0xff] }
 0x7dd   :  { %6547 = vmatprep.subr.bf16.mxu0 %v9664_v19  ;;  %6579 = vmatprep.subr.bf16.mxu1 %v9665_v58 }
 0x7e0   :  { %6549 = vmatpush1.bf16.msra.mxu0 %v9666_v44  ;;  %6581 = vmatpush1.bf16.msra.mxu1 %v9667_v62 }
 0x7e1   :  { %6551 = vmatprep.subr.bf16.mxu0 %v9668_v63  ;;  %6583 = vmatprep.subr.bf16.mxu1 %v9669_v14 }
 0x7e4   :  { %v7016_v38 = vpop.eup %7015  ;;  %6553 = vmatpush1.bf16.msra.mxu0 %v9670_v18  ;;  %6585 = vmatpush1.bf16.msra.mxu1 %v9671_v61 }
 0x7e5   :  { %v7018_v59 = vpop.eup %7017  ;;  %v4740_v43 = vmul.f32 %v7016_v38, %v7014_v39  ;;  %6555 = vmatprep.subr.bf16.mxu0 %v9248_v5  ;;  %6587 = vmatprep.subr.bf16.mxu1 %v9250_v40 }
 0x7e6   :  { %v4739_v10 = vmul.f32 %v7018_v59, %v9265_v6  ;;  %v7020_v6 = vpop.eup %7019  ;;  %v9674_v59 = vld [vmem:[#allocation28_spill] sm:$0xff] }
 0x7e8   :  { %v9377_v42 = vadd.f32 %v4740_v43, %v4739_v10  ;;  %6557 = vmatpush1.bf16.msra.mxu0 %v9254_v13  ;;  %6589 = vmatpush1.bf16.msra.mxu1 %v9256_v4  ;;  %v9672_v4 = vld [vmem:[#allocation15_spill] sm:$0xff] }
 0x7e9   :  { %6559 = vmatprep.subr.bf16.mxu0 %v9260_v56  ;;  %6591 = vmatprep.subr.bf16.mxu1 %v9262_v20 }
 0x7ea   :  { %7021 = vtanh.f32 %v9377_v42 }
 0x7ec   :  { %6561 = vmatpush1.bf16.msra.mxu0 %v9269_v33  ;;  %6593 = vmatpush1.bf16.msra.mxu1 %v9271_v1 }
 0x7ed   :  { %6563 = vmatprep.subr.bf16.mxu0 %v9275_v31  ;;  %6595 = vmatprep.subr.bf16.mxu1 %v9277_v2 }
 0x7f0   :  { %6565 = vmatpush1.bf16.msra.mxu0 %v9282_v36  ;;  %6597 = vmatpush1.bf16.msra.mxu1 %v9284_v52 }
 0x7f1   :  { %6567 = vmatprep.subr.bf16.mxu0 %v9288_v37  ;;  %6599 = vmatprep.subr.bf16.mxu1 %v9290_v9 }
 0x7f4   :  { %v7022_v20 = vpop.eup %7021  ;;  %6569 = vmatpush1.bf16.msra.mxu0 %v9294_v7  ;;  %6601 = vmatpush1.bf16.msra.mxu1 %v9296_v57 }
 0x7f5   :  { %v4743_v56 = vmul.f32 %v7022_v20, %v7020_v6 }
 0x7f7   :  { %5093 = vmatmul.mubr.f32.vlgmr.msra.gmra.mrb[16].mxu0 %v4743_v56  ;;  %v5245_v5 = vadd.f32 %v4743_v56, %v9672_v4  ;;  %5164 = vmatmul.mubr.f32.vlgmr.msra.gmra.mrb[16].mxu1 %v4743_v56 }
 0x7f9   :  { %5253 = vst [vmem:[%s9434_s6 + $0x8] sm:$0xff] %v5245_v5 }
 0x8aa   :  { %v4884_v40 = vpop.f32.mrb[14].mxu0  ;;  %v4955_v13 = vpop.f32.mrb[14].mxu1 }
 0x8ab   :  { %v6616_v33 = vadd.f32 %v4884_v40, %v9650_v29  ;;  %v4886_v1 = vpop.f32.mrb[15].mxu0  ;;  %v4957_v31 = vpop.f32.mrb[15].mxu1  ;;  %v6632_v7 = vadd.f32 %v4955_v13, %v9653_v22 }
 0x8ac   :  { %v6617_v2 = vadd.f32 %v4886_v1, %v9651_v17  ;;  %v6633_v37 = vadd.f32 %v4957_v31, %v9652_v50 }
 0x8ad   :  { %v5316_v36 = vmul.f32 -1.442695, %v6616_v33 }
 0x8ae   :  { %v5317_v52 = vmul.f32 -1.442695, %v6617_v2  ;;  %v5318_v9 = vmul.f32 -1.442695, %v6633_v37 }
 0x8af   :  { %7023 = vpow2.f32 %v5316_v36 }
 0x8b0   :  { %7025 = vpow2.f32 %v5317_v52 }
 0x8b1   :  { %7027 = vpow2.f32 %v5318_v9 }
 0x8b2   :  { %7029 = vtanh.f32 %v6632_v7 }
 0x8b9   :  { %v7024_v57 = vpop.eup %7023 }
 0x8ba   :  { %v7026_v32 = vpop.eup %7025  ;;  %v5177_v53 = vadd.f32 1.0, %v7024_v57 }
 0x8bb   :  { %v5183_v54 = vadd.f32 1.0, %v7026_v32  ;;  %v7028_v29 = vpop.eup %7027 }
 0x8bc   :  { %7031 = vrcp.f32 %v5177_v53  ;;  %v7030_v48 = vpop.eup %7029  ;;  %v5190_v21 = vadd.f32 1.0, %v7028_v29 }
 0x8bd   :  { %7033 = vrcp.f32 %v5183_v54 }
 0x8be   :  { %7035 = vrcp.f32 %v5190_v21 }
 0x8c6   :  { %v7032_v17 = vpop.eup %7031 }
 0x8c7   :  { %v7034_v47 = vpop.eup %7033  ;;  %v5194_v27 = vmul.f32 %v7032_v17, %v7030_v48 }
 0x8c8   :  { %v5193_v25 = vmul.f32 %v7034_v47, %v9347_v28  ;;  %v7036_v34 = vpop.eup %7035 }
 0x8ca   :  { %v5195_v50 = vadd.f32 %v5194_v27, %v5193_v25  ;;  %v5094_v3 = vpop.f32.mrb[16].mxu0  ;;  %v5165_v8 = vpop.f32.mrb[16].mxu1 }
 0x8cb   :  { %v6634_v22 = vadd.f32 %v5094_v3, %v9655_v55  ;;  %v5096_v30 = vpop.f32.mrb[17].mxu0  ;;  %v5167_v26 = vpop.f32.mrb[17].mxu1  ;;  %v6650_v55 = vadd.f32 %v5165_v8, %v8416_v12 }
 0x8cc   :  { %7037 = vtanh.f32 %v5195_v50  ;;  %5226 = vst [vmem:[%s9436_s8] sm:$0xff] %v5195_v50  ;;  %v6635_v46 = vadd.f32 %v5096_v30, %v9656_v15  ;;  %v6651_v28 = vadd.f32 %v5167_v26, %v9657_v16 }
 0x8cd   :  { %v5319_v11 = vmul.f32 -1.442695, %v6634_v22 }
 0x8ce   :  { %v5320_v23 = vmul.f32 -1.442695, %v6635_v46  ;;  %v5321_v49 = vmul.f32 -1.442695, %v6651_v28 }
 0x8cf   :  { %7039 = vpow2.f32 %v5319_v11 }
 0x8d0   :  { %7041 = vpow2.f32 %v5320_v23 }
 0x8d1   :  { %7043 = vpow2.f32 %v5321_v49 }
 0x8d2   :  { %7045 = vtanh.f32 %v6650_v55 }
 0x8d6   :  { %v7038_v35 = vpop.eup %7037 }
 0x8d7   :  { %v5197_v41 = vmul.f32 %v7038_v35, %v7036_v34 }
 0x8d9   :  { %v7040_v0 = vpop.eup %7039  ;;  %5224 = vst [vmem:[%s9435_s7] sm:$0xff] %v5197_v41  ;;  %v5251_v60 = vadd.f32 %v5197_v41, %v9673_v45 }
 0x8da   :  { %v7042_v15 = vpop.eup %7041  ;;  %v5201_v19 = vadd.f32 1.0, %v7040_v0 }
 0x8db   :  { %5259 = vst [vmem:[%s9434_s6 + $0x38] sm:$0xff] %v5251_v60  ;;  %v5207_v16 = vadd.f32 1.0, %v7042_v15  ;;  %v7044_v58 = vpop.eup %7043 }
 0x8dc   :  { %7047 = vrcp.f32 %v5201_v19  ;;  %v7046_v12 = vpop.eup %7045  ;;  %v5214_v14 = vadd.f32 1.0, %v7044_v58 }
 0x8dd   :  { %7049 = vrcp.f32 %v5207_v16 }
 0x8de   :  { %7051 = vrcp.f32 %v5214_v14 }
 0x8e6   :  { %v7048_v44 = vpop.eup %7047 }
 0x8e7   :  { %v7050_v62 = vpop.eup %7049  ;;  %v5218_v63 = vmul.f32 %v7048_v44, %v7046_v12 }
 0x8e8   :  { %v5217_v51 = vmul.f32 %v7050_v62, %v9377_v42  ;;  %v7052_v38 = vpop.eup %7051 }
 0x8ea   :  { %v5219_v39 = vadd.f32 %v5218_v63, %v5217_v51 }
 0x8ec   :  { %7053 = vtanh.f32 %v5219_v39  ;;  %5227 = vst [vmem:[%s9436_s8 + $0x8] sm:$0xff] %v5219_v39 }
 0x8f6   :  { %v7054_v18 = vpop.eup %7053 }
 0x8f7   :  { %v5221_v61 = vmul.f32 %v7054_v18, %v7052_v38 }
 0x8f9   :  { %5225 = vst [vmem:[%s9435_s7 + $0x8] sm:$0xff] %v5221_v61  ;;  %v5244_v43 = vadd.f32 %v5221_v61, %v9674_v59 }
 0x8fb   :  { %5252 = vst [vmem:[%s9434_s6] sm:$0xff] %v5244_v43 }
 0x8fc   :  { %5272 = vsyncpa [#allocation6], 1 }
 0x8fd   :  { %5273 = vsyncpa [#allocation8], 1 }

</bundles_post_ra>
